<compile_context>
chip_gen: v7x
topology: tpu7x:2x2x1
jax: 0.10.0
libtpu: 0.0.40
codegen_flags: <defaults>
</compile_context>

<pallas_src>
import jax
import jax.numpy as jnp
from jax.experimental import pallas as pl
from jax.experimental.pallas import tpu as pltpu


def cosine_attention_kernel(q_ref, v_ref, o_ref):
    # q_ref: (BB, 1, D)   v_ref: (BB, T, D)   o_ref: (BB, T)
    q = q_ref[...].astype(jnp.float32)            # (BB, 1, D)
    v = v_ref[...].astype(jnp.float32)            # (BB, T, D) f32 upcast (v5e-safe elementwise)

    # --- <q_b, v_{b,t}> over D: batched MXU contraction, lane-dense (BB, T) ---
    dots = jnp.einsum('bqd,btd->bqt', q, v,
                      preferred_element_type=jnp.float32)[:, 0, :]      # (BB, T)

    # --- ||q_b|| (tiny lane reduce over D) ------------------------------------
    q_nrm = jnp.sqrt(jnp.sum(q * q, axis=-1))                           # (BB, 1)

    # --- per-row ||v_{b,t}||^2 via a ones-LHS batched matmul on the MXU -------
    # NOTE: v*v is a full (BB, T, D) f32 temp; BB is capped in the wrapper so
    # this (plus the f32 upcast and the double-buffered input) stays well under
    # the scoped VMEM limit on all generations (incl. v7x's 64 MiB).
    ones = jnp.ones(q.shape, jnp.float32)                                # (BB, 1, D)
    v_nrm2 = jnp.einsum('bqd,btd->bqt', ones, v * v,
                        preferred_element_type=jnp.float32)[:, 0, :]    # (BB, T)

    # cosine score: dot / ((||q||+eps) * (||v_t||+eps)); reciprocal on the EUP.
    # (Approx error here is damped by the softmax -> ~1e-5 on the probabilities.)
    inv = pl.reciprocal((jnp.sqrt(v_nrm2) + 1e-13) * (q_nrm + 1e-13),
                        approx=True)
    s = dots * inv                                                       # (BB, T)

    # --- softmax over T (whole T lives in this block, so this is exact) -------
    m = jnp.max(s, axis=-1, keepdims=True)
    e = jnp.exp(s - m)
    denom = jnp.sum(e, axis=-1, keepdims=True)
    o_ref[...] = (e / denom).astype(o_ref.dtype)    # exact divide -> rows sum to 1


def _pick_block_b(B, T, D, value_itemsize, block_b,
                  vmem_budget_bytes=24 * 1024 * 1024):
    """Sublane-dense (multiple-of-8) batch block, capped by a VMEM budget."""
    BB = max(8, min(block_b, ((B + 7) // 8) * 8))
    BB = (BB // 8) * 8
    # per-step VMEM per batch row: 2x double-buffered value tile (+query/out,
    # negligible) + f32 upcast temp + f32 v*v temp.
    per_row = T * D * (2 * value_itemsize + 4 + 4)
    while BB > 8 and BB * per_row > vmem_budget_bytes:
        BB -= 8
    return BB


def cosine_attention(query, value, *, block_b=32, value_dtype=jnp.bfloat16):
    """query: (B, D), value: (B, T, D) -> (B, T) softmax'd cosine scores."""
    B, D = query.shape
    Bv, T, Dv = value.shape
    assert B == Bv and D == Dv

    v_itemsize = jnp.dtype(value_dtype).itemsize
    BB = _pick_block_b(B, T, D, v_itemsize, block_b)
    B_pad = pl.cdiv(B, BB) * BB

    q = query.astype(jnp.float32).reshape(B, 1, D)
    v = value.astype(value_dtype)                 # halve HBM traffic on the big operand
    if B_pad != B:                                # zero-padded tail block (sliced off below)
        q = jnp.pad(q, ((0, B_pad - B), (0, 0), (0, 0)))
        v = jnp.pad(v, ((0, B_pad - B), (0, 0), (0, 0)))

    cost = pl.CostEstimate(
        flops=5 * B_pad * T * D,                  # two matmuls + v*v
        transcendentals=2 * B_pad * T,            # exp + sqrt
        bytes_accessed=B_pad * T * D * v_itemsize + B_pad * D * 4 + B_pad * T * 4,
    )

    out = pl.pallas_call(
        cosine_attention_kernel,
        out_shape=jax.ShapeDtypeStruct((B_pad, T), jnp.float32),
        grid=(B_pad // BB,),
        in_specs=[
            pl.BlockSpec((BB, 1, D), lambda b: (b, 0, 0)),   # query rows
            pl.BlockSpec((BB, T, D), lambda b: (b, 0, 0)),   # value slab (dominant DMA)
        ],
        out_specs=pl.BlockSpec((BB, T), lambda b: (b, 0)),   # 2-D, sublane+lane dense
        compiler_params=pltpu.CompilerParams(
            dimension_semantics=("parallel",),   # shard batch steps across TCs (v7x)
            vmem_limit_bytes=32 * 1024 * 1024,   # explicit; BB is budgeted against 24 MiB
        ),
        cost_estimate=cost,
    )(q, v)
    return out[:B]


def _reference(query, value):
    # pure-JAX reference matching the PyTorch forward (mask=None path)
    qn = query / (jnp.linalg.norm(query, axis=-1, keepdims=True) + 1e-13)
    vn = value / (jnp.linalg.norm(value, axis=-1, keepdims=True) + 1e-13)
    s = jnp.einsum('bd,btd->bt', qn, vn)
    return jax.nn.softmax(s, axis=-1)


if __name__ == "__main__":
    # Lane-dense shapes: batch=64, seq(T)=128, hidden(D)=128 -> grid of 2 steps
    # at the default BB=32 (both v7x TensorCores get work).
    B, T, D = 64, 128, 128

    key = jax.random.PRNGKey(0)
    kq, kv = jax.random.split(key, 2)
    query = jax.random.normal(kq, (B, D), dtype=jnp.float32)
    value = jax.random.normal(kv, (B, T, D), dtype=jnp.float32)

    score = jax.block_until_ready(cosine_attention(query, value))
    ref = _reference(query, value)
    assert score.shape == (B, T)
    # bf16 value + approx reciprocal on the cosine scale => small slack on scores
    assert jnp.allclose(score, ref, atol=2e-3, rtol=2e-3)
    # exact softmax divide => rows sum to 1 to f32 precision
    assert jnp.allclose(jnp.sum(score, axis=-1), 1.0, atol=1e-4)

    # Ragged batch (exercises the padded tail block path).
    B2 = 5
    q2 = jax.random.normal(jax.random.PRNGKey(1), (B2, D), dtype=jnp.float32)
    v2 = jax.random.normal(jax.random.PRNGKey(2), (B2, T, D), dtype=jnp.float32)
    s2 = jax.block_until_ready(cosine_attention(q2, v2))
    assert s2.shape == (B2, T)
    assert jnp.allclose(s2, _reference(q2, v2), atol=2e-3, rtol=2e-3)
    assert jnp.allclose(jnp.sum(s2, axis=-1), 1.0, atol=1e-4)

    print("KERNEL_OK")
</pallas_src>

<mosaic_0001>
module attributes {stable_mosaic.version = 11 : i64} {
  func.func @cosine_attention_kernel(%arg0: i32, %arg1: memref<32x1x128xf32, #tpu.memory_space<vmem>>, %arg2: memref<32x128x128xbf16, #tpu.memory_space<vmem>>, %arg3: memref<32x128xf32, #tpu.memory_space<vmem>>) attributes {dimension_semantics = [#tpu.dimension_semantics<parallel>], iteration_bounds = array<i64: 2>, scalar_prefetch = 0 : i64, scratch_operands = 0 : i64, tpu.core_type = #tpu.core_type<tc>, window_params = [{transform_indices = @transform_0, window_bounds = array<i64: 32, 1, 128>}, {transform_indices = @transform_1, window_bounds = array<i64: 32, 128, 128>}, {transform_indices = @transform_2, window_bounds = array<i64: 32, 128>}]} {
    %c0 = arith.constant 0 : index
    %c0_0 = arith.constant 0 : index
    %c0_1 = arith.constant 0 : index
    %0 = vector.load %arg1[%c0, %c0_0, %c0_1] : memref<32x1x128xf32, #tpu.memory_space<vmem>>, vector<32x1x128xf32>
    %c0_2 = arith.constant 0 : index
    %c0_3 = arith.constant 0 : index
    %c0_4 = arith.constant 0 : index
    %1 = vector.load %arg2[%c0_2, %c0_3, %c0_4] : memref<32x128x128xbf16, #tpu.memory_space<vmem>>, vector<32x128x128xbf16>
    %2 = arith.extf %1 : vector<32x128x128xbf16> to vector<32x128x128xf32>
    "tpu.trace_start"() <{level = 10 : i32, message = "bqd,btd->bqt"}> : () -> ()
    %cst = arith.constant dense<0.000000e+00> : vector<32x1x128xf32>
    %3 = tpu.matmul %0, %2, %cst {dimension_numbers = #tpu.dot_dimension_numbers<[2], [2], [1], [1], [0, 0, 0, 1, 1, 1], [0], [0]>} : vector<32x1x128xf32>, vector<32x128x128xf32>, vector<32x1x128xf32> -> vector<32x1x128xf32>
    "tpu.trace_stop"() : () -> ()
    %4 = vector.shape_cast %3 : vector<32x1x128xf32> to vector<32x128xf32>
    %5 = arith.mulf %0, %0 : vector<32x1x128xf32>
    %cst_5 = arith.constant dense<0.000000e+00> : vector<32x1xf32>
    %6 = vector.multi_reduction <add>, %5, %cst_5 [2] : vector<32x1x128xf32> to vector<32x1xf32>
    %7 = math.sqrt %6 : vector<32x1xf32>
    %cst_6 = arith.constant 1.000000e+00 : f32
    %8 = vector.broadcast %cst_6 : f32 to vector<32x1x128xf32>
    %9 = arith.mulf %2, %2 : vector<32x128x128xf32>
    "tpu.trace_start"() <{level = 10 : i32, message = "bqd,btd->bqt"}> : () -> ()
    %cst_7 = arith.constant dense<0.000000e+00> : vector<32x1x128xf32>
    %10 = tpu.matmul %8, %9, %cst_7 {dimension_numbers = #tpu.dot_dimension_numbers<[2], [2], [1], [1], [0, 0, 0, 1, 1, 1], [0], [0]>} : vector<32x1x128xf32>, vector<32x128x128xf32>, vector<32x1x128xf32> -> vector<32x1x128xf32>
    "tpu.trace_stop"() : () -> ()
    %11 = vector.shape_cast %10 : vector<32x1x128xf32> to vector<32x128xf32>
    %12 = math.sqrt %11 : vector<32x128xf32>
    %cst_8 = arith.constant 9.99999982E-14 : f32
    %13 = vector.broadcast %cst_8 : f32 to vector<32x128xf32>
    %14 = arith.addf %12, %13 : vector<32x128xf32>
    %cst_9 = arith.constant 9.99999982E-14 : f32
    %15 = vector.broadcast %cst_9 : f32 to vector<32x1xf32>
    %16 = arith.addf %7, %15 : vector<32x1xf32>
    %17 = vector.broadcast %16 : vector<32x1xf32> to vector<32x128xf32>
    %18 = arith.mulf %14, %17 : vector<32x128xf32>
    %19 = tpu.reciprocal %18 {approx = true} : vector<32x128xf32> -> vector<32x128xf32>
    %20 = arith.mulf %4, %19 : vector<32x128xf32>
    %cst_10 = arith.constant dense<0xFF800000> : vector<32xf32>
    %21 = vector.multi_reduction <maximumf>, %20, %cst_10 [1] : vector<32x128xf32> to vector<32xf32>
    %22 = vector.shape_cast %21 : vector<32xf32> to vector<32x1xf32>
    %23 = vector.broadcast %22 : vector<32x1xf32> to vector<32x128xf32>
    %24 = arith.subf %20, %23 : vector<32x128xf32>
    %25 = math.exp %24 : vector<32x128xf32>
    %cst_11 = arith.constant dense<0.000000e+00> : vector<32xf32>
    %26 = vector.multi_reduction <add>, %25, %cst_11 [1] : vector<32x128xf32> to vector<32xf32>
    %27 = vector.shape_cast %26 : vector<32xf32> to vector<32x1xf32>
    %28 = vector.broadcast %27 : vector<32x1xf32> to vector<32x128xf32>
    %29 = arith.divf %25, %28 : vector<32x128xf32>
    %c0_12 = arith.constant 0 : index
    %c0_13 = arith.constant 0 : index
    %30 = vector.load %arg3[%c0_12, %c0_13] : memref<32x128xf32, #tpu.memory_space<vmem>>, vector<32x128xf32>
    tpu.vector_store %arg3[%c0_12, %c0_13], %29 {strides = array<i32>} : memref<32x128xf32, #tpu.memory_space<vmem>>, vector<32x128xf32>,
    return
  }
  func.func @transform_0(%arg0: i32) -> (i32, i32, i32) {
    %c0_i32 = arith.constant 0 : i32
    %c0_i32_0 = arith.constant 0 : i32
    %c0_i32_1 = arith.constant 0 : i32
    return %arg0, %c0_i32, %c0_i32_0 : i32, i32, i32
  }
  func.func @transform_1(%arg0: i32) -> (i32, i32, i32) {
    %c0_i32 = arith.constant 0 : i32
    %c0_i32_0 = arith.constant 0 : i32
    %c0_i32_1 = arith.constant 0 : i32
    return %arg0, %c0_i32, %c0_i32_0 : i32, i32, i32
  }
  func.func @transform_2(%arg0: i32) -> (i32, i32) {
    %c0_i32 = arith.constant 0 : i32
    %c0_i32_0 = arith.constant 0 : i32
    return %arg0, %c0_i32 : i32, i32
  }
}

</mosaic_0001>

<bundles_post_ra>
// kernel: tpu_custom_call.1
= control target key start
LH: loop header
LB: loop body
LE: loop exit
PB: predicated region body
PF: predicated region fallthrough
CT: control target
= control target key end

     0   :  { %7 = vsyncpa [#allocation3], 0  ;;  %s17129_s0 = inlined_call_operand.hbm [shape: f32[64,1,128], index: 0, kind: input, shape index: {}]   ;;  %s17130_s1 = inlined_call_operand.hbm [shape: bf16[64,128,128], index: 1, kind: input, shape index: {}]   ;;  %s17131_s2 = inlined_call_operand.hbm [shape: f32[64,128], index: 2, kind: output, shape index: {}]  }
   0x1   :  { %9 = vsyncpa [#allocation3 + $0x1], 0 }
   0x2   :  { %10 = vsyncpa [#allocation6], 0 }
   0x3   :  { %12 = vsyncpa [#allocation6 + $0x1], 0 }
   0x4   :  { %13 = vsyncpa [#allocation4], 0 }
   0x5   :  { %15 = vsyncpa [#allocation4 + $0x1], 0  ;;  %s14811_s9 = smov 0   ;;  %s14813_s10 = smov 0  }
   0x6   :  { %s14815_s11 = smov 0   ;;  %s14817_s12 = smov 0  }
   0x7 LB: > { %s14832_s13 = sadd.s32 4294967295, %s14781_s12   ;;  %s7820_s14 = sadd.s32 4294967294, %s14781_s12   ;;  %s14781_s12 = sphi %s14817_s12, %s17194_s12   ;;  %s14777_s11 = sphi %s14815_s11, %s17193_s11   ;;  %s14773_s10 = sphi %s14813_s10, %s17192_s10   ;;  %s14769_s9 = sphi %s14811_s9, %s17191_s9  }
   0x8   : > { %s14836_s15 = sadd.s32 1, %s14781_s12   ;;  %s28_s16 = sadd.s32 1, %s14777_s11 }
   0x9   : > { %s25_s17 = ssub.s32 %s14781_s12, %s14836_s15  ;;  %p35_p0 = scmp.ne.s32.totalorder %s14777_s11, %s14773_s10 }
   0xa   : > { %p26_p1 = scmp.eq.s32.totalorder %s25_s17, 0  ;;  %p36_p2 = scmp.eq.s32.totalorder %s14781_s12, 0 }
   0xb   : > { %p41_p3 = scmp.ne.s32.totalorder %s14773_s10, %s14769_s9  ;;  %p42_p4 = scmp.eq.s32.totalorder %s14832_s13, 0 }
   0xc   : > { %s14848_s18 = scalar_select %p26_p1, %s14777_s11, %s28_s16  }
   0xd   : > { %p14850_p5 = por %p36_p2, %p35_p0  ;;  %p14854_p6 = por %p42_p4, %p41_p3 }
   0xe   : > { %p91_p7 = scmp.eq.s32.totalorder %s14832_s13, 1  ;;  %p97_p8 = scmp.eq.s32.totalorder %s7820_s14, 1 }
   0xf   : > { %s17147_s20 = scalar_select %p14854_p6, 1, 0 }
  0x10   : > { %p14003_p10 = scmp.lt.s32.totalorder %s14781_s12, 2  ;;  %p14861_p11 = por %p91_p7, %p35_p0 }
  0x11   : > { %p14865_p12 = por %p97_p8, %p41_p3  ;;  %s14870_s23 = sand.u32 1, %s14777_s11  }
  0x12   : > { %s17148_s21 = scalar_select %p14861_p11, 1, 0 }
  0x13   : > { %s17149_s22 = scalar_select %p14865_p12, 1, 0 }
  0x14   : > { %s7839_s24 = sshll.u32 %s14781_s12, 9  ;;  %s7823_s25 = sshll.u32 %s14870_s23, 5 }
  0x15   : > { %s14877_s28 = scalar_lea.hbm %s17129_s0, %s7839_s24  ;;  %s121_s29 = scalar_lea.vmem [#allocation2], %s7823_s25 }
  0x16   : > { %s128_s30 = sshll.u32 %s121_s29, 4  ;;  %p14881_p13 = pnand %p14003_p10, %p14850_p5  ;;  %s14885_s30 = int_to_ptr.vmem [resolvable:$true] %s128_s30 }
  0x17   : > { %s118_s4 = scalar_lea.sflag [#allocation3], %s14870_s23  ;;  %s14651_s5 = scalar_lea.hbm %s14877_s28, 512 }
  0x18   : > { %p14652_p0 = scmp.ne.s32.totalorder %s14877_s28, %s14651_s5  ;;  %p14653_p1 = pneg %p14881_p13 }
  0x19   : > { %s14656_s8 = scalar_lea.hbm %s17129_s0, 1024  ;;  %p14657_p4 = scmp.lt.u32.totalorder %s14877_s28, %s17129_s0 }
  0x1a   : > { %p14654_p2 = pnand %p14653_p1, %p14652_p0  ;;  %p14658_p5 = scmp.lt.u32.totalorder %s14656_s8, %s14651_s5 }
  0x1b   : > { %p14660_p8 = scmp.lt.u32.totalorder %s14651_s5, %s14877_s28 }
  0x1c   : > { %p14655_p3 = pneg %p14654_p2  ;;  %p14659_p7 = por %p14658_p5, %p14657_p4 }
  0x1e   : > { %p14661_p10 = por %p14660_p8, %p14659_p7 }
  0x20   : > { %p14662_p9 = pnand %p14661_p10, %p14655_p3 }
  0x22   : > { %14665 = shalt.err (!%p14662_p9)
}
  0x23   : > { %s14666_s17 = scalar_lea.vmem %s14885_s30, 512  ;;  %s14783_s19 = smov [#allocation2]  }
  0x24   : > { %p14667_p0 = scmp.ne.s32.totalorder %s14885_s30, %s14666_s17  ;;  %s14671_s24 = sshll.u32 %s14783_s19, 4  ;;  %s14672_s24 = int_to_ptr.vmem [resolvable:$false] %s14671_s24 }
  0x25   : > { %s14673_s25 = scalar_lea.vmem %s14672_s24, 1024  ;;  %p14674_p11 = scmp.lt.s32.totalorder %s14885_s30, %s14672_s24 }
  0x26   : > { %p14669_p2 = pnand %p14667_p0, %p14653_p1  ;;  %p14675_p4 = scmp.lt.s32.totalorder %s14673_s25, %s14666_s17 }
  0x28   : > { %p14670_p12 = pneg %p14669_p2  ;;  %p14676_p5 = por %p14675_p4, %p14674_p11 }
  0x2a   : > { %p14677_p7 = pnand %p14676_p5, %p14670_p12 }
  0x2c   : > { %14680 = shalt.err (!%p14677_p7)
}
  0x2d   : > { %s14784_s26 = smov 16   ;;  %s14785_s27 = smov 1  }
  0x2e   : > { %13995 = dma.hbm_to_vmem [thread:$0]  (!%p14881_p13), %s14877_s28, 512, %s14885_s30, %s118_s4, %s14784_s26, %s14784_s26, %s14785_s27  }
  0x2f   : > { %p7830_p9 = scmp.ge.s32.totalorder %s14781_s12, 1  ;;  %p158_p3 = scmp.lt.s32.totalorder %s14781_s12, 3 }
  0x30   : > { %s7826_s29 = sshll.u32 %s14870_s23, 11  ;;  %s7841_s6 = sshll.u32 %s14781_s12, 15 }
  0x31   : > { %p14918_p11 = pnand %p7830_p9, %p158_p3  ;;  %s142_s7 = scalar_lea.vmem [#allocation5], %s7826_s29 }
  0x32   : > { %s150_s8 = sshll.u32 %s142_s7, 4  ;;  %s14926_s17 = scalar_lea.hbm %s17130_s1, %s7841_s6  ;;  %s14928_s8 = int_to_ptr.vmem [resolvable:$true] %s150_s8 }
  0x33   : > { %s139_s28 = scalar_lea.sflag [#allocation6], %s14870_s23  ;;  %s14681_s30 = scalar_lea.hbm %s14926_s17, 32768 }
  0x34   : > { %p14682_p12 = scmp.ne.s32.totalorder %s14926_s17, %s14681_s30  ;;  %s14686_s24 = scalar_lea.hbm %s17130_s1, 65536 }
  0x35   : > { %p14687_p0 = scmp.lt.u32.totalorder %s14926_s17, %s17130_s1  ;;  %p14688_p2 = scmp.lt.u32.totalorder %s14686_s24, %s14681_s30 }
  0x36   : > { %p14684_p8 = pnand %p14682_p12, %p14653_p1  ;;  %p14690_p5 = scmp.lt.u32.totalorder %s14681_s30, %s14926_s17 }
  0x37   : > { %p14689_p4 = por %p14688_p2, %p14687_p0 }
  0x38   : > { %p14685_p10 = pneg %p14684_p8 }
  0x39   : > { %p14691_p7 = por %p14690_p5, %p14689_p4 }
  0x3b   : > { %p14692_p9 = pnand %p14691_p7, %p14685_p10 }
  0x3d   : > { %14695 = shalt.err (!%p14692_p9)
}
  0x3e   : > { %s14696_s27 = scalar_lea.vmem %s14928_s8, 32768  ;;  %s14786_s29 = smov [#allocation5]  }
  0x3f   : > { %p14697_p3 = scmp.ne.s32.totalorder %s14928_s8, %s14696_s27  ;;  %s14701_s6 = sshll.u32 %s14786_s29, 4  ;;  %s14702_s6 = int_to_ptr.vmem [resolvable:$false] %s14701_s6 }
  0x40   : > { %s14703_s7 = scalar_lea.vmem %s14702_s6, 65536  ;;  %p14704_p6 = scmp.lt.s32.totalorder %s14928_s8, %s14702_s6 }
  0x41   : > { %p14699_p12 = pnand %p14697_p3, %p14653_p1  ;;  %p14705_p0 = scmp.lt.s32.totalorder %s14703_s7, %s14696_s27 }
  0x43   : > { %p14700_p8 = pneg %p14699_p12  ;;  %p14706_p2 = por %p14705_p0, %p14704_p6 }
  0x45   : > { %p14707_p4 = pnand %p14706_p2, %p14700_p8 }
  0x47   : > { %14710 = shalt.err (!%p14707_p4)
}
  0x48   : > { %s14787_s14 = smov 64   ;;  %s14788_s16 = smov 4  }
  0x49   : > { %13998 = dma.hbm_to_vmem [thread:$0]  (!%p14881_p13), %s14926_s17, 32768, %s14928_s8, %s139_s28, %s14787_s14, %s14787_s14, %s14788_s16  }
  0x4a   : > { %162 = sbr.rel (%p14918_p11) target bundleno = 2742 (0xab6), region = 28 }
  0x51   : > { %s14959_s30 = sand.u32 1, %s14773_s10   ;;  %p17152_p6 = scmp.ne.s32.totalorder %s17147_s20, 0 }
  0x52   : > { %s7831_s4 = sshll.u32 %s14959_s30, 5  ;;  %s165_s19 = scalar_lea.sflag [#allocation3], %s14959_s30 }
  0x53   : > { %s14965_s24 = scalar_lea.vmem [#allocation2], %s7831_s4 }
  0x54   : > { %14756 = dma.done.wait (%p17152_p6), %s165_s19, 512  }
  0x55   : > { %14758 = vsyncadd (%p17152_p6), %s165_s19, 4294966784  ;;  %s7832_s23 = sshll.u32 %s14959_s30, 11  ;;  %s174_s3 = scalar_lea.sflag [#allocation6], %s14959_s30 }
  0x56   : > { %s14973_s5 = scalar_lea.vmem [#allocation5], %s7832_s23 }
  0x57   : > { %14760 = dma.done.wait (%p17152_p6), %s174_s3, 32768  }
  0x58   : > { %14762 = vsyncadd (%p17152_p6), %s174_s3, 4294934528  ;;  %v17138_v0 = vmov 0.0|0.0   ;;  %vm14790_vm0 = vmmov 0   ;;  %v17134_v1 = vmov 0.0   ;;  %v7844_v2 = vld [vmem:[%s14973_s5] sm:$0xff]   ;;  %v8867_v4 = vld [vmem:[%s14973_s5 + $0x8] sm:$0xff]  }
  0x59   : > { %12450 = vmatprep.subr.bf16.mxu0 %v17138_v0  ;;  %12474 = vmatprep.subr.bf16.mxu1 %v17138_v0  ;;  %v8874_v3 = vld [vmem:[%s14973_s5 + $0x40] sm:$0xff]   ;;  %v8875_v5 = vld [vmem:[%s14973_s5 + $0x48] sm:$0xff]   ;;  %v8868_v6 = vld [vmem:[%s14973_s5 + $0x10] sm:$0xff]   ;;  %vm3534_vm1 = vcmask 1040384   ;;  %s16910_s20 = scalar_lea.vmem [#allocation7], %s7831_s4  ;;  %s7842_s8 = sshll.u32 %s14832_s13, 9 }
  0x5a   : > { %10242 = vmatprep.mubr.msk.f32.mxu0 %vm14790_vm0, %v17134_v1  ;;  %10277 = vmatprep.mubr.msk.f32.mxu1 %vm14790_vm0, %v17134_v1  ;;  %v8876_v7 = vld [vmem:[%s14973_s5 + $0x50] sm:$0xff]   ;;  %v8869_v8 = vld [vmem:[%s14973_s5 + $0x18] sm:$0xff]   ;;  %v8870_v10 = vld [vmem:[%s14973_s5 + $0x20] sm:$0xff]   ;;  %s7724_s17 = sshll.u32 %s16910_s20, 4  ;;  %s17080_s26 = scalar_lea.hbm %s17131_s2, %s7842_s8  ;;  %s17082_s17 = int_to_ptr.vmem [resolvable:$true] %s7724_s17 }
  0x5b   : > { %12452 = vmatpush3.bf16.xpose.msra.mxu0 %v7844_v2  ;;  %12476 = vmatpush3.bf16.xpose.msra.mxu1 %v8874_v3  ;;  %v8877_v9 = vld [vmem:[%s14973_s5 + $0x58] sm:$0xff]   ;;  %v8878_v11 = vld [vmem:[%s14973_s5 + $0x60] sm:$0xff]   ;;  %v8871_v12 = vld [vmem:[%s14973_s5 + $0x28] sm:$0xff]   ;;  %s7711_s13 = scalar_lea.sflag [#allocation4], %s14959_s30  ;;  %s14711_s27 = scalar_lea.vmem %s17082_s17, 512 }
  0x5c   : > { %12453 = vmatprep.subr.bf16.mxu0 %v17138_v0  ;;  %12477 = vmatprep.subr.bf16.mxu1 %v17138_v0  ;;  %v8879_v13 = vld [vmem:[%s14973_s5 + $0x68] sm:$0xff]   ;;  %v8872_v14 = vld [vmem:[%s14973_s5 + $0x30] sm:$0xff]   ;;  %v8873_v16 = vld [vmem:[%s14973_s5 + $0x38] sm:$0xff]   ;;  %p14712_p13 = scmp.ne.s32.totalorder %s17082_s17, %s14711_s27  ;;  %p17188_p1 = scmp.ne.s32.totalorder %s17148_s21, 0 }
  0x5d   : > { %v8880_v15 = vld [vmem:[%s14973_s5 + $0x70] sm:$0xff]   ;;  %v8881_v17 = vld [vmem:[%s14973_s5 + $0x78] sm:$0xff]   ;;  %v206_v18 = vld [vmem:[%s14965_s24] sm:$0x1]  ;;  %s14793_s29 = smov [#allocation7]  }
  0x5e   : > { %v207_v19 = vld [vmem:[%s14965_s24 + $0x1] sm:$0x1]  ;;  %v8883_v22 = vld [vmem:[%s14973_s5 + $0x88] sm:$0xff]   ;;  %v8884_v24 = vld [vmem:[%s14973_s5 + $0x90] sm:$0xff]   ;;  %p14713_p11 = pnand %p14712_p13, %p17188_p1  ;;  %s14715_s6 = sshll.u32 %s14793_s29, 4  ;;  %s14716_s6 = int_to_ptr.vmem [resolvable:$false] %s14715_s6 }
  0x5f   : > { %v8882_v20 = vld [vmem:[%s14973_s5 + $0x80] sm:$0xff]   ;;  %v8891_v23 = vld [vmem:[%s14973_s5 + $0xc8] sm:$0xff]   ;;  %v8892_v25 = vld [vmem:[%s14973_s5 + $0xd0] sm:$0xff]   ;;  %s14717_s7 = scalar_lea.vmem %s14716_s6, 1024  ;;  %p14718_p5 = scmp.lt.s32.totalorder %s17082_s17, %s14716_s6 }
  0x60   : > { %v8890_v21 = vld [vmem:[%s14973_s5 + $0xc0] sm:$0xff]   ;;  %v8885_v26 = vld [vmem:[%s14973_s5 + $0x98] sm:$0xff]   ;;  %v8887_v30 = vld [vmem:[%s14973_s5 + $0xa8] sm:$0xff]   ;;  %p14714_p10 = pneg %p14713_p11  ;;  %p14719_p7 = scmp.lt.s32.totalorder %s14717_s7, %s14711_s27 }
  0x61   : > { %v8893_v27 = vld [vmem:[%s14973_s5 + $0xd8] sm:$0xff]   ;;  %v8886_v28 = vld [vmem:[%s14973_s5 + $0xa0] sm:$0xff]   ;;  %v8895_v31 = vld [vmem:[%s14973_s5 + $0xe8] sm:$0xff]  }
  0x62   : > { %v8894_v29 = vld [vmem:[%s14973_s5 + $0xe0] sm:$0xff]   ;;  %v8888_v32 = vld [vmem:[%s14973_s5 + $0xb0] sm:$0xff]   ;;  %v8889_v34 = vld [vmem:[%s14973_s5 + $0xb8] sm:$0xff]   ;;  %p14720_p9 = por %p14719_p7, %p14718_p5 }
  0x63   : > { %12455 = vmatpush3.bf16.xpose.msra.mxu0 %v8867_v4  ;;  %12479 = vmatpush3.bf16.xpose.msra.mxu1 %v8875_v5  ;;  %v8896_v33 = vld [vmem:[%s14973_s5 + $0xf0] sm:$0xff]   ;;  %v8897_v35 = vld [vmem:[%s14973_s5 + $0xf8] sm:$0xff]   ;;  %v208_v36 = vld [vmem:[%s14965_s24 + $0x2] sm:$0x1] }
  0x64   : > { %12456 = vmatprep.subr.bf16.mxu0 %v17138_v0  ;;  %12480 = vmatprep.subr.bf16.mxu1 %v17138_v0  ;;  %v209_v37 = vld [vmem:[%s14965_s24 + $0x3] sm:$0x1]  ;;  %v8899_v40 = vld [vmem:[%s14973_s5 + $0x108] sm:$0xff]   ;;  %v8900_v42 = vld [vmem:[%s14973_s5 + $0x110] sm:$0xff]   ;;  %p14721_p3 = pnand %p14720_p9, %p14714_p10 }
  0x65   : > { %v8898_v38 = vld [vmem:[%s14973_s5 + $0x100] sm:$0xff]   ;;  %v8907_v41 = vld [vmem:[%s14973_s5 + $0x148] sm:$0xff]   ;;  %v8908_v43 = vld [vmem:[%s14973_s5 + $0x150] sm:$0xff]  }
  0x66   : > { %v8906_v39 = vld [vmem:[%s14973_s5 + $0x140] sm:$0xff]   ;;  %v8901_v44 = vld [vmem:[%s14973_s5 + $0x118] sm:$0xff]   ;;  %v8903_v48 = vld [vmem:[%s14973_s5 + $0x128] sm:$0xff]  }
  0x67   : > { %v8909_v45 = vld [vmem:[%s14973_s5 + $0x158] sm:$0xff]   ;;  %v8902_v46 = vld [vmem:[%s14973_s5 + $0x120] sm:$0xff]   ;;  %v8911_v49 = vld [vmem:[%s14973_s5 + $0x168] sm:$0xff]  }
  0x68   : > { %v8910_v47 = vld [vmem:[%s14973_s5 + $0x160] sm:$0xff]   ;;  %v8904_v50 = vld [vmem:[%s14973_s5 + $0x130] sm:$0xff]   ;;  %v8905_v52 = vld [vmem:[%s14973_s5 + $0x138] sm:$0xff]  }
  0x69   : > { %v8912_v51 = vld [vmem:[%s14973_s5 + $0x170] sm:$0xff]   ;;  %v8913_v53 = vld [vmem:[%s14973_s5 + $0x178] sm:$0xff]   ;;  %v210_v54 = vld [vmem:[%s14965_s24 + $0x4] sm:$0x1] }
  0x6a   : > { %v211_v55 = vld [vmem:[%s14965_s24 + $0x5] sm:$0x1]  ;;  %v8915_v58 = vld [vmem:[%s14973_s5 + $0x188] sm:$0xff]   ;;  %v8916_v60 = vld [vmem:[%s14973_s5 + $0x190] sm:$0xff]  }
  0x6b   : > { %12458 = vmatpush3.bf16.xpose.msra.mxu0 %v8868_v6  ;;  %12482 = vmatpush3.bf16.xpose.msra.mxu1 %v8876_v7  ;;  %v8914_v56 = vld [vmem:[%s14973_s5 + $0x180] sm:$0xff]   ;;  %v8923_v59 = vld [vmem:[%s14973_s5 + $0x1c8] sm:$0xff]   ;;  %v8924_v61 = vld [vmem:[%s14973_s5 + $0x1d0] sm:$0xff]  }
  0x6c   : > { %12459 = vmatprep.subr.bf16.mxu0 %v17138_v0  ;;  %12483 = vmatprep.subr.bf16.mxu1 %v17138_v0  ;;  %v8922_v57 = vld [vmem:[%s14973_s5 + $0x1c0] sm:$0xff]   ;;  %v8917_v62 = vld [vmem:[%s14973_s5 + $0x198] sm:$0xff]   ;;  %v8919_v4 = vld [vmem:[%s14973_s5 + $0x1a8] sm:$0xff]  }
  0x6d   : > { %v8925_v63 = vld [vmem:[%s14973_s5 + $0x1d8] sm:$0xff]   ;;  %v8918_v2 = vld [vmem:[%s14973_s5 + $0x1a0] sm:$0xff]   ;;  %v8927_v5 = vld [vmem:[%s14973_s5 + $0x1e8] sm:$0xff]  }
  0x6e   : > { %v8926_v3 = vld [vmem:[%s14973_s5 + $0x1e0] sm:$0xff]   ;;  %v8920_v6 = vld [vmem:[%s14973_s5 + $0x1b0] sm:$0xff]  }
  0x6f   : > { %v8928_v7 = vld [vmem:[%s14973_s5 + $0x1f0] sm:$0xff]  }
  0x73   : > { %12461 = vmatpush3.bf16.xpose.msra.mxu0 %v8869_v8  ;;  %12485 = vmatpush3.bf16.xpose.msra.mxu1 %v8877_v9  ;;  %v8921_v8 = vld [vmem:[%s14973_s5 + $0x1b8] sm:$0xff]  }
  0x74   : > { %12462 = vmatprep.subr.bf16.mxu0 %v17138_v0  ;;  %12486 = vmatprep.subr.bf16.mxu1 %v17138_v0  ;;  %v8929_v9 = vld [vmem:[%s14973_s5 + $0x1f8] sm:$0xff]  }
  0x7b   : > { %12464 = vmatpush3.bf16.xpose.msra.mxu0 %v8870_v10  ;;  %12488 = vmatpush3.bf16.xpose.msra.mxu1 %v8878_v11  ;;  %v212_v10 = vld [vmem:[%s14965_s24 + $0x6] sm:$0x1]  ;;  %v213_v11 = vld [vmem:[%s14965_s24 + $0x7] sm:$0x1] }
  0x7c   : > { %12465 = vmatprep.subr.bf16.mxu0 %v17138_v0  ;;  %12489 = vmatprep.subr.bf16.mxu1 %v17138_v0 }
  0x83   : > { %12467 = vmatpush3.bf16.xpose.msra.mxu0 %v8871_v12  ;;  %12491 = vmatpush3.bf16.xpose.msra.mxu1 %v8879_v13  ;;  %v8930_v12 = vld [vmem:[%s14973_s5 + $0x200] sm:$0xff]  }
  0x84   : > { %12468 = vmatprep.subr.bf16.mxu0 %v17138_v0  ;;  %12492 = vmatprep.subr.bf16.mxu1 %v17138_v0  ;;  %v8938_v13 = vld [vmem:[%s14973_s5 + $0x240] sm:$0xff]  }
  0x8b   : > { %12470 = vmatpush3.bf16.xpose.msra.mxu0 %v8872_v14  ;;  %12494 = vmatpush3.bf16.xpose.msra.mxu1 %v8880_v15  ;;  %v8931_v14 = vld [vmem:[%s14973_s5 + $0x208] sm:$0xff]  }
  0x8c   : > { %12471 = vmatprep.subr.bf16.mxu0 %v17138_v0  ;;  %12495 = vmatprep.subr.bf16.mxu1 %v17138_v0  ;;  %v8939_v15 = vld [vmem:[%s14973_s5 + $0x248] sm:$0xff]  }
  0x93   : > { %12473 = vmatpush3.bf16.xpose.msra.mxu0 %v8873_v16  ;;  %12497 = vmatpush3.bf16.xpose.msra.mxu1 %v8881_v17  ;;  %v8932_v16 = vld [vmem:[%s14973_s5 + $0x210] sm:$0xff]  }
  0x94   : > { %12498 = vmatprep.subr.bf16.mxu0 %v17138_v0  ;;  %12522 = vmatprep.subr.bf16.mxu1 %v17138_v0  ;;  %v8940_v17 = vld [vmem:[%s14973_s5 + $0x250] sm:$0xff]  }
  0x9a   : > { %10243 = vmatmul.mubr.f32.vlgmr.msra.gmra.mrb[0].mxu0 %v206_v18  ;;  %10278 = vmatmul.mubr.f32.vlgmr.msra.gmra.mrb[0].mxu1 %v207_v19 }
  0x9b   : > { %12500 = vmatpush3.bf16.xpose.msra.mxu0 %v8882_v20  ;;  %12524 = vmatpush3.bf16.xpose.msra.mxu1 %v8890_v21 }
  0x9c   : > { %12501 = vmatprep.subr.bf16.mxu0 %v17138_v0  ;;  %12525 = vmatprep.subr.bf16.mxu1 %v17138_v0 }
  0x9d   : > { %10312 = vmatprep.mubr.msk.f32.mxu0 %vm14790_vm0, %v17134_v1  ;;  %10347 = vmatprep.mubr.msk.f32.mxu1 %vm14790_vm0, %v17134_v1 }
  0xa3   : > { %12503 = vmatpush3.bf16.xpose.msra.mxu0 %v8883_v22  ;;  %12527 = vmatpush3.bf16.xpose.msra.mxu1 %v8891_v23  ;;  %v8933_v22 = vld [vmem:[%s14973_s5 + $0x218] sm:$0xff]  }
  0xa4   : > { %12504 = vmatprep.subr.bf16.mxu0 %v17138_v0  ;;  %12528 = vmatprep.subr.bf16.mxu1 %v17138_v0  ;;  %v8941_v23 = vld [vmem:[%s14973_s5 + $0x258] sm:$0xff]  }
  0xab   : > { %12506 = vmatpush3.bf16.xpose.msra.mxu0 %v8884_v24  ;;  %12530 = vmatpush3.bf16.xpose.msra.mxu1 %v8892_v25  ;;  %v8934_v24 = vld [vmem:[%s14973_s5 + $0x220] sm:$0xff]  }
  0xac   : > { %12507 = vmatprep.subr.bf16.mxu0 %v17138_v0  ;;  %12531 = vmatprep.subr.bf16.mxu1 %v17138_v0  ;;  %v8942_v25 = vld [vmem:[%s14973_s5 + $0x260] sm:$0xff]  }
  0xb3   : > { %12509 = vmatpush3.bf16.xpose.msra.mxu0 %v8885_v26  ;;  %12533 = vmatpush3.bf16.xpose.msra.mxu1 %v8893_v27  ;;  %v8935_v26 = vld [vmem:[%s14973_s5 + $0x228] sm:$0xff]  }
  0xb4   : > { %12510 = vmatprep.subr.bf16.mxu0 %v17138_v0  ;;  %12534 = vmatprep.subr.bf16.mxu1 %v17138_v0  ;;  %v8943_v27 = vld [vmem:[%s14973_s5 + $0x268] sm:$0xff]  }
  0xbb   : > { %12512 = vmatpush3.bf16.xpose.msra.mxu0 %v8886_v28  ;;  %12536 = vmatpush3.bf16.xpose.msra.mxu1 %v8894_v29  ;;  %v8936_v28 = vld [vmem:[%s14973_s5 + $0x230] sm:$0xff]  }
  0xbc   : > { %12513 = vmatprep.subr.bf16.mxu0 %v17138_v0  ;;  %12537 = vmatprep.subr.bf16.mxu1 %v17138_v0  ;;  %v8944_v29 = vld [vmem:[%s14973_s5 + $0x270] sm:$0xff]  }
  0xc3   : > { %12515 = vmatpush3.bf16.xpose.msra.mxu0 %v8887_v30  ;;  %12539 = vmatpush3.bf16.xpose.msra.mxu1 %v8895_v31  ;;  %v8937_v30 = vld [vmem:[%s14973_s5 + $0x238] sm:$0xff]  }
  0xc4   : > { %12516 = vmatprep.subr.bf16.mxu0 %v17138_v0  ;;  %12540 = vmatprep.subr.bf16.mxu1 %v17138_v0  ;;  %v8945_v31 = vld [vmem:[%s14973_s5 + $0x278] sm:$0xff]  }
  0xcb   : > { %12518 = vmatpush3.bf16.xpose.msra.mxu0 %v8888_v32  ;;  %12542 = vmatpush3.bf16.xpose.msra.mxu1 %v8896_v33  ;;  %v214_v32 = vld [vmem:[%s14965_s24 + $0x8] sm:$0x1]  ;;  %v215_v33 = vld [vmem:[%s14965_s24 + $0x9] sm:$0x1] }
  0xcc   : > { %12519 = vmatprep.subr.bf16.mxu0 %v17138_v0  ;;  %12543 = vmatprep.subr.bf16.mxu1 %v17138_v0 }
  0xd3   : > { %12521 = vmatpush3.bf16.xpose.msra.mxu0 %v8889_v34  ;;  %12545 = vmatpush3.bf16.xpose.msra.mxu1 %v8897_v35  ;;  %v8946_v34 = vld [vmem:[%s14973_s5 + $0x280] sm:$0xff]  }
  0xd4   : > { %12546 = vmatprep.subr.bf16.mxu0 %v17138_v0  ;;  %12570 = vmatprep.subr.bf16.mxu1 %v17138_v0  ;;  %v8954_v35 = vld [vmem:[%s14973_s5 + $0x2c0] sm:$0xff]  }
  0xda   : > { %10313 = vmatmul.mubr.f32.vlgmr.msra.gmra.mrb[2].mxu0 %v208_v36  ;;  %10348 = vmatmul.mubr.f32.vlgmr.msra.gmra.mrb[2].mxu1 %v209_v37  ;;  %v8947_v36 = vld [vmem:[%s14973_s5 + $0x288] sm:$0xff]  }
  0xdb   : > { %12548 = vmatpush3.bf16.xpose.msra.mxu0 %v8898_v38  ;;  %12572 = vmatpush3.bf16.xpose.msra.mxu1 %v8906_v39  ;;  %v8955_v37 = vld [vmem:[%s14973_s5 + $0x2c8] sm:$0xff]   ;;  %v8948_v38 = vld [vmem:[%s14973_s5 + $0x290] sm:$0xff]  }
  0xdc   : > { %12549 = vmatprep.subr.bf16.mxu0 %v17138_v0  ;;  %12573 = vmatprep.subr.bf16.mxu1 %v17138_v0  ;;  %v8956_v39 = vld [vmem:[%s14973_s5 + $0x2d0] sm:$0xff]  }
  0xdd   : > { %10382 = vmatprep.mubr.msk.f32.mxu0 %vm14790_vm0, %v17134_v1  ;;  %10417 = vmatprep.mubr.msk.f32.mxu1 %vm14790_vm0, %v17134_v1 }
  0xe3   : > { %12551 = vmatpush3.bf16.xpose.msra.mxu0 %v8899_v40  ;;  %12575 = vmatpush3.bf16.xpose.msra.mxu1 %v8907_v41 }
  0xe4   : > { %12552 = vmatprep.subr.bf16.mxu0 %v17138_v0  ;;  %12576 = vmatprep.subr.bf16.mxu1 %v17138_v0 }
  0xeb   : > { %12554 = vmatpush3.bf16.xpose.msra.mxu0 %v8900_v42  ;;  %12578 = vmatpush3.bf16.xpose.msra.mxu1 %v8908_v43 }
  0xec   : > { %12555 = vmatprep.subr.bf16.mxu0 %v17138_v0  ;;  %12579 = vmatprep.subr.bf16.mxu1 %v17138_v0 }
  0xf3   : > { %12557 = vmatpush3.bf16.xpose.msra.mxu0 %v8901_v44  ;;  %12581 = vmatpush3.bf16.xpose.msra.mxu1 %v8909_v45  ;;  %v8949_v44 = vld [vmem:[%s14973_s5 + $0x298] sm:$0xff]  }
  0xf4   : > { %12558 = vmatprep.subr.bf16.mxu0 %v17138_v0  ;;  %12582 = vmatprep.subr.bf16.mxu1 %v17138_v0  ;;  %v8957_v45 = vld [vmem:[%s14973_s5 + $0x2d8] sm:$0xff]  }
  0xfb   : > { %12560 = vmatpush3.bf16.xpose.msra.mxu0 %v8902_v46  ;;  %12584 = vmatpush3.bf16.xpose.msra.mxu1 %v8910_v47  ;;  %v8950_v46 = vld [vmem:[%s14973_s5 + $0x2a0] sm:$0xff]  }
  0xfc   : > { %12561 = vmatprep.subr.bf16.mxu0 %v17138_v0  ;;  %12585 = vmatprep.subr.bf16.mxu1 %v17138_v0  ;;  %v8958_v47 = vld [vmem:[%s14973_s5 + $0x2e0] sm:$0xff]  }
 0x103   : > { %12563 = vmatpush3.bf16.xpose.msra.mxu0 %v8903_v48  ;;  %12587 = vmatpush3.bf16.xpose.msra.mxu1 %v8911_v49  ;;  %v8951_v48 = vld [vmem:[%s14973_s5 + $0x2a8] sm:$0xff]  }
 0x104   : > { %12564 = vmatprep.subr.bf16.mxu0 %v17138_v0  ;;  %12588 = vmatprep.subr.bf16.mxu1 %v17138_v0  ;;  %v8959_v49 = vld [vmem:[%s14973_s5 + $0x2e8] sm:$0xff]  }
 0x10b   : > { %12566 = vmatpush3.bf16.xpose.msra.mxu0 %v8904_v50  ;;  %12590 = vmatpush3.bf16.xpose.msra.mxu1 %v8912_v51  ;;  %v8952_v50 = vld [vmem:[%s14973_s5 + $0x2b0] sm:$0xff]  }
 0x10c   : > { %12567 = vmatprep.subr.bf16.mxu0 %v17138_v0  ;;  %12591 = vmatprep.subr.bf16.mxu1 %v17138_v0  ;;  %v8960_v51 = vld [vmem:[%s14973_s5 + $0x2f0] sm:$0xff]  }
 0x113   : > { %12569 = vmatpush3.bf16.xpose.msra.mxu0 %v8905_v52  ;;  %12593 = vmatpush3.bf16.xpose.msra.mxu1 %v8913_v53  ;;  %v8953_v52 = vld [vmem:[%s14973_s5 + $0x2b8] sm:$0xff]  }
 0x114   : > { %12594 = vmatprep.subr.bf16.mxu0 %v17138_v0  ;;  %12618 = vmatprep.subr.bf16.mxu1 %v17138_v0  ;;  %v8961_v53 = vld [vmem:[%s14973_s5 + $0x2f8] sm:$0xff]  }
 0x11a   : > { %10383 = vmatmul.mubr.f32.vlgmr.msra.gmra.mrb[4].mxu0 %v210_v54  ;;  %10418 = vmatmul.mubr.f32.vlgmr.msra.gmra.mrb[4].mxu1 %v211_v55  ;;  %v216_v54 = vld [vmem:[%s14965_s24 + $0xa] sm:$0x1]  ;;  %v217_v55 = vld [vmem:[%s14965_s24 + $0xb] sm:$0x1] }
 0x11b   : > { %12596 = vmatpush3.bf16.xpose.msra.mxu0 %v8914_v56  ;;  %12620 = vmatpush3.bf16.xpose.msra.mxu1 %v8922_v57  ;;  %v8962_v56 = vld [vmem:[%s14973_s5 + $0x300] sm:$0xff]  }
 0x11c   : > { %12597 = vmatprep.subr.bf16.mxu0 %v17138_v0  ;;  %12621 = vmatprep.subr.bf16.mxu1 %v17138_v0  ;;  %v8970_v57 = vld [vmem:[%s14973_s5 + $0x340] sm:$0xff]  }
 0x11d   : > { %10452 = vmatprep.mubr.msk.f32.mxu0 %vm14790_vm0, %v17134_v1  ;;  %10487 = vmatprep.mubr.msk.f32.mxu1 %vm14790_vm0, %v17134_v1 }
 0x123   : > { %12599 = vmatpush3.bf16.xpose.msra.mxu0 %v8915_v58  ;;  %12623 = vmatpush3.bf16.xpose.msra.mxu1 %v8923_v59  ;;  %v8963_v58 = vld [vmem:[%s14973_s5 + $0x308] sm:$0xff]  }
 0x124   : > { %12600 = vmatprep.subr.bf16.mxu0 %v17138_v0  ;;  %12624 = vmatprep.subr.bf16.mxu1 %v17138_v0  ;;  %v8971_v59 = vld [vmem:[%s14973_s5 + $0x348] sm:$0xff]  }
 0x12b   : > { %12602 = vmatpush3.bf16.xpose.msra.mxu0 %v8916_v60  ;;  %12626 = vmatpush3.bf16.xpose.msra.mxu1 %v8924_v61  ;;  %v8964_v60 = vld [vmem:[%s14973_s5 + $0x310] sm:$0xff]  }
 0x12c   : > { %12603 = vmatprep.subr.bf16.mxu0 %v17138_v0  ;;  %12627 = vmatprep.subr.bf16.mxu1 %v17138_v0  ;;  %v8972_v61 = vld [vmem:[%s14973_s5 + $0x350] sm:$0xff]  }
 0x133   : > { %12605 = vmatpush3.bf16.xpose.msra.mxu0 %v8917_v62  ;;  %12629 = vmatpush3.bf16.xpose.msra.mxu1 %v8925_v63 }
 0x134   : > { %12606 = vmatprep.subr.bf16.mxu0 %v17138_v0  ;;  %12630 = vmatprep.subr.bf16.mxu1 %v17138_v0 }
 0x13b   : > { %12608 = vmatpush3.bf16.xpose.msra.mxu0 %v8918_v2  ;;  %12632 = vmatpush3.bf16.xpose.msra.mxu1 %v8926_v3 }
 0x13c   : > { %12609 = vmatprep.subr.bf16.mxu0 %v17138_v0  ;;  %12633 = vmatprep.subr.bf16.mxu1 %v17138_v0 }
 0x143   : > { %12611 = vmatpush3.bf16.xpose.msra.mxu0 %v8919_v4  ;;  %12635 = vmatpush3.bf16.xpose.msra.mxu1 %v8927_v5  ;;  %v8965_v4 = vld [vmem:[%s14973_s5 + $0x318] sm:$0xff]  }
 0x144   : > { %12612 = vmatprep.subr.bf16.mxu0 %v17138_v0  ;;  %12636 = vmatprep.subr.bf16.mxu1 %v17138_v0  ;;  %v8973_v5 = vld [vmem:[%s14973_s5 + $0x358] sm:$0xff]  }
 0x14b   : > { %12614 = vmatpush3.bf16.xpose.msra.mxu0 %v8920_v6  ;;  %12638 = vmatpush3.bf16.xpose.msra.mxu1 %v8928_v7  ;;  %v8966_v6 = vld [vmem:[%s14973_s5 + $0x320] sm:$0xff]  }
 0x14c   : > { %12615 = vmatprep.subr.bf16.mxu0 %v17138_v0  ;;  %12639 = vmatprep.subr.bf16.mxu1 %v17138_v0  ;;  %v8974_v7 = vld [vmem:[%s14973_s5 + $0x360] sm:$0xff]  }
 0x153   : > { %12617 = vmatpush3.bf16.xpose.msra.mxu0 %v8921_v8  ;;  %12641 = vmatpush3.bf16.xpose.msra.mxu1 %v8929_v9  ;;  %v8967_v8 = vld [vmem:[%s14973_s5 + $0x328] sm:$0xff]  }
 0x154   : > { %12642 = vmatprep.subr.bf16.mxu0 %v17138_v0  ;;  %12666 = vmatprep.subr.bf16.mxu1 %v17138_v0  ;;  %v8975_v9 = vld [vmem:[%s14973_s5 + $0x368] sm:$0xff]  }
 0x15a   : > { %10453 = vmatmul.mubr.f32.vlgmr.msra.gmra.mrb[6].mxu0 %v212_v10  ;;  %10488 = vmatmul.mubr.f32.vlgmr.msra.gmra.mrb[6].mxu1 %v213_v11  ;;  %v8968_v10 = vld [vmem:[%s14973_s5 + $0x330] sm:$0xff]  }
 0x15b   : > { %12644 = vmatpush3.bf16.xpose.msra.mxu0 %v8930_v12  ;;  %12668 = vmatpush3.bf16.xpose.msra.mxu1 %v8938_v13  ;;  %v8976_v11 = vld [vmem:[%s14973_s5 + $0x370] sm:$0xff]   ;;  %v8969_v12 = vld [vmem:[%s14973_s5 + $0x338] sm:$0xff]  }
 0x15c   : > { %12645 = vmatprep.subr.bf16.mxu0 %v17138_v0  ;;  %12669 = vmatprep.subr.bf16.mxu1 %v17138_v0  ;;  %v8977_v13 = vld [vmem:[%s14973_s5 + $0x378] sm:$0xff]  }
 0x15d   : > { %10522 = vmatprep.mubr.msk.f32.mxu0 %vm14790_vm0, %v17134_v1  ;;  %10557 = vmatprep.mubr.msk.f32.mxu1 %vm14790_vm0, %v17134_v1 }
 0x163   : > { %12647 = vmatpush3.bf16.xpose.msra.mxu0 %v8931_v14  ;;  %12671 = vmatpush3.bf16.xpose.msra.mxu1 %v8939_v15  ;;  %v218_v14 = vld [vmem:[%s14965_s24 + $0xc] sm:$0x1]  ;;  %v219_v15 = vld [vmem:[%s14965_s24 + $0xd] sm:$0x1] }
 0x164   : > { %12648 = vmatprep.subr.bf16.mxu0 %v17138_v0  ;;  %12672 = vmatprep.subr.bf16.mxu1 %v17138_v0 }
 0x16b   : > { %12650 = vmatpush3.bf16.xpose.msra.mxu0 %v8932_v16  ;;  %12674 = vmatpush3.bf16.xpose.msra.mxu1 %v8940_v17  ;;  %v8978_v16 = vld [vmem:[%s14973_s5 + $0x380] sm:$0xff]  }
 0x16c   : > { %12651 = vmatprep.subr.bf16.mxu0 %v17138_v0  ;;  %12675 = vmatprep.subr.bf16.mxu1 %v17138_v0  ;;  %v8986_v17 = vld [vmem:[%s14973_s5 + $0x3c0] sm:$0xff]  }
 0x16d   : > { %v15149_v18 = vpop.f32.mrb[0].mxu0  ;;  %v15151_v19 = vpop.f32.mrb[0].mxu1 }
 0x16e   : > { %v10244_v20 = vpop.f32.mrb[1].mxu0  ;;  %v10279_v21 = vpop.f32.mrb[1].mxu1 }
 0x16f   : > { %v8979_v20 = vld [vmem:[%s14973_s5 + $0x388] sm:$0xff]  }
 0x170   : > { %v8987_v21 = vld [vmem:[%s14973_s5 + $0x3c8] sm:$0xff]  }
 0x173   : > { %12653 = vmatpush3.bf16.xpose.msra.mxu0 %v8933_v22  ;;  %12677 = vmatpush3.bf16.xpose.msra.mxu1 %v8941_v23  ;;  %v8980_v22 = vld [vmem:[%s14973_s5 + $0x390] sm:$0xff]  }
 0x174   : > { %12654 = vmatprep.subr.bf16.mxu0 %v17138_v0  ;;  %12678 = vmatprep.subr.bf16.mxu1 %v17138_v0  ;;  %v8988_v23 = vld [vmem:[%s14973_s5 + $0x3d0] sm:$0xff]  }
 0x17b   : > { %12656 = vmatpush3.bf16.xpose.msra.mxu0 %v8934_v24  ;;  %12680 = vmatpush3.bf16.xpose.msra.mxu1 %v8942_v25 }
 0x17c   : > { %12657 = vmatprep.subr.bf16.mxu0 %v17138_v0  ;;  %12681 = vmatprep.subr.bf16.mxu1 %v17138_v0 }
 0x183   : > { %12659 = vmatpush3.bf16.xpose.msra.mxu0 %v8935_v26  ;;  %12683 = vmatpush3.bf16.xpose.msra.mxu1 %v8943_v27 }
 0x184   : > { %12660 = vmatprep.subr.bf16.mxu0 %v17138_v0  ;;  %12684 = vmatprep.subr.bf16.mxu1 %v17138_v0 }
 0x18b   : > { %12662 = vmatpush3.bf16.xpose.msra.mxu0 %v8936_v28  ;;  %12686 = vmatpush3.bf16.xpose.msra.mxu1 %v8944_v29  ;;  %v8981_v28 = vld [vmem:[%s14973_s5 + $0x398] sm:$0xff]  }
 0x18c   : > { %12663 = vmatprep.subr.bf16.mxu0 %v17138_v0  ;;  %12687 = vmatprep.subr.bf16.mxu1 %v17138_v0  ;;  %v8989_v29 = vld [vmem:[%s14973_s5 + $0x3d8] sm:$0xff]  }
 0x193   : > { %12665 = vmatpush3.bf16.xpose.msra.mxu0 %v8937_v30  ;;  %12689 = vmatpush3.bf16.xpose.msra.mxu1 %v8945_v31  ;;  %v8982_v30 = vld [vmem:[%s14973_s5 + $0x3a0] sm:$0xff]  }
 0x194   : > { %12690 = vmatprep.subr.bf16.mxu0 %v17138_v0  ;;  %12714 = vmatprep.subr.bf16.mxu1 %v17138_v0  ;;  %v8990_v31 = vld [vmem:[%s14973_s5 + $0x3e0] sm:$0xff]  }
 0x19a   : > { %10523 = vmatmul.mubr.f32.vlgmr.msra.gmra.mrb[8].mxu0 %v214_v32  ;;  %10558 = vmatmul.mubr.f32.vlgmr.msra.gmra.mrb[8].mxu1 %v215_v33  ;;  %v8983_v32 = vld [vmem:[%s14973_s5 + $0x3a8] sm:$0xff]  }
 0x19b   : > { %12692 = vmatpush3.bf16.xpose.msra.mxu0 %v8946_v34  ;;  %12716 = vmatpush3.bf16.xpose.msra.mxu1 %v8954_v35  ;;  %v8991_v33 = vld [vmem:[%s14973_s5 + $0x3e8] sm:$0xff]   ;;  %v8984_v34 = vld [vmem:[%s14973_s5 + $0x3b0] sm:$0xff]  }
 0x19c   : > { %12693 = vmatprep.subr.bf16.mxu0 %v17138_v0  ;;  %12717 = vmatprep.subr.bf16.mxu1 %v17138_v0  ;;  %v8992_v35 = vld [vmem:[%s14973_s5 + $0x3f0] sm:$0xff]  }
 0x19d   : > { %10592 = vmatprep.mubr.msk.f32.mxu0 %vm14790_vm0, %v17134_v1  ;;  %10627 = vmatprep.mubr.msk.f32.mxu1 %vm14790_vm0, %v17134_v1 }
 0x1a3   : > { %12695 = vmatpush3.bf16.xpose.msra.mxu0 %v8947_v36  ;;  %12719 = vmatpush3.bf16.xpose.msra.mxu1 %v8955_v37  ;;  %v8985_v36 = vld [vmem:[%s14973_s5 + $0x3b8] sm:$0xff]  }
 0x1a4   : > { %12696 = vmatprep.subr.bf16.mxu0 %v17138_v0  ;;  %12720 = vmatprep.subr.bf16.mxu1 %v17138_v0  ;;  %v8993_v37 = vld [vmem:[%s14973_s5 + $0x3f8] sm:$0xff]  }
 0x1ab   : > { %12698 = vmatpush3.bf16.xpose.msra.mxu0 %v8948_v38  ;;  %12722 = vmatpush3.bf16.xpose.msra.mxu1 %v8956_v39  ;;  %v220_v38 = vld [vmem:[%s14965_s24 + $0xe] sm:$0x1]  ;;  %v221_v39 = vld [vmem:[%s14965_s24 + $0xf] sm:$0x1] }
 0x1ac   : > { %12699 = vmatprep.subr.bf16.mxu0 %v17138_v0  ;;  %12723 = vmatprep.subr.bf16.mxu1 %v17138_v0 }
 0x1ad   : > { %v15191_v40 = vpop.f32.mrb[2].mxu0  ;;  %v15193_v41 = vpop.f32.mrb[2].mxu1 }
 0x1ae   : > { %v10314_v42 = vpop.f32.mrb[3].mxu0  ;;  %v10349_v43 = vpop.f32.mrb[3].mxu1 }
 0x1af   : > { %v8994_v42 = vld [vmem:[%s14973_s5 + $0x400] sm:$0xff]  }
 0x1b0   : > { %v9002_v43 = vld [vmem:[%s14973_s5 + $0x440] sm:$0xff]  }
 0x1b3   : > { %12701 = vmatpush3.bf16.xpose.msra.mxu0 %v8949_v44  ;;  %12725 = vmatpush3.bf16.xpose.msra.mxu1 %v8957_v45  ;;  %v8995_v44 = vld [vmem:[%s14973_s5 + $0x408] sm:$0xff]  }
 0x1b4   : > { %12702 = vmatprep.subr.bf16.mxu0 %v17138_v0  ;;  %12726 = vmatprep.subr.bf16.mxu1 %v17138_v0  ;;  %v9003_v45 = vld [vmem:[%s14973_s5 + $0x448] sm:$0xff]  }
 0x1bb   : > { %12704 = vmatpush3.bf16.xpose.msra.mxu0 %v8950_v46  ;;  %12728 = vmatpush3.bf16.xpose.msra.mxu1 %v8958_v47  ;;  %v8996_v46 = vld [vmem:[%s14973_s5 + $0x410] sm:$0xff]  }
 0x1bc   : > { %12705 = vmatprep.subr.bf16.mxu0 %v17138_v0  ;;  %12729 = vmatprep.subr.bf16.mxu1 %v17138_v0  ;;  %v9004_v47 = vld [vmem:[%s14973_s5 + $0x450] sm:$0xff]  }
 0x1c3   : > { %12707 = vmatpush3.bf16.xpose.msra.mxu0 %v8951_v48  ;;  %12731 = vmatpush3.bf16.xpose.msra.mxu1 %v8959_v49 }
 0x1c4   : > { %12708 = vmatprep.subr.bf16.mxu0 %v17138_v0  ;;  %12732 = vmatprep.subr.bf16.mxu1 %v17138_v0 }
 0x1cb   : > { %12710 = vmatpush3.bf16.xpose.msra.mxu0 %v8952_v50  ;;  %12734 = vmatpush3.bf16.xpose.msra.mxu1 %v8960_v51 }
 0x1cc   : > { %12711 = vmatprep.subr.bf16.mxu0 %v17138_v0  ;;  %12735 = vmatprep.subr.bf16.mxu1 %v17138_v0 }
 0x1d3   : > { %12713 = vmatpush3.bf16.xpose.msra.mxu0 %v8953_v52  ;;  %12737 = vmatpush3.bf16.xpose.msra.mxu1 %v8961_v53  ;;  %v8997_v52 = vld [vmem:[%s14973_s5 + $0x418] sm:$0xff]  }
 0x1d4   : > { %12738 = vmatprep.subr.bf16.mxu0 %v17138_v0  ;;  %12762 = vmatprep.subr.bf16.mxu1 %v17138_v0  ;;  %v9005_v53 = vld [vmem:[%s14973_s5 + $0x458] sm:$0xff]  }
 0x1da   : > { %10593 = vmatmul.mubr.f32.vlgmr.msra.gmra.mrb[10].mxu0 %v216_v54  ;;  %10628 = vmatmul.mubr.f32.vlgmr.msra.gmra.mrb[10].mxu1 %v217_v55  ;;  %v8998_v54 = vld [vmem:[%s14973_s5 + $0x420] sm:$0xff]  }
 0x1db   : > { %12740 = vmatpush3.bf16.xpose.msra.mxu0 %v8962_v56  ;;  %12764 = vmatpush3.bf16.xpose.msra.mxu1 %v8970_v57  ;;  %v9006_v55 = vld [vmem:[%s14973_s5 + $0x460] sm:$0xff]   ;;  %v8999_v56 = vld [vmem:[%s14973_s5 + $0x428] sm:$0xff]  }
 0x1dc   : > { %12741 = vmatprep.subr.bf16.mxu0 %v17138_v0  ;;  %12765 = vmatprep.subr.bf16.mxu1 %v17138_v0  ;;  %v9007_v57 = vld [vmem:[%s14973_s5 + $0x468] sm:$0xff]  }
 0x1dd   : > { %10662 = vmatprep.mubr.msk.f32.mxu0 %vm14790_vm0, %v17134_v1  ;;  %10697 = vmatprep.mubr.msk.f32.mxu1 %vm14790_vm0, %v17134_v1 }
 0x1e3   : > { %12743 = vmatpush3.bf16.xpose.msra.mxu0 %v8963_v58  ;;  %12767 = vmatpush3.bf16.xpose.msra.mxu1 %v8971_v59  ;;  %v9000_v58 = vld [vmem:[%s14973_s5 + $0x430] sm:$0xff]  }
 0x1e4   : > { %12744 = vmatprep.subr.bf16.mxu0 %v17138_v0  ;;  %12768 = vmatprep.subr.bf16.mxu1 %v17138_v0  ;;  %v9008_v59 = vld [vmem:[%s14973_s5 + $0x470] sm:$0xff]  }
 0x1eb   : > { %12746 = vmatpush3.bf16.xpose.msra.mxu0 %v8964_v60  ;;  %12770 = vmatpush3.bf16.xpose.msra.mxu1 %v8972_v61  ;;  %v9001_v60 = vld [vmem:[%s14973_s5 + $0x438] sm:$0xff]  }
 0x1ec   : > { %12747 = vmatprep.subr.bf16.mxu0 %v17138_v0  ;;  %12771 = vmatprep.subr.bf16.mxu1 %v17138_v0  ;;  %v9009_v61 = vld [vmem:[%s14973_s5 + $0x478] sm:$0xff]  }
 0x1ed   : > { %v15233_v62 = vpop.f32.mrb[4].mxu0  ;;  %v15235_v63 = vpop.f32.mrb[4].mxu1 }
 0x1ee   : > { %v10384_v2 = vpop.f32.mrb[5].mxu0  ;;  %v10419_v3 = vpop.f32.mrb[5].mxu1 }
 0x1ef   : > { %v222_v2 = vld [vmem:[%s14965_s24 + $0x10] sm:$0x1]  ;;  %v223_v3 = vld [vmem:[%s14965_s24 + $0x11] sm:$0x1] }
 0x1f3   : > { %12749 = vmatpush3.bf16.xpose.msra.mxu0 %v8965_v4  ;;  %12773 = vmatpush3.bf16.xpose.msra.mxu1 %v8973_v5  ;;  %v9010_v4 = vld [vmem:[%s14973_s5 + $0x480] sm:$0xff]  }
 0x1f4   : > { %12750 = vmatprep.subr.bf16.mxu0 %v17138_v0  ;;  %12774 = vmatprep.subr.bf16.mxu1 %v17138_v0  ;;  %v9018_v5 = vld [vmem:[%s14973_s5 + $0x4c0] sm:$0xff]  }
 0x1fb   : > { %12752 = vmatpush3.bf16.xpose.msra.mxu0 %v8966_v6  ;;  %12776 = vmatpush3.bf16.xpose.msra.mxu1 %v8974_v7  ;;  %v9011_v6 = vld [vmem:[%s14973_s5 + $0x488] sm:$0xff]  }
 0x1fc   : > { %12753 = vmatprep.subr.bf16.mxu0 %v17138_v0  ;;  %12777 = vmatprep.subr.bf16.mxu1 %v17138_v0  ;;  %v9019_v7 = vld [vmem:[%s14973_s5 + $0x4c8] sm:$0xff]  }
 0x203   : > { %12755 = vmatpush3.bf16.xpose.msra.mxu0 %v8967_v8  ;;  %12779 = vmatpush3.bf16.xpose.msra.mxu1 %v8975_v9  ;;  %v9012_v8 = vld [vmem:[%s14973_s5 + $0x490] sm:$0xff]  }
 0x204   : > { %12756 = vmatprep.subr.bf16.mxu0 %v17138_v0  ;;  %12780 = vmatprep.subr.bf16.mxu1 %v17138_v0  ;;  %v9020_v9 = vld [vmem:[%s14973_s5 + $0x4d0] sm:$0xff]  }
 0x20b   : > { %12758 = vmatpush3.bf16.xpose.msra.mxu0 %v8968_v10  ;;  %12782 = vmatpush3.bf16.xpose.msra.mxu1 %v8976_v11 }
 0x20c   : > { %12759 = vmatprep.subr.bf16.mxu0 %v17138_v0  ;;  %12783 = vmatprep.subr.bf16.mxu1 %v17138_v0 }
 0x213   : > { %12761 = vmatpush3.bf16.xpose.msra.mxu0 %v8969_v12  ;;  %12785 = vmatpush3.bf16.xpose.msra.mxu1 %v8977_v13 }
 0x214   : > { %12786 = vmatprep.subr.bf16.mxu0 %v17138_v0  ;;  %12810 = vmatprep.subr.bf16.mxu1 %v17138_v0 }
 0x21a   : > { %10663 = vmatmul.mubr.f32.vlgmr.msra.gmra.mrb[12].mxu0 %v218_v14  ;;  %10698 = vmatmul.mubr.f32.vlgmr.msra.gmra.mrb[12].mxu1 %v219_v15  ;;  %v9013_v14 = vld [vmem:[%s14973_s5 + $0x498] sm:$0xff]  }
 0x21b   : > { %12788 = vmatpush3.bf16.xpose.msra.mxu0 %v8978_v16  ;;  %12812 = vmatpush3.bf16.xpose.msra.mxu1 %v8986_v17  ;;  %v9021_v15 = vld [vmem:[%s14973_s5 + $0x4d8] sm:$0xff]   ;;  %v9014_v16 = vld [vmem:[%s14973_s5 + $0x4a0] sm:$0xff]  }
 0x21c   : > { %12789 = vmatprep.subr.bf16.mxu0 %v17138_v0  ;;  %12813 = vmatprep.subr.bf16.mxu1 %v17138_v0  ;;  %v9022_v17 = vld [vmem:[%s14973_s5 + $0x4e0] sm:$0xff]  }
 0x21d   : > { %10732 = vmatprep.mubr.msk.f32.mxu0 %vm14790_vm0, %v17134_v1  ;;  %10767 = vmatprep.mubr.msk.f32.mxu1 %vm14790_vm0, %v17134_v1 }
 0x223   : > { %12791 = vmatpush3.bf16.xpose.msra.mxu0 %v8979_v20  ;;  %12815 = vmatpush3.bf16.xpose.msra.mxu1 %v8987_v21  ;;  %v9015_v20 = vld [vmem:[%s14973_s5 + $0x4a8] sm:$0xff]  }
 0x224   : > { %12792 = vmatprep.subr.bf16.mxu0 %v17138_v0  ;;  %12816 = vmatprep.subr.bf16.mxu1 %v17138_v0  ;;  %v9023_v21 = vld [vmem:[%s14973_s5 + $0x4e8] sm:$0xff]  }
 0x22b   : > { %12794 = vmatpush3.bf16.xpose.msra.mxu0 %v8980_v22  ;;  %12818 = vmatpush3.bf16.xpose.msra.mxu1 %v8988_v23  ;;  %v9016_v22 = vld [vmem:[%s14973_s5 + $0x4b0] sm:$0xff]  }
 0x22c   : > { %12795 = vmatprep.subr.bf16.mxu0 %v17138_v0  ;;  %12819 = vmatprep.subr.bf16.mxu1 %v17138_v0  ;;  %v9024_v23 = vld [vmem:[%s14973_s5 + $0x4f0] sm:$0xff]  }
 0x22d   : > { %v15275_v24 = vpop.f32.mrb[6].mxu0  ;;  %v15277_v25 = vpop.f32.mrb[6].mxu1 }
 0x22e   : > { %v10454_v26 = vpop.f32.mrb[7].mxu0  ;;  %v10489_v27 = vpop.f32.mrb[7].mxu1 }
 0x22f   : > { %v9017_v26 = vld [vmem:[%s14973_s5 + $0x4b8] sm:$0xff]  }
 0x230   : > { %v9025_v27 = vld [vmem:[%s14973_s5 + $0x4f8] sm:$0xff]  }
 0x233   : > { %12797 = vmatpush3.bf16.xpose.msra.mxu0 %v8981_v28  ;;  %12821 = vmatpush3.bf16.xpose.msra.mxu1 %v8989_v29  ;;  %v15384_v28 = vld [vmem:[%s14965_s24 + $0x12] sm:$0x1]  ;;  %v225_v29 = vld [vmem:[%s14965_s24 + $0x13] sm:$0x1] }
 0x234   : > { %12798 = vmatprep.subr.bf16.mxu0 %v17138_v0  ;;  %12822 = vmatprep.subr.bf16.mxu1 %v17138_v0 }
 0x23b   : > { %12800 = vmatpush3.bf16.xpose.msra.mxu0 %v8982_v30  ;;  %12824 = vmatpush3.bf16.xpose.msra.mxu1 %v8990_v31  ;;  %v9026_v30 = vld [vmem:[%s14973_s5 + $0x500] sm:$0xff]  }
 0x23c   : > { %12801 = vmatprep.subr.bf16.mxu0 %v17138_v0  ;;  %12825 = vmatprep.subr.bf16.mxu1 %v17138_v0  ;;  %v9034_v31 = vld [vmem:[%s14973_s5 + $0x540] sm:$0xff]  }
 0x243   : > { %12803 = vmatpush3.bf16.xpose.msra.mxu0 %v8983_v32  ;;  %12827 = vmatpush3.bf16.xpose.msra.mxu1 %v8991_v33  ;;  %v9027_v32 = vld [vmem:[%s14973_s5 + $0x508] sm:$0xff]  }
 0x244   : > { %12804 = vmatprep.subr.bf16.mxu0 %v17138_v0  ;;  %12828 = vmatprep.subr.bf16.mxu1 %v17138_v0  ;;  %v9035_v33 = vld [vmem:[%s14973_s5 + $0x548] sm:$0xff]  }
 0x24b   : > { %12806 = vmatpush3.bf16.xpose.msra.mxu0 %v8984_v34  ;;  %12830 = vmatpush3.bf16.xpose.msra.mxu1 %v8992_v35  ;;  %v9028_v34 = vld [vmem:[%s14973_s5 + $0x510] sm:$0xff]  }
 0x24c   : > { %12807 = vmatprep.subr.bf16.mxu0 %v17138_v0  ;;  %12831 = vmatprep.subr.bf16.mxu1 %v17138_v0  ;;  %v9036_v35 = vld [vmem:[%s14973_s5 + $0x550] sm:$0xff]  }
 0x253   : > { %12809 = vmatpush3.bf16.xpose.msra.mxu0 %v8985_v36  ;;  %12833 = vmatpush3.bf16.xpose.msra.mxu1 %v8993_v37 }
 0x254   : > { %12834 = vmatprep.subr.bf16.mxu0 %v17138_v0  ;;  %12858 = vmatprep.subr.bf16.mxu1 %v17138_v0 }
 0x25a   : > { %10733 = vmatmul.mubr.f32.vlgmr.msra.gmra.mrb[14].mxu0 %v220_v38  ;;  %10768 = vmatmul.mubr.f32.vlgmr.msra.gmra.mrb[14].mxu1 %v221_v39 }
 0x25b   : > { %12836 = vmatpush3.bf16.xpose.msra.mxu0 %v8994_v42  ;;  %12860 = vmatpush3.bf16.xpose.msra.mxu1 %v9002_v43  ;;  %v9029_v42 = vld [vmem:[%s14973_s5 + $0x518] sm:$0xff]  }
 0x25c   : > { %12837 = vmatprep.subr.bf16.mxu0 %v17138_v0  ;;  %12861 = vmatprep.subr.bf16.mxu1 %v17138_v0  ;;  %v9037_v43 = vld [vmem:[%s14973_s5 + $0x558] sm:$0xff]  }
 0x25d   : > { %10802 = vmatprep.mubr.msk.f32.mxu0 %vm14790_vm0, %v17134_v1  ;;  %10837 = vmatprep.mubr.msk.f32.mxu1 %vm14790_vm0, %v17134_v1 }
 0x263   : > { %12839 = vmatpush3.bf16.xpose.msra.mxu0 %v8995_v44  ;;  %12863 = vmatpush3.bf16.xpose.msra.mxu1 %v9003_v45  ;;  %v9030_v44 = vld [vmem:[%s14973_s5 + $0x520] sm:$0xff]  }
 0x264   : > { %12840 = vmatprep.subr.bf16.mxu0 %v17138_v0  ;;  %12864 = vmatprep.subr.bf16.mxu1 %v17138_v0  ;;  %v9038_v45 = vld [vmem:[%s14973_s5 + $0x560] sm:$0xff]  }
 0x26b   : > { %12842 = vmatpush3.bf16.xpose.msra.mxu0 %v8996_v46  ;;  %12866 = vmatpush3.bf16.xpose.msra.mxu1 %v9004_v47  ;;  %v9031_v46 = vld [vmem:[%s14973_s5 + $0x528] sm:$0xff]  }
 0x26c   : > { %12843 = vmatprep.subr.bf16.mxu0 %v17138_v0  ;;  %12867 = vmatprep.subr.bf16.mxu1 %v17138_v0  ;;  %v9039_v47 = vld [vmem:[%s14973_s5 + $0x568] sm:$0xff]  }
 0x26d   : > { %v15317_v48 = vpop.f32.mrb[8].mxu0  ;;  %v15319_v49 = vpop.f32.mrb[8].mxu1 }
 0x26e   : > { %v10524_v50 = vpop.f32.mrb[9].mxu0  ;;  %v10559_v51 = vpop.f32.mrb[9].mxu1 }
 0x26f   : > { %v9032_v50 = vld [vmem:[%s14973_s5 + $0x530] sm:$0xff]  }
 0x270   : > { %v9040_v51 = vld [vmem:[%s14973_s5 + $0x570] sm:$0xff]  }
 0x273   : > { %12845 = vmatpush3.bf16.xpose.msra.mxu0 %v8997_v52  ;;  %12869 = vmatpush3.bf16.xpose.msra.mxu1 %v9005_v53  ;;  %v9033_v52 = vld [vmem:[%s14973_s5 + $0x538] sm:$0xff]  }
 0x274   : > { %12846 = vmatprep.subr.bf16.mxu0 %v17138_v0  ;;  %12870 = vmatprep.subr.bf16.mxu1 %v17138_v0  ;;  %v9041_v53 = vld [vmem:[%s14973_s5 + $0x578] sm:$0xff]  }
 0x27b   : > { %12848 = vmatpush3.bf16.xpose.msra.mxu0 %v8998_v54  ;;  %12872 = vmatpush3.bf16.xpose.msra.mxu1 %v9006_v55  ;;  %v226_v54 = vld [vmem:[%s14965_s24 + $0x14] sm:$0x1]  ;;  %v227_v55 = vld [vmem:[%s14965_s24 + $0x15] sm:$0x1] }
 0x27c   : > { %12849 = vmatprep.subr.bf16.mxu0 %v17138_v0  ;;  %12873 = vmatprep.subr.bf16.mxu1 %v17138_v0 }
 0x283   : > { %12851 = vmatpush3.bf16.xpose.msra.mxu0 %v8999_v56  ;;  %12875 = vmatpush3.bf16.xpose.msra.mxu1 %v9007_v57  ;;  %v9042_v56 = vld [vmem:[%s14973_s5 + $0x580] sm:$0xff]  }
 0x284   : > { %12852 = vmatprep.subr.bf16.mxu0 %v17138_v0  ;;  %12876 = vmatprep.subr.bf16.mxu1 %v17138_v0  ;;  %v9050_v57 = vld [vmem:[%s14973_s5 + $0x5c0] sm:$0xff]  }
 0x28b   : > { %12854 = vmatpush3.bf16.xpose.msra.mxu0 %v9000_v58  ;;  %12878 = vmatpush3.bf16.xpose.msra.mxu1 %v9008_v59  ;;  %v9043_v58 = vld [vmem:[%s14973_s5 + $0x588] sm:$0xff]  }
 0x28c   : > { %12855 = vmatprep.subr.bf16.mxu0 %v17138_v0  ;;  %12879 = vmatprep.subr.bf16.mxu1 %v17138_v0  ;;  %v9051_v59 = vld [vmem:[%s14973_s5 + $0x5c8] sm:$0xff]  }
 0x293   : > { %12857 = vmatpush3.bf16.xpose.msra.mxu0 %v9001_v60  ;;  %12881 = vmatpush3.bf16.xpose.msra.mxu1 %v9009_v61  ;;  %v9044_v60 = vld [vmem:[%s14973_s5 + $0x590] sm:$0xff]  }
 0x294   : > { %12882 = vmatprep.subr.bf16.mxu0 %v17138_v0  ;;  %12906 = vmatprep.subr.bf16.mxu1 %v17138_v0  ;;  %v9052_v61 = vld [vmem:[%s14973_s5 + $0x5d0] sm:$0xff]  }
 0x29a   : > { %10803 = vmatmul.mubr.f32.vlgmr.msra.gmra.mrb[16].mxu0 %v222_v2  ;;  %10838 = vmatmul.mubr.f32.vlgmr.msra.gmra.mrb[16].mxu1 %v223_v3 }
 0x29b   : > { %12884 = vmatpush3.bf16.xpose.msra.mxu0 %v9010_v4  ;;  %12908 = vmatpush3.bf16.xpose.msra.mxu1 %v9018_v5 }
 0x29c   : > { %12885 = vmatprep.subr.bf16.mxu0 %v17138_v0  ;;  %12909 = vmatprep.subr.bf16.mxu1 %v17138_v0 }
 0x29d   : > { %10872 = vmatprep.mubr.msk.f32.mxu0 %vm14790_vm0, %v17134_v1  ;;  %10907 = vmatprep.mubr.msk.f32.mxu1 %vm14790_vm0, %v17134_v1 }
 0x2a3   : > { %12887 = vmatpush3.bf16.xpose.msra.mxu0 %v9011_v6  ;;  %12911 = vmatpush3.bf16.xpose.msra.mxu1 %v9019_v7  ;;  %v9045_v6 = vld [vmem:[%s14973_s5 + $0x598] sm:$0xff]  }
 0x2a4   : > { %12888 = vmatprep.subr.bf16.mxu0 %v17138_v0  ;;  %12912 = vmatprep.subr.bf16.mxu1 %v17138_v0  ;;  %v9053_v7 = vld [vmem:[%s14973_s5 + $0x5d8] sm:$0xff]  }
 0x2ab   : > { %12890 = vmatpush3.bf16.xpose.msra.mxu0 %v9012_v8  ;;  %12914 = vmatpush3.bf16.xpose.msra.mxu1 %v9020_v9  ;;  %v9046_v8 = vld [vmem:[%s14973_s5 + $0x5a0] sm:$0xff]  }
 0x2ac   : > { %12891 = vmatprep.subr.bf16.mxu0 %v17138_v0  ;;  %12915 = vmatprep.subr.bf16.mxu1 %v17138_v0  ;;  %v9054_v9 = vld [vmem:[%s14973_s5 + $0x5e0] sm:$0xff]  }
 0x2ad   : > { %v15359_v10 = vpop.f32.mrb[10].mxu0  ;;  %v15361_v11 = vpop.f32.mrb[10].mxu1 }
 0x2ae   : > { %v10594_v12 = vpop.f32.mrb[11].mxu0  ;;  %v10629_v13 = vpop.f32.mrb[11].mxu1 }
 0x2af   : > { %v9047_v12 = vld [vmem:[%s14973_s5 + $0x5a8] sm:$0xff]  }
 0x2b0   : > { %v9055_v13 = vld [vmem:[%s14973_s5 + $0x5e8] sm:$0xff]  }
 0x2b3   : > { %12893 = vmatpush3.bf16.xpose.msra.mxu0 %v9013_v14  ;;  %12917 = vmatpush3.bf16.xpose.msra.mxu1 %v9021_v15  ;;  %v9048_v14 = vld [vmem:[%s14973_s5 + $0x5b0] sm:$0xff]  }
 0x2b4   : > { %12894 = vmatprep.subr.bf16.mxu0 %v17138_v0  ;;  %12918 = vmatprep.subr.bf16.mxu1 %v17138_v0  ;;  %v9056_v15 = vld [vmem:[%s14973_s5 + $0x5f0] sm:$0xff]  }
 0x2bb   : > { %12896 = vmatpush3.bf16.xpose.msra.mxu0 %v9014_v16  ;;  %12920 = vmatpush3.bf16.xpose.msra.mxu1 %v9022_v17  ;;  %v9049_v16 = vld [vmem:[%s14973_s5 + $0x5b8] sm:$0xff]  }
 0x2bc   : > { %12897 = vmatprep.subr.bf16.mxu0 %v17138_v0  ;;  %12921 = vmatprep.subr.bf16.mxu1 %v17138_v0  ;;  %v9057_v17 = vld [vmem:[%s14973_s5 + $0x5f8] sm:$0xff]  }
 0x2c3   : > { %12899 = vmatpush3.bf16.xpose.msra.mxu0 %v9015_v20  ;;  %12923 = vmatpush3.bf16.xpose.msra.mxu1 %v9023_v21  ;;  %v228_v20 = vld [vmem:[%s14965_s24 + $0x16] sm:$0x1]  ;;  %v229_v21 = vld [vmem:[%s14965_s24 + $0x17] sm:$0x1] }
 0x2c4   : > { %12900 = vmatprep.subr.bf16.mxu0 %v17138_v0  ;;  %12924 = vmatprep.subr.bf16.mxu1 %v17138_v0 }
 0x2cb   : > { %12902 = vmatpush3.bf16.xpose.msra.mxu0 %v9016_v22  ;;  %12926 = vmatpush3.bf16.xpose.msra.mxu1 %v9024_v23  ;;  %v9058_v22 = vld [vmem:[%s14973_s5 + $0x600] sm:$0xff]  }
 0x2cc   : > { %12903 = vmatprep.subr.bf16.mxu0 %v17138_v0  ;;  %12927 = vmatprep.subr.bf16.mxu1 %v17138_v0  ;;  %v9066_v23 = vld [vmem:[%s14973_s5 + $0x640] sm:$0xff]  }
 0x2d3   : > { %12905 = vmatpush3.bf16.xpose.msra.mxu0 %v9017_v26  ;;  %12929 = vmatpush3.bf16.xpose.msra.mxu1 %v9025_v27  ;;  %v9059_v26 = vld [vmem:[%s14973_s5 + $0x608] sm:$0xff]  }
 0x2d4   : > { %12930 = vmatprep.subr.bf16.mxu0 %v17138_v0  ;;  %12954 = vmatprep.subr.bf16.mxu1 %v17138_v0  ;;  %v9067_v27 = vld [vmem:[%s14973_s5 + $0x648] sm:$0xff]  }
 0x2da   : > { %10873 = vmatmul.mubr.f32.vlgmr.msra.gmra.mrb[18].mxu0 %v15384_v28  ;;  %10908 = vmatmul.mubr.f32.vlgmr.msra.gmra.mrb[18].mxu1 %v225_v29  ;;  %v9060_v29 = vld [vmem:[%s14973_s5 + $0x610] sm:$0xff]  }
 0x2db   : > { %12932 = vmatpush3.bf16.xpose.msra.mxu0 %v9026_v30  ;;  %12956 = vmatpush3.bf16.xpose.msra.mxu1 %v9034_v31  ;;  %v9068_v30 = vld [vmem:[%s14973_s5 + $0x650] sm:$0xff]  }
 0x2dc   : > { %12933 = vmatprep.subr.bf16.mxu0 %v17138_v0  ;;  %12957 = vmatprep.subr.bf16.mxu1 %v17138_v0 }
 0x2dd   : > { %10942 = vmatprep.mubr.msk.f32.mxu0 %vm14790_vm0, %v17134_v1  ;;  %10977 = vmatprep.mubr.msk.f32.mxu1 %vm14790_vm0, %v17134_v1 }
 0x2e3   : > { %12935 = vmatpush3.bf16.xpose.msra.mxu0 %v9027_v32  ;;  %12959 = vmatpush3.bf16.xpose.msra.mxu1 %v9035_v33 }
 0x2e4   : > { %12936 = vmatprep.subr.bf16.mxu0 %v17138_v0  ;;  %12960 = vmatprep.subr.bf16.mxu1 %v17138_v0 }
 0x2eb   : > { %12938 = vmatpush3.bf16.xpose.msra.mxu0 %v9028_v34  ;;  %12962 = vmatpush3.bf16.xpose.msra.mxu1 %v9036_v35  ;;  %v9061_v35 = vld [vmem:[%s14973_s5 + $0x618] sm:$0xff]  }
 0x2ec   : > { %12939 = vmatprep.subr.bf16.mxu0 %v17138_v0  ;;  %12963 = vmatprep.subr.bf16.mxu1 %v17138_v0 }
 0x2ed   : > { %v15404_v36 = vpop.f32.mrb[12].mxu0  ;;  %v15406_v37 = vpop.f32.mrb[12].mxu1 }
 0x2ee   : > { %v10664_v38 = vpop.f32.mrb[13].mxu0  ;;  %v10699_v39 = vpop.f32.mrb[13].mxu1 }
 0x2ef   : > { %v9069_v38 = vld [vmem:[%s14973_s5 + $0x658] sm:$0xff]   ;;  %v9062_v39 = vld [vmem:[%s14973_s5 + $0x620] sm:$0xff]  }
 0x2f3   : > { %12941 = vmatpush3.bf16.xpose.msra.mxu0 %v9029_v42  ;;  %12965 = vmatpush3.bf16.xpose.msra.mxu1 %v9037_v43  ;;  %v9070_v42 = vld [vmem:[%s14973_s5 + $0x660] sm:$0xff]   ;;  %v9063_v43 = vld [vmem:[%s14973_s5 + $0x628] sm:$0xff]  }
 0x2f4   : > { %12942 = vmatprep.subr.bf16.mxu0 %v17138_v0  ;;  %12966 = vmatprep.subr.bf16.mxu1 %v17138_v0 }
 0x2fb   : > { %12944 = vmatpush3.bf16.xpose.msra.mxu0 %v9030_v44  ;;  %12968 = vmatpush3.bf16.xpose.msra.mxu1 %v9038_v45  ;;  %v9071_v44 = vld [vmem:[%s14973_s5 + $0x668] sm:$0xff]   ;;  %v9064_v45 = vld [vmem:[%s14973_s5 + $0x630] sm:$0xff]  }
 0x2fc   : > { %12945 = vmatprep.subr.bf16.mxu0 %v17138_v0  ;;  %12969 = vmatprep.subr.bf16.mxu1 %v17138_v0 }
 0x303   : > { %12947 = vmatpush3.bf16.xpose.msra.mxu0 %v9031_v46  ;;  %12971 = vmatpush3.bf16.xpose.msra.mxu1 %v9039_v47  ;;  %v9072_v46 = vld [vmem:[%s14973_s5 + $0x670] sm:$0xff]   ;;  %v9065_v47 = vld [vmem:[%s14973_s5 + $0x638] sm:$0xff]  }
 0x304   : > { %12948 = vmatprep.subr.bf16.mxu0 %v17138_v0  ;;  %12972 = vmatprep.subr.bf16.mxu1 %v17138_v0 }
 0x30b   : > { %12950 = vmatpush3.bf16.xpose.msra.mxu0 %v9032_v50  ;;  %12974 = vmatpush3.bf16.xpose.msra.mxu1 %v9040_v51  ;;  %v9073_v50 = vld [vmem:[%s14973_s5 + $0x678] sm:$0xff]  }
 0x30c   : > { %12951 = vmatprep.subr.bf16.mxu0 %v17138_v0  ;;  %12975 = vmatprep.subr.bf16.mxu1 %v17138_v0  ;;  %v15513_v51 = vld [vmem:[%s14965_s24 + $0x18] sm:$0x1] }
 0x313   : > { %12953 = vmatpush3.bf16.xpose.msra.mxu0 %v9033_v52  ;;  %12977 = vmatpush3.bf16.xpose.msra.mxu1 %v9041_v53  ;;  %v15516_v52 = vld [vmem:[%s14965_s24 + $0x19] sm:$0x1]  ;;  %v9074_v53 = vld [vmem:[%s14973_s5 + $0x680] sm:$0xff]  }
 0x314   : > { %12978 = vmatprep.subr.bf16.mxu0 %v17138_v0  ;;  %13002 = vmatprep.subr.bf16.mxu1 %v17138_v0 }
 0x31a   : > { %10943 = vmatmul.mubr.f32.vlgmr.msra.gmra.mrb[20].mxu0 %v226_v54  ;;  %10978 = vmatmul.mubr.f32.vlgmr.msra.gmra.mrb[20].mxu1 %v227_v55  ;;  %v9082_v54 = vld [vmem:[%s14973_s5 + $0x6c0] sm:$0xff]   ;;  %v9075_v55 = vld [vmem:[%s14973_s5 + $0x688] sm:$0xff]  }
 0x31b   : > { %12980 = vmatpush3.bf16.xpose.msra.mxu0 %v9042_v56  ;;  %13004 = vmatpush3.bf16.xpose.msra.mxu1 %v9050_v57  ;;  %v9083_v56 = vld [vmem:[%s14973_s5 + $0x6c8] sm:$0xff]   ;;  %v9076_v57 = vld [vmem:[%s14973_s5 + $0x690] sm:$0xff]  }
 0x31c   : > { %12981 = vmatprep.subr.bf16.mxu0 %v17138_v0  ;;  %13005 = vmatprep.subr.bf16.mxu1 %v17138_v0 }
 0x31d   : > { %11012 = vmatprep.mubr.msk.f32.mxu0 %vm14790_vm0, %v17134_v1  ;;  %11047 = vmatprep.mubr.msk.f32.mxu1 %vm14790_vm0, %v17134_v1 }
 0x323   : > { %12983 = vmatpush3.bf16.xpose.msra.mxu0 %v9043_v58  ;;  %13007 = vmatpush3.bf16.xpose.msra.mxu1 %v9051_v59  ;;  %v9084_v58 = vld [vmem:[%s14973_s5 + $0x6d0] sm:$0xff]  }
 0x324   : > { %12984 = vmatprep.subr.bf16.mxu0 %v17138_v0  ;;  %13008 = vmatprep.subr.bf16.mxu1 %v17138_v0 }
 0x32b   : > { %12986 = vmatpush3.bf16.xpose.msra.mxu0 %v9044_v60  ;;  %13010 = vmatpush3.bf16.xpose.msra.mxu1 %v9052_v61 }
 0x32c   : > { %12987 = vmatprep.subr.bf16.mxu0 %v17138_v0  ;;  %13011 = vmatprep.subr.bf16.mxu1 %v17138_v0 }
 0x32d   : > { %v15446_v2 = vpop.f32.mrb[14].mxu0  ;;  %v15448_v3 = vpop.f32.mrb[14].mxu1 }
 0x32e   : > { %v10734_v4 = vpop.f32.mrb[15].mxu0  ;;  %v10769_v5 = vpop.f32.mrb[15].mxu1 }
 0x32f   : > { %v9077_v5 = vld [vmem:[%s14973_s5 + $0x698] sm:$0xff]  }
 0x333   : > { %12989 = vmatpush3.bf16.xpose.msra.mxu0 %v9045_v6  ;;  %13013 = vmatpush3.bf16.xpose.msra.mxu1 %v9053_v7  ;;  %v9085_v6 = vld [vmem:[%s14973_s5 + $0x6d8] sm:$0xff]   ;;  %v9078_v7 = vld [vmem:[%s14973_s5 + $0x6a0] sm:$0xff]  }
 0x334   : > { %12990 = vmatprep.subr.bf16.mxu0 %v17138_v0  ;;  %13014 = vmatprep.subr.bf16.mxu1 %v17138_v0 }
 0x33b   : > { %12992 = vmatpush3.bf16.xpose.msra.mxu0 %v9046_v8  ;;  %13016 = vmatpush3.bf16.xpose.msra.mxu1 %v9054_v9  ;;  %v9086_v8 = vld [vmem:[%s14973_s5 + $0x6e0] sm:$0xff]   ;;  %v9079_v9 = vld [vmem:[%s14973_s5 + $0x6a8] sm:$0xff]  }
 0x33c   : > { %12993 = vmatprep.subr.bf16.mxu0 %v17138_v0  ;;  %13017 = vmatprep.subr.bf16.mxu1 %v17138_v0 }
 0x343   : > { %12995 = vmatpush3.bf16.xpose.msra.mxu0 %v9047_v12  ;;  %13019 = vmatpush3.bf16.xpose.msra.mxu1 %v9055_v13  ;;  %v9087_v12 = vld [vmem:[%s14973_s5 + $0x6e8] sm:$0xff]   ;;  %v9080_v13 = vld [vmem:[%s14973_s5 + $0x6b0] sm:$0xff]  }
 0x344   : > { %12996 = vmatprep.subr.bf16.mxu0 %v17138_v0  ;;  %13020 = vmatprep.subr.bf16.mxu1 %v17138_v0 }
 0x34b   : > { %12998 = vmatpush3.bf16.xpose.msra.mxu0 %v9048_v14  ;;  %13022 = vmatpush3.bf16.xpose.msra.mxu1 %v9056_v15  ;;  %v9088_v14 = vld [vmem:[%s14973_s5 + $0x6f0] sm:$0xff]   ;;  %v9081_v15 = vld [vmem:[%s14973_s5 + $0x6b8] sm:$0xff]  }
 0x34c   : > { %12999 = vmatprep.subr.bf16.mxu0 %v17138_v0  ;;  %13023 = vmatprep.subr.bf16.mxu1 %v17138_v0 }
 0x353   : > { %13001 = vmatpush3.bf16.xpose.msra.mxu0 %v9049_v16  ;;  %13025 = vmatpush3.bf16.xpose.msra.mxu1 %v9057_v17  ;;  %v9089_v16 = vld [vmem:[%s14973_s5 + $0x6f8] sm:$0xff]  }
 0x354   : > { %13026 = vmatprep.subr.bf16.mxu0 %v17138_v0  ;;  %13050 = vmatprep.subr.bf16.mxu1 %v17138_v0  ;;  %v15561_v17 = vld [vmem:[%s14965_s24 + $0x1a] sm:$0x1] }
 0x35a   : > { %11013 = vmatmul.mubr.f32.vlgmr.msra.gmra.mrb[22].mxu0 %v228_v20  ;;  %11048 = vmatmul.mubr.f32.vlgmr.msra.gmra.mrb[22].mxu1 %v229_v21  ;;  %v233_v20 = vld [vmem:[%s14965_s24 + $0x1b] sm:$0x1]  ;;  %v9090_v21 = vld [vmem:[%s14973_s5 + $0x700] sm:$0xff]  }
 0x35b   : > { %13028 = vmatpush3.bf16.xpose.msra.mxu0 %v9058_v22  ;;  %13052 = vmatpush3.bf16.xpose.msra.mxu1 %v9066_v23  ;;  %v9098_v22 = vld [vmem:[%s14973_s5 + $0x740] sm:$0xff]   ;;  %v9091_v23 = vld [vmem:[%s14973_s5 + $0x708] sm:$0xff]  }
 0x35c   : > { %13029 = vmatprep.subr.bf16.mxu0 %v17138_v0  ;;  %13053 = vmatprep.subr.bf16.mxu1 %v17138_v0 }
 0x35d   : > { %11082 = vmatprep.mubr.msk.f32.mxu0 %vm14790_vm0, %v17134_v1  ;;  %11117 = vmatprep.mubr.msk.f32.mxu1 %vm14790_vm0, %v17134_v1 }
 0x363   : > { %13031 = vmatpush3.bf16.xpose.msra.mxu0 %v9059_v26  ;;  %13055 = vmatpush3.bf16.xpose.msra.mxu1 %v9067_v27  ;;  %v9099_v26 = vld [vmem:[%s14973_s5 + $0x748] sm:$0xff]   ;;  %v9092_v27 = vld [vmem:[%s14973_s5 + $0x710] sm:$0xff]  }
 0x364   : > { %13032 = vmatprep.subr.bf16.mxu0 %v17138_v0  ;;  %13056 = vmatprep.subr.bf16.mxu1 %v17138_v0 }
 0x36b   : > { %13034 = vmatpush3.bf16.xpose.msra.mxu0 %v9060_v29  ;;  %13058 = vmatpush3.bf16.xpose.msra.mxu1 %v9068_v30  ;;  %v9100_v29 = vld [vmem:[%s14973_s5 + $0x750] sm:$0xff]  }
 0x36c   : > { %13035 = vmatprep.subr.bf16.mxu0 %v17138_v0  ;;  %13059 = vmatprep.subr.bf16.mxu1 %v17138_v0 }
 0x36d   : > { %v15488_v31 = vpop.f32.mrb[16].mxu0  ;;  %v15490_v32 = vpop.f32.mrb[16].mxu1 }
 0x36e   : > { %v10804_v33 = vpop.f32.mrb[17].mxu0  ;;  %v10839_v34 = vpop.f32.mrb[17].mxu1 }
 0x373   : > { %13037 = vmatpush3.bf16.xpose.msra.mxu0 %v9061_v35  ;;  %13061 = vmatpush3.bf16.xpose.msra.mxu1 %v9069_v38  ;;  %v9093_v38 = vld [vmem:[%s14973_s5 + $0x718] sm:$0xff]  }
 0x374   : > { %13038 = vmatprep.subr.bf16.mxu0 %v17138_v0  ;;  %13062 = vmatprep.subr.bf16.mxu1 %v17138_v0 }
 0x37b   : > { %13040 = vmatpush3.bf16.xpose.msra.mxu0 %v9062_v39  ;;  %13064 = vmatpush3.bf16.xpose.msra.mxu1 %v9070_v42  ;;  %v9101_v39 = vld [vmem:[%s14973_s5 + $0x758] sm:$0xff]   ;;  %v9094_v42 = vld [vmem:[%s14973_s5 + $0x720] sm:$0xff]  }
 0x37c   : > { %13041 = vmatprep.subr.bf16.mxu0 %v17138_v0  ;;  %13065 = vmatprep.subr.bf16.mxu1 %v17138_v0 }
 0x383   : > { %13043 = vmatpush3.bf16.xpose.msra.mxu0 %v9063_v43  ;;  %13067 = vmatpush3.bf16.xpose.msra.mxu1 %v9071_v44  ;;  %v9102_v43 = vld [vmem:[%s14973_s5 + $0x760] sm:$0xff]   ;;  %v9095_v44 = vld [vmem:[%s14973_s5 + $0x728] sm:$0xff]  }
 0x384   : > { %13044 = vmatprep.subr.bf16.mxu0 %v17138_v0  ;;  %13068 = vmatprep.subr.bf16.mxu1 %v17138_v0 }
 0x38b   : > { %13046 = vmatpush3.bf16.xpose.msra.mxu0 %v9064_v45  ;;  %13070 = vmatpush3.bf16.xpose.msra.mxu1 %v9072_v46  ;;  %v9103_v45 = vld [vmem:[%s14973_s5 + $0x768] sm:$0xff]   ;;  %v9096_v46 = vld [vmem:[%s14973_s5 + $0x730] sm:$0xff]  }
 0x38c   : > { %13047 = vmatprep.subr.bf16.mxu0 %v17138_v0  ;;  %13071 = vmatprep.subr.bf16.mxu1 %v17138_v0 }
 0x393   : > { %13049 = vmatpush3.bf16.xpose.msra.mxu0 %v9065_v47  ;;  %13073 = vmatpush3.bf16.xpose.msra.mxu1 %v9073_v50  ;;  %v9104_v47 = vld [vmem:[%s14973_s5 + $0x770] sm:$0xff]   ;;  %v9097_v50 = vld [vmem:[%s14973_s5 + $0x738] sm:$0xff]  }
 0x394   : > { %13074 = vmatprep.subr.bf16.mxu0 %v17138_v0  ;;  %13098 = vmatprep.subr.bf16.mxu1 %v17138_v0 }
 0x39a   : > { %11083 = vmatmul.mubr.f32.vlgmr.msra.gmra.mrb[24].mxu0 %v15513_v51  ;;  %11118 = vmatmul.mubr.f32.vlgmr.msra.gmra.mrb[24].mxu1 %v15516_v52 }
 0x39b   : > { %13076 = vmatpush3.bf16.xpose.msra.mxu0 %v9074_v53  ;;  %13100 = vmatpush3.bf16.xpose.msra.mxu1 %v9082_v54  ;;  %v9105_v53 = vld [vmem:[%s14973_s5 + $0x778] sm:$0xff]  }
 0x39c   : > { %13077 = vmatprep.subr.bf16.mxu0 %v17138_v0  ;;  %13101 = vmatprep.subr.bf16.mxu1 %v17138_v0  ;;  %v234_v54 = vld [vmem:[%s14965_s24 + $0x1c] sm:$0x1] }
 0x39d   : > { %11152 = vmatprep.mubr.msk.f32.mxu0 %vm14790_vm0, %v17134_v1  ;;  %11187 = vmatprep.mubr.msk.f32.mxu1 %vm14790_vm0, %v17134_v1 }
 0x3a3   : > { %13079 = vmatpush3.bf16.xpose.msra.mxu0 %v9075_v55  ;;  %13103 = vmatpush3.bf16.xpose.msra.mxu1 %v9083_v56  ;;  %v235_v55 = vld [vmem:[%s14965_s24 + $0x1d] sm:$0x1]  ;;  %v9106_v56 = vld [vmem:[%s14973_s5 + $0x780] sm:$0xff]  }
 0x3a4   : > { %13080 = vmatprep.subr.bf16.mxu0 %v17138_v0  ;;  %13104 = vmatprep.subr.bf16.mxu1 %v17138_v0 }
 0x3ab   : > { %13082 = vmatpush3.bf16.xpose.msra.mxu0 %v9076_v57  ;;  %13106 = vmatpush3.bf16.xpose.msra.mxu1 %v9084_v58  ;;  %v9114_v57 = vld [vmem:[%s14973_s5 + $0x7c0] sm:$0xff]   ;;  %v9107_v58 = vld [vmem:[%s14973_s5 + $0x788] sm:$0xff]  }
 0x3ac   : > { %13083 = vmatprep.subr.bf16.mxu0 %v17138_v0  ;;  %13107 = vmatprep.subr.bf16.mxu1 %v17138_v0 }
 0x3ad   : > { %v15536_v59 = vpop.f32.mrb[18].mxu0  ;;  %v15538_v60 = vpop.f32.mrb[18].mxu1 }
 0x3ae   : > { %v10874_v61 = vpop.f32.mrb[19].mxu0  ;;  %v10909_v4 = vpop.f32.mrb[19].mxu1 }
 0x3af   : > { %v9115_v61 = vld [vmem:[%s14973_s5 + $0x7c8] sm:$0xff]   ;;  %v9108_v4 = vld [vmem:[%s14973_s5 + $0x790] sm:$0xff]  }
 0x3b3   : > { %13085 = vmatpush3.bf16.xpose.msra.mxu0 %v9077_v5  ;;  %13109 = vmatpush3.bf16.xpose.msra.mxu1 %v9085_v6  ;;  %v9116_v5 = vld [vmem:[%s14973_s5 + $0x7d0] sm:$0xff]  }
 0x3b4   : > { %13086 = vmatprep.subr.bf16.mxu0 %v17138_v0  ;;  %13110 = vmatprep.subr.bf16.mxu1 %v17138_v0 }
 0x3bb   : > { %13088 = vmatpush3.bf16.xpose.msra.mxu0 %v9078_v7  ;;  %13112 = vmatpush3.bf16.xpose.msra.mxu1 %v9086_v8 }
 0x3bc   : > { %13089 = vmatprep.subr.bf16.mxu0 %v17138_v0  ;;  %13113 = vmatprep.subr.bf16.mxu1 %v17138_v0 }
 0x3c3   : > { %13091 = vmatpush3.bf16.xpose.msra.mxu0 %v9079_v9  ;;  %13115 = vmatpush3.bf16.xpose.msra.mxu1 %v9087_v12  ;;  %v9109_v12 = vld [vmem:[%s14973_s5 + $0x798] sm:$0xff]  }
 0x3c4   : > { %13092 = vmatprep.subr.bf16.mxu0 %v17138_v0  ;;  %13116 = vmatprep.subr.bf16.mxu1 %v17138_v0 }
 0x3cb   : > { %13094 = vmatpush3.bf16.xpose.msra.mxu0 %v9080_v13  ;;  %13118 = vmatpush3.bf16.xpose.msra.mxu1 %v9088_v14  ;;  %v9117_v13 = vld [vmem:[%s14973_s5 + $0x7d8] sm:$0xff]   ;;  %v9110_v14 = vld [vmem:[%s14973_s5 + $0x7a0] sm:$0xff]  }
 0x3cc   : > { %13095 = vmatprep.subr.bf16.mxu0 %v17138_v0  ;;  %13119 = vmatprep.subr.bf16.mxu1 %v17138_v0 }
 0x3d3   : > { %13097 = vmatpush3.bf16.xpose.msra.mxu0 %v9081_v15  ;;  %13121 = vmatpush3.bf16.xpose.msra.mxu1 %v9089_v16  ;;  %v9118_v15 = vld [vmem:[%s14973_s5 + $0x7e0] sm:$0xff]   ;;  %v9111_v16 = vld [vmem:[%s14973_s5 + $0x7a8] sm:$0xff]  }
 0x3d4   : > { %13122 = vmatprep.subr.bf16.mxu0 %v17138_v0  ;;  %13146 = vmatprep.subr.bf16.mxu1 %v17138_v0 }
 0x3da   : > { %11153 = vmatmul.mubr.f32.vlgmr.msra.gmra.mrb[26].mxu0 %v15561_v17  ;;  %11188 = vmatmul.mubr.f32.vlgmr.msra.gmra.mrb[26].mxu1 %v233_v20  ;;  %v9119_v20 = vld [vmem:[%s14973_s5 + $0x7e8] sm:$0xff]  }
 0x3db   : > { %13124 = vmatpush3.bf16.xpose.msra.mxu0 %v9090_v21  ;;  %13148 = vmatpush3.bf16.xpose.msra.mxu1 %v9098_v22  ;;  %v9112_v21 = vld [vmem:[%s14973_s5 + $0x7b0] sm:$0xff]  }
 0x3dc   : > { %13125 = vmatprep.subr.bf16.mxu0 %v17138_v0  ;;  %13149 = vmatprep.subr.bf16.mxu1 %v17138_v0  ;;  %v9120_v22 = vld [vmem:[%s14973_s5 + $0x7f0] sm:$0xff]  }
 0x3dd   : > { %11222 = vmatprep.mubr.msk.f32.mxu0 %vm14790_vm0, %v17134_v1  ;;  %11257 = vmatprep.mubr.msk.f32.mxu1 %vm14790_vm0, %v17134_v1 }
 0x3e3   : > { %13127 = vmatpush3.bf16.xpose.msra.mxu0 %v9091_v23  ;;  %13151 = vmatpush3.bf16.xpose.msra.mxu1 %v9099_v26  ;;  %v14367_v23 = vld [vmem:[%s14965_s24 + $0x1] sm:$0x1] }
 0x3e4   : > { %13128 = vmatprep.subr.bf16.mxu0 %v17138_v0  ;;  %13152 = vmatprep.subr.bf16.mxu1 %v17138_v0  ;;  %v3503_v26 = vmul.f32 %v14367_v23, %v14367_v23 }
 0x3eb   : > { %13130 = vmatpush3.bf16.xpose.msra.mxu0 %v9092_v27  ;;  %13154 = vmatpush3.bf16.xpose.msra.mxu1 %v9100_v29  ;;  %v14368_v27 = vld [vmem:[%s14965_s24 + $0x9] sm:$0x1] }
 0x3ec   : > { %13131 = vmatprep.subr.bf16.mxu0 %v17138_v0  ;;  %13155 = vmatprep.subr.bf16.mxu1 %v17138_v0  ;;  %v3511_v29 = vmul.f32 %v14368_v27, %v14368_v27 }
 0x3ed   : > { %v15581_v30 = vpop.f32.mrb[20].mxu0  ;;  %v15583_v33 = vpop.f32.mrb[20].mxu1 }
 0x3ee   : > { %v10944_v34 = vpop.f32.mrb[21].mxu0  ;;  %v10979_v35 = vpop.f32.mrb[21].mxu1 }
 0x3ef   : > { %v3538_v34 = vsel %vm3534_vm1, %v3503_v26, 0.0  ;;  %v14369_v35 = vld [vmem:[%s14973_s5] sm:$0xff]  }
 0x3f0   : > { %3539 = vadd.xlane.f32.xlu0 %v3538_v34 }
 0x3f3   : > { %13133 = vmatpush3.bf16.xpose.msra.mxu0 %v9093_v38  ;;  %13157 = vmatpush3.bf16.xpose.msra.mxu1 %v9101_v39  ;;  %v7845_v38 = vunpack.c.l.bf16 %v14369_v35  ;;  %v7846_v39 = vunpack.c.h.bf16 %v14369_v35  ;;  %v14375_v35 = vld [vmem:[%s14973_s5 + $0x10] sm:$0xff]  }
 0x3f4   : > { %13134 = vmatprep.subr.bf16.mxu0 %v17138_v0  ;;  %13158 = vmatprep.subr.bf16.mxu1 %v17138_v0 }
 0x3fb   : > { %13136 = vmatpush3.bf16.xpose.msra.mxu0 %v9094_v42  ;;  %13160 = vmatpush3.bf16.xpose.msra.mxu1 %v9102_v43  ;;  %v14370_v42 = vld [vmem:[%s14973_s5 + $0x40] sm:$0xff]  }
 0x3fc   : > { %13137 = vmatprep.subr.bf16.mxu0 %v17138_v0  ;;  %13161 = vmatprep.subr.bf16.mxu1 %v17138_v0  ;;  %v7877_v43 = vunpack.c.l.bf16 %v14370_v42 }
 0x403   : > { %13139 = vmatpush3.bf16.xpose.msra.mxu0 %v9095_v44  ;;  %13163 = vmatpush3.bf16.xpose.msra.mxu1 %v9103_v45  ;;  %v7878_v44 = vunpack.c.h.bf16 %v14370_v42  ;;  %v3562_v45 = vsel %vm3534_vm1, %v3511_v29, 0.0  ;;  %v14374_v29 = vld [vmem:[%s14965_s24] sm:$0x1] }
 0x404   : > { %13140 = vmatprep.subr.bf16.mxu0 %v17138_v0  ;;  %13164 = vmatprep.subr.bf16.mxu1 %v17138_v0  ;;  %v3502_v34 = vmul.f32 %v14374_v29, %v14374_v29 }
 0x405   : > { %3563 = vadd.xlane.f32.xlu0 %v3562_v45 }
 0x40b   : > { %13142 = vmatpush3.bf16.xpose.msra.mxu0 %v9096_v46  ;;  %13166 = vmatpush3.bf16.xpose.msra.mxu1 %v9104_v47  ;;  %v9113_v46 = vld [vmem:[%s14973_s5 + $0x7b8] sm:$0xff]  }
 0x40c   : > { %13143 = vmatprep.subr.bf16.mxu0 %v17138_v0  ;;  %13167 = vmatprep.subr.bf16.mxu1 %v17138_v0  ;;  %v9121_v47 = vld [vmem:[%s14973_s5 + $0x7f8] sm:$0xff]  }
 0x413   : > { %13145 = vmatpush3.bf16.xpose.msra.mxu0 %v9097_v50  ;;  %13169 = vmatpush3.bf16.xpose.msra.mxu1 %v9105_v53  ;;  %v3855_v50 = vmul.f32 %v7845_v38, %v7845_v38  ;;  %v3856_v53 = vmul.f32 %v7846_v39, %v7846_v39  ;;  %v7853_v38 = vunpack.c.l.bf16 %v14375_v35  ;;  %v7854_v39 = vunpack.c.h.bf16 %v14375_v35 }
 0x414   : > { %13170 = vmatprep.subr.bf16.mxu0 %v17138_v0  ;;  %13194 = vmatprep.subr.bf16.mxu1 %v17138_v0 }
 0x41a   : > { %11223 = vmatmul.mubr.f32.vlgmr.msra.gmra.mrb[28].mxu0 %v234_v54  ;;  %11258 = vmatmul.mubr.f32.vlgmr.msra.gmra.mrb[28].mxu1 %v235_v55  ;;  %v3871_v54 = vmul.f32 %v7877_v43, %v7877_v43  ;;  %v3872_v55 = vmul.f32 %v7878_v44, %v7878_v44  ;;  %v14376_v43 = vld [vmem:[%s14973_s5 + $0x50] sm:$0xff]  }
 0x41b   : > { %13172 = vmatpush3.bf16.xpose.msra.mxu0 %v9106_v56  ;;  %13196 = vmatpush3.bf16.xpose.msra.mxu1 %v9114_v57  ;;  %v14371_v56 = vld [vmem:[%s14965_s24 + $0x2] sm:$0x1]  ;;  %v7885_v44 = vunpack.c.l.bf16 %v14376_v43  ;;  %v7886_v45 = vunpack.c.h.bf16 %v14376_v43 }
 0x41c   : > { %13173 = vmatprep.subr.bf16.mxu0 %v17138_v0  ;;  %13197 = vmatprep.subr.bf16.mxu1 %v17138_v0  ;;  %v3504_v57 = vmul.f32 %v14371_v56, %v14371_v56 }
 0x41d   : > { %11292 = vmatprep.mubr.msk.f32.mxu0 %vm14790_vm0, %v17134_v1  ;;  %11327 = vmatprep.mubr.msk.f32.mxu1 %vm14790_vm0, %v17134_v1 }
 0x423   : > { %13175 = vmatpush3.bf16.xpose.msra.mxu0 %v9107_v58  ;;  %13199 = vmatpush3.bf16.xpose.msra.mxu1 %v9115_v61  ;;  %v3541_v58 = vsel %vm3534_vm1, %v3504_v57, 0.0  ;;  %v14372_v61 = vld [vmem:[%s14973_s5 + $0x8] sm:$0xff]  }
 0x424   : > { %13176 = vmatprep.subr.bf16.mxu0 %v17138_v0  ;;  %13200 = vmatprep.subr.bf16.mxu1 %v17138_v0 }
 0x425   : > { %3542 = vadd.xlane.f32.xlu0 %v3541_v58 }
 0x42b   : > { %13178 = vmatpush3.bf16.xpose.msra.mxu0 %v9108_v4  ;;  %13202 = vmatpush3.bf16.xpose.msra.mxu1 %v9116_v5  ;;  %v7849_v4 = vunpack.c.l.bf16 %v14372_v61  ;;  %v7850_v5 = vunpack.c.h.bf16 %v14372_v61 }
 0x42c   : > { %13179 = vmatprep.subr.bf16.mxu0 %v17138_v0  ;;  %13203 = vmatprep.subr.bf16.mxu1 %v17138_v0 }
 0x42d   : > { %v15623_v6 = vpop.f32.mrb[22].mxu0  ;;  %v15625_v7 = vpop.f32.mrb[22].mxu1 }
 0x42e   : > { %17153 = vst [vmem:[#allocation11_spill] sm:$0xff] %v15623_v6  ;;  %17154 = vst [vmem:[#allocation12_spill] sm:$0xff] %v15625_v7  ;;  %v11014_v8 = vpop.f32.mrb[23].mxu0  ;;  %v11049_v9 = vpop.f32.mrb[23].mxu1 }
 0x42f   : > { %v14373_v8 = vld [vmem:[%s14973_s5 + $0x48] sm:$0xff]  }
 0x430   : > { %v7881_v9 = vunpack.c.l.bf16 %v14373_v8 }
 0x432   : > { %v3873_v23 = vmul.f32 %v7881_v9, %v7881_v9 }
 0x433   : > { %13181 = vmatpush3.bf16.xpose.msra.mxu0 %v9109_v12  ;;  %13205 = vmatpush3.bf16.xpose.msra.mxu1 %v9117_v13  ;;  %v13219_v12 = vpack.c.bf16 %v3856_v53, %v3855_v50  ;;  %v13243_v13 = vpack.c.bf16 %v3872_v55, %v3871_v54  ;;  %v3860_v50 = vmul.f32 %v7854_v39, %v7854_v39  ;;  %v14377_v55 = vld [vmem:[%s14973_s5 + $0x18] sm:$0xff]  }
 0x434   : > { %13182 = vmatprep.subr.bf16.mxu0 %v17138_v0  ;;  %13206 = vmatprep.subr.bf16.mxu1 %v17138_v0  ;;  %v3875_v53 = vmul.f32 %v7885_v44, %v7885_v44  ;;  %v3876_v54 = vmul.f32 %v7886_v45, %v7886_v45  ;;  %v7857_v56 = vunpack.c.l.bf16 %v14377_v55  ;;  %v7858_v57 = vunpack.c.h.bf16 %v14377_v55  ;;  %v14381_v44 = vld [vmem:[%s14973_s5 + $0x28] sm:$0xff]  }
 0x435   : > { %v7865_v45 = vunpack.c.l.bf16 %v14381_v44 }
 0x436   : > { %v13249_v61 = vpack.c.bf16 %v3876_v54, %v3875_v53  ;;  %v3861_v9 = vmul.f32 %v7857_v56, %v7857_v56  ;;  %v14382_v53 = vld [vmem:[%s14973_s5 + $0x68] sm:$0xff]  }
 0x437   : > { %v7897_v54 = vunpack.c.l.bf16 %v14382_v53  ;;  %v7898_v55 = vunpack.c.h.bf16 %v14382_v53  ;;  %v3865_v56 = vmul.f32 %v7865_v45, %v7865_v45  ;;  %v3527_v53 = vmul.f32 %v15516_v52, %v15516_v52 }
 0x43b   : > { %13184 = vmatpush3.bf16.xpose.msra.mxu0 %v9110_v14  ;;  %13208 = vmatpush3.bf16.xpose.msra.mxu1 %v9118_v15  ;;  %v7882_v14 = vunpack.c.h.bf16 %v14373_v8  ;;  %v236_v15 = vld [vmem:[%s14965_s24 + $0x1e] sm:$0x1] }
 0x43c   : > { %13185 = vmatprep.subr.bf16.mxu0 %v17138_v0  ;;  %13209 = vmatprep.subr.bf16.mxu1 %v17138_v0 }
 0x43d   : > { %v3874_v26 = vmul.f32 %v7882_v14, %v7882_v14 }
 0x43f   : > { %v13246_v42 = vpack.c.bf16 %v3874_v26, %v3873_v23 }
 0x443   : > { %13187 = vmatpush3.bf16.xpose.msra.mxu0 %v9111_v16  ;;  %13211 = vmatpush3.bf16.xpose.msra.mxu1 %v9119_v20  ;;  %v237_v16 = vld [vmem:[%s14965_s24 + $0x1f] sm:$0x1]  ;;  %v3520_v20 = vmul.f32 %v15384_v28, %v15384_v28 }
 0x444   : > { %13188 = vmatprep.subr.bf16.mxu0 %v17138_v0  ;;  %13212 = vmatprep.subr.bf16.mxu1 %v17138_v0 }
 0x445   : > { %v3589_v27 = vsel %vm3534_vm1, %v3520_v20, 0.0  ;;  %v14379_v20 = vld [vmem:[%s14973_s5 + $0x20] sm:$0xff]  }
 0x446   : > { %3590 = vadd.xlane.f32.xlu0 %v3589_v27 }
 0x44b   : > { %13190 = vmatpush3.bf16.xpose.msra.mxu0 %v9112_v21  ;;  %13214 = vmatpush3.bf16.xpose.msra.mxu1 %v9120_v22  ;;  %v3857_v21 = vmul.f32 %v7849_v4, %v7849_v4  ;;  %v3858_v22 = vmul.f32 %v7850_v5, %v7850_v5  ;;  %v14378_v4 = vld [vmem:[%s14973_s5 + $0x58] sm:$0xff]  }
 0x44c   : > { %13191 = vmatprep.subr.bf16.mxu0 %v17138_v0  ;;  %13215 = vmatprep.subr.bf16.mxu1 %v17138_v0  ;;  %v7889_v5 = vunpack.c.l.bf16 %v14378_v4  ;;  %v7890_v8 = vunpack.c.h.bf16 %v14378_v4  ;;  %v14383_v4 = vld [vmem:[%s14973_s5 + $0x30] sm:$0xff]  }
 0x44d   : > { %v13222_v28 = vpack.c.bf16 %v3858_v22, %v3857_v21  ;;  %v7861_v21 = vunpack.c.l.bf16 %v14379_v20  ;;  %v7862_v22 = vunpack.c.h.bf16 %v14379_v20 }
 0x44e   : > { %v3878_v14 = vmul.f32 %v7890_v8, %v7890_v8  ;;  %v7870_v8 = vunpack.c.h.bf16 %v14383_v4 }
 0x44f   : > { %v3864_v39 = vmul.f32 %v7862_v22, %v7862_v22 }
 0x450   : > { %v3868_v22 = vmul.f32 %v7870_v8, %v7870_v8 }
 0x453   : > { %13193 = vmatpush3.bf16.xpose.msra.mxu0 %v9113_v46  ;;  %13217 = vmatpush3.bf16.xpose.msra.mxu1 %v9121_v47  ;;  %v3535_v46 = vsel %vm3534_vm1, %v3502_v34, 0.0  ;;  %v3859_v47 = vmul.f32 %v7853_v38, %v7853_v38  ;;  %v14380_v34 = vld [vmem:[%s14973_s5 + $0x60] sm:$0xff]   ;;  %v3863_v38 = vmul.f32 %v7861_v21, %v7861_v21 }
 0x454   : > { %13218 = vmatprep.subr.bf16.mxu0 %v17138_v0  ;;  %13242 = vmatprep.subr.bf16.mxu1 %v17138_v0  ;;  %v7894_v35 = vunpack.c.h.bf16 %v14380_v34 }
 0x455   : > { %3536 = vadd.xlane.f32.xlu0 %v3535_v46  ;;  %v13225_v58 = vpack.c.bf16 %v3860_v50, %v3859_v47  ;;  %v7866_v46 = vunpack.c.h.bf16 %v14381_v44  ;;  %v13231_v47 = vpack.c.bf16 %v3864_v39, %v3863_v38 }
 0x456   : > { %v3880_v43 = vmul.f32 %v7894_v35, %v7894_v35 }
 0x45a   : > { %11293 = vmatmul.mubr.f32.vlgmr.msra.gmra.mrb[30].mxu0 %v236_v15  ;;  %11328 = vmatmul.mubr.f32.vlgmr.msra.gmra.mrb[30].mxu1 %v237_v16 }
 0x45b   : > { %13220 = vmatpush3.bf16.xpose.msra.mxu0 %v13219_v12  ;;  %13244 = vmatpush3.bf16.xpose.msra.mxu1 %v13243_v13  ;;  %v3862_v12 = vmul.f32 %v7858_v57, %v7858_v57  ;;  %v3877_v13 = vmul.f32 %v7889_v5, %v7889_v5  ;;  %v3866_v57 = vmul.f32 %v7866_v46, %v7866_v46  ;;  %v7869_v5 = vunpack.c.l.bf16 %v14383_v4  ;;  %v14389_v4 = vld [vmem:[%s14973_s5 + $0xc0] sm:$0xff]  }
 0x45c   : > { %13221 = vmatprep.subr.bf16.mxu0 %v17138_v0  ;;  %13245 = vmatprep.subr.bf16.mxu1 %v17138_v0  ;;  %v7942_v8 = vunpack.c.h.bf16 %v14389_v4 }
 0x45d   : > { %11362 = vmatprep.mubr.msk.f32.mxu0 %vm14790_vm0, %v17134_v1  ;;  %11397 = vmatprep.mubr.msk.f32.mxu1 %vm14790_vm0, %v17134_v1  ;;  %v13228_v27 = vpack.c.bf16 %v3862_v12, %v3861_v9  ;;  %v13252_v29 = vpack.c.bf16 %v3878_v14, %v3877_v13  ;;  %v13234_v9 = vpack.c.bf16 %v3866_v57, %v3865_v56  ;;  %v14384_v13 = vld [vmem:[%s14973_s5 + $0x70] sm:$0xff]   ;;  %v14388_v56 = vld [vmem:[%s14973_s5 + $0x80] sm:$0xff]  }
 0x45e   : > { %v7901_v14 = vunpack.c.l.bf16 %v14384_v13  ;;  %v7902_v20 = vunpack.c.h.bf16 %v14384_v13  ;;  %v3867_v21 = vmul.f32 %v7869_v5, %v7869_v5  ;;  %v7909_v57 = vunpack.c.l.bf16 %v14388_v56 }
 0x45f   : > { %v7941_v5 = vunpack.c.l.bf16 %v14389_v4 }
 0x460   : > { %v13237_v38 = vpack.c.bf16 %v3868_v22, %v3867_v21  ;;  %v3887_v52 = vmul.f32 %v7909_v57, %v7909_v57 }
 0x461   : > { %v3903_v13 = vmul.f32 %v7941_v5, %v7941_v5 }
 0x463   : > { %13223 = vmatpush3.bf16.xpose.msra.mxu0 %v13222_v28  ;;  %13247 = vmatpush3.bf16.xpose.msra.mxu1 %v13246_v42  ;;  %v7893_v28 = vunpack.c.l.bf16 %v14380_v34 }
 0x464   : > { %13224 = vmatprep.subr.bf16.mxu0 %v17138_v0  ;;  %13248 = vmatprep.subr.bf16.mxu1 %v17138_v0 }
 0x465   : > { %v3879_v42 = vmul.f32 %v7893_v28, %v7893_v28  ;;  %v14386_v28 = vld [vmem:[%s14973_s5 + $0x78] sm:$0xff]  }
 0x466   : > { %v7905_v35 = vunpack.c.l.bf16 %v14386_v28 }
 0x467   : > { %v13255_v50 = vpack.c.bf16 %v3880_v43, %v3879_v42  ;;  %v7906_v42 = vunpack.c.h.bf16 %v14386_v28 }
 0x468   : > { %v3885_v45 = vmul.f32 %v7905_v35, %v7905_v35 }
 0x469   : > { %v3886_v46 = vmul.f32 %v7906_v42, %v7906_v42 }
 0x46b   : > { %13226 = vmatpush3.bf16.xpose.msra.mxu0 %v13225_v58  ;;  %13250 = vmatpush3.bf16.xpose.msra.mxu1 %v13249_v61  ;;  %v3881_v58 = vmul.f32 %v7897_v54, %v7897_v54  ;;  %v3882_v61 = vmul.f32 %v7898_v55, %v7898_v55 }
 0x46c   : > { %13227 = vmatprep.subr.bf16.mxu0 %v17138_v0  ;;  %13251 = vmatprep.subr.bf16.mxu1 %v17138_v0 }
 0x46d   : > { %v15678_v15 = vpop.f32.mrb[24].mxu0  ;;  %v15680_v16 = vpop.f32.mrb[24].mxu1  ;;  %v13258_v12 = vpack.c.bf16 %v3882_v61, %v3881_v58  ;;  %v7910_v58 = vunpack.c.h.bf16 %v14388_v56  ;;  %v13264_v61 = vpack.c.bf16 %v3886_v46, %v3885_v45  ;;  %v14395_v56 = vld [vmem:[%s14973_s5 + $0xd0] sm:$0xff]  }
 0x46e   : > { %17155 = vst [vmem:[#allocation13_spill] sm:$0xff] %v15678_v15  ;;  %17156 = vst [vmem:[#allocation14_spill] sm:$0xff] %v15680_v16  ;;  %v11084_v23 = vpop.f32.mrb[25].mxu0  ;;  %v11119_v26 = vpop.f32.mrb[25].mxu1  ;;  %v7949_v57 = vunpack.c.l.bf16 %v14395_v56 }
 0x46f   : > { %v3883_v23 = vmul.f32 %v7901_v14, %v7901_v14  ;;  %v3884_v26 = vmul.f32 %v7902_v20, %v7902_v20  ;;  %v3904_v14 = vmul.f32 %v7942_v8, %v7942_v8  ;;  %v14390_v20 = vld [vmem:[%s14965_s24 + $0xa] sm:$0x1] }
 0x470   : > { %v3512_v21 = vmul.f32 %v14390_v20, %v14390_v20 }
 0x471   : > { %v13261_v39 = vpack.c.bf16 %v3884_v26, %v3883_v23  ;;  %v14391_v23 = vld [vmem:[%s14973_s5 + $0x88] sm:$0xff]  }
 0x472   : > { %v3565_v22 = vsel %vm3534_vm1, %v3512_v21, 0.0  ;;  %v7913_v26 = vunpack.c.l.bf16 %v14391_v23  ;;  %v14397_v21 = vld [vmem:[%s14973_s5 + $0xd8] sm:$0xff]  }
 0x473   : > { %13229 = vmatpush3.bf16.xpose.msra.mxu0 %v13228_v27  ;;  %13253 = vmatpush3.bf16.xpose.msra.mxu1 %v13252_v29  ;;  %v14385_v27 = vld [vmem:[%s14973_s5 + $0x38] sm:$0xff]  }
 0x474   : > { %13230 = vmatprep.subr.bf16.mxu0 %v17138_v0  ;;  %13254 = vmatprep.subr.bf16.mxu1 %v17138_v0  ;;  %v7873_v29 = vunpack.c.l.bf16 %v14385_v27  ;;  %v7874_v34 = vunpack.c.h.bf16 %v14385_v27  ;;  %v7914_v27 = vunpack.c.h.bf16 %v14391_v23  ;;  %v3889_v42 = vmul.f32 %v7913_v26, %v7913_v26 }
 0x475   : > { %v7954_v23 = vunpack.c.h.bf16 %v14397_v21 }
 0x476   : > { %v3869_v43 = vmul.f32 %v7873_v29, %v7873_v29  ;;  %v3870_v44 = vmul.f32 %v7874_v34, %v7874_v34  ;;  %v14392_v29 = vld [vmem:[%s14973_s5 + $0xc8] sm:$0xff]  }
 0x477   : > { %v7945_v34 = vunpack.c.l.bf16 %v14392_v29  ;;  %v7946_v28 = vunpack.c.h.bf16 %v14392_v29 }
 0x478   : > { %v13240_v55 = vpack.c.bf16 %v3870_v44, %v3869_v43  ;;  %v3890_v43 = vmul.f32 %v7914_v27, %v7914_v27  ;;  %v17136_v44 = vmov 1.0  }
 0x479   : > { %v3905_v45 = vmul.f32 %v7945_v34, %v7945_v34  ;;  %v3906_v46 = vmul.f32 %v7946_v28, %v7946_v28 }
 0x47b   : > { %13232 = vmatpush3.bf16.xpose.msra.mxu0 %v13231_v47  ;;  %13256 = vmatpush3.bf16.xpose.msra.mxu1 %v13255_v50  ;;  %v14387_v47 = vld [vmem:[%s14965_s24 + $0x11] sm:$0x1]  ;;  %v13294_v4 = vpack.c.bf16 %v3906_v46, %v3905_v45 }
 0x47c   : > { %13233 = vmatprep.subr.bf16.mxu0 %v17138_v0  ;;  %13257 = vmatprep.subr.bf16.mxu1 %v17138_v0  ;;  %v3519_v50 = vmul.f32 %v14387_v47, %v14387_v47 }
 0x47e   : > { %v3586_v54 = vsel %vm3534_vm1, %v3519_v50, 0.0  ;;  %v14393_v50 = vld [vmem:[%s14965_s24 + $0x3] sm:$0x1] }
 0x47f   : > { %3587 = vadd.xlane.f32.xlu1 %v3586_v54 }
 0x483   : > { %13235 = vmatpush3.bf16.xpose.msra.mxu0 %v13234_v9  ;;  %13259 = vmatpush3.bf16.xpose.msra.mxu1 %v13258_v12  ;;  %v3610_v9 = vsel %vm3534_vm1, %v3527_v53, 0.0  ;;  %v3888_v12 = vmul.f32 %v7910_v58, %v7910_v58  ;;  %v3505_v53 = vmul.f32 %v14393_v50, %v14393_v50  ;;  %v7950_v58 = vunpack.c.h.bf16 %v14395_v56  ;;  %v14399_v50 = vld [vmem:[%s14973_s5 + $0xe0] sm:$0xff]  }
 0x484   : > { %13236 = vmatprep.subr.bf16.mxu0 %v17138_v0  ;;  %13260 = vmatprep.subr.bf16.mxu1 %v17138_v0 }
 0x485   : > { %3611 = vadd.xlane.f32.xlu1 %v3610_v9  ;;  %v13267_v35 = vpack.c.bf16 %v3888_v12, %v3887_v52  ;;  %v3544_v5 = vsel %vm3534_vm1, %v3505_v53, 0.0  ;;  %v3907_v52 = vmul.f32 %v7949_v57, %v7949_v57  ;;  %v3908_v12 = vmul.f32 %v7950_v58, %v7950_v58 }
 0x486   : > { %v7957_v53 = vunpack.c.l.bf16 %v14399_v50 }
 0x487   : > { %v13297_v27 = vpack.c.bf16 %v3908_v12, %v3907_v52 }
 0x488   : > { %v3911_v58 = vmul.f32 %v7957_v53, %v7957_v53  ;;  %v14404_v53 = vld [vmem:[%s14965_s24 + $0x8] sm:$0x1] }
 0x489   : > { %3566 = vadd.xlane.f32.xlu1 %v3565_v22  ;;  %v7953_v22 = vunpack.c.l.bf16 %v14397_v21 }
 0x48b   : > { %13238 = vmatpush3.bf16.xpose.msra.mxu0 %v13237_v38  ;;  %13262 = vmatpush3.bf16.xpose.msra.mxu1 %v13261_v39  ;;  %v13291_v38 = vpack.c.bf16 %v3904_v14, %v3903_v13  ;;  %v3528_v39 = vmul.f32 %v15561_v17, %v15561_v17  ;;  %v14394_v17 = vld [vmem:[%s14973_s5 + $0x90] sm:$0xff]   ;;  %v14396_v13 = vld [vmem:[%s14973_s5 + $0x98] sm:$0xff]   ;;  %v3909_v28 = vmul.f32 %v7953_v22, %v7953_v22 }
 0x48c   : > { %13239 = vmatprep.subr.bf16.mxu0 %v17138_v0  ;;  %13263 = vmatprep.subr.bf16.mxu1 %v17138_v0  ;;  %v7917_v54 = vunpack.c.l.bf16 %v14394_v17  ;;  %v7921_v14 = vunpack.c.l.bf16 %v14396_v13  ;;  %v7922_v20 = vunpack.c.h.bf16 %v14396_v13 }
 0x48d   : > { %v3613_v47 = vsel %vm3534_vm1, %v3528_v39, 0.0 }
 0x48e   : > { %3614 = vadd.xlane.f32.xlu1 %v3613_v47  ;;  %v3891_v8 = vmul.f32 %v7917_v54, %v7917_v54  ;;  %v3893_v29 = vmul.f32 %v7921_v14, %v7921_v14  ;;  %v3894_v34 = vmul.f32 %v7922_v20, %v7922_v20 }
 0x490   : > { %v13276_v54 = vpack.c.bf16 %v3894_v34, %v3893_v29  ;;  %v14403_v34 = vld [vmem:[%s14973_s5 + $0xf0] sm:$0xff]  }
 0x492   : > { %3545 = vadd.xlane.f32.xlu1 %v3544_v5 }
 0x493   : > { %13241 = vmatpush3.bf16.xpose.msra.mxu0 %v13240_v55  ;;  %13265 = vmatpush3.bf16.xpose.msra.mxu1 %v13264_v61  ;;  %v7918_v55 = vunpack.c.h.bf16 %v14394_v17  ;;  %v13270_v61 = vpack.c.bf16 %v3890_v43, %v3889_v42  ;;  %v14398_v42 = vld [vmem:[%s14973_s5 + $0xa0] sm:$0xff]   ;;  %v7958_v17 = vunpack.c.h.bf16 %v14399_v50 }
 0x494   : > { %13266 = vmatprep.subr.bf16.mxu0 %v17138_v0  ;;  %13290 = vmatprep.subr.bf16.mxu1 %v17138_v0  ;;  %v7925_v43 = vunpack.c.l.bf16 %v14398_v42  ;;  %v7926_v45 = vunpack.c.h.bf16 %v14398_v42 }
 0x495   : > { %v3892_v9 = vmul.f32 %v7918_v55, %v7918_v55 }
 0x496   : > { %v3895_v56 = vmul.f32 %v7925_v43, %v7925_v43  ;;  %v3896_v57 = vmul.f32 %v7926_v45, %v7926_v45 }
 0x497   : > { %v13273_v26 = vpack.c.bf16 %v3892_v9, %v3891_v8  ;;  %v14401_v9 = vld [vmem:[%s14973_s5 + $0xe8] sm:$0xff]  }
 0x498   : > { %v7961_v52 = vunpack.c.l.bf16 %v14401_v9  ;;  %v7962_v12 = vunpack.c.h.bf16 %v14401_v9  ;;  %v13279_v13 = vpack.c.bf16 %v3896_v57, %v3895_v56 }
 0x49a   : > { %11363 = vmatmul.mubr.f32.vlgmr.msra.gmra.mrb[32].mxu0 %v17136_v44  ;;  %11398 = vmatmul.mubr.f32.vlgmr.msra.gmra.mrb[32].mxu1 %v17136_v44  ;;  %v3913_v22 = vmul.f32 %v7961_v52, %v7961_v52 }
 0x49b   : > { %13268 = vmatpush3.bf16.xpose.msra.mxu0 %v13267_v35  ;;  %13292 = vmatpush3.bf16.xpose.msra.mxu1 %v13291_v38  ;;  %v3910_v35 = vmul.f32 %v7954_v23, %v7954_v23  ;;  %v3914_v23 = vmul.f32 %v7962_v12, %v7962_v12 }
 0x49c   : > { %13269 = vmatprep.subr.bf16.mxu0 %v17138_v0  ;;  %13293 = vmatprep.subr.bf16.mxu1 %v17138_v0 }
 0x49d   : > { %11432 = vmatprep.mubr.msk.f32.mxu0 %vm14790_vm0, %v17134_v1  ;;  %11467 = vmatprep.mubr.msk.f32.mxu1 %vm14790_vm0, %v17134_v1  ;;  %v13300_v55 = vpack.c.bf16 %v3910_v35, %v3909_v28  ;;  %v7965_v28 = vunpack.c.l.bf16 %v14403_v34  ;;  %v7966_v35 = vunpack.c.h.bf16 %v14403_v34  ;;  %v13306_v43 = vpack.c.bf16 %v3914_v23, %v3913_v22  ;;  %v14408_v23 = vld [vmem:[%s14973_s5 + $0x100] sm:$0xff]  }
 0x49f   : > { %v3916_v50 = vmul.f32 %v7966_v35, %v7966_v35 }
 0x4a3   : > { %13271 = vmatpush3.bf16.xpose.msra.mxu0 %v13270_v61  ;;  %13295 = vmatpush3.bf16.xpose.msra.mxu1 %v13294_v4  ;;  %v3912_v61 = vmul.f32 %v7958_v17, %v7958_v17  ;;  %v14400_v4 = vld [vmem:[%s14973_s5 + $0xa8] sm:$0xff]   ;;  %v3510_v17 = vmul.f32 %v14404_v53, %v14404_v53 }
 0x4a4   : > { %13272 = vmatprep.subr.bf16.mxu0 %v17138_v0  ;;  %13296 = vmatprep.subr.bf16.mxu1 %v17138_v0  ;;  %v7929_v5 = vunpack.c.l.bf16 %v14400_v4  ;;  %v7930_v8 = vunpack.c.h.bf16 %v14400_v4 }
 0x4a5   : > { %v13303_v14 = vpack.c.bf16 %v3912_v61, %v3911_v58  ;;  %v3559_v57 = vsel %vm3534_vm1, %v3510_v17, 0.0  ;;  %v14406_v58 = vld [vmem:[%s14973_s5 + $0xf8] sm:$0xff]  }
 0x4a6   : > { %v3897_v20 = vmul.f32 %v7929_v5, %v7929_v5  ;;  %v3898_v21 = vmul.f32 %v7930_v8, %v7930_v8  ;;  %v7969_v61 = vunpack.c.l.bf16 %v14406_v58  ;;  %v7970_v4 = vunpack.c.h.bf16 %v14406_v58  ;;  %3560 = vadd.xlane.f32.xlu0 %v3559_v57  ;;  %v14412_v57 = vld [vmem:[%s14973_s5 + $0x148] sm:$0xff]  }
 0x4a7   : > { %v8009_v58 = vunpack.c.l.bf16 %v14412_v57 }
 0x4a8   : > { %v13282_v42 = vpack.c.bf16 %v3898_v21, %v3897_v20  ;;  %v3917_v12 = vmul.f32 %v7969_v61, %v7969_v61  ;;  %v3526_v21 = vmul.f32 %v15513_v51, %v15513_v51  ;;  %v8010_v61 = vunpack.c.h.bf16 %v14412_v57 }
 0x4ab   : > { %13274 = vmatpush3.bf16.xpose.msra.mxu0 %v13273_v26  ;;  %13298 = vmatpush3.bf16.xpose.msra.mxu1 %v13297_v27  ;;  %v14402_v26 = vld [vmem:[%s14973_s5 + $0xb0] sm:$0xff]  }
 0x4ac   : > { %13275 = vmatprep.subr.bf16.mxu0 %v17138_v0  ;;  %13299 = vmatprep.subr.bf16.mxu1 %v17138_v0  ;;  %v7933_v27 = vunpack.c.l.bf16 %v14402_v26  ;;  %v7934_v29 = vunpack.c.h.bf16 %v14402_v26  ;;  %v7973_v26 = vunpack.c.l.bf16 %v14408_v23 }
 0x4ad   : > { %v15732_v38 = vpop.f32.mrb[26].mxu0  ;;  %v15734_v39 = vpop.f32.mrb[26].mxu1 }
 0x4ae   : > { %17157 = vst [vmem:[#allocation15_spill] sm:$0xff] %v15732_v38  ;;  %17158 = vst [vmem:[#allocation16_spill] sm:$0xff] %v15734_v39  ;;  %v11154_v46 = vpop.f32.mrb[27].mxu0  ;;  %v11189_v47 = vpop.f32.mrb[27].mxu1  ;;  %v3899_v45 = vmul.f32 %v7933_v27, %v7933_v27  ;;  %v7974_v27 = vunpack.c.h.bf16 %v14408_v23  ;;  %v14415_v23 = vld [vmem:[%s14973_s5 + $0x110] sm:$0xff]  }
 0x4af   : > { %v3900_v46 = vmul.f32 %v7934_v29, %v7934_v29  ;;  %v3915_v47 = vmul.f32 %v7965_v28, %v7965_v28  ;;  %v14409_v29 = vld [vmem:[%s14973_s5 + $0x140] sm:$0xff]  }
 0x4b0   : > { %v8005_v34 = vunpack.c.l.bf16 %v14409_v29  ;;  %v8006_v28 = vunpack.c.h.bf16 %v14409_v29  ;;  %v14416_v29 = vld [vmem:[%s14973_s5 + $0x150] sm:$0xff]  }
 0x4b1   : > { %v13285_v5 = vpack.c.bf16 %v3900_v46, %v3899_v45  ;;  %v13309_v8 = vpack.c.bf16 %v3916_v50, %v3915_v47  ;;  %v3919_v45 = vmul.f32 %v7973_v26, %v7973_v26  ;;  %v3920_v46 = vmul.f32 %v7974_v27, %v7974_v27  ;;  %v14410_v50 = vld [vmem:[%s14965_s24 + $0x4] sm:$0x1] }
 0x4b2   : > { %v3935_v51 = vmul.f32 %v8005_v34, %v8005_v34  ;;  %v3936_v47 = vmul.f32 %v8006_v28, %v8006_v28  ;;  %v3506_v53 = vmul.f32 %v14410_v50, %v14410_v50  ;;  %v7981_v26 = vunpack.c.l.bf16 %v14415_v23  ;;  %v14417_v50 = vld [vmem:[%s14973_s5 + $0x118] sm:$0xff]  }
 0x4b3   : > { %13277 = vmatpush3.bf16.xpose.msra.mxu0 %v13276_v54  ;;  %13301 = vmatpush3.bf16.xpose.msra.mxu1 %v13300_v55  ;;  %v14405_v54 = vld [vmem:[%s14973_s5 + $0xb8] sm:$0xff]   ;;  %v7982_v27 = vunpack.c.h.bf16 %v14415_v23  ;;  %v8013_v34 = vunpack.c.l.bf16 %v14416_v29  ;;  %v8014_v28 = vunpack.c.h.bf16 %v14416_v29 }
 0x4b4   : > { %13278 = vmatprep.subr.bf16.mxu0 %v17138_v0  ;;  %13302 = vmatprep.subr.bf16.mxu1 %v17138_v0  ;;  %v7937_v55 = vunpack.c.l.bf16 %v14405_v54  ;;  %v7938_v56 = vunpack.c.h.bf16 %v14405_v54  ;;  %v3547_v17 = vsel %vm3534_vm1, %v3506_v53, 0.0  ;;  %v14411_v54 = vld [vmem:[%s14973_s5 + $0x108] sm:$0xff]   ;;  %v7985_v53 = vunpack.c.l.bf16 %v14417_v50 }
 0x4b6   : > { %v3901_v9 = vmul.f32 %v7937_v55, %v7937_v55  ;;  %v3902_v52 = vmul.f32 %v7938_v56, %v7938_v56  ;;  %v7977_v55 = vunpack.c.l.bf16 %v14411_v54  ;;  %v7978_v56 = vunpack.c.h.bf16 %v14411_v54  ;;  %v14418_v54 = vld [vmem:[%s14973_s5 + $0x158] sm:$0xff]  }
 0x4b8   : > { %v13288_v35 = vpack.c.bf16 %v3902_v52, %v3901_v9  ;;  %v3921_v52 = vmul.f32 %v7977_v55, %v7977_v55  ;;  %v8017_v55 = vunpack.c.l.bf16 %v14418_v54 }
 0x4bb   : > { %13280 = vmatpush3.bf16.xpose.msra.mxu0 %v13279_v13  ;;  %13304 = vmatpush3.bf16.xpose.msra.mxu1 %v13303_v14  ;;  %v3918_v13 = vmul.f32 %v7970_v4, %v7970_v4  ;;  %v14407_v14 = vld [vmem:[%s14965_s24 + $0x10] sm:$0x1]  ;;  %v13315_v4 = vpack.c.bf16 %v3920_v46, %v3919_v45  ;;  %v3923_v45 = vmul.f32 %v7981_v26, %v7981_v26 }
 0x4bc   : > { %13281 = vmatprep.subr.bf16.mxu0 %v17138_v0  ;;  %13305 = vmatprep.subr.bf16.mxu1 %v17138_v0  ;;  %v3518_v20 = vmul.f32 %v14407_v14, %v14407_v14  ;;  %v3938_v14 = vmul.f32 %v8010_v61, %v8010_v61  ;;  %v3924_v46 = vmul.f32 %v7982_v27, %v7982_v27 }
 0x4bd   : > { %v3925_v61 = vmul.f32 %v7985_v53, %v7985_v53 }
 0x4be   : > { %v3583_v22 = vsel %vm3534_vm1, %v3518_v20, 0.0  ;;  %v13321_v57 = vpack.c.bf16 %v3924_v46, %v3923_v45 }
 0x4bf   : > { %3584 = vadd.xlane.f32.xlu0 %v3583_v22 }
 0x4c3   : > { %13283 = vmatpush3.bf16.xpose.msra.mxu0 %v13282_v42  ;;  %13307 = vmatpush3.bf16.xpose.msra.mxu1 %v13306_v43  ;;  %v13312_v42 = vpack.c.bf16 %v3918_v13, %v3917_v12  ;;  %v3607_v43 = vsel %vm3534_vm1, %v3526_v21, 0.0  ;;  %v3922_v12 = vmul.f32 %v7978_v56, %v7978_v56  ;;  %v3937_v13 = vmul.f32 %v8009_v58, %v8009_v58  ;;  %v14414_v21 = vld [vmem:[%s14965_s24 + $0x5] sm:$0x1] }
 0x4c4   : > { %13284 = vmatprep.subr.bf16.mxu0 %v17138_v0  ;;  %13308 = vmatprep.subr.bf16.mxu1 %v17138_v0  ;;  %v3507_v22 = vmul.f32 %v14414_v21, %v14414_v21  ;;  %v8018_v56 = vunpack.c.h.bf16 %v14418_v54 }
 0x4c5   : > { %3608 = vadd.xlane.f32.xlu0 %v3607_v43 }
 0x4c6   : > { %v3550_v43 = vsel %vm3534_vm1, %v3507_v22, 0.0  ;;  %v14420_v22 = vld [vmem:[%s14973_s5 + $0x160] sm:$0xff]  }
 0x4c7   : > { %v8021_v23 = vunpack.c.l.bf16 %v14420_v22  ;;  %v8022_v26 = vunpack.c.h.bf16 %v14420_v22 }
 0x4c9   : > { %3548 = vadd.xlane.f32.xlu0 %v3547_v17  ;;  %v7986_v17 = vunpack.c.h.bf16 %v14417_v50 }
 0x4cb   : > { %13286 = vmatpush3.bf16.xpose.msra.mxu0 %v13285_v5  ;;  %13310 = vmatpush3.bf16.xpose.msra.mxu1 %v13309_v8  ;;  %v13339_v5 = vpack.c.bf16 %v3936_v47, %v3935_v51  ;;  %v14413_v8 = vld [vmem:[%s14965_s24 + $0x14] sm:$0x1]  ;;  %v3939_v51 = vmul.f32 %v8013_v34, %v8013_v34  ;;  %v3940_v47 = vmul.f32 %v8014_v28, %v8014_v28 }
 0x4cc   : > { %13287 = vmatprep.subr.bf16.mxu0 %v17138_v0  ;;  %13311 = vmatprep.subr.bf16.mxu1 %v17138_v0  ;;  %v3522_v9 = vmul.f32 %v14413_v8, %v14413_v8  ;;  %v3942_v8 = vmul.f32 %v8018_v56, %v8018_v56 }
 0x4cd   : > { %v13345_v58 = vpack.c.bf16 %v3940_v47, %v3939_v51  ;;  %v14422_v51 = vld [vmem:[%s14973_s5 + $0x168] sm:$0xff]  }
 0x4ce   : > { %v3595_v20 = vsel %vm3534_vm1, %v3522_v9, 0.0  ;;  %v8025_v47 = vunpack.c.l.bf16 %v14422_v51  ;;  %v8026_v50 = vunpack.c.h.bf16 %v14422_v51 }
 0x4cf   : > { %3596 = vadd.xlane.f32.xlu0 %v3595_v20 }
 0x4d0   : > { %v3945_v56 = vmul.f32 %v8025_v47, %v8025_v47 }
 0x4d3   : > { %13289 = vmatpush3.bf16.xpose.msra.mxu0 %v13288_v35  ;;  %13313 = vmatpush3.bf16.xpose.msra.mxu1 %v13312_v42  ;;  %v13318_v35 = vpack.c.bf16 %v3922_v12, %v3921_v52  ;;  %v13342_v42 = vpack.c.bf16 %v3938_v14, %v3937_v13  ;;  %v14419_v12 = vld [vmem:[%s14973_s5 + $0x120] sm:$0xff]  }
 0x4d4   : > { %13314 = vmatprep.subr.bf16.mxu0 %v17138_v0  ;;  %13338 = vmatprep.subr.bf16.mxu1 %v17138_v0  ;;  %v7989_v13 = vunpack.c.l.bf16 %v14419_v12  ;;  %v7990_v14 = vunpack.c.h.bf16 %v14419_v12 }
 0x4d5   : > { %3551 = vadd.xlane.f32.xlu0 %v3550_v43  ;;  %v14421_v43 = vld [vmem:[%s14973_s5 + $0x128] sm:$0xff]  }
 0x4d6   : > { %v3927_v34 = vmul.f32 %v7989_v13, %v7989_v13  ;;  %v3928_v28 = vmul.f32 %v7990_v14, %v7990_v14  ;;  %v7993_v45 = vunpack.c.l.bf16 %v14421_v43  ;;  %v7994_v46 = vunpack.c.h.bf16 %v14421_v43 }
 0x4d8   : > { %v13327_v53 = vpack.c.bf16 %v3928_v28, %v3927_v34  ;;  %v3929_v54 = vmul.f32 %v7993_v45, %v7993_v45  ;;  %v14426_v34 = vld [vmem:[%s14973_s5 + $0x178] sm:$0xff]  }
 0x4d9   : > { %v8033_v28 = vunpack.c.l.bf16 %v14426_v34 }
 0x4da   : > { %11433 = vmatmul.mubr.f32.vlgmr.msra.gmra.mrb[34].mxu0 %v17136_v44  ;;  %11468 = vmatmul.mubr.f32.vlgmr.msra.gmra.mrb[34].mxu1 %v17136_v44 }
 0x4db   : > { %13316 = vmatpush3.bf16.xpose.msra.mxu0 %v13315_v4  ;;  %13340 = vmatpush3.bf16.xpose.msra.mxu1 %v13339_v5  ;;  %v3926_v4 = vmul.f32 %v7986_v17, %v7986_v17  ;;  %v3941_v5 = vmul.f32 %v8017_v55, %v8017_v55  ;;  %v3930_v55 = vmul.f32 %v7994_v46, %v7994_v46 }
 0x4dc   : > { %13317 = vmatprep.subr.bf16.mxu0 %v17138_v0  ;;  %13341 = vmatprep.subr.bf16.mxu1 %v17138_v0  ;;  %v3949_v51 = vmul.f32 %v8033_v28, %v8033_v28 }
 0x4dd   : > { %11502 = vmatprep.mubr.msk.f32.mxu0 %vm14790_vm0, %v17134_v1  ;;  %11537 = vmatprep.mubr.msk.f32.mxu1 %vm14790_vm0, %v17134_v1  ;;  %v13324_v27 = vpack.c.bf16 %v3926_v4, %v3925_v61  ;;  %v13348_v29 = vpack.c.bf16 %v3942_v8, %v3941_v5  ;;  %v14424_v5 = vld [vmem:[%s14973_s5 + $0x170] sm:$0xff]   ;;  %v13330_v13 = vpack.c.bf16 %v3930_v55, %v3929_v54 }
 0x4de   : > { %v8029_v8 = vunpack.c.l.bf16 %v14424_v5  ;;  %v8030_v12 = vunpack.c.h.bf16 %v14424_v5 }
 0x4e0   : > { %v3947_v22 = vmul.f32 %v8029_v8, %v8029_v8 }
 0x4e3   : > { %13319 = vmatpush3.bf16.xpose.msra.mxu0 %v13318_v35  ;;  %13343 = vmatpush3.bf16.xpose.msra.mxu1 %v13342_v42  ;;  %v3943_v35 = vmul.f32 %v8021_v23, %v8021_v23  ;;  %v3944_v42 = vmul.f32 %v8022_v26, %v8022_v26  ;;  %v3948_v23 = vmul.f32 %v8030_v12, %v8030_v12  ;;  %v14425_v26 = vld [vmem:[%s14973_s5 + $0x138] sm:$0xff]  }
 0x4e4   : > { %13320 = vmatprep.subr.bf16.mxu0 %v17138_v0  ;;  %13344 = vmatprep.subr.bf16.mxu1 %v17138_v0 }
 0x4e5   : > { %v13351_v17 = vpack.c.bf16 %v3944_v42, %v3943_v35  ;;  %v8034_v35 = vunpack.c.h.bf16 %v14426_v34  ;;  %v13357_v43 = vpack.c.bf16 %v3948_v23, %v3947_v22  ;;  %v14431_v23 = vld [vmem:[%s14973_s5 + $0x188] sm:$0xff]  }
 0x4e7   : > { %v3950_v47 = vmul.f32 %v8034_v35, %v8034_v35 }
 0x4e9   : > { %v13360_v5 = vpack.c.bf16 %v3950_v47, %v3949_v51 }
 0x4eb   : > { %13322 = vmatpush3.bf16.xpose.msra.mxu0 %v13321_v57  ;;  %13346 = vmatpush3.bf16.xpose.msra.mxu1 %v13345_v58  ;;  %v3946_v57 = vmul.f32 %v8026_v50, %v8026_v50  ;;  %v14423_v58 = vld [vmem:[%s14973_s5 + $0x130] sm:$0xff]  }
 0x4ec   : > { %13323 = vmatprep.subr.bf16.mxu0 %v17138_v0  ;;  %13347 = vmatprep.subr.bf16.mxu1 %v17138_v0  ;;  %v7997_v61 = vunpack.c.l.bf16 %v14423_v58  ;;  %v7998_v4 = vunpack.c.h.bf16 %v14423_v58  ;;  %v14427_v50 = vld [vmem:[%s14965_s24 + $0x15] sm:$0x1] }
 0x4ed   : > { %v15787_v9 = vpop.f32.mrb[28].mxu0  ;;  %v15789_v52 = vpop.f32.mrb[28].mxu1  ;;  %v13354_v14 = vpack.c.bf16 %v3946_v57, %v3945_v56  ;;  %v14429_v57 = vld [vmem:[%s14973_s5 + $0x1c0] sm:$0xff]  }
 0x4ee   : > { %17159 = vst [vmem:[#allocation17_spill] sm:$0xff] %v15787_v9  ;;  %17160 = vst [vmem:[#allocation18_spill] sm:$0xff] %v15789_v52  ;;  %v11224_v20 = vpop.f32.mrb[29].mxu0  ;;  %v11259_v21 = vpop.f32.mrb[29].mxu1  ;;  %v8069_v58 = vunpack.c.l.bf16 %v14429_v57 }
 0x4ef   : > { %v3931_v20 = vmul.f32 %v7997_v61, %v7997_v61  ;;  %v3932_v21 = vmul.f32 %v7998_v4, %v7998_v4  ;;  %v8070_v61 = vunpack.c.h.bf16 %v14429_v57 }
 0x4f1   : > { %v13333_v42 = vpack.c.bf16 %v3932_v21, %v3931_v20  ;;  %v14430_v20 = vld [vmem:[%s14965_s24 + $0x6] sm:$0x1] }
 0x4f2   : > { %v3508_v21 = vmul.f32 %v14430_v20, %v14430_v20 }
 0x4f3   : > { %13325 = vmatpush3.bf16.xpose.msra.mxu0 %v13324_v27  ;;  %13349 = vmatpush3.bf16.xpose.msra.mxu1 %v13348_v29  ;;  %v8001_v27 = vunpack.c.l.bf16 %v14425_v26  ;;  %v8002_v29 = vunpack.c.h.bf16 %v14425_v26  ;;  %v8041_v26 = vunpack.c.l.bf16 %v14431_v23 }
 0x4f4   : > { %13326 = vmatprep.subr.bf16.mxu0 %v17138_v0  ;;  %13350 = vmatprep.subr.bf16.mxu1 %v17138_v0  ;;  %v3553_v22 = vsel %vm3534_vm1, %v3508_v21, 0.0 }
 0x4f5   : > { %v3933_v45 = vmul.f32 %v8001_v27, %v8001_v27  ;;  %v3934_v46 = vmul.f32 %v8002_v29, %v8002_v29  ;;  %v8042_v27 = vunpack.c.h.bf16 %v14431_v23  ;;  %v14432_v29 = vld [vmem:[%s14973_s5 + $0x1c8] sm:$0xff]  }
 0x4f6   : > { %v8073_v34 = vunpack.c.l.bf16 %v14432_v29  ;;  %v8074_v28 = vunpack.c.h.bf16 %v14432_v29 }
 0x4f7   : > { %v13336_v4 = vpack.c.bf16 %v3934_v46, %v3933_v45  ;;  %v3953_v46 = vmul.f32 %v8041_v26, %v8041_v26  ;;  %v3954_v51 = vmul.f32 %v8042_v27, %v8042_v27  ;;  %v14438_v27 = vld [vmem:[%s14973_s5 + $0x1d8] sm:$0xff]  }
 0x4f8   : > { %v3969_v47 = vmul.f32 %v8073_v34, %v8073_v34  ;;  %v8081_v29 = vunpack.c.l.bf16 %v14438_v27  ;;  %v8082_v34 = vunpack.c.h.bf16 %v14438_v27 }
 0x4fb   : > { %13328 = vmatpush3.bf16.xpose.msra.mxu0 %v13327_v53  ;;  %13352 = vmatpush3.bf16.xpose.msra.mxu1 %v13351_v17  ;;  %v3523_v53 = vmul.f32 %v14427_v50, %v14427_v50  ;;  %v14428_v17 = vld [vmem:[%s14973_s5 + $0x180] sm:$0xff]   ;;  %v3970_v50 = vmul.f32 %v8074_v28, %v8074_v28 }
 0x4fc   : > { %13329 = vmatprep.subr.bf16.mxu0 %v17138_v0  ;;  %13353 = vmatprep.subr.bf16.mxu1 %v17138_v0  ;;  %v8037_v54 = vunpack.c.l.bf16 %v14428_v17  ;;  %v8038_v55 = vunpack.c.h.bf16 %v14428_v17  ;;  %v14434_v17 = vld [vmem:[%s14965_s24 + $0x7] sm:$0x1] }
 0x4fd   : > { %v3598_v56 = vsel %vm3534_vm1, %v3523_v53, 0.0 }
 0x4fe   : > { %3599 = vadd.xlane.f32.xlu0 %v3598_v56  ;;  %v3951_v8 = vmul.f32 %v8037_v54, %v8037_v54  ;;  %v3952_v12 = vmul.f32 %v8038_v55, %v8038_v55  ;;  %v3509_v54 = vmul.f32 %v14434_v17, %v14434_v17  ;;  %v14435_v55 = vld [vmem:[%s14973_s5 + $0x190] sm:$0xff]  }
 0x4ff   : > { %v8045_v56 = vunpack.c.l.bf16 %v14435_v55  ;;  %v8046_v57 = vunpack.c.h.bf16 %v14435_v55 }
 0x500   : > { %v13363_v35 = vpack.c.bf16 %v3952_v12, %v3951_v8  ;;  %v13390_v8 = vpack.c.bf16 %v3970_v50, %v3969_v47  ;;  %v3556_v12 = vsel %vm3534_vm1, %v3509_v54, 0.0  ;;  %v14439_v50 = vld [vmem:[%s14973_s5 + $0x1a0] sm:$0xff]  }
 0x501   : > { %v8054_v17 = vunpack.c.h.bf16 %v14439_v50 }
 0x502   : > { %3554 = vadd.xlane.f32.xlu0 %v3553_v22  ;;  %v14437_v22 = vld [vmem:[%s14973_s5 + $0x198] sm:$0xff]  }
 0x503   : > { %13331 = vmatpush3.bf16.xpose.msra.mxu0 %v13330_v13  ;;  %13355 = vmatpush3.bf16.xpose.msra.mxu1 %v13354_v14  ;;  %v3967_v13 = vmul.f32 %v8069_v58, %v8069_v58  ;;  %v3968_v14 = vmul.f32 %v8070_v61, %v8070_v61  ;;  %v14436_v58 = vld [vmem:[%s14973_s5 + $0x1d0] sm:$0xff]   ;;  %v8049_v23 = vunpack.c.l.bf16 %v14437_v22  ;;  %v8050_v26 = vunpack.c.h.bf16 %v14437_v22  ;;  %v14442_v22 = vld [vmem:[%s14973_s5 + $0x1e8] sm:$0xff]  }
 0x504   : > { %13332 = vmatprep.subr.bf16.mxu0 %v17138_v0  ;;  %13356 = vmatprep.subr.bf16.mxu1 %v17138_v0  ;;  %v8077_v61 = vunpack.c.l.bf16 %v14436_v58 }
 0x506   : > { %v3971_v20 = vmul.f32 %v8077_v61, %v8077_v61 }
 0x50b   : > { %13334 = vmatpush3.bf16.xpose.msra.mxu0 %v13333_v42  ;;  %13358 = vmatpush3.bf16.xpose.msra.mxu1 %v13357_v43  ;;  %v13387_v42 = vpack.c.bf16 %v3968_v14, %v3967_v13  ;;  %v14433_v43 = vld [vmem:[%s14965_s24 + $0x16] sm:$0x1]  ;;  %v3955_v13 = vmul.f32 %v8045_v56, %v8045_v56  ;;  %v3956_v14 = vmul.f32 %v8046_v57, %v8046_v57  ;;  %v14440_v56 = vld [vmem:[%s14973_s5 + $0x1e0] sm:$0xff]  }
 0x50c   : > { %13335 = vmatprep.subr.bf16.mxu0 %v17138_v0  ;;  %13359 = vmatprep.subr.bf16.mxu1 %v17138_v0  ;;  %v3524_v45 = vmul.f32 %v14433_v43, %v14433_v43  ;;  %v3958_v43 = vmul.f32 %v8050_v26, %v8050_v26  ;;  %v8085_v57 = vunpack.c.l.bf16 %v14440_v56  ;;  %v8090_v26 = vunpack.c.h.bf16 %v14442_v22 }
 0x50d   : > { %v13369_v28 = vpack.c.bf16 %v3956_v14, %v3955_v13  ;;  %v14441_v14 = vld [vmem:[%s14973_s5 + $0x1a8] sm:$0xff]  }
 0x50e   : > { %v3601_v53 = vsel %vm3534_vm1, %v3524_v45, 0.0  ;;  %v3973_v45 = vmul.f32 %v8081_v29, %v8081_v29 }
 0x50f   : > { %3602 = vadd.xlane.f32.xlu0 %v3601_v53  ;;  %v8053_v53 = vunpack.c.l.bf16 %v14439_v50  ;;  %v14444_v50 = vld [vmem:[%s14973_s5 + $0x1f0] sm:$0xff]  }
 0x513   : > { %13337 = vmatpush3.bf16.xpose.msra.mxu0 %v13336_v4  ;;  %13361 = vmatpush3.bf16.xpose.msra.mxu1 %v13360_v5  ;;  %v8078_v4 = vunpack.c.h.bf16 %v14436_v58  ;;  %v13366_v5 = vpack.c.bf16 %v3954_v51, %v3953_v46  ;;  %v3974_v46 = vmul.f32 %v8082_v34, %v8082_v34  ;;  %v8086_v58 = vunpack.c.h.bf16 %v14440_v56 }
 0x514   : > { %13362 = vmatprep.subr.bf16.mxu0 %v17138_v0  ;;  %13386 = vmatprep.subr.bf16.mxu1 %v17138_v0 }
 0x515   : > { %3557 = vadd.xlane.f32.xlu0 %v3556_v12  ;;  %v3972_v21 = vmul.f32 %v8078_v4, %v8078_v4  ;;  %v13396_v4 = vpack.c.bf16 %v3974_v46, %v3973_v45  ;;  %v3975_v12 = vmul.f32 %v8085_v57, %v8085_v57  ;;  %v3976_v13 = vmul.f32 %v8086_v58, %v8086_v58 }
 0x517   : > { %v13399_v29 = vpack.c.bf16 %v3976_v13, %v3975_v12  ;;  %v14446_v13 = vld [vmem:[%s14973_s5 + $0x1f8] sm:$0xff]  }
 0x51a   : > { %11503 = vmatmul.mubr.f32.vlgmr.msra.gmra.mrb[36].mxu0 %v17136_v44  ;;  %11538 = vmatmul.mubr.f32.vlgmr.msra.gmra.mrb[36].mxu1 %v17136_v44 }
 0x51b   : > { %13364 = vmatpush3.bf16.xpose.msra.mxu0 %v13363_v35  ;;  %13388 = vmatpush3.bf16.xpose.msra.mxu1 %v13387_v42  ;;  %v13393_v35 = vpack.c.bf16 %v3972_v21, %v3971_v20  ;;  %v3957_v42 = vmul.f32 %v8049_v23, %v8049_v23  ;;  %v8057_v20 = vunpack.c.l.bf16 %v14441_v14  ;;  %v8058_v21 = vunpack.c.h.bf16 %v14441_v14 }
 0x51c   : > { %13365 = vmatprep.subr.bf16.mxu0 %v17138_v0  ;;  %13389 = vmatprep.subr.bf16.mxu1 %v17138_v0  ;;  %v8089_v23 = vunpack.c.l.bf16 %v14442_v22  ;;  %v8097_v14 = vunpack.c.l.bf16 %v14446_v13 }
 0x51d   : > { %11572 = vmatprep.mubr.msk.f32.mxu0 %vm14790_vm0, %v17134_v1  ;;  %11607 = vmatprep.mubr.msk.f32.mxu1 %vm14790_vm0, %v17134_v1  ;;  %v13372_v61 = vpack.c.bf16 %v3958_v43, %v3957_v42  ;;  %v3961_v34 = vmul.f32 %v8057_v20, %v8057_v20  ;;  %v3978_v42 = vmul.f32 %v8090_v26, %v8090_v26  ;;  %v14443_v43 = vld [vmem:[%s14973_s5 + $0x1b0] sm:$0xff]   ;;  %v8098_v20 = vunpack.c.h.bf16 %v14446_v13 }
 0x51e   : > { %v8061_v45 = vunpack.c.l.bf16 %v14443_v43  ;;  %v8062_v46 = vunpack.c.h.bf16 %v14443_v43  ;;  %v14448_v43 = vld [vmem:[%s14973_s5 + $0x240] sm:$0xff]  }
 0x520   : > { %v3963_v56 = vmul.f32 %v8061_v45, %v8061_v45  ;;  %v3964_v57 = vmul.f32 %v8062_v46, %v8062_v46  ;;  %v8133_v45 = vunpack.c.l.bf16 %v14448_v43  ;;  %v8134_v46 = vunpack.c.h.bf16 %v14448_v43  ;;  %v14452_v43 = vld [vmem:[%s14973_s5 + $0x250] sm:$0xff]  }
 0x523   : > { %13367 = vmatpush3.bf16.xpose.msra.mxu0 %v13366_v5  ;;  %13391 = vmatpush3.bf16.xpose.msra.mxu1 %v13390_v8  ;;  %v3959_v5 = vmul.f32 %v8053_v53, %v8053_v53  ;;  %v3960_v8 = vmul.f32 %v8054_v17, %v8054_v17  ;;  %v8093_v53 = vunpack.c.l.bf16 %v14444_v50  ;;  %v8094_v17 = vunpack.c.h.bf16 %v14444_v50 }
 0x524   : > { %13368 = vmatprep.subr.bf16.mxu0 %v17138_v0  ;;  %13392 = vmatprep.subr.bf16.mxu1 %v17138_v0 }
 0x525   : > { %v13375_v27 = vpack.c.bf16 %v3960_v8, %v3959_v5  ;;  %v3979_v58 = vmul.f32 %v8093_v53, %v8093_v53  ;;  %v14445_v5 = vld [vmem:[%s14973_s5 + $0x1b8] sm:$0xff]  }
 0x526   : > { %v8065_v8 = vunpack.c.l.bf16 %v14445_v5  ;;  %v8066_v12 = vunpack.c.h.bf16 %v14445_v5 }
 0x52b   : > { %13370 = vmatpush3.bf16.xpose.msra.mxu0 %v13369_v28  ;;  %13394 = vmatpush3.bf16.xpose.msra.mxu1 %v13393_v35  ;;  %v3962_v28 = vmul.f32 %v8058_v21, %v8058_v21  ;;  %v3977_v35 = vmul.f32 %v8089_v23, %v8089_v23  ;;  %v13381_v21 = vpack.c.bf16 %v3964_v57, %v3963_v56 }
 0x52c   : > { %13371 = vmatprep.subr.bf16.mxu0 %v17138_v0  ;;  %13395 = vmatprep.subr.bf16.mxu1 %v17138_v0  ;;  %v3965_v23 = vmul.f32 %v8065_v8, %v8065_v8  ;;  %v3999_v56 = vmul.f32 %v8133_v45, %v8133_v45  ;;  %v4000_v57 = vmul.f32 %v8134_v46, %v8134_v46  ;;  %v8141_v45 = vunpack.c.l.bf16 %v14452_v43 }
 0x52d   : > { %v15837_v51 = vpop.f32.mrb[30].mxu0  ;;  %v15839_v47 = vpop.f32.mrb[30].mxu1  ;;  %v8142_v46 = vunpack.c.h.bf16 %v14452_v43 }
 0x52e   : > { %17161 = vst [vmem:[#allocation19_spill] sm:$0xff] %v15837_v51  ;;  %17162 = vst [vmem:[#allocation20_spill] sm:$0xff] %v15839_v47  ;;  %v11294_v54 = vpop.f32.mrb[31].mxu0  ;;  %v11329_v55 = vpop.f32.mrb[31].mxu1 }
 0x52f   : > { %v13378_v54 = vpack.c.bf16 %v3962_v28, %v3961_v34  ;;  %v13402_v55 = vpack.c.bf16 %v3978_v42, %v3977_v35  ;;  %v3982_v34 = vmul.f32 %v8098_v20, %v8098_v20  ;;  %v14447_v28 = vld [vmem:[%s14973_s5 + $0x200] sm:$0xff]  }
 0x530   : > { %v8101_v35 = vunpack.c.l.bf16 %v14447_v28  ;;  %v8102_v42 = vunpack.c.h.bf16 %v14447_v28  ;;  %v14451_v28 = vld [vmem:[%s14973_s5 + $0x210] sm:$0xff]  }
 0x533   : > { %13373 = vmatpush3.bf16.xpose.msra.mxu0 %v13372_v61  ;;  %13397 = vmatpush3.bf16.xpose.msra.mxu1 %v13396_v4  ;;  %v3980_v61 = vmul.f32 %v8094_v17, %v8094_v17  ;;  %v15853_v4 = vpop.xlane.xlu0 %3539 }
 0x534   : > { %13374 = vmatprep.subr.bf16.mxu0 %v17138_v0  ;;  %13398 = vmatprep.subr.bf16.mxu1 %v17138_v0  ;;  %vm3640_vm3 = vcmp.eq.f32.partialorder %v15853_v4, inf  ;;  %vm3642_vm5 = vcmp.eq.f32.partialorder %v15853_v4, 0.0 }
 0x535   : > { %v13405_v22 = vpack.c.bf16 %v3980_v61, %v3979_v58  ;;  %v14449_v58 = vld [vmem:[%s14973_s5 + $0x208] sm:$0xff]  }
 0x536   : > { %v8105_v61 = vunpack.c.l.bf16 %v14449_v58  ;;  %v8106_v5 = vunpack.c.h.bf16 %v14449_v58  ;;  %v14453_v58 = vld [vmem:[%s14973_s5 + $0x218] sm:$0xff]  }
 0x537   : > { %v15857_v26 = vpop.xlane.xlu0 %3563 }
 0x53b   : > { %13376 = vmatpush3.bf16.xpose.msra.mxu0 %v13375_v27  ;;  %13400 = vmatpush3.bf16.xpose.msra.mxu1 %v13399_v29  ;;  %v3966_v27 = vmul.f32 %v8066_v12, %v8066_v12  ;;  %v3981_v29 = vmul.f32 %v8097_v14, %v8097_v14  ;;  %v15863_v17 = vpop.xlane.xlu0 %3542  ;;  %v14450_v12 = vld [vmem:[%s14973_s5 + $0x248] sm:$0xff]  }
 0x53c   : > { %13377 = vmatprep.subr.bf16.mxu0 %v17138_v0  ;;  %13401 = vmatprep.subr.bf16.mxu1 %v17138_v0  ;;  %v8137_v13 = vunpack.c.l.bf16 %v14450_v12  ;;  %v8138_v14 = vunpack.c.h.bf16 %v14450_v12  ;;  %v14454_v12 = vld [vmem:[%s14973_s5 + $0x258] sm:$0xff]   ;;  %vm3647_vm10 = vcmp.eq.f32.partialorder %v15863_v17, inf  ;;  %vm3649_vm12 = vcmp.eq.f32.partialorder %v15863_v17, 0.0 }
 0x53d   : > { %v13384_v50 = vpack.c.bf16 %v3966_v27, %v3965_v23  ;;  %v13408_v53 = vpack.c.bf16 %v3982_v34, %v3981_v29  ;;  %v3986_v23 = vmul.f32 %v8106_v5, %v8106_v5  ;;  %v8114_v5 = vunpack.c.h.bf16 %v14453_v58 }
 0x53e   : > { %v4001_v27 = vmul.f32 %v8137_v13, %v8137_v13  ;;  %v4002_v29 = vmul.f32 %v8138_v14, %v8138_v14  ;;  %v8145_v13 = vunpack.c.l.bf16 %v14454_v12  ;;  %v8146_v14 = vunpack.c.h.bf16 %v14454_v12 }
 0x53f   : > { %v15868_v8 = vpop.xlane.xlu0 %3590 }
 0x543   : > { %13379 = vmatpush3.bf16.xpose.msra.mxu0 %v13378_v54  ;;  %13403 = vmatpush3.bf16.xpose.msra.mxu1 %v13402_v55  ;;  %v3983_v54 = vmul.f32 %v8101_v35, %v8101_v35  ;;  %v3984_v55 = vmul.f32 %v8102_v42, %v8102_v42  ;;  %v15875_v34 = vpop.xlane.xlu0 %3536  ;;  %v8109_v35 = vunpack.c.l.bf16 %v14451_v28  ;;  %v8110_v42 = vunpack.c.h.bf16 %v14451_v28 }
 0x544   : > { %13404 = vmatprep.subr.bf16.mxu1 %v17138_v0  ;;  %13380 = vmatprep.subr.bf16.mxu0 %v17138_v0  ;;  %14047 = vrsqrt.f32 %v15875_v34  ;;  %v4005_v28 = vmul.f32 %v8145_v13, %v8145_v13  ;;  %vm3633_vm2 = vcmp.eq.f32.partialorder %v15875_v34, inf  ;;  %v3636_v12 = vand.u32 2147483648, %v15875_v34 }
 0x545   : > { %v13411_v20 = vpack.c.bf16 %v3984_v55, %v3983_v54  ;;  %14049 = vrsqrt.f32 %v15853_v4  ;;  %v3987_v54 = vmul.f32 %v8109_v35, %v8109_v35  ;;  %v3988_v55 = vmul.f32 %v8110_v42, %v8110_v42  ;;  %v14455_v42 = vld [vmem:[%s14973_s5 + $0x220] sm:$0xff]  }
 0x546   : > { %v4006_v35 = vmul.f32 %v8146_v14, %v8146_v14  ;;  %v8117_v43 = vunpack.c.l.bf16 %v14455_v42  ;;  %vm3635_vm4 = vcmp.eq.f32.partialorder %v15875_v34, 0.0 }
 0x548   : > { %v13444_v14 = vpack.c.bf16 %v4006_v35, %v4005_v28  ;;  %v14458_v28 = vld [vmem:[%s14973_s5 + $0x268] sm:$0xff]  }
 0x549   : > { %v8153_v35 = vunpack.c.l.bf16 %v14458_v28 }
 0x54b   : > { %13382 = vmatpush3.bf16.xpose.msra.mxu0 %v13381_v21  ;;  %13406 = vmatpush3.bf16.xpose.msra.mxu1 %v13405_v22  ;;  %v13435_v21 = vpack.c.bf16 %v4000_v57, %v3999_v56  ;;  %v3985_v22 = vmul.f32 %v8105_v61, %v8105_v61  ;;  %v4003_v56 = vmul.f32 %v8141_v45, %v8141_v45  ;;  %v8113_v61 = vunpack.c.l.bf16 %v14453_v58 }
 0x54c   : > { %13407 = vmatprep.subr.bf16.mxu1 %v17138_v0  ;;  %13383 = vmatprep.subr.bf16.mxu0 %v17138_v0  ;;  %v4004_v57 = vmul.f32 %v8142_v46, %v8142_v46  ;;  %v8118_v46 = vunpack.c.h.bf16 %v14455_v42 }
 0x553   : > { %13385 = vmatpush3.bf16.xpose.msra.mxu0 %v13384_v50  ;;  %13409 = vmatpush3.bf16.xpose.msra.mxu1 %v13408_v53  ;;  %v13414_v50 = vpack.c.bf16 %v3986_v23, %v3985_v22  ;;  %v13438_v53 = vpack.c.bf16 %v4002_v29, %v4001_v27  ;;  %v14048_v22 = vpop.eup %14047  ;;  %v3989_v23 = vmul.f32 %v8113_v61, %v8113_v61 }
 0x554   : > { %13434 = vmatprep.subr.bf16.mxu1 %v17138_v0  ;;  %13410 = vmatprep.subr.bf16.mxu0 %v17138_v0  ;;  %v14050_v27 = vpop.eup %14049  ;;  %v3990_v29 = vmul.f32 %v8114_v5, %v8114_v5  ;;  %v3632_v45 = vmul.f32 %v14048_v22, %v15875_v34  ;;  %v3643_v22 = vand.u32 2147483648, %v15853_v4 }
 0x555   : > { %v3639_v58 = vmul.f32 %v14050_v27, %v15853_v4  ;;  %v3992_v27 = vmul.f32 %v8118_v46, %v8118_v46 }
 0x556   : > { %v13420_v13 = vpack.c.bf16 %v3990_v29, %v3989_v23  ;;  %v14457_v23 = vld [vmem:[%s14973_s5 + $0x228] sm:$0xff]  }
 0x557   : > { %v8121_v29 = vunpack.c.l.bf16 %v14457_v23 }
 0x55a   : > { %11608 = vmatmul.mubr.f32.vlgmr.msra.gmra.mrb[38].mxu1 %v17136_v44  ;;  %11573 = vmatmul.mubr.f32.vlgmr.msra.gmra.mrb[38].mxu0 %v17136_v44 }
 0x55b   : > { %13412 = vmatpush3.bf16.xpose.msra.mxu0 %v13411_v20  ;;  %13436 = vmatpush3.bf16.xpose.msra.mxu1 %v13435_v21  ;;  %v13441_v20 = vpack.c.bf16 %v4004_v57, %v4003_v56  ;;  %v13417_v21 = vpack.c.bf16 %v3988_v55, %v3987_v54  ;;  %v6895_v57 = vlaneseq }
 0x55c   : > { %13413 = vmatprep.subr.bf16.mxu0 %v17138_v0  ;;  %13437 = vmatprep.subr.bf16.mxu1 %v17138_v0 }
 0x55d   : > { %11642 = vmatprep.mubr.msk.f32.mxu0 %vm14790_vm0, %v17134_v1  ;;  %11677 = vmatprep.mubr.msk.f32.mxu1 %vm14790_vm0, %v17134_v1  ;;  %v6896_v42 = vshrl.u32 %v6895_v57, 7 }
 0x55f   : > { %v15910_v46 = vsub.s32 0, %v6896_v42 }
 0x563   : > { %13415 = vmatpush3.bf16.xpose.msra.mxu0 %v13414_v50  ;;  %13439 = vmatpush3.bf16.xpose.msra.mxu1 %v13438_v53  ;;  %v14456_v50 = vld [vmem:[%s14973_s5 + $0x260] sm:$0xff]  }
 0x564   : > { %13416 = vmatprep.subr.bf16.mxu0 %v17138_v0  ;;  %13440 = vmatprep.subr.bf16.mxu1 %v17138_v0  ;;  %v8149_v53 = vunpack.c.l.bf16 %v14456_v50  ;;  %v8150_v54 = vunpack.c.h.bf16 %v14456_v50  ;;  %v3641_v50 = vsel %vm3640_vm3, %v15853_v4, %v3639_v58  ;;  %v3993_v58 = vmul.f32 %v8121_v29, %v8121_v29 }
 0x56b   : > { %13442 = vmatpush3.bf16.xpose.msra.mxu1 %v13441_v20  ;;  %13418 = vmatpush3.bf16.xpose.msra.mxu0 %v13417_v21  ;;  %v3634_v20 = vsel %vm3633_vm2, %v15875_v34, %v3632_v45  ;;  %v3991_v21 = vmul.f32 %v8117_v43, %v8117_v43  ;;  %v8122_v34 = vunpack.c.h.bf16 %v14457_v23  ;;  %v8154_v43 = vunpack.c.h.bf16 %v14458_v28  ;;  %v14460_v28 = vld [vmem:[%s14973_s5 + $0x270] sm:$0xff]  }
 0x56c   : > { %13419 = vmatprep.subr.bf16.mxu0 %v17138_v0  ;;  %13443 = vmatprep.subr.bf16.mxu1 %v17138_v0  ;;  %v3637_v1 = vsel %vm3635_vm4, %v3636_v12, %v3634_v20  ;;  %v3644_v45 = vsel %vm3642_vm5, %v3643_v22, %v3641_v50  ;;  %v4009_v20 = vmul.f32 %v8153_v35, %v8153_v35  ;;  %v8157_v35 = vunpack.c.l.bf16 %v14460_v28 }
 0x56d   : > { %v4433_v55 = vpop.f32.mrb[32].mxu0  ;;  %v15895_v56 = vpop.f32.mrb[32].mxu1  ;;  %v6863_v57 = vadd.f32 1e-13, %v3637_v1  ;;  %v13423_v4 = vpack.c.bf16 %v3992_v27, %v3991_v21  ;;  %v6864_v12 = vadd.f32 1e-13, %v3644_v45  ;;  %v4010_v44 = vmul.f32 %v8154_v43, %v8154_v43 }
 0x56e   : > { %14051 = vrsqrt.f32 %v4433_v55  ;;  %v11364_v61 = vpop.f32.mrb[33].mxu0  ;;  %v11399_v5 = vpop.f32.mrb[33].mxu1  ;;  %vm6609_vm6 = vcmp.eq.f32.partialorder %v4433_v55, inf  ;;  %v6612_v23 = vand.u32 2147483648, %v4433_v55  ;;  %vm6611_vm7 = vcmp.eq.f32.partialorder %v4433_v55, 0.0 }
 0x56f   : > { %14053 = vrsqrt.f32 %v15895_v56  ;;  %v4007_v61 = vmul.f32 %v8149_v53, %v8149_v53  ;;  %v4008_v5 = vmul.f32 %v8150_v54, %v8150_v54  ;;  %vm6616_vm8 = vcmp.eq.f32.partialorder %v15895_v56, inf }
 0x570   : > { %v6619_v1 = vand.u32 2147483648, %v15895_v56  ;;  %v6902_v21 = vrot.slane %v6864_v12, %v15910_v46  ;;  %vm6618_vm9 = vcmp.eq.f32.partialorder %v15895_v56, 0.0  ;;  %v8158_v45 = vunpack.c.h.bf16 %v14460_v28 }
 0x571   : > { %v13447_v53 = vpack.c.bf16 %v4008_v5, %v4007_v61  ;;  %v17163_v61 = vmov 0.0|0.0   ;;  %v14459_v5 = vld [vmem:[%s14973_s5 + $0x230] sm:$0xff]  }
 0x572   : > { %v8125_v29 = vunpack.c.l.bf16 %v14459_v5 }
 0x573   : > { %13421 = vmatpush3.bf16.xpose.msra.mxu0 %v13420_v13  ;;  %13445 = vmatpush3.bf16.xpose.msra.mxu1 %v13444_v14  ;;  %v3994_v14 = vmul.f32 %v8122_v34, %v8122_v34  ;;  %v8126_v34 = vunpack.c.h.bf16 %v14459_v5 }
 0x574   : > { %13422 = vmatprep.subr.bf16.mxu0 %v17138_v0  ;;  %13446 = vmatprep.subr.bf16.mxu1 %v17138_v0  ;;  %v6898_v0 = vrot.slane %v6863_v57, %v15910_v46 }
 0x575   : > { %v3996_v12 = vmul.f32 %v8126_v34, %v8126_v34 }
 0x578   : > { %v14052_v54 = vpop.eup %14051 }
 0x579   : > { %v14054_v13 = vpop.eup %14053  ;;  %v6608_v47 = vmul.f32 %v14052_v54, %v4433_v55 }
 0x57a   : > { %v6615_v22 = vmul.f32 %v14054_v13, %v15895_v56  ;;  %v4011_v13 = vmul.f32 %v8157_v35, %v8157_v35 }
 0x57b   : > { %v6610_v42 = vsel %vm6609_vm6, %v4433_v55, %v6608_v47  ;;  %13424 = vmatpush3.bf16.xpose.msra.mxu0 %v13423_v4  ;;  %13448 = vmatpush3.bf16.xpose.msra.mxu1 %v13447_v53  ;;  %v13426_v4 = vpack.c.bf16 %v3994_v14, %v3993_v58  ;;  %v13450_v53 = vpack.c.bf16 %v4010_v44, %v4009_v20  ;;  %v14462_v44 = vld [vmem:[%s14973_s5 + $0x278] sm:$0xff]  }
 0x57c   : > { %v6613_v27 = vsel %vm6611_vm7, %v6612_v23, %v6610_v42  ;;  %v6617_v50 = vsel %vm6616_vm8, %v15895_v56, %v6615_v22  ;;  %13425 = vmatprep.subr.bf16.mxu0 %v17163_v61  ;;  %13449 = vmatprep.subr.bf16.mxu1 %v17163_v61  ;;  %v3995_v56 = vmul.f32 %v8125_v29, %v8125_v29  ;;  %v14461_v22 = vld [vmem:[%s14973_s5 + $0x238] sm:$0xff]   ;;  %v8161_v58 = vunpack.c.l.bf16 %v14462_v44 }
 0x57d   : > { %v6831_v47 = vadd.f32 1e-13, %v6613_v27  ;;  %v6620_v55 = vsel %vm6618_vm9, %v6619_v1, %v6617_v50  ;;  %v4012_v23 = vmul.f32 %v8158_v45, %v8158_v45  ;;  %v8129_v42 = vunpack.c.l.bf16 %v14461_v22 }
 0x57e   : > { %v6832_v43 = vadd.f32 1e-13, %v6620_v55  ;;  %v8130_v1 = vunpack.c.h.bf16 %v14461_v22  ;;  %v8162_v14 = vunpack.c.h.bf16 %v14462_v44  ;;  %v13429_v20 = vpack.c.bf16 %v3996_v12, %v3995_v56 }
 0x57f   : > { %v7023_v57 = vmul.f32 %v6898_v0, %v6831_v47  ;;  %v15926_v0 = vpop.xlane.xlu1 %3587  ;;  %v3997_v27 = vmul.f32 %v8129_v42, %v8129_v42  ;;  %v4013_v55 = vmul.f32 %v8161_v58, %v8161_v58  ;;  %v14466_v58 = vld [vmem:[%s14973_s5 + $0x2c8] sm:$0xff]  }
 0x580   : > { %v7024_v54 = vmul.f32 %v6902_v21, %v6832_v43  ;;  %v13453_v21 = vpack.c.bf16 %v4012_v23, %v4011_v13  ;;  %v3998_v47 = vmul.f32 %v8130_v1, %v8130_v1  ;;  %v4014_v5 = vmul.f32 %v8162_v14, %v8162_v14  ;;  %v14463_v43 = vld [vmem:[%s14973_s5 + $0x280] sm:$0xff]  }
 0x581   : > { %14055 = vrcp.f32 %v7023_v57  ;;  %v8165_v45 = vunpack.c.l.bf16 %v14463_v43  ;;  %v8166_v57 = vunpack.c.h.bf16 %v14463_v43  ;;  %v8201_v14 = vunpack.c.l.bf16 %v14466_v58 }
 0x582   : > { %14057 = vrcp.f32 %v7024_v54  ;;  %v13432_v56 = vpack.c.bf16 %v3998_v47, %v3997_v27  ;;  %v13456_v12 = vpack.c.bf16 %v4014_v5, %v4013_v55  ;;  %v17166_v5 = vmov 1.0  }
 0x583   : > { %13427 = vmatpush3.bf16.xpose.msra.mxu0 %v13426_v4  ;;  %13451 = vmatpush3.bf16.xpose.msra.mxu1 %v13450_v53  ;;  %v15931_v34 = vpop.xlane.xlu1 %3611  ;;  %v14464_v4 = vld [vmem:[%s14973_s5 + $0x2c0] sm:$0xff]   ;;  %v4015_v13 = vmul.f32 %v8165_v45, %v8165_v45  ;;  %v4016_v22 = vmul.f32 %v8166_v57, %v8166_v57  ;;  %v14467_v45 = vld [vmem:[%s14965_s24 + $0xb] sm:$0x1]  ;;  %14059 = vrsqrt.f32 %v15863_v17 }
 0x584   : > { %13428 = vmatprep.subr.bf16.mxu0 %v17163_v61  ;;  %13452 = vmatprep.subr.bf16.mxu1 %v17163_v61  ;;  %17164 = vst [vmem:[#allocation21_spill] sm:$0xff] %v15931_v34  ;;  %v8197_v53 = vunpack.c.l.bf16 %v14464_v4  ;;  %v8198_v54 = vunpack.c.h.bf16 %v14464_v4  ;;  %v3513_v57 = vmul.f32 %v14467_v45, %v14467_v45  ;;  %v17167_v4 = vmov 0.0  }
 0x586   : > { %v4031_v42 = vmul.f32 %v8197_v53, %v8197_v53  ;;  %v3568_v53 = vsel %vm3534_vm1, %v3513_v57, 0.0  ;;  %v14471_v57 = vld [vmem:[%s14973_s5 + $0x2d8] sm:$0xff]  }
 0x587   : > { %v15941_v23 = vpop.xlane.xlu1 %3566  ;;  %3569 = vadd.xlane.f32.xlu1 %v3568_v53  ;;  %v8209_v53 = vunpack.c.l.bf16 %v14471_v57 }
 0x58b   : > { %v14056_v50 = vpop.eup %14055  ;;  %13430 = vmatpush3.bf16.xpose.msra.mxu0 %v13429_v20  ;;  %13454 = vmatpush3.bf16.xpose.msra.mxu1 %v13453_v21  ;;  %v8202_v20 = vunpack.c.h.bf16 %v14466_v58  ;;  %v13459_v21 = vpack.c.bf16 %v4016_v22, %v4015_v13  ;;  %v14469_v13 = vld [vmem:[%s14973_s5 + $0x2d0] sm:$0xff]  }
 0x58c   : > { %v14058_v29 = vpop.eup %14057  ;;  %13455 = vmatprep.subr.bf16.mxu1 %v17163_v61  ;;  %13431 = vmatprep.subr.bf16.mxu0 %v17163_v61  ;;  %v15934_v28 = vmul.f32 %v14056_v50, %v15149_v18  ;;  %v4032_v18 = vmul.f32 %v8198_v54, %v8198_v54  ;;  %v15947_v50 = vpop.xlane.xlu1 %3614  ;;  %v14468_v54 = vld [vmem:[%s14973_s5 + $0x290] sm:$0xff]   ;;  %v8205_v22 = vunpack.c.l.bf16 %v14469_v13 }
 0x58d   : > { %v15937_v35 = vmul.f32 %v14058_v29, %v15151_v19  ;;  %v14465_v19 = vld [vmem:[%s14973_s5 + $0x288] sm:$0xff]   ;;  %17165 = vst [vmem:[#allocation22_spill] sm:$0xff] %v15947_v50  ;;  %v4033_v29 = vmul.f32 %v8201_v14, %v8201_v14  ;;  %v4034_v43 = vmul.f32 %v8202_v20, %v8202_v20 }
 0x58e   : > { %v8169_v1 = vunpack.c.l.bf16 %v14465_v19  ;;  %v8170_v44 = vunpack.c.h.bf16 %v14465_v19  ;;  %v13483_v27 = vpack.c.bf16 %v4032_v18, %v4031_v42  ;;  %v8206_v18 = vunpack.c.h.bf16 %v14469_v13 }
 0x58f   : > { %v4035_v14 = vmul.f32 %v8205_v22, %v8205_v22  ;;  %v4037_v13 = vmul.f32 %v8209_v53, %v8209_v53 }
 0x590   : > { %v4017_v47 = vmul.f32 %v8169_v1, %v8169_v1  ;;  %v4018_v55 = vmul.f32 %v8170_v44, %v8170_v44  ;;  %v15961_v42 = vpop.xlane.xlu1 %3545  ;;  %v13486_v1 = vpack.c.bf16 %v4034_v43, %v4033_v29  ;;  %v4036_v20 = vmul.f32 %v8206_v18, %v8206_v18  ;;  %v14060_v43 = vpop.eup %14059 }
 0x591   : > { %14061 = vrsqrt.f32 %v15961_v42  ;;  %v3646_v18 = vmul.f32 %v14060_v43, %v15863_v17  ;;  %vm3654_vm11 = vcmp.eq.f32.partialorder %v15961_v42, inf  ;;  %vm3656_vm13 = vcmp.eq.f32.partialorder %v15961_v42, 0.0 }
 0x592   : > { %v13462_v19 = vpack.c.bf16 %v4018_v55, %v4017_v47  ;;  %v8210_v47 = vunpack.c.h.bf16 %v14471_v57  ;;  %v13489_v29 = vpack.c.bf16 %v4036_v20, %v4035_v14 }
 0x593   : > { %13433 = vmatpush3.bf16.xpose.msra.mxu0 %v13432_v56  ;;  %13457 = vmatpush3.bf16.xpose.msra.mxu1 %v13456_v12  ;;  %v8173_v56 = vunpack.c.l.bf16 %v14468_v54  ;;  %v8174_v12 = vunpack.c.h.bf16 %v14468_v54  ;;  %v3648_v43 = vsel %vm3647_vm10, %v15863_v17, %v3646_v18 }
 0x594   : > { %13482 = vmatprep.subr.bf16.mxu1 %v17163_v61  ;;  %13458 = vmatprep.subr.bf16.mxu0 %v17163_v61  ;;  %v4038_v22 = vmul.f32 %v8210_v47, %v8210_v47 }
 0x595   : > { %v4019_v44 = vmul.f32 %v8173_v56, %v8173_v56  ;;  %v4020_v58 = vmul.f32 %v8174_v12, %v8174_v12 }
 0x597   : > { %v13465_v55 = vpack.c.bf16 %v4020_v58, %v4019_v44  ;;  %v14473_v44 = vld [vmem:[%s14973_s5 + $0x2e0] sm:$0xff]  }
 0x598   : > { %v8213_v58 = vunpack.c.l.bf16 %v14473_v44 }
 0x59a   : > { %11678 = vmatmul.mubr.f32.vlgmr.msra.gmra.mrb[40].mxu1 %v17166_v5  ;;  %11643 = vmatmul.mubr.f32.vlgmr.msra.gmra.mrb[40].mxu0 %v17166_v5 }
 0x59b   : > { %13460 = vmatpush3.bf16.xpose.msra.mxu0 %v13459_v21  ;;  %13484 = vmatpush3.bf16.xpose.msra.mxu1 %v13483_v27  ;;  %v14470_v21 = vld [vmem:[%s14973_s5 + $0x298] sm:$0xff]   ;;  %v14062_v56 = vpop.eup %14061 }
 0x59c   : > { %13461 = vmatprep.subr.bf16.mxu0 %v17163_v61  ;;  %13485 = vmatprep.subr.bf16.mxu1 %v17163_v61  ;;  %v8177_v27 = vunpack.c.l.bf16 %v14470_v21  ;;  %v8178_v45 = vunpack.c.h.bf16 %v14470_v21  ;;  %v3653_v57 = vmul.f32 %v14062_v56, %v15961_v42 }
 0x59d   : > { %11712 = vmatprep.mubr.msk.f32.mxu0 %vm14790_vm0, %v17167_v4  ;;  %11747 = vmatprep.mubr.msk.f32.mxu1 %vm14790_vm0, %v17167_v4 }
 0x59e   : > { %v4021_v54 = vmul.f32 %v8177_v27, %v8177_v27  ;;  %v4022_v12 = vmul.f32 %v8178_v45, %v8178_v45  ;;  %v8214_v27 = vunpack.c.h.bf16 %v14473_v44  ;;  %v3650_v45 = vand.u32 2147483648, %v15863_v17 }
 0x59f   : > { %v3655_v56 = vsel %vm3654_vm11, %v15961_v42, %v3653_v57 }
 0x5a0   : > { %v3651_v52 = vsel %vm3649_vm12, %v3650_v45, %v3648_v43 }
 0x5a3   : > { %13463 = vmatpush3.bf16.xpose.msra.mxu0 %v13462_v19  ;;  %13487 = vmatpush3.bf16.xpose.msra.mxu1 %v13486_v1  ;;  %v14472_v19 = vld [vmem:[%s14973_s5 + $0x2a0] sm:$0xff]  }
 0x5a4   : > { %13464 = vmatprep.subr.bf16.mxu0 %v17163_v61  ;;  %13488 = vmatprep.subr.bf16.mxu1 %v17163_v61  ;;  %v8181_v1 = vunpack.c.l.bf16 %v14472_v19  ;;  %v8182_v21 = vunpack.c.h.bf16 %v14472_v19  ;;  %v3657_v19 = vand.u32 2147483648, %v15961_v42 }
 0x5a6   : > { %v4023_v44 = vmul.f32 %v8181_v1, %v8181_v1  ;;  %v4024_v51 = vmul.f32 %v8182_v21, %v8182_v21  ;;  %v3658_v1 = vsel %vm3656_vm13, %v3657_v19, %v3655_v56  ;;  %v6865_v21 = vadd.f32 1e-13, %v3651_v52 }
 0x5a8   : > { %v13471_v57 = vpack.c.bf16 %v4024_v51, %v4023_v44  ;;  %v6906_v38 = vrot.slane %v6865_v21, %v15910_v46 }
 0x5ab   : > { %13466 = vmatpush3.bf16.xpose.msra.mxu0 %v13465_v55  ;;  %13490 = vmatpush3.bf16.xpose.msra.mxu1 %v13489_v29  ;;  %v13468_v55 = vpack.c.bf16 %v4022_v12, %v4021_v54  ;;  %v13492_v29 = vpack.c.bf16 %v4038_v22, %v4037_v13  ;;  %v14474_v54 = vld [vmem:[%s14973_s5 + $0x2a8] sm:$0xff]  }
 0x5ac   : > { %13467 = vmatprep.subr.bf16.mxu0 %v17163_v61  ;;  %13491 = vmatprep.subr.bf16.mxu1 %v17163_v61  ;;  %v8185_v12 = vunpack.c.l.bf16 %v14474_v54  ;;  %v8186_v17 = vunpack.c.h.bf16 %v14474_v54  ;;  %v14475_v13 = vld [vmem:[%s14973_s5 + $0x2e8] sm:$0xff]  }
 0x5ad   : > { %v4573_v14 = vpop.f32.mrb[34].mxu0  ;;  %v4643_v20 = vpop.f32.mrb[34].mxu1  ;;  %v8217_v22 = vunpack.c.l.bf16 %v14475_v13  ;;  %v8218_v18 = vunpack.c.h.bf16 %v14475_v13 }
 0x5ae   : > { %14063 = vrsqrt.f32 %v4573_v14  ;;  %v11434_v53 = vpop.f32.mrb[35].mxu0  ;;  %v11469_v47 = vpop.f32.mrb[35].mxu1  ;;  %vm6623_vm14 = vcmp.eq.f32.partialorder %v4573_v14, inf  ;;  %v6626_v50 = vand.u32 2147483648, %v4573_v14  ;;  %vm6625_vm15 = vcmp.eq.f32.partialorder %v4573_v14, 0.0 }
 0x5af   : > { %14065 = vrsqrt.f32 %v4643_v20  ;;  %v4039_v53 = vmul.f32 %v8213_v58, %v8213_v58  ;;  %v4040_v47 = vmul.f32 %v8214_v27, %v8214_v27  ;;  %v4025_v58 = vmul.f32 %v8185_v12, %v8185_v12 }
 0x5b0   : > { %v6866_v27 = vadd.f32 1e-13, %v3658_v1  ;;  %v4042_v43 = vmul.f32 %v8218_v18, %v8218_v18  ;;  %vm6630_vm2 = vcmp.eq.f32.partialorder %v4643_v20, inf  ;;  %v6633_v52 = vand.u32 2147483648, %v4643_v20 }
 0x5b1   : > { %v13495_v9 = vpack.c.bf16 %v4040_v47, %v4039_v53  ;;  %vm6632_vm3 = vcmp.eq.f32.partialorder %v4643_v20, 0.0  ;;  %v14476_v47 = vld [vmem:[%s14973_s5 + $0x2b0] sm:$0xff]  }
 0x5b2   : > { %v6910_v51 = vrot.slane %v6866_v27, %v15910_v46  ;;  %v8189_v12 = vunpack.c.l.bf16 %v14476_v47  ;;  %v14478_v27 = vld [vmem:[%s14973_s5 + $0x2b8] sm:$0xff]  }
 0x5b3   : > { %13469 = vmatpush3.bf16.xpose.msra.mxu0 %v13468_v55  ;;  %13493 = vmatpush3.bf16.xpose.msra.mxu1 %v13492_v29  ;;  %v4026_v55 = vmul.f32 %v8186_v17, %v8186_v17  ;;  %v4041_v29 = vmul.f32 %v8217_v22, %v8217_v22 }
 0x5b4   : > { %13470 = vmatprep.subr.bf16.mxu0 %v17163_v61  ;;  %13494 = vmatprep.subr.bf16.mxu1 %v17163_v61 }
 0x5b5   : > { %v13474_v18 = vpack.c.bf16 %v4026_v55, %v4025_v58  ;;  %v13498_v1 = vpack.c.bf16 %v4042_v43, %v4041_v29  ;;  %v8194_v58 = vunpack.c.h.bf16 %v14478_v27 }
 0x5b8   : > { %v14064_v42 = vpop.eup %14063 }
 0x5b9   : > { %v14066_v45 = vpop.eup %14065  ;;  %v6622_v39 = vmul.f32 %v14064_v42, %v4573_v14 }
 0x5ba   : > { %v6629_v54 = vmul.f32 %v14066_v45, %v4643_v20  ;;  %v14479_v45 = vld [vmem:[%s14973_s5 + $0x2f8] sm:$0xff]  }
 0x5bb   : > { %v6624_v16 = vsel %vm6623_vm14, %v4573_v14, %v6622_v39  ;;  %13472 = vmatpush3.bf16.xpose.msra.mxu0 %v13471_v57  ;;  %13496 = vmatpush3.bf16.xpose.msra.mxu1 %v13495_v9  ;;  %v8190_v39 = vunpack.c.h.bf16 %v14476_v47  ;;  %v14477_v14 = vld [vmem:[%s14973_s5 + $0x2f0] sm:$0xff]   ;;  %v8225_v55 = vunpack.c.l.bf16 %v14479_v45  ;;  %v8226_v29 = vunpack.c.h.bf16 %v14479_v45 }
 0x5bc   : > { %v6627_v19 = vsel %vm6625_vm15, %v6626_v50, %v6624_v16  ;;  %v6631_v44 = vsel %vm6630_vm2, %v4643_v20, %v6629_v54  ;;  %13473 = vmatprep.subr.bf16.mxu0 %v17163_v61  ;;  %13497 = vmatprep.subr.bf16.mxu1 %v17163_v61  ;;  %v8221_v17 = vunpack.c.l.bf16 %v14477_v14  ;;  %v8222_v22 = vunpack.c.h.bf16 %v14477_v14  ;;  %v15993_v50 = vpop.xlane.xlu0 %3560  ;;  %v14480_v47 = vld [vmem:[%s14965_s24 + $0x13] sm:$0x1] }
 0x5bd   : > { %v6833_v56 = vadd.f32 1e-13, %v6627_v19  ;;  %v6634_v53 = vsel %vm6632_vm3, %v6633_v52, %v6631_v44  ;;  %v4027_v20 = vmul.f32 %v8189_v12, %v8189_v12  ;;  %v4028_v21 = vmul.f32 %v8190_v39, %v8190_v39  ;;  %v14481_v39 = vld [vmem:[%s14965_s24 + $0x17] sm:$0x1] }
 0x5be   : > { %v6834_v13 = vadd.f32 1e-13, %v6634_v53  ;;  %v4043_v57 = vmul.f32 %v8221_v17, %v8221_v17  ;;  %v4044_v42 = vmul.f32 %v8222_v22, %v8222_v22  ;;  %v4030_v19 = vmul.f32 %v8194_v58, %v8194_v58  ;;  %v14482_v17 = vld [vmem:[%s14965_s24 + $0x1b] sm:$0x1] }
 0x5bf   : > { %v7025_v9 = vmul.f32 %v6906_v38, %v6833_v56  ;;  %v8193_v38 = vunpack.c.l.bf16 %v14478_v27  ;;  %v13477_v54 = vpack.c.bf16 %v4028_v21, %v4027_v20  ;;  %v4045_v44 = vmul.f32 %v8225_v55, %v8225_v55  ;;  %v14483_v21 = vld [vmem:[%s14973_s5 + $0x300] sm:$0xff]  }
 0x5c0   : > { %v7026_v16 = vmul.f32 %v6910_v51, %v6834_v13  ;;  %v15999_v43 = vpop.xlane.xlu0 %3584  ;;  %v13501_v52 = vpack.c.bf16 %v4044_v42, %v4043_v57  ;;  %v4046_v56 = vmul.f32 %v8226_v29, %v8226_v29  ;;  %v3521_v12 = vmul.f32 %v14480_v47, %v14480_v47  ;;  %v14484_v27 = vld [vmem:[%s14973_s5 + $0x340] sm:$0xff]   ;;  %v14485_v47 = vld [vmem:[%s14965_s24 + $0xc] sm:$0x1] }
 0x5c1   : > { %14067 = vrcp.f32 %v7025_v9  ;;  %v4029_v51 = vmul.f32 %v8193_v38, %v8193_v38  ;;  %v3525_v14 = vmul.f32 %v14481_v39, %v14481_v39  ;;  %v3529_v13 = vmul.f32 %v14482_v17, %v14482_v17  ;;  %v14487_v39 = vld [vmem:[%s14973_s5 + $0x348] sm:$0xff]  }
 0x5c2   : > { %14069 = vrcp.f32 %v7026_v16  ;;  %v8229_v57 = vunpack.c.l.bf16 %v14483_v21  ;;  %v8230_v42 = vunpack.c.h.bf16 %v14483_v21  ;;  %v8261_v38 = vunpack.c.l.bf16 %v14484_v27 }
 0x5c3   : > { %13475 = vmatpush3.bf16.xpose.msra.mxu0 %v13474_v18  ;;  %13499 = vmatpush3.bf16.xpose.msra.mxu1 %v13498_v1  ;;  %v3592_v1 = vsel %vm3534_vm1, %v3521_v12, 0.0  ;;  %v3604_v16 = vsel %vm3534_vm1, %v3525_v14, 0.0  ;;  %v8262_v58 = vunpack.c.h.bf16 %v14484_v27  ;;  %v13480_v45 = vpack.c.bf16 %v4030_v19, %v4029_v51  ;;  %v14486_v19 = vld [vmem:[%s14973_s5 + $0x308] sm:$0xff]  }
 0x5c4   : > { %13476 = vmatprep.subr.bf16.mxu0 %v17163_v61  ;;  %13500 = vmatprep.subr.bf16.mxu1 %v17163_v61  ;;  %v16006_v9 = vpop.xlane.xlu0 %3608  ;;  %v3616_v55 = vsel %vm3534_vm1, %v3529_v13, 0.0  ;;  %v4047_v29 = vmul.f32 %v8229_v57, %v8229_v57  ;;  %v3514_v12 = vmul.f32 %v14485_v47, %v14485_v47  ;;  %v8265_v14 = vunpack.c.l.bf16 %v14487_v39 }
 0x5c5   : > { %17168 = vst [vmem:[#allocation23_spill] sm:$0xff] %v16006_v9  ;;  %3593 = vadd.xlane.f32.xlu1 %v3592_v1  ;;  %3605 = vadd.xlane.f32.xlu0 %v3604_v16  ;;  %v8266_v17 = vunpack.c.h.bf16 %v14487_v39  ;;  %v14488_v1 = vld [vmem:[%s14965_s24 + $0x1c] sm:$0x1] }
 0x5c6   : > { %v3571_v51 = vsel %vm3534_vm1, %v3514_v12, 0.0  ;;  %v3530_v16 = vmul.f32 %v14488_v1, %v14488_v1  ;;  %v4065_v27 = vmul.f32 %v8265_v14, %v8265_v14 }
 0x5c9   : > { %3617 = vadd.xlane.f32.xlu1 %v3616_v55  ;;  %v14490_v55 = vld [vmem:[%s14973_s5 + $0x310] sm:$0xff]  }
 0x5cb   : > { %v14068_v53 = vpop.eup %14067  ;;  %13478 = vmatpush3.bf16.xpose.msra.mxu0 %v13477_v54  ;;  %13502 = vmatpush3.bf16.xpose.msra.mxu1 %v13501_v52  ;;  %v4048_v54 = vmul.f32 %v8230_v42, %v8230_v42  ;;  %v16019_v52 = vpop.xlane.xlu0 %3548 }
 0x5cc   : > { %v14070_v22 = vpop.eup %14069  ;;  %13479 = vmatprep.subr.bf16.mxu0 %v17163_v61  ;;  %13503 = vmatprep.subr.bf16.mxu1 %v17163_v61  ;;  %v16009_v18 = vmul.f32 %v14068_v53, %v15191_v40  ;;  %v13504_v40 = vpack.c.bf16 %v4046_v56, %v4045_v44  ;;  %v4064_v53 = vmul.f32 %v8262_v58, %v8262_v58  ;;  %v8233_v44 = vunpack.c.l.bf16 %v14486_v19 }
 0x5cd   : > { %v16014_v20 = vmul.f32 %v14070_v22, %v15193_v41  ;;  %v4063_v41 = vmul.f32 %v8261_v38, %v8261_v38  ;;  %v8234_v56 = vunpack.c.h.bf16 %v14486_v19  ;;  %3572 = vadd.xlane.f32.xlu1 %v3571_v51  ;;  %v13507_v22 = vpack.c.bf16 %v4048_v54, %v4047_v29 }
 0x5ce   : > { %v4049_v57 = vmul.f32 %v8233_v44, %v8233_v44  ;;  %v4066_v38 = vmul.f32 %v8266_v17, %v8266_v17  ;;  %v3619_v58 = vsel %vm3534_vm1, %v3530_v16, 0.0  ;;  %v8237_v29 = vunpack.c.l.bf16 %v14490_v55  ;;  %v14493_v16 = vld [vmem:[%s14973_s5 + $0x358] sm:$0xff]  }
 0x5cf   : > { %v13531_v13 = vpack.c.bf16 %v4064_v53, %v4063_v41  ;;  %v16028_v21 = vpop.xlane.xlu0 %3596  ;;  %v4050_v42 = vmul.f32 %v8234_v56, %v8234_v56  ;;  %v8238_v54 = vunpack.c.h.bf16 %v14490_v55  ;;  %v14491_v41 = vld [vmem:[%s14973_s5 + $0x350] sm:$0xff]   ;;  %14071 = vrsqrt.f32 %v16019_v52 }
 0x5d0   : > { %v8269_v53 = vunpack.c.l.bf16 %v14491_v41  ;;  %v8270_v47 = vunpack.c.h.bf16 %v14491_v41  ;;  %v13534_v51 = vpack.c.bf16 %v4066_v38, %v4065_v27  ;;  %v4051_v56 = vmul.f32 %v8237_v29, %v8237_v29 }
 0x5d1   : > { %3620 = vadd.xlane.f32.xlu1 %v3619_v58  ;;  %v13510_v19 = vpack.c.bf16 %v4050_v42, %v4049_v57  ;;  %v4052_v39 = vmul.f32 %v8238_v54, %v8238_v54  ;;  %v8273_v57 = vunpack.c.l.bf16 %v14493_v16  ;;  %v8274_v42 = vunpack.c.h.bf16 %v14493_v16 }
 0x5d2   : > { %v4067_v14 = vmul.f32 %v8269_v53, %v8269_v53  ;;  %v4068_v17 = vmul.f32 %v8270_v47, %v8270_v47  ;;  %v14494_v53 = vld [vmem:[%s14973_s5 + $0x320] sm:$0xff]   ;;  %vm3661_vm4 = vcmp.eq.f32.partialorder %v16019_v52, inf  ;;  %vm3663_vm6 = vcmp.eq.f32.partialorder %v16019_v52, 0.0 }
 0x5d3   : > { %13481 = vmatpush3.bf16.xpose.msra.mxu0 %v13480_v45  ;;  %13505 = vmatpush3.bf16.xpose.msra.mxu1 %v13504_v40  ;;  %v14489_v45 = vld [vmem:[%s14965_s24 + $0xd] sm:$0x1]  ;;  %v16042_v12 = vpop.xlane.xlu0 %3551  ;;  %v13513_v38 = vpack.c.bf16 %v4052_v39, %v4051_v56  ;;  %v4069_v29 = vmul.f32 %v8273_v57, %v8273_v57  ;;  %v4070_v54 = vmul.f32 %v8274_v42, %v8274_v42  ;;  %v8245_v47 = vunpack.c.l.bf16 %v14494_v53 }
 0x5d4   : > { %13506 = vmatprep.subr.bf16.mxu0 %v17163_v61  ;;  %13530 = vmatprep.subr.bf16.mxu1 %v17163_v61  ;;  %v3515_v40 = vmul.f32 %v14489_v45, %v14489_v45  ;;  %14073 = vrsqrt.f32 %v16042_v12  ;;  %v13537_v27 = vpack.c.bf16 %v4068_v17, %v4067_v14  ;;  %v3664_v17 = vand.u32 2147483648, %v16019_v52 }
 0x5d5   : > { %vm3668_vm5 = vcmp.eq.f32.partialorder %v16042_v12, inf  ;;  %v13540_v57 = vpack.c.bf16 %v4070_v54, %v4069_v29  ;;  %vm3670_vm7 = vcmp.eq.f32.partialorder %v16042_v12, 0.0  ;;  %v14497_v29 = vld [vmem:[%s14973_s5 + $0x368] sm:$0xff]  }
 0x5d6   : > { %v3574_v44 = vsel %vm3534_vm1, %v3515_v40, 0.0  ;;  %v8281_v54 = vunpack.c.l.bf16 %v14497_v29 }
 0x5d7   : > { %3575 = vadd.xlane.f32.xlu1 %v3574_v44 }
 0x5d9   : > { %v14072_v58 = vpop.eup %14071 }
 0x5da   : > { %11713 = vmatmul.mubr.f32.vlgmr.msra.gmra.mrb[42].mxu0 %v17166_v5  ;;  %11748 = vmatmul.mubr.f32.vlgmr.msra.gmra.mrb[42].mxu1 %v17166_v5  ;;  %v3660_v41 = vmul.f32 %v14072_v58, %v16019_v52 }
 0x5db   : > { %13532 = vmatpush3.bf16.xpose.msra.mxu1 %v13531_v13  ;;  %13508 = vmatpush3.bf16.xpose.msra.mxu0 %v13507_v22  ;;  %v14492_v13 = vld [vmem:[%s14973_s5 + $0x318] sm:$0xff]  }
 0x5dc   : > { %13509 = vmatprep.subr.bf16.mxu0 %v17163_v61  ;;  %13533 = vmatprep.subr.bf16.mxu1 %v17163_v61  ;;  %v8241_v22 = vunpack.c.l.bf16 %v14492_v13  ;;  %v8242_v1 = vunpack.c.h.bf16 %v14492_v13  ;;  %v3662_v42 = vsel %vm3661_vm4, %v16019_v52, %v3660_v41  ;;  %v8282_v41 = vunpack.c.h.bf16 %v14497_v29 }
 0x5dd   : > { %11782 = vmatprep.mubr.msk.f32.mxu0 %vm14790_vm0, %v17167_v4  ;;  %11817 = vmatprep.mubr.msk.f32.mxu1 %vm14790_vm0, %v17167_v4 }
 0x5de   : > { %v4053_v45 = vmul.f32 %v8241_v22, %v8241_v22  ;;  %v14074_v40 = vpop.eup %14073  ;;  %v4054_v55 = vmul.f32 %v8242_v1, %v8242_v1 }
 0x5df   : > { %v3667_v13 = vmul.f32 %v14074_v40, %v16042_v12 }
 0x5e0   : > { %v13516_v16 = vpack.c.bf16 %v4054_v55, %v4053_v45  ;;  %v14496_v45 = vld [vmem:[%s14973_s5 + $0x328] sm:$0xff]  }
 0x5e1   : > { %v3669_v40 = vsel %vm3668_vm5, %v16042_v12, %v3667_v13  ;;  %v8249_v55 = vunpack.c.l.bf16 %v14496_v45  ;;  %v8250_v52 = vunpack.c.h.bf16 %v14496_v45 }
 0x5e3   : > { %13535 = vmatpush3.bf16.xpose.msra.mxu1 %v13534_v51  ;;  %13511 = vmatpush3.bf16.xpose.msra.mxu0 %v13510_v19  ;;  %v8246_v51 = vunpack.c.h.bf16 %v14494_v53  ;;  %v14495_v19 = vld [vmem:[%s14973_s5 + $0x360] sm:$0xff]  }
 0x5e4   : > { %13512 = vmatprep.subr.bf16.mxu0 %v17163_v61  ;;  %13536 = vmatprep.subr.bf16.mxu1 %v17163_v61  ;;  %v8277_v44 = vunpack.c.l.bf16 %v14495_v19  ;;  %v8278_v14 = vunpack.c.h.bf16 %v14495_v19 }
 0x5e5   : > { %v4056_v58 = vmul.f32 %v8246_v51, %v8246_v51 }
 0x5e6   : > { %v4071_v53 = vmul.f32 %v8277_v44, %v8277_v44  ;;  %v4072_v19 = vmul.f32 %v8278_v14, %v8278_v14  ;;  %v4057_v44 = vmul.f32 %v8249_v55, %v8249_v55 }
 0x5eb   : > { %13538 = vmatpush3.bf16.xpose.msra.mxu1 %v13537_v27  ;;  %13514 = vmatpush3.bf16.xpose.msra.mxu0 %v13513_v38  ;;  %v3671_v27 = vand.u32 2147483648, %v16042_v12  ;;  %v4055_v38 = vmul.f32 %v8245_v47, %v8245_v47 }
 0x5ec   : > { %13515 = vmatprep.subr.bf16.mxu0 %v17163_v61  ;;  %13539 = vmatprep.subr.bf16.mxu1 %v17163_v61 }
 0x5ed   : > { %v4713_v56 = vpop.f32.mrb[36].mxu0  ;;  %v4783_v39 = vpop.f32.mrb[36].mxu1  ;;  %v3672_v47 = vsel %vm3670_vm7, %v3671_v27, %v3669_v40  ;;  %v13519_v13 = vpack.c.bf16 %v4056_v58, %v4055_v38  ;;  %vm7155_vm7 = vcmask 1042434  }
 0x5ee   : > { %14075 = vrsqrt.f32 %v4713_v56  ;;  %v11504_v22 = vpop.f32.mrb[37].mxu0  ;;  %v11539_v1 = vpop.f32.mrb[37].mxu1  ;;  %v6868_v14 = vadd.f32 1e-13, %v3672_v47  ;;  %vm6637_vm8 = vcmp.eq.f32.partialorder %v4713_v56, inf  ;;  %v6640_v9 = vand.u32 2147483648, %v4713_v56 }
 0x5ef   : > { %14077 = vrsqrt.f32 %v4783_v39  ;;  %v3665_v22 = vsel %vm3663_vm6, %v3664_v17, %v3662_v42  ;;  %v13543_v1 = vpack.c.bf16 %v4072_v19, %v4071_v53  ;;  %v4074_v42 = vmul.f32 %v8282_v41, %v8282_v41 }
 0x5f0   : > { %v6867_v51 = vadd.f32 1e-13, %v3665_v22  ;;  %vm6639_vm9 = vcmp.eq.f32.partialorder %v4713_v56, 0.0  ;;  %vm6644_vm10 = vcmp.eq.f32.partialorder %v4783_v39, inf  ;;  %v6647_v27 = vand.u32 2147483648, %v4783_v39  ;;  %v14498_v22 = vld [vmem:[%s14973_s5 + $0x330] sm:$0xff]  }
 0x5f1   : > { %v6918_v38 = vrot.slane %v6868_v14, %v15910_v46  ;;  %vm6646_vm11 = vcmp.eq.f32.partialorder %v4783_v39, 0.0  ;;  %v8253_v55 = vunpack.c.l.bf16 %v14498_v22  ;;  %vm7152_vm6 = vcmask 1041409  }
 0x5f2   : > { %v6914_v34 = vrot.slane %v6867_v51, %v15910_v46 }
 0x5f3   : > { %13517 = vmatpush3.bf16.xpose.msra.mxu0 %v13516_v16  ;;  %13541 = vmatpush3.bf16.xpose.msra.mxu1 %v13540_v57  ;;  %v4058_v16 = vmul.f32 %v8250_v52, %v8250_v52  ;;  %v4073_v57 = vmul.f32 %v8281_v54, %v8281_v54 }
 0x5f4   : > { %13518 = vmatprep.subr.bf16.mxu0 %v17163_v61  ;;  %13542 = vmatprep.subr.bf16.mxu1 %v17163_v61 }
 0x5f5   : > { %v13522_v47 = vpack.c.bf16 %v4058_v16, %v4057_v44  ;;  %v14501_v44 = vld [vmem:[%s14973_s5 + $0x378] sm:$0xff]  }
 0x5f6   : > { %v8290_v16 = vunpack.c.h.bf16 %v14501_v44 }
 0x5f8   : > { %v14076_v12 = vpop.eup %14075 }
 0x5f9   : > { %v14078_v17 = vpop.eup %14077  ;;  %v6636_v15 = vmul.f32 %v14076_v12, %v4713_v56  ;;  %v14500_v12 = vld [vmem:[%s14973_s5 + $0x338] sm:$0xff]  }
 0x5fa   : > { %v6643_v45 = vmul.f32 %v14078_v17, %v4783_v39  ;;  %v8257_v14 = vunpack.c.l.bf16 %v14500_v12  ;;  %v8289_v17 = vunpack.c.l.bf16 %v14501_v44 }
 0x5fb   : > { %v6638_v7 = vsel %vm6637_vm8, %v4713_v56, %v6636_v15  ;;  %13520 = vmatpush3.bf16.xpose.msra.mxu0 %v13519_v13  ;;  %13544 = vmatpush3.bf16.xpose.msra.mxu1 %v13543_v1  ;;  %v8254_v15 = vunpack.c.h.bf16 %v14498_v22  ;;  %v14499_v56 = vld [vmem:[%s14973_s5 + $0x370] sm:$0xff]   ;;  %vm7158_vm8 = vcmask 1043459  }
 0x5fc   : > { %v6641_v58 = vsel %vm6639_vm9, %v6640_v9, %v6638_v7  ;;  %v6645_v40 = vsel %vm6644_vm10, %v4783_v39, %v6643_v45  ;;  %13521 = vmatprep.subr.bf16.mxu0 %v17163_v61  ;;  %13545 = vmatprep.subr.bf16.mxu1 %v17163_v61  ;;  %v8285_v52 = vunpack.c.l.bf16 %v14499_v56  ;;  %v8286_v54 = vunpack.c.h.bf16 %v14499_v56 }
 0x5fd   : > { %v6835_v53 = vadd.f32 1e-13, %v6641_v58  ;;  %v6648_v19 = vsel %vm6646_vm11, %v6647_v27, %v6645_v40  ;;  %v13546_v7 = vpack.c.bf16 %v4074_v42, %v4073_v57  ;;  %v4059_v39 = vmul.f32 %v8253_v55, %v8253_v55  ;;  %v16082_v55 = vpop.xlane.xlu0 %3599 }
 0x5fe   : > { %v6836_v29 = vadd.f32 1e-13, %v6648_v19  ;;  %v4060_v51 = vmul.f32 %v8254_v15, %v8254_v15  ;;  %v4075_v13 = vmul.f32 %v8285_v52, %v8285_v52  ;;  %v4076_v1 = vmul.f32 %v8286_v54, %v8286_v54 }
 0x5ff   : > { %v7027_v41 = vmul.f32 %v6914_v34, %v6835_v53  ;;  %v8258_v34 = vunpack.c.h.bf16 %v14500_v12  ;;  %v4061_v45 = vmul.f32 %v8257_v14, %v8257_v14  ;;  %v4077_v58 = vmul.f32 %v8289_v17, %v8289_v17  ;;  %v14502_v53 = vld [vmem:[%s14965_s24 + $0x1d] sm:$0x1]  ;;  %v14505_v14 = vld [vmem:[%s14965_s24 + $0xe] sm:$0x1] }
 0x600   : > { %v7028_v9 = vmul.f32 %v6918_v38, %v6836_v29  ;;  %v13525_v57 = vpack.c.bf16 %v4060_v51, %v4059_v39  ;;  %v13549_v42 = vpack.c.bf16 %v4076_v1, %v4075_v13  ;;  %v4078_v40 = vmul.f32 %v8290_v16, %v8290_v16  ;;  %v14503_v29 = vld [vmem:[%s14973_s5 + $0x380] sm:$0xff]   ;;  %v14506_v17 = vld [vmem:[%s14973_s5 + $0x388] sm:$0xff]  }
 0x601   : > { %14079 = vrcp.f32 %v7027_v41  ;;  %v4062_v27 = vmul.f32 %v8258_v34, %v8258_v34  ;;  %v3531_v19 = vmul.f32 %v14502_v53, %v14502_v53  ;;  %v8293_v54 = vunpack.c.l.bf16 %v14503_v29  ;;  %v16093_v1 = vpop.xlane.xlu0 %3554 }
 0x602   : > { %14081 = vrcp.f32 %v7028_v9  ;;  %v8294_v41 = vunpack.c.h.bf16 %v14503_v29  ;;  %v13552_v51 = vpack.c.bf16 %v4078_v40, %v4077_v58  ;;  %v3516_v34 = vmul.f32 %v14505_v14, %v14505_v14  ;;  %v14508_v40 = vld [vmem:[%s14965_s24 + $0x1e] sm:$0x1] }
 0x603   : > { %13523 = vmatpush3.bf16.xpose.msra.mxu0 %v13522_v47  ;;  %13547 = vmatpush3.bf16.xpose.msra.mxu1 %v13546_v7  ;;  %v3622_v52 = vsel %vm3534_vm1, %v3531_v19, 0.0  ;;  %v14504_v47 = vld [vmem:[%s14973_s5 + $0x3c0] sm:$0xff]   ;;  %v13528_v39 = vpack.c.bf16 %v4062_v27, %v4061_v45  ;;  %v4079_v13 = vmul.f32 %v8293_v54, %v8293_v54  ;;  %v8297_v16 = vunpack.c.l.bf16 %v14506_v17 }
 0x604   : > { %13524 = vmatprep.subr.bf16.mxu0 %v17163_v61  ;;  %13548 = vmatprep.subr.bf16.mxu1 %v17163_v61  ;;  %v8325_v7 = vunpack.c.l.bf16 %v14504_v47  ;;  %v8326_v9 = vunpack.c.h.bf16 %v14504_v47  ;;  %v3577_v44 = vsel %vm3534_vm1, %v3516_v34, 0.0  ;;  %v3532_v53 = vmul.f32 %v14508_v40, %v14508_v40  ;;  %v14509_v47 = vld [vmem:[%s14965_s24 + $0xf] sm:$0x1] }
 0x605   : > { %3623 = vadd.xlane.f32.xlu1 %v3622_v52  ;;  %v16102_v19 = vpop.xlane.xlu0 %3602  ;;  %14083 = vrsqrt.f32 %v16093_v1  ;;  %vm3675_vm12 = vcmp.eq.f32.partialorder %v16093_v1, inf  ;;  %vm3677_vm14 = vcmp.eq.f32.partialorder %v16093_v1, 0.0  ;;  %vm7161_vm9 = vcmask 1044484  }
 0x606   : > { %v4096_v12 = vmul.f32 %v8326_v9, %v8326_v9  ;;  %17169 = vst [vmem:[#allocation24_spill] sm:$0xff] %v16102_v19  ;;  %v14510_v9 = vld [vmem:[%s14973_s5 + $0x390] sm:$0xff]   ;;  %vm7164_vm10 = vcmask 1045509   ;;  %vm7167_vm11 = vcmask 1046534  }
 0x609   : > { %3578 = vadd.xlane.f32.xlu1 %v3577_v44 }
 0x60b   : > { %v14080_v38 = vpop.eup %14079  ;;  %13526 = vmatpush3.bf16.xpose.msra.mxu0 %v13525_v57  ;;  %13550 = vmatpush3.bf16.xpose.msra.mxu1 %v13549_v42  ;;  %v8298_v57 = vunpack.c.h.bf16 %v14506_v17  ;;  %v14507_v42 = vld [vmem:[%s14973_s5 + $0x3c8] sm:$0xff]  }
 0x60c   : > { %v14082_v22 = vpop.eup %14081  ;;  %13527 = vmatprep.subr.bf16.mxu0 %v17163_v61  ;;  %13551 = vmatprep.subr.bf16.mxu1 %v17163_v61  ;;  %v16085_v15 = vmul.f32 %v14080_v38, %v15233_v62  ;;  %v4080_v62 = vmul.f32 %v8294_v41, %v8294_v41  ;;  %v8329_v45 = vunpack.c.l.bf16 %v14507_v42  ;;  %v8330_v27 = vunpack.c.h.bf16 %v14507_v42 }
 0x60d   : > { %v16088_v56 = vmul.f32 %v14082_v22, %v15235_v63  ;;  %v4095_v63 = vmul.f32 %v8325_v7, %v8325_v7  ;;  %v4081_v22 = vmul.f32 %v8297_v16, %v8297_v16  ;;  %v4082_v52 = vmul.f32 %v8298_v57, %v8298_v57 }
 0x60e   : > { %v13555_v38 = vpack.c.bf16 %v4080_v62, %v4079_v13  ;;  %v4097_v29 = vmul.f32 %v8329_v45, %v8329_v45  ;;  %v4098_v54 = vmul.f32 %v8330_v27, %v8330_v27  ;;  %v3625_v41 = vsel %vm3534_vm1, %v3532_v53, 0.0  ;;  %v14511_v13 = vld [vmem:[%s14973_s5 + $0x3d0] sm:$0xff]   ;;  %v14512_v45 = vld [vmem:[%s14973_s5 + $0x398] sm:$0xff]  }
 0x60f   : > { %v13579_v58 = vpack.c.bf16 %v4096_v12, %v4095_v63  ;;  %v3517_v7 = vmul.f32 %v14509_v47, %v14509_v47  ;;  %v8333_v62 = vunpack.c.l.bf16 %v14511_v13  ;;  %v8334_v63 = vunpack.c.h.bf16 %v14511_v13  ;;  %v16116_v12 = vpop.xlane.xlu0 %3557  ;;  %3626 = vadd.xlane.f32.xlu1 %v3625_v41 }
 0x610   : > { %v13582_v14 = vpack.c.bf16 %v4098_v54, %v4097_v29  ;;  %v13558_v34 = vpack.c.bf16 %v4082_v52, %v4081_v22  ;;  %14085 = vrsqrt.f32 %v16116_v12  ;;  %v8305_v27 = vunpack.c.l.bf16 %v14512_v45  ;;  %v14084_v29 = vpop.eup %14083 }
 0x611   : > { %v3580_v44 = vsel %vm3534_vm1, %v3517_v7, 0.0  ;;  %v4099_v57 = vmul.f32 %v8333_v62, %v8333_v62  ;;  %v4100_v42 = vmul.f32 %v8334_v63, %v8334_v63  ;;  %v14515_v63 = vld [vmem:[%s14973_s5 + $0x3e0] sm:$0xff]   ;;  %vm3682_vm13 = vcmp.eq.f32.partialorder %v16116_v12, inf }
 0x612   : > { %v4085_v54 = vmul.f32 %v8305_v27, %v8305_v27  ;;  %vm3684_vm15 = vcmp.eq.f32.partialorder %v16116_v12, 0.0 }
 0x613   : > { %13529 = vmatpush3.bf16.xpose.msra.mxu0 %v13528_v39  ;;  %13553 = vmatpush3.bf16.xpose.msra.mxu1 %v13552_v51  ;;  %v8301_v39 = vunpack.c.l.bf16 %v14510_v9  ;;  %v8302_v51 = vunpack.c.h.bf16 %v14510_v9  ;;  %v13585_v22 = vpack.c.bf16 %v4100_v42, %v4099_v57 }
 0x614   : > { %13554 = vmatprep.subr.bf16.mxu0 %v17163_v61  ;;  %13578 = vmatprep.subr.bf16.mxu1 %v17163_v61 }
 0x615   : > { %v4083_v17 = vmul.f32 %v8301_v39, %v8301_v39  ;;  %3581 = vadd.xlane.f32.xlu1 %v3580_v44  ;;  %v4084_v16 = vmul.f32 %v8302_v51, %v8302_v51  ;;  %v3674_v39 = vmul.f32 %v14084_v29, %v16093_v1  ;;  %v14514_v51 = vld [vmem:[%s14973_s5 + $0x3a0] sm:$0xff]  }
 0x616   : > { %v8309_v13 = vunpack.c.l.bf16 %v14514_v51  ;;  %v8310_v62 = vunpack.c.h.bf16 %v14514_v51 }
 0x617   : > { %v13561_v52 = vpack.c.bf16 %v4084_v16, %v4083_v17  ;;  %v8342_v17 = vunpack.c.h.bf16 %v14515_v63  ;;  %v3678_v16 = vand.u32 2147483648, %v16093_v1 }
 0x61a   : > { %11783 = vmatmul.mubr.f32.vlgmr.msra.gmra.mrb[44].mxu0 %v17166_v5  ;;  %11818 = vmatmul.mubr.f32.vlgmr.msra.gmra.mrb[44].mxu1 %v17166_v5  ;;  %v14086_v41 = vpop.eup %14085 }
 0x61b   : > { %13556 = vmatpush3.bf16.xpose.msra.mxu0 %v13555_v38  ;;  %13580 = vmatpush3.bf16.xpose.msra.mxu1 %v13579_v58  ;;  %v8306_v38 = vunpack.c.h.bf16 %v14512_v45  ;;  %v14513_v58 = vld [vmem:[%s14973_s5 + $0x3d8] sm:$0xff]   ;;  %v3681_v57 = vmul.f32 %v14086_v41, %v16116_v12  ;;  %v4104_v41 = vmul.f32 %v8342_v17, %v8342_v17 }
 0x61c   : > { %13557 = vmatprep.subr.bf16.mxu0 %v17163_v61  ;;  %13581 = vmatprep.subr.bf16.mxu1 %v17163_v61  ;;  %v8337_v40 = vunpack.c.l.bf16 %v14513_v58  ;;  %v8338_v53 = vunpack.c.h.bf16 %v14513_v58  ;;  %v3676_v58 = vsel %vm3675_vm12, %v16093_v1, %v3674_v39  ;;  %vm7170_vm12 = vcmask 1047559  }
 0x61d   : > { %11852 = vmatprep.mubr.msk.f32.mxu0 %vm14790_vm0, %v17167_v4  ;;  %11887 = vmatprep.mubr.msk.f32.mxu1 %vm14790_vm0, %v17167_v4  ;;  %v4086_v47 = vmul.f32 %v8306_v38, %v8306_v38  ;;  %v3679_v51 = vsel %vm3677_vm14, %v3678_v16, %v3676_v58  ;;  %vm3696_vm14 = vcmp.eq.f32.partialorder %v15857_v26, inf }
 0x61e   : > { %v4101_v7 = vmul.f32 %v8337_v40, %v8337_v40  ;;  %v4102_v9 = vmul.f32 %v8338_v53, %v8338_v53  ;;  %v3685_v40 = vand.u32 2147483648, %v16116_v12  ;;  %v4087_v53 = vmul.f32 %v8309_v13, %v8309_v13 }
 0x61f   : > { %v13564_v27 = vpack.c.bf16 %v4086_v47, %v4085_v54  ;;  %v14516_v54 = vld [vmem:[%s14973_s5 + $0x3a8] sm:$0xff]  }
 0x620   : > { %v13588_v38 = vpack.c.bf16 %v4102_v9, %v4101_v7  ;;  %v8313_v47 = vunpack.c.l.bf16 %v14516_v54  ;;  %v8314_v1 = vunpack.c.h.bf16 %v14516_v54  ;;  %v14517_v7 = vld [vmem:[%s14973_s5 + $0x3e8] sm:$0xff]  }
 0x621   : > { %v8345_v9 = vunpack.c.l.bf16 %v14517_v7  ;;  %v8346_v39 = vunpack.c.h.bf16 %v14517_v7 }
 0x623   : > { %13583 = vmatpush3.bf16.xpose.msra.mxu1 %v13582_v14  ;;  %13559 = vmatpush3.bf16.xpose.msra.mxu0 %v13558_v34  ;;  %v8341_v14 = vunpack.c.l.bf16 %v14515_v63 }
 0x624   : > { %13560 = vmatprep.subr.bf16.mxu0 %v17163_v61  ;;  %13584 = vmatprep.subr.bf16.mxu1 %v17163_v61 }
 0x625   : > { %v4103_v29 = vmul.f32 %v8341_v14, %v8341_v14  ;;  %v4089_v14 = vmul.f32 %v8313_v47, %v8313_v47 }
 0x62b   : > { %13586 = vmatpush3.bf16.xpose.msra.mxu1 %v13585_v22  ;;  %13562 = vmatpush3.bf16.xpose.msra.mxu0 %v13561_v52  ;;  %v4088_v22 = vmul.f32 %v8310_v62, %v8310_v62  ;;  %v3683_v52 = vsel %vm3682_vm13, %v16116_v12, %v3681_v57  ;;  %v6869_v62 = vadd.f32 1e-13, %v3679_v51  ;;  %v13591_v57 = vpack.c.bf16 %v4104_v41, %v4103_v29  ;;  %v14518_v51 = vld [vmem:[%s14973_s5 + $0x3b0] sm:$0xff]  }
 0x62c   : > { %13563 = vmatprep.subr.bf16.mxu0 %v17163_v61  ;;  %13587 = vmatprep.subr.bf16.mxu1 %v17163_v61  ;;  %v3686_v13 = vsel %vm3684_vm15, %v3685_v40, %v3683_v52  ;;  %v8317_v47 = vunpack.c.l.bf16 %v14518_v51  ;;  %vm3689_vm13 = vcmp.eq.f32.partialorder %v15993_v50, inf  ;;  %vm3691_vm15 = vcmp.eq.f32.partialorder %v15993_v50, 0.0 }
 0x62d   : > { %v4853_v34 = vpop.f32.mrb[38].mxu0  ;;  %v4923_v44 = vpop.f32.mrb[38].mxu1  ;;  %v13567_v63 = vpack.c.bf16 %v4088_v22, %v4087_v53  ;;  %v6870_v17 = vadd.f32 1e-13, %v3686_v13  ;;  %v6922_v58 = vrot.slane %v6869_v62, %v15910_v46 }
 0x62e   : > { %14087 = vrsqrt.f32 %v4853_v34  ;;  %v11574_v42 = vpop.f32.mrb[39].mxu0  ;;  %v11609_v45 = vpop.f32.mrb[39].mxu1  ;;  %vm6651_vm2 = vcmp.eq.f32.partialorder %v4853_v34, inf  ;;  %v6654_v6 = vand.u32 2147483648, %v4853_v34  ;;  %vm6653_vm3 = vcmp.eq.f32.partialorder %v4853_v34, 0.0 }
 0x62f   : > { %14089 = vrsqrt.f32 %v4923_v44  ;;  %v4090_v42 = vmul.f32 %v8314_v1, %v8314_v1  ;;  %v4105_v45 = vmul.f32 %v8345_v9, %v8345_v9  ;;  %vm6658_vm4 = vcmp.eq.f32.partialorder %v4923_v44, inf }
 0x630   : > { %v6661_v40 = vand.u32 2147483648, %v4923_v44  ;;  %v6926_v53 = vrot.slane %v6870_v17, %v15910_v46  ;;  %vm6660_vm5 = vcmp.eq.f32.partialorder %v4923_v44, 0.0  ;;  %v8318_v1 = vunpack.c.h.bf16 %v14518_v51 }
 0x631   : > { %v13570_v62 = vpack.c.bf16 %v4090_v42, %v4089_v14  ;;  %v7151_v17 = vrot.slane %v15937_v35, 7  ;;  %v7154_v14 = vrot.slane %v16009_v18, 6 }
 0x633   : > { %13565 = vmatpush3.bf16.xpose.msra.mxu0 %v13564_v27  ;;  %13589 = vmatpush3.bf16.xpose.msra.mxu1 %v13588_v38  ;;  %v4106_v27 = vmul.f32 %v8346_v39, %v8346_v39 }
 0x634   : > { %13566 = vmatprep.subr.bf16.mxu0 %v17163_v61  ;;  %13590 = vmatprep.subr.bf16.mxu1 %v17163_v61 }
 0x638   : > { %v14088_v12 = vpop.eup %14087 }
 0x639   : > { %v14090_v16 = vpop.eup %14089  ;;  %v6650_v38 = vmul.f32 %v14088_v12, %v4853_v34 }
 0x63a   : > { %v6657_v54 = vmul.f32 %v14090_v16, %v4923_v44  ;;  %v14520_v16 = vld [vmem:[%s14973_s5 + $0x3b8] sm:$0xff]  }
 0x63b   : > { %v6652_v19 = vsel %vm6651_vm2, %v4853_v34, %v6650_v38  ;;  %13568 = vmatpush3.bf16.xpose.msra.mxu0 %v13567_v63  ;;  %13592 = vmatpush3.bf16.xpose.msra.mxu1 %v13591_v57  ;;  %v14519_v34 = vld [vmem:[%s14973_s5 + $0x3f0] sm:$0xff]   ;;  %v13594_v63 = vpack.c.bf16 %v4106_v27, %v4105_v45  ;;  %v8321_v42 = vunpack.c.l.bf16 %v14520_v16  ;;  %v8322_v45 = vunpack.c.h.bf16 %v14520_v16  ;;  %v14521_v27 = vld [vmem:[%s14973_s5 + $0x3f8] sm:$0xff]  }
 0x63c   : > { %v6655_v22 = vsel %vm6653_vm3, %v6654_v6, %v6652_v19  ;;  %v6659_v52 = vsel %vm6658_vm4, %v4923_v44, %v6657_v54  ;;  %13569 = vmatprep.subr.bf16.mxu0 %v17163_v61  ;;  %13593 = vmatprep.subr.bf16.mxu1 %v17163_v61  ;;  %v8349_v7 = vunpack.c.l.bf16 %v14519_v34  ;;  %v8350_v39 = vunpack.c.h.bf16 %v14519_v34 }
 0x63d   : > { %v6837_v29 = vadd.f32 1e-13, %v6655_v22  ;;  %v6662_v41 = vsel %vm6660_vm5, %v6661_v40, %v6659_v52  ;;  %v4091_v19 = vmul.f32 %v8317_v47, %v8317_v47  ;;  %v4092_v44 = vmul.f32 %v8318_v1, %v8318_v1 }
 0x63e   : > { %v6838_v9 = vadd.f32 1e-13, %v6662_v41  ;;  %v4107_v57 = vmul.f32 %v8349_v7, %v8349_v7  ;;  %v4108_v12 = vmul.f32 %v8350_v39, %v8350_v39  ;;  %v8353_v38 = vunpack.c.l.bf16 %v14521_v27 }
 0x63f   : > { %v7029_v13 = vmul.f32 %v6922_v58, %v6837_v29  ;;  %v8354_v58 = vunpack.c.h.bf16 %v14521_v27  ;;  %v13573_v54 = vpack.c.bf16 %v4092_v44, %v4091_v19  ;;  %v7157_v22 = vrot.slane %v16014_v20, 5 }
 0x640   : > { %v7030_v6 = vmul.f32 %v6926_v53, %v6838_v9  ;;  %v13597_v40 = vpack.c.bf16 %v4108_v12, %v4107_v57  ;;  %v7153_v53 = vsel %vm7152_vm6, %v7151_v17, %v15934_v28  ;;  %v7160_v29 = vrot.slane %v16085_v15, 4  ;;  %v14523_v57 = vld [vmem:[%s14973_s5 + $0x440] sm:$0xff]  }
 0x641   : > { %14091 = vrcp.f32 %v7029_v13  ;;  %v7156_v52 = vsel %vm7155_vm7, %v7154_v14, %v7153_v53  ;;  %v4093_v41 = vmul.f32 %v8321_v42, %v8321_v42  ;;  %v4094_v51 = vmul.f32 %v8322_v45, %v8322_v45  ;;  %v14524_v53 = vld [vmem:[%s14973_s5 + $0x408] sm:$0xff]  }
 0x642   : > { %14093 = vrcp.f32 %v7030_v6  ;;  %v4109_v1 = vmul.f32 %v8353_v38, %v8353_v38  ;;  %v4110_v34 = vmul.f32 %v8354_v58, %v8354_v58  ;;  %v7159_v7 = vsel %vm7158_vm8, %v7157_v22, %v7156_v52 }
 0x643   : > { %13571 = vmatpush3.bf16.xpose.msra.mxu0 %v13570_v62  ;;  %13595 = vmatpush3.bf16.xpose.msra.mxu1 %v13594_v63  ;;  %v7163_v9 = vrot.slane %v16088_v56, 3  ;;  %v7162_v62 = vsel %vm7161_vm9, %v7160_v29, %v7159_v7  ;;  %v14522_v63 = vld [vmem:[%s14973_s5 + $0x400] sm:$0xff]   ;;  %v8389_v12 = vunpack.c.l.bf16 %v14523_v57  ;;  %v8390_v17 = vunpack.c.h.bf16 %v14523_v57  ;;  %v14525_v29 = vld [vmem:[%s14973_s5 + $0x448] sm:$0xff]  }
 0x644   : > { %13572 = vmatprep.subr.bf16.mxu0 %v17163_v61  ;;  %13596 = vmatprep.subr.bf16.mxu1 %v17163_v61  ;;  %v8357_v6 = vunpack.c.l.bf16 %v14522_v63  ;;  %v8358_v19 = vunpack.c.h.bf16 %v14522_v63  ;;  %v13576_v42 = vpack.c.bf16 %v4094_v51, %v4093_v41  ;;  %v13600_v45 = vpack.c.bf16 %v4110_v34, %v4109_v1 }
 0x645   : > { %v8361_v22 = vunpack.c.l.bf16 %v14524_v53  ;;  %v8362_v52 = vunpack.c.h.bf16 %v14524_v53  ;;  %v8393_v41 = vunpack.c.l.bf16 %v14525_v29  ;;  %v8394_v51 = vunpack.c.h.bf16 %v14525_v29 }
 0x646   : > { %v4111_v38 = vmul.f32 %v8357_v6, %v8357_v6  ;;  %v4112_v58 = vmul.f32 %v8358_v19, %v8358_v19  ;;  %v14527_v19 = vld [vmem:[%s14973_s5 + $0x450] sm:$0xff]   ;;  %14095 = vrsqrt.f32 %v15993_v50  ;;  %vm3698_vm2 = vcmp.eq.f32.partialorder %v15857_v26, 0.0 }
 0x647   : > { %v4113_v34 = vmul.f32 %v8361_v22, %v8361_v22  ;;  %v4114_v7 = vmul.f32 %v8362_v52, %v8362_v52  ;;  %v8397_v57 = vunpack.c.l.bf16 %v14527_v19  ;;  %14097 = vrsqrt.f32 %v15857_v26 }
 0x64b   : > { %v14092_v47 = vpop.eup %14091  ;;  %13574 = vmatpush3.bf16.xpose.msra.mxu0 %v13573_v54  ;;  %13598 = vmatpush3.bf16.xpose.msra.mxu1 %v13597_v40  ;;  %v4127_v54 = vmul.f32 %v8389_v12, %v8389_v12  ;;  %v4128_v40 = vmul.f32 %v8390_v17, %v8390_v17  ;;  %v8398_v12 = vunpack.c.h.bf16 %v14527_v19  ;;  %v13606_v17 = vpack.c.bf16 %v4114_v7, %v4113_v34  ;;  %v14530_v7 = vld [vmem:[%s14973_s5 + $0x420] sm:$0xff]  }
 0x64c   : > { %v14094_v39 = vpop.eup %14093  ;;  %13575 = vmatprep.subr.bf16.mxu0 %v17163_v61  ;;  %13599 = vmatprep.subr.bf16.mxu1 %v17163_v61  ;;  %v16165_v13 = vmul.f32 %v14092_v47, %v15275_v24  ;;  %v7165_v24 = vsel %vm7164_vm10, %v7163_v9, %v7162_v62  ;;  %v13603_v47 = vpack.c.bf16 %v4112_v58, %v4111_v38  ;;  %v14526_v62 = vld [vmem:[%s14973_s5 + $0x410] sm:$0xff]   ;;  %v14529_v58 = vld [vmem:[%s14973_s5 + $0x458] sm:$0xff]  }
 0x64d   : > { %v16170_v44 = vmul.f32 %v14094_v39, %v15277_v25  ;;  %v13627_v1 = vpack.c.bf16 %v4128_v40, %v4127_v54  ;;  %v4129_v9 = vmul.f32 %v8393_v41, %v8393_v41  ;;  %v4130_v39 = vmul.f32 %v8394_v51, %v8394_v51 }
 0x64e   : > { %v7166_v14 = vrot.slane %v16165_v13, 2  ;;  %v8365_v63 = vunpack.c.l.bf16 %v14526_v62  ;;  %v8366_v6 = vunpack.c.h.bf16 %v14526_v62  ;;  %v8401_v54 = vunpack.c.l.bf16 %v14529_v58  ;;  %v14531_v62 = vld [vmem:[%s14973_s5 + $0x460] sm:$0xff]  }
 0x64f   : > { %v7169_v16 = vrot.slane %v16170_v44, 1  ;;  %v8402_v40 = vunpack.c.h.bf16 %v14529_v58 }
 0x650   : > { %v7168_v27 = vsel %vm7167_vm11, %v7166_v14, %v7165_v24  ;;  %v13630_v14 = vpack.c.bf16 %v4130_v39, %v4129_v9  ;;  %v4115_v24 = vmul.f32 %v8365_v63, %v8365_v63  ;;  %v14096_v52 = vpop.eup %14095  ;;  %v8373_v9 = vunpack.c.l.bf16 %v14530_v7 }
 0x651   : > { %v7171_v25 = vsel %vm7170_vm12, %v7169_v16, %v7168_v27  ;;  %v4116_v16 = vmul.f32 %v8366_v6, %v8366_v6  ;;  %v14528_v27 = vld [vmem:[%s14973_s5 + $0x418] sm:$0xff]   ;;  %v14098_v41 = vpop.eup %14097  ;;  %v3688_v34 = vmul.f32 %v14096_v52, %v15993_v50  ;;  %v8374_v39 = vunpack.c.h.bf16 %v14530_v7 }
 0x652   : > { %7218 = vmax.xlane.f32.xlu0 %v7171_v25  ;;  %v8369_v25 = vunpack.c.l.bf16 %v14528_v27  ;;  %v8370_v38 = vunpack.c.h.bf16 %v14528_v27  ;;  %v8405_v63 = vunpack.c.l.bf16 %v14531_v62  ;;  %v3699_v27 = vand.u32 2147483648, %v15857_v26 }
 0x653   : > { %13577 = vmatpush3.bf16.xpose.msra.mxu0 %v13576_v42  ;;  %13601 = vmatpush3.bf16.xpose.msra.mxu1 %v13600_v45  ;;  %v4131_v42 = vmul.f32 %v8397_v57, %v8397_v57  ;;  %v4132_v45 = vmul.f32 %v8398_v12, %v8398_v12  ;;  %v13609_v53 = vpack.c.bf16 %v4116_v16, %v4115_v24  ;;  %v8406_v57 = vunpack.c.h.bf16 %v14531_v62 }
 0x654   : > { %13602 = vmatprep.subr.bf16.mxu0 %v17163_v61  ;;  %13626 = vmatprep.subr.bf16.mxu1 %v17163_v61  ;;  %v4117_v29 = vmul.f32 %v8369_v25, %v8369_v25  ;;  %v4118_v51 = vmul.f32 %v8370_v38, %v8370_v38  ;;  %v3695_v12 = vmul.f32 %v14098_v41, %v15857_v26  ;;  %v3692_v24 = vand.u32 2147483648, %v15993_v50 }
 0x655   : > { %v13633_v22 = vpack.c.bf16 %v4132_v45, %v4131_v42  ;;  %v3690_v45 = vsel %vm3689_vm13, %v15993_v50, %v3688_v34  ;;  %v4119_v25 = vmul.f32 %v8373_v9, %v8373_v9  ;;  %v4120_v38 = vmul.f32 %v8374_v39, %v8374_v39 }
 0x656   : > { %v13612_v16 = vpack.c.bf16 %v4118_v51, %v4117_v29  ;;  %v3697_v58 = vsel %vm3696_vm14, %v15857_v26, %v3695_v12  ;;  %v14533_v29 = vld [vmem:[%s14973_s5 + $0x468] sm:$0xff]   ;;  %vm3703_vm14 = vcmp.eq.f32.partialorder %v15941_v23, inf }
 0x657   : > { %v8409_v41 = vunpack.c.l.bf16 %v14533_v29  ;;  %v8410_v51 = vunpack.c.h.bf16 %v14533_v29  ;;  %v13615_v34 = vpack.c.bf16 %v4120_v38, %v4119_v25 }
 0x659   : > { %v4138_v12 = vmul.f32 %v8410_v51, %v8410_v51 }
 0x65a   : > { %11853 = vmatmul.mubr.f32.vlgmr.msra.gmra.mrb[46].mxu0 %v17166_v5  ;;  %11888 = vmatmul.mubr.f32.vlgmr.msra.gmra.mrb[46].mxu1 %v17166_v5 }
 0x65b   : > { %13604 = vmatpush3.bf16.xpose.msra.mxu0 %v13603_v47  ;;  %13628 = vmatpush3.bf16.xpose.msra.mxu1 %v13627_v1  ;;  %v4133_v47 = vmul.f32 %v8401_v54, %v8401_v54  ;;  %v4134_v1 = vmul.f32 %v8402_v40, %v8402_v40  ;;  %v4135_v54 = vmul.f32 %v8405_v63, %v8405_v63 }
 0x65c   : > { %13605 = vmatprep.subr.bf16.mxu0 %v17163_v61  ;;  %13629 = vmatprep.subr.bf16.mxu1 %v17163_v61  ;;  %v4136_v40 = vmul.f32 %v8406_v57, %v8406_v57  ;;  %v4137_v57 = vmul.f32 %v8409_v41, %v8409_v41 }
 0x65d   : > { %11922 = vmatprep.mubr.msk.f32.mxu0 %vm14790_vm0, %v17167_v4  ;;  %11957 = vmatprep.mubr.msk.f32.mxu1 %vm14790_vm0, %v17167_v4  ;;  %v13636_v42 = vpack.c.bf16 %v4134_v1, %v4133_v47  ;;  %v3700_v47 = vsel %vm3698_vm2, %v3699_v27, %v3697_v58  ;;  %vm3705_vm2 = vcmp.eq.f32.partialorder %v15941_v23, 0.0 }
 0x65e   : > { %v13639_v7 = vpack.c.bf16 %v4136_v40, %v4135_v54  ;;  %v6872_v39 = vadd.f32 1e-13, %v3700_v47  ;;  %v14534_v40 = vld [vmem:[%s14973_s5 + $0x430] sm:$0xff]   ;;  %v13642_v47 = vpack.c.bf16 %v4138_v12, %v4137_v57 }
 0x660   : > { %v6934_v27 = vrot.slane %v6872_v39, %v15910_v46  ;;  %v14536_v39 = vld [vmem:[%s14973_s5 + $0x438] sm:$0xff]  }
 0x663   : > { %13607 = vmatpush3.bf16.xpose.msra.mxu0 %v13606_v17  ;;  %13631 = vmatpush3.bf16.xpose.msra.mxu1 %v13630_v14 }
 0x664   : > { %13608 = vmatprep.subr.bf16.mxu0 %v17163_v61  ;;  %13632 = vmatprep.subr.bf16.mxu1 %v17163_v61 }
 0x66b   : > { %13610 = vmatpush3.bf16.xpose.msra.mxu0 %v13609_v53  ;;  %13634 = vmatpush3.bf16.xpose.msra.mxu1 %v13633_v22  ;;  %v3693_v53 = vsel %vm3691_vm15, %v3692_v24, %v3690_v45  ;;  %v14532_v22 = vld [vmem:[%s14973_s5 + $0x428] sm:$0xff]  }
 0x66c   : > { %13611 = vmatprep.subr.bf16.mxu0 %v17163_v61  ;;  %13635 = vmatprep.subr.bf16.mxu1 %v17163_v61  ;;  %v8377_v52 = vunpack.c.l.bf16 %v14532_v22  ;;  %v8378_v50 = vunpack.c.h.bf16 %v14532_v22  ;;  %v6871_v1 = vadd.f32 1e-13, %v3693_v53  ;;  %v8381_v53 = vunpack.c.l.bf16 %v14534_v40 }
 0x66d   : > { %v4993_v6 = vpop.f32.mrb[40].mxu0  ;;  %v5063_v19 = vpop.f32.mrb[40].mxu1  ;;  %v8382_v22 = vunpack.c.h.bf16 %v14534_v40 }
 0x66e   : > { %14099 = vrsqrt.f32 %v4993_v6  ;;  %v11644_v17 = vpop.f32.mrb[41].mxu0  ;;  %v11679_v14 = vpop.f32.mrb[41].mxu1  ;;  %v4121_v9 = vmul.f32 %v8377_v52, %v8377_v52  ;;  %v4122_v63 = vmul.f32 %v8378_v50, %v8378_v50  ;;  %vm6665_vm3 = vcmp.eq.f32.partialorder %v4993_v6, inf }
 0x66f   : > { %14101 = vrsqrt.f32 %v5063_v19  ;;  %v6930_v14 = vrot.slane %v6871_v1, %v15910_v46  ;;  %v6668_v24 = vand.u32 2147483648, %v4993_v6  ;;  %vm6667_vm4 = vcmp.eq.f32.partialorder %v4993_v6, 0.0 }
 0x670   : > { %vm6672_vm5 = vcmp.eq.f32.partialorder %v5063_v19, inf  ;;  %v6675_v45 = vand.u32 2147483648, %v5063_v19  ;;  %vm6674_vm13 = vcmp.eq.f32.partialorder %v5063_v19, 0.0  ;;  %v13618_v51 = vpack.c.bf16 %v4122_v63, %v4121_v9 }
 0x673   : > { %13613 = vmatpush3.bf16.xpose.msra.mxu0 %v13612_v16  ;;  %13637 = vmatpush3.bf16.xpose.msra.mxu1 %v13636_v42 }
 0x674   : > { %13614 = vmatprep.subr.bf16.mxu0 %v17163_v61  ;;  %13638 = vmatprep.subr.bf16.mxu1 %v17163_v61 }
 0x678   : > { %v14100_v26 = vpop.eup %14099 }
 0x679   : > { %v14102_v62 = vpop.eup %14101  ;;  %v6664_v17 = vmul.f32 %v14100_v26, %v4993_v6 }
 0x67a   : > { %v6671_v16 = vmul.f32 %v14102_v62, %v5063_v19  ;;  %v8385_v62 = vunpack.c.l.bf16 %v14536_v39 }
 0x67b   : > { %v6666_v42 = vsel %vm6665_vm3, %v4993_v6, %v6664_v17  ;;  %13616 = vmatpush3.bf16.xpose.msra.mxu0 %v13615_v34  ;;  %13640 = vmatpush3.bf16.xpose.msra.mxu1 %v13639_v7  ;;  %v14535_v6 = vld [vmem:[%s14973_s5 + $0x470] sm:$0xff]   ;;  %v4124_v34 = vmul.f32 %v8382_v22, %v8382_v22  ;;  %v8386_v17 = vunpack.c.h.bf16 %v14536_v39  ;;  %v14539_v22 = vld [vmem:[%s14973_s5 + $0x4c0] sm:$0xff]  }
 0x67c   : > { %v6669_v25 = vsel %vm6667_vm4, %v6668_v24, %v6666_v42  ;;  %v6673_v38 = vsel %vm6672_vm5, %v5063_v19, %v6671_v16  ;;  %13617 = vmatprep.subr.bf16.mxu0 %v17163_v61  ;;  %13641 = vmatprep.subr.bf16.mxu1 %v17163_v61  ;;  %v8413_v52 = vunpack.c.l.bf16 %v14535_v6  ;;  %v8414_v29 = vunpack.c.h.bf16 %v14535_v6 }
 0x67d   : > { %v6839_v58 = vadd.f32 1e-13, %v6669_v25  ;;  %v6676_v54 = vsel %vm6674_vm13, %v6675_v45, %v6673_v38  ;;  %v4123_v19 = vmul.f32 %v8381_v53, %v8381_v53  ;;  %v4125_v24 = vmul.f32 %v8385_v62, %v8385_v62 }
 0x67e   : > { %v6840_v50 = vadd.f32 1e-13, %v6676_v54  ;;  %v4139_v7 = vmul.f32 %v8413_v52, %v8413_v52  ;;  %v4140_v26 = vmul.f32 %v8414_v29, %v8414_v29  ;;  %v4126_v42 = vmul.f32 %v8386_v17, %v8386_v17  ;;  %v14538_v54 = vld [vmem:[%s14973_s5 + $0x480] sm:$0xff]  }
 0x67f   : > { %v7031_v41 = vmul.f32 %v6930_v14, %v6839_v58  ;;  %v14537_v14 = vld [vmem:[%s14973_s5 + $0x478] sm:$0xff]   ;;  %v13621_v57 = vpack.c.bf16 %v4124_v34, %v4123_v19  ;;  %v8421_v40 = vunpack.c.l.bf16 %v14538_v54  ;;  %v8422_v53 = vunpack.c.h.bf16 %v14538_v54  ;;  %v14541_v34 = vld [vmem:[%s14973_s5 + $0x4c8] sm:$0xff]  }
 0x680   : > { %v7032_v1 = vmul.f32 %v6934_v27, %v6840_v50  ;;  %v8417_v9 = vunpack.c.l.bf16 %v14537_v14  ;;  %v8418_v63 = vunpack.c.h.bf16 %v14537_v14  ;;  %v13645_v12 = vpack.c.bf16 %v4140_v26, %v4139_v7 }
 0x681   : > { %14103 = vrcp.f32 %v7031_v41  ;;  %v8453_v6 = vunpack.c.l.bf16 %v14539_v22  ;;  %v8454_v52 = vunpack.c.h.bf16 %v14539_v22  ;;  %v13624_v50 = vpack.c.bf16 %v4126_v42, %v4125_v24 }
 0x682   : > { %14105 = vrcp.f32 %v7032_v1  ;;  %v4141_v45 = vmul.f32 %v8417_v9, %v8417_v9  ;;  %v4142_v27 = vmul.f32 %v8418_v63, %v8418_v63  ;;  %v4143_v41 = vmul.f32 %v8421_v40, %v8421_v40 }
 0x683   : > { %13619 = vmatpush3.bf16.xpose.msra.mxu0 %v13618_v51  ;;  %13643 = vmatpush3.bf16.xpose.msra.mxu1 %v13642_v47  ;;  %v4144_v51 = vmul.f32 %v8422_v53, %v8422_v53  ;;  %v4159_v47 = vmul.f32 %v8453_v6, %v8453_v6  ;;  %v4160_v1 = vmul.f32 %v8454_v52, %v8454_v52  ;;  %v8457_v7 = vunpack.c.l.bf16 %v14541_v34  ;;  %v14544_v52 = vld [vmem:[%s14973_s5 + $0x498] sm:$0xff]  }
 0x684   : > { %13620 = vmatprep.subr.bf16.mxu0 %v17163_v61  ;;  %13644 = vmatprep.subr.bf16.mxu1 %v17163_v61  ;;  %v13648_v29 = vpack.c.bf16 %v4142_v27, %v4141_v45  ;;  %v8458_v26 = vunpack.c.h.bf16 %v14541_v34  ;;  %v16250_v45 = vpop.xlane.xlu1 %3569  ;;  %14107 = vrsqrt.f32 %v15941_v23 }
 0x685   : > { %v13651_v39 = vpack.c.bf16 %v4144_v51, %v4143_v41  ;;  %v13675_v62 = vpack.c.bf16 %v4160_v1, %v4159_v47  ;;  %v4161_v9 = vmul.f32 %v8457_v7, %v8457_v7  ;;  %14109 = vrsqrt.f32 %v16250_v45  ;;  %v14545_v41 = vld [vmem:[%s14973_s5 + $0x4d8] sm:$0xff]  }
 0x686   : > { %v4162_v63 = vmul.f32 %v8458_v26, %v8458_v26  ;;  %v8465_v51 = vunpack.c.l.bf16 %v14545_v41  ;;  %v8466_v47 = vunpack.c.h.bf16 %v14545_v41  ;;  %vm3710_vm15 = vcmp.eq.f32.partialorder %v16250_v45, inf }
 0x687   : > { %vm3712_vm3 = vcmp.eq.f32.partialorder %v16250_v45, 0.0 }
 0x688   : > { %v13678_v54 = vpack.c.bf16 %v4162_v63, %v4161_v9  ;;  %v4165_v26 = vmul.f32 %v8465_v51, %v8465_v51  ;;  %v14547_v63 = vld [vmem:[%s14973_s5 + $0x4e0] sm:$0xff]  }
 0x68b   : > { %v14104_v16 = vpop.eup %14103  ;;  %13622 = vmatpush3.bf16.xpose.msra.mxu0 %v13621_v57  ;;  %13646 = vmatpush3.bf16.xpose.msra.mxu1 %v13645_v12  ;;  %v14542_v57 = vld [vmem:[%s14973_s5 + $0x490] sm:$0xff]  }
 0x68c   : > { %v14106_v25 = vpop.eup %14105  ;;  %13623 = vmatprep.subr.bf16.mxu0 %v17163_v61  ;;  %13647 = vmatprep.subr.bf16.mxu1 %v17163_v61  ;;  %v16229_v38 = vmul.f32 %v14104_v16, %v15317_v48  ;;  %v14540_v48 = vld [vmem:[%s14973_s5 + $0x488] sm:$0xff]   ;;  %v8429_v12 = vunpack.c.l.bf16 %v14542_v57  ;;  %v8430_v24 = vunpack.c.h.bf16 %v14542_v57  ;;  %v14543_v16 = vld [vmem:[%s14973_s5 + $0x4d0] sm:$0xff]   ;;  %v8469_v57 = vunpack.c.l.bf16 %v14547_v63 }
 0x68d   : > { %v16232_v58 = vmul.f32 %v14106_v25, %v15319_v49  ;;  %v8425_v49 = vunpack.c.l.bf16 %v14540_v48  ;;  %v8426_v19 = vunpack.c.h.bf16 %v14540_v48  ;;  %v8461_v42 = vunpack.c.l.bf16 %v14543_v16 }
 0x68e   : > { %v8462_v27 = vunpack.c.h.bf16 %v14543_v16  ;;  %v4147_v40 = vmul.f32 %v8429_v12, %v8429_v12  ;;  %v4148_v53 = vmul.f32 %v8430_v24, %v8430_v24  ;;  %v8470_v16 = vunpack.c.h.bf16 %v14547_v63 }
 0x68f   : > { %v4145_v17 = vmul.f32 %v8425_v49, %v8425_v49  ;;  %v4146_v14 = vmul.f32 %v8426_v19, %v8426_v19  ;;  %v4163_v22 = vmul.f32 %v8461_v42, %v8461_v42  ;;  %v14108_v49 = vpop.eup %14107  ;;  %v3706_v42 = vand.u32 2147483648, %v15941_v23 }
 0x690   : > { %v4164_v6 = vmul.f32 %v8462_v27, %v8462_v27  ;;  %v13657_v1 = vpack.c.bf16 %v4148_v53, %v4147_v40  ;;  %v14110_v34 = vpop.eup %14109  ;;  %v4167_v41 = vmul.f32 %v8469_v57, %v8469_v57  ;;  %v4168_v51 = vmul.f32 %v8470_v16, %v8470_v16 }
 0x691   : > { %v13654_v25 = vpack.c.bf16 %v4146_v14, %v4145_v17  ;;  %v14546_v17 = vld [vmem:[%s14973_s5 + $0x4a0] sm:$0xff]   ;;  %v3709_v27 = vmul.f32 %v14110_v34, %v16250_v45 }
 0x692   : > { %v13681_v48 = vpack.c.bf16 %v4164_v6, %v4163_v22  ;;  %v8437_v14 = vunpack.c.l.bf16 %v14546_v17  ;;  %v8438_v9 = vunpack.c.h.bf16 %v14546_v17  ;;  %v3713_v6 = vand.u32 2147483648, %v16250_v45 }
 0x693   : > { %13625 = vmatpush3.bf16.xpose.msra.mxu0 %v13624_v50  ;;  %13649 = vmatpush3.bf16.xpose.msra.mxu1 %v13648_v29  ;;  %v8433_v50 = vunpack.c.l.bf16 %v14544_v52  ;;  %v8434_v29 = vunpack.c.h.bf16 %v14544_v52 }
 0x694   : > { %13650 = vmatprep.subr.bf16.mxu0 %v17163_v61  ;;  %13674 = vmatprep.subr.bf16.mxu1 %v17163_v61  ;;  %v4151_v52 = vmul.f32 %v8437_v14, %v8437_v14 }
 0x695   : > { %v4149_v19 = vmul.f32 %v8433_v50, %v8433_v50  ;;  %v4150_v7 = vmul.f32 %v8434_v29, %v8434_v29  ;;  %v4152_v50 = vmul.f32 %v8438_v9, %v8438_v9  ;;  %v3711_v29 = vsel %vm3710_vm15, %v16250_v45, %v3709_v27 }
 0x697   : > { %v13660_v40 = vpack.c.bf16 %v4150_v7, %v4149_v19  ;;  %v3714_v7 = vsel %vm3712_vm3, %v3713_v6, %v3711_v29 }
 0x698   : > { %v6874_v14 = vadd.f32 1e-13, %v3714_v7 }
 0x69a   : > { %11923 = vmatmul.mubr.f32.vlgmr.msra.gmra.mrb[48].mxu0 %v17166_v5  ;;  %11958 = vmatmul.mubr.f32.vlgmr.msra.gmra.mrb[48].mxu1 %v17166_v5 }
 0x69b   : > { %13652 = vmatpush3.bf16.xpose.msra.mxu0 %v13651_v39  ;;  %13676 = vmatpush3.bf16.xpose.msra.mxu1 %v13675_v62  ;;  %v4166_v39 = vmul.f32 %v8466_v47, %v8466_v47  ;;  %v3702_v62 = vmul.f32 %v14108_v49, %v15941_v23  ;;  %v14549_v49 = vld [vmem:[%s14973_s5 + $0x4e8] sm:$0xff]  }
 0x69c   : > { %13653 = vmatprep.subr.bf16.mxu0 %v17163_v61  ;;  %13677 = vmatprep.subr.bf16.mxu1 %v17163_v61  ;;  %v8473_v19 = vunpack.c.l.bf16 %v14549_v49  ;;  %v8474_v34 = vunpack.c.h.bf16 %v14549_v49 }
 0x69d   : > { %11992 = vmatprep.mubr.msk.f32.mxu0 %vm14790_vm0, %v17167_v4  ;;  %12027 = vmatprep.mubr.msk.f32.mxu1 %vm14790_vm0, %v17167_v4  ;;  %v13684_v53 = vpack.c.bf16 %v4166_v39, %v4165_v26  ;;  %v3704_v22 = vsel %vm3703_vm14, %v15941_v23, %v3702_v62  ;;  %v13663_v39 = vpack.c.bf16 %v4152_v50, %v4151_v52 }
 0x69e   : > { %v3707_v47 = vsel %vm3705_vm2, %v3706_v42, %v3704_v22  ;;  %v13687_v62 = vpack.c.bf16 %v4168_v51, %v4167_v41  ;;  %v4169_v57 = vmul.f32 %v8473_v19, %v8473_v19  ;;  %v4170_v16 = vmul.f32 %v8474_v34, %v8474_v34  ;;  %v14550_v41 = vld [vmem:[%s14973_s5 + $0x4b0] sm:$0xff]  }
 0x69f   : > { %v6873_v26 = vadd.f32 1e-13, %v3707_v47  ;;  %v6942_v22 = vrot.slane %v6874_v14, %v15910_v46  ;;  %v8445_v51 = vunpack.c.l.bf16 %v14550_v41  ;;  %v8446_v47 = vunpack.c.h.bf16 %v14550_v41 }
 0x6a0   : > { %v13690_v34 = vpack.c.bf16 %v4170_v16, %v4169_v57 }
 0x6a1   : > { %v6938_v27 = vrot.slane %v6873_v26, %v15910_v46  ;;  %v4156_v26 = vmul.f32 %v8446_v47, %v8446_v47 }
 0x6a3   : > { %13655 = vmatpush3.bf16.xpose.msra.mxu0 %v13654_v25  ;;  %13679 = vmatpush3.bf16.xpose.msra.mxu1 %v13678_v54 }
 0x6a4   : > { %13656 = vmatprep.subr.bf16.mxu0 %v17163_v61  ;;  %13680 = vmatprep.subr.bf16.mxu1 %v17163_v61 }
 0x6ab   : > { %13658 = vmatpush3.bf16.xpose.msra.mxu0 %v13657_v1  ;;  %13682 = vmatpush3.bf16.xpose.msra.mxu1 %v13681_v48  ;;  %v14548_v1 = vld [vmem:[%s14973_s5 + $0x4a8] sm:$0xff]  }
 0x6ac   : > { %13659 = vmatprep.subr.bf16.mxu0 %v17163_v61  ;;  %13683 = vmatprep.subr.bf16.mxu1 %v17163_v61  ;;  %v8441_v48 = vunpack.c.l.bf16 %v14548_v1  ;;  %v8442_v23 = vunpack.c.h.bf16 %v14548_v1 }
 0x6ad   : > { %v5133_v12 = vpop.f32.mrb[42].mxu0  ;;  %v5203_v24 = vpop.f32.mrb[42].mxu1 }
 0x6ae   : > { %14111 = vrsqrt.f32 %v5133_v12  ;;  %v11714_v25 = vpop.f32.mrb[43].mxu0  ;;  %v11749_v54 = vpop.f32.mrb[43].mxu1  ;;  %v4153_v17 = vmul.f32 %v8441_v48, %v8441_v48  ;;  %v4154_v63 = vmul.f32 %v8442_v23, %v8442_v23  ;;  %vm6679_vm4 = vcmp.eq.f32.partialorder %v5133_v12, inf }
 0x6af   : > { %14113 = vrsqrt.f32 %v5203_v24  ;;  %v6682_v25 = vand.u32 2147483648, %v5133_v12  ;;  %vm6681_vm5 = vcmp.eq.f32.partialorder %v5133_v12, 0.0  ;;  %vm6686_vm13 = vcmp.eq.f32.partialorder %v5203_v24, inf }
 0x6b0   : > { %vm6688_vm14 = vcmp.eq.f32.partialorder %v5203_v24, 0.0  ;;  %v13666_v19 = vpack.c.bf16 %v4154_v63, %v4153_v17  ;;  %v16285_v17 = vpop.xlane.xlu1 %3593  ;;  %v14553_v63 = vld [vmem:[%s14973_s5 + $0x4f8] sm:$0xff]  }
 0x6b1   : > { %v8481_v57 = vunpack.c.l.bf16 %v14553_v63  ;;  %v8482_v16 = vunpack.c.h.bf16 %v14553_v63 }
 0x6b3   : > { %13661 = vmatpush3.bf16.xpose.msra.mxu0 %v13660_v40  ;;  %13685 = vmatpush3.bf16.xpose.msra.mxu1 %v13684_v53  ;;  %v6689_v53 = vand.u32 2147483648, %v5203_v24 }
 0x6b4   : > { %13662 = vmatprep.subr.bf16.mxu0 %v17163_v61  ;;  %13686 = vmatprep.subr.bf16.mxu1 %v17163_v61 }
 0x6b8   : > { %v14112_v45 = vpop.eup %14111 }
 0x6b9   : > { %v14114_v9 = vpop.eup %14113  ;;  %v6678_v42 = vmul.f32 %v14112_v45, %v5133_v12  ;;  %v14552_v45 = vld [vmem:[%s14973_s5 + $0x4b8] sm:$0xff]  }
 0x6ba   : > { %v6685_v54 = vmul.f32 %v14114_v9, %v5203_v24  ;;  %v8449_v14 = vunpack.c.l.bf16 %v14552_v45  ;;  %v8450_v9 = vunpack.c.h.bf16 %v14552_v45 }
 0x6bb   : > { %v6680_v40 = vsel %vm6679_vm4, %v5133_v12, %v6678_v42  ;;  %13664 = vmatpush3.bf16.xpose.msra.mxu0 %v13663_v39  ;;  %13688 = vmatpush3.bf16.xpose.msra.mxu1 %v13687_v62  ;;  %v14551_v12 = vld [vmem:[%s14973_s5 + $0x4f0] sm:$0xff]  }
 0x6bc   : > { %v6683_v6 = vsel %vm6681_vm5, %v6682_v25, %v6680_v40  ;;  %v6687_v52 = vsel %vm6686_vm13, %v5203_v24, %v6685_v54  ;;  %13665 = vmatprep.subr.bf16.mxu0 %v17163_v61  ;;  %13689 = vmatprep.subr.bf16.mxu1 %v17163_v61  ;;  %v8477_v1 = vunpack.c.l.bf16 %v14551_v12  ;;  %v8478_v23 = vunpack.c.h.bf16 %v14551_v12  ;;  %v14555_v12 = vld [vmem:[%s14973_s5 + $0x500] sm:$0xff]  }
 0x6bd   : > { %v6841_v50 = vadd.f32 1e-13, %v6683_v6  ;;  %v6690_v29 = vsel %vm6688_vm14, %v6689_v53, %v6687_v52  ;;  %v4155_v24 = vmul.f32 %v8445_v51, %v8445_v51  ;;  %v4157_v25 = vmul.f32 %v8449_v14, %v8449_v14  ;;  %v14554_v6 = vld [vmem:[%s14965_s24 + $0x1f] sm:$0x1] }
 0x6be   : > { %v6842_v48 = vadd.f32 1e-13, %v6690_v29  ;;  %v4171_v39 = vmul.f32 %v8477_v1, %v8477_v1  ;;  %v4172_v62 = vmul.f32 %v8478_v23, %v8478_v23  ;;  %v4158_v54 = vmul.f32 %v8450_v9, %v8450_v9  ;;  %v16291_v29 = vpop.xlane.xlu1 %3617  ;;  %v14556_v23 = vld [vmem:[%s14973_s5 + $0x540] sm:$0xff]   ;;  %v14558_v9 = vld [vmem:[%s14973_s5 + $0x548] sm:$0xff]  }
 0x6bf   : > { %v7033_v49 = vmul.f32 %v6938_v27, %v6841_v50  ;;  %v13669_v42 = vpack.c.bf16 %v4156_v26, %v4155_v24  ;;  %v4173_v53 = vmul.f32 %v8481_v57, %v8481_v57  ;;  %v3533_v52 = vmul.f32 %v14554_v6, %v14554_v6 }
 0x6c0   : > { %v7034_v7 = vmul.f32 %v6942_v22, %v6842_v48  ;;  %v13693_v27 = vpack.c.bf16 %v4172_v62, %v4171_v39  ;;  %v4174_v22 = vmul.f32 %v8482_v16, %v8482_v16  ;;  %v8485_v1 = vunpack.c.l.bf16 %v14555_v12 }
 0x6c1   : > { %14115 = vrcp.f32 %v7033_v49  ;;  %v3628_v51 = vsel %vm3534_vm1, %v3533_v52, 0.0  ;;  %v8486_v48 = vunpack.c.h.bf16 %v14555_v12  ;;  %v8517_v49 = vunpack.c.l.bf16 %v14556_v23 }
 0x6c2   : > { %14117 = vrcp.f32 %v7034_v7  ;;  %3629 = vadd.xlane.f32.xlu1 %v3628_v51  ;;  %v13696_v7 = vpack.c.bf16 %v4174_v22, %v4173_v53  ;;  %v4175_v24 = vmul.f32 %v8485_v1, %v8485_v1  ;;  %v16302_v26 = vpop.xlane.xlu1 %3572  ;;  %v8521_v63 = vunpack.c.l.bf16 %v14558_v9  ;;  %v14559_v22 = vld [vmem:[%s14973_s5 + $0x510] sm:$0xff]  }
 0x6c3   : > { %13667 = vmatpush3.bf16.xpose.msra.mxu0 %v13666_v19  ;;  %13691 = vmatpush3.bf16.xpose.msra.mxu1 %v13690_v34  ;;  %v8518_v19 = vunpack.c.h.bf16 %v14556_v23  ;;  %v13672_v34 = vpack.c.bf16 %v4158_v54, %v4157_v25  ;;  %v4191_v39 = vmul.f32 %v8517_v49, %v8517_v49  ;;  %v8522_v57 = vunpack.c.h.bf16 %v14558_v9 }
 0x6c4   : > { %13668 = vmatprep.subr.bf16.mxu0 %v17163_v61  ;;  %13692 = vmatprep.subr.bf16.mxu1 %v17163_v61  ;;  %v8493_v6 = vunpack.c.l.bf16 %v14559_v22  ;;  %v8494_v52 = vunpack.c.h.bf16 %v14559_v22  ;;  %14119 = vrsqrt.f32 %v16302_v26  ;;  %vm3717_vm1 = vcmp.eq.f32.partialorder %v16302_v26, inf }
 0x6c5   : > { %v4192_v62 = vmul.f32 %v8518_v19, %v8518_v19  ;;  %v4194_v53 = vmul.f32 %v8522_v57, %v8522_v57  ;;  %vm3719_vm2 = vcmp.eq.f32.partialorder %v16302_v26, 0.0 }
 0x6c6   : > { %v4179_v49 = vmul.f32 %v8493_v6, %v8493_v6  ;;  %v4180_v19 = vmul.f32 %v8494_v52, %v8494_v52  ;;  %v14564_v52 = vld [vmem:[%s14973_s5 + $0x560] sm:$0xff]  }
 0x6c7   : > { %v13723_v16 = vpack.c.bf16 %v4192_v62, %v4191_v39  ;;  %v14562_v62 = vld [vmem:[%s14973_s5 + $0x558] sm:$0xff]  }
 0x6cb   : > { %v14116_v40 = vpop.eup %14115  ;;  %13670 = vmatpush3.bf16.xpose.msra.mxu0 %v13669_v42  ;;  %13694 = vmatpush3.bf16.xpose.msra.mxu1 %v13693_v27  ;;  %v16308_v27 = vpop.xlane.xlu1 %3620 }
 0x6cc   : > { %v14118_v50 = vpop.eup %14117  ;;  %13671 = vmatprep.subr.bf16.mxu0 %v17163_v61  ;;  %13695 = vmatprep.subr.bf16.mxu1 %v17163_v61  ;;  %v16294_v41 = vmul.f32 %v14116_v40, %v15359_v10  ;;  %v4176_v10 = vmul.f32 %v8486_v48, %v8486_v48  ;;  %v4193_v40 = vmul.f32 %v8521_v63, %v8521_v63 }
 0x6cd   : > { %v16298_v47 = vmul.f32 %v14118_v50, %v15361_v11  ;;  %v14557_v11 = vld [vmem:[%s14973_s5 + $0x508] sm:$0xff]   ;;  %v14560_v50 = vld [vmem:[%s14973_s5 + $0x550] sm:$0xff]  }
 0x6ce   : > { %v8489_v45 = vunpack.c.l.bf16 %v14557_v11  ;;  %v8490_v14 = vunpack.c.h.bf16 %v14557_v11  ;;  %v13699_v42 = vpack.c.bf16 %v4176_v10, %v4175_v24  ;;  %v8525_v51 = vunpack.c.l.bf16 %v14560_v50  ;;  %v14561_v24 = vld [vmem:[%s14973_s5 + $0x518] sm:$0xff]   ;;  %v14120_v63 = vpop.eup %14119 }
 0x6cf   : > { %v16320_v12 = vpop.xlane.xlu1 %3575  ;;  %v8526_v1 = vunpack.c.h.bf16 %v14560_v50  ;;  %v13726_v23 = vpack.c.bf16 %v4194_v53, %v4193_v40  ;;  %v8497_v10 = vunpack.c.l.bf16 %v14561_v24  ;;  %v8498_v39 = vunpack.c.h.bf16 %v14561_v24  ;;  %v14563_v53 = vld [vmem:[%s14973_s5 + $0x520] sm:$0xff]  }
 0x6d0   : > { %v4177_v25 = vmul.f32 %v8489_v45, %v8489_v45  ;;  %v4178_v54 = vmul.f32 %v8490_v14, %v8490_v14  ;;  %14121 = vrsqrt.f32 %v16320_v12  ;;  %v8529_v11 = vunpack.c.l.bf16 %v14562_v62 }
 0x6d1   : > { %v8530_v45 = vunpack.c.h.bf16 %v14562_v62  ;;  %v13705_v14 = vpack.c.bf16 %v4180_v19, %v4179_v49  ;;  %v4181_v57 = vmul.f32 %v8497_v10, %v8497_v10  ;;  %v3716_v40 = vmul.f32 %v14120_v63, %v16302_v26 }
 0x6d2   : > { %v13702_v48 = vpack.c.bf16 %v4178_v54, %v4177_v25  ;;  %v4197_v25 = vmul.f32 %v8529_v11, %v8529_v11  ;;  %v8501_v22 = vunpack.c.l.bf16 %v14563_v53  ;;  %v8502_v6 = vunpack.c.h.bf16 %v14563_v53 }
 0x6d3   : > { %13673 = vmatpush3.bf16.xpose.msra.mxu0 %v13672_v34  ;;  %13697 = vmatpush3.bf16.xpose.msra.mxu1 %v13696_v7  ;;  %v4195_v34 = vmul.f32 %v8525_v51, %v8525_v51  ;;  %v4196_v7 = vmul.f32 %v8526_v1, %v8526_v1  ;;  %v4198_v54 = vmul.f32 %v8530_v45, %v8530_v45  ;;  %v8533_v50 = vunpack.c.l.bf16 %v14564_v52 }
 0x6d4   : > { %13698 = vmatprep.subr.bf16.mxu0 %v17163_v61  ;;  %13722 = vmatprep.subr.bf16.mxu1 %v17163_v61  ;;  %vm3724_vm15 = vcmp.eq.f32.partialorder %v16320_v12, inf  ;;  %v3718_v10 = vsel %vm3717_vm1, %v16302_v26, %v3716_v40  ;;  %v4183_v62 = vmul.f32 %v8501_v22, %v8501_v22  ;;  %v4184_v11 = vmul.f32 %v8502_v6, %v8502_v6 }
 0x6d5   : > { %v13729_v9 = vpack.c.bf16 %v4196_v7, %v4195_v34  ;;  %v13732_v24 = vpack.c.bf16 %v4198_v54, %v4197_v25  ;;  %vm3726_vm3 = vcmp.eq.f32.partialorder %v16320_v12, 0.0 }
 0x6d6   : > { %v13711_v22 = vpack.c.bf16 %v4184_v11, %v4183_v62 }
 0x6da   : > { %11993 = vmatmul.mubr.f32.vlgmr.msra.gmra.mrb[50].mxu0 %v17166_v5  ;;  %12028 = vmatmul.mubr.f32.vlgmr.msra.gmra.mrb[50].mxu1 %v17166_v5 }
 0x6db   : > { %13724 = vmatpush3.bf16.xpose.msra.mxu1 %v13723_v16  ;;  %13700 = vmatpush3.bf16.xpose.msra.mxu0 %v13699_v42  ;;  %v14122_v16 = vpop.eup %14121  ;;  %v4182_v42 = vmul.f32 %v8498_v39, %v8498_v39  ;;  %v3727_v39 = vand.u32 2147483648, %v16320_v12 }
 0x6dc   : > { %13701 = vmatprep.subr.bf16.mxu0 %v17163_v61  ;;  %13725 = vmatprep.subr.bf16.mxu1 %v17163_v61  ;;  %v3723_v49 = vmul.f32 %v14122_v16, %v16320_v12 }
 0x6dd   : > { %12062 = vmatprep.mubr.msk.f32.mxu0 %vm14790_vm0, %v17167_v4  ;;  %12097 = vmatprep.mubr.msk.f32.mxu1 %vm14790_vm0, %v17167_v4  ;;  %v13708_v7 = vpack.c.bf16 %v4182_v42, %v4181_v57  ;;  %v14565_v57 = vld [vmem:[%s14973_s5 + $0x528] sm:$0xff]  }
 0x6de   : > { %v3725_v45 = vsel %vm3724_vm15, %v16320_v12, %v3723_v49  ;;  %v8505_v16 = vunpack.c.l.bf16 %v14565_v57  ;;  %v14566_v42 = vld [vmem:[%s14973_s5 + $0x568] sm:$0xff]  }
 0x6df   : > { %v8537_v25 = vunpack.c.l.bf16 %v14566_v42  ;;  %v8538_v54 = vunpack.c.h.bf16 %v14566_v42  ;;  %v3728_v40 = vsel %vm3726_vm3, %v3727_v39, %v3725_v45 }
 0x6e1   : > { %v4201_v49 = vmul.f32 %v8537_v25, %v8537_v25 }
 0x6e3   : > { %13703 = vmatpush3.bf16.xpose.msra.mxu0 %v13702_v48  ;;  %13727 = vmatpush3.bf16.xpose.msra.mxu1 %v13726_v23  ;;  %v8534_v48 = vunpack.c.h.bf16 %v14564_v52  ;;  %v3720_v23 = vand.u32 2147483648, %v16302_v26  ;;  %v8506_v26 = vunpack.c.h.bf16 %v14565_v57  ;;  %v4185_v52 = vmul.f32 %v8505_v16, %v8505_v16 }
 0x6e4   : > { %13704 = vmatprep.subr.bf16.mxu0 %v17163_v61  ;;  %13728 = vmatprep.subr.bf16.mxu1 %v17163_v61 }
 0x6e5   : > { %v3721_v63 = vsel %vm3719_vm2, %v3720_v23, %v3718_v10  ;;  %v4186_v23 = vmul.f32 %v8506_v26, %v8506_v26 }
 0x6e6   : > { %v6875_v53 = vadd.f32 1e-13, %v3721_v63  ;;  %v14567_v63 = vld [vmem:[%s14973_s5 + $0x530] sm:$0xff]  }
 0x6e7   : > { %v8509_v16 = vunpack.c.l.bf16 %v14567_v63  ;;  %v8510_v26 = vunpack.c.h.bf16 %v14567_v63 }
 0x6eb   : > { %13706 = vmatpush3.bf16.xpose.msra.mxu0 %v13705_v14  ;;  %13730 = vmatpush3.bf16.xpose.msra.mxu1 %v13729_v9  ;;  %v4199_v14 = vmul.f32 %v8533_v50, %v8533_v50  ;;  %v4200_v9 = vmul.f32 %v8534_v48, %v8534_v48  ;;  %v6876_v50 = vadd.f32 1e-13, %v3728_v40 }
 0x6ec   : > { %13707 = vmatprep.subr.bf16.mxu0 %v17163_v61  ;;  %13731 = vmatprep.subr.bf16.mxu1 %v17163_v61 }
 0x6ed   : > { %v5273_v51 = vpop.f32.mrb[44].mxu0  ;;  %v5343_v1 = vpop.f32.mrb[44].mxu1  ;;  %v13735_v6 = vpack.c.bf16 %v4200_v9, %v4199_v14  ;;  %v6950_v62 = vrot.slane %v6876_v50, %v15910_v46 }
 0x6ee   : > { %14123 = vrsqrt.f32 %v5273_v51  ;;  %v11784_v19 = vpop.f32.mrb[45].mxu0  ;;  %v11819_v34 = vpop.f32.mrb[45].mxu1  ;;  %vm6693_vm4 = vcmp.eq.f32.partialorder %v5273_v51, inf  ;;  %vm6695_vm5 = vcmp.eq.f32.partialorder %v5273_v51, 0.0  ;;  %vm6700_vm13 = vcmp.eq.f32.partialorder %v5343_v1, inf }
 0x6ef   : > { %14125 = vrsqrt.f32 %v5343_v1  ;;  %v4202_v19 = vmul.f32 %v8538_v54, %v8538_v54  ;;  %v6703_v39 = vand.u32 2147483648, %v5343_v1  ;;  %vm6702_vm14 = vcmp.eq.f32.partialorder %v5343_v1, 0.0 }
 0x6f3   : > { %13709 = vmatpush3.bf16.xpose.msra.mxu0 %v13708_v7  ;;  %13733 = vmatpush3.bf16.xpose.msra.mxu1 %v13732_v24  ;;  %v6946_v7 = vrot.slane %v6875_v53, %v15910_v46  ;;  %v6696_v24 = vand.u32 2147483648, %v5273_v51  ;;  %v13714_v53 = vpack.c.bf16 %v4186_v23, %v4185_v52 }
 0x6f4   : > { %13710 = vmatprep.subr.bf16.mxu0 %v17163_v61  ;;  %13734 = vmatprep.subr.bf16.mxu1 %v17163_v61 }
 0x6f8   : > { %v14124_v12 = vpop.eup %14123 }
 0x6f9   : > { %v14126_v48 = vpop.eup %14125  ;;  %v6692_v34 = vmul.f32 %v14124_v12, %v5273_v51  ;;  %v4188_v12 = vmul.f32 %v8510_v26, %v8510_v26  ;;  %v14571_v26 = vld [vmem:[%s14973_s5 + $0x580] sm:$0xff]  }
 0x6fa   : > { %v6699_v10 = vmul.f32 %v14126_v48, %v5343_v1 }
 0x6fb   : > { %v6694_v57 = vsel %vm6693_vm4, %v5273_v51, %v6692_v34  ;;  %13712 = vmatpush3.bf16.xpose.msra.mxu0 %v13711_v22  ;;  %13736 = vmatpush3.bf16.xpose.msra.mxu1 %v13735_v6  ;;  %v14568_v51 = vld [vmem:[%s14973_s5 + $0x570] sm:$0xff]   ;;  %v13738_v22 = vpack.c.bf16 %v4202_v19, %v4201_v49  ;;  %v14569_v34 = vld [vmem:[%s14973_s5 + $0x538] sm:$0xff]  }
 0x6fc   : > { %v6697_v11 = vsel %vm6695_vm5, %v6696_v24, %v6694_v57  ;;  %v6701_v45 = vsel %vm6700_vm13, %v5343_v1, %v6699_v10  ;;  %13713 = vmatprep.subr.bf16.mxu0 %v17163_v61  ;;  %13737 = vmatprep.subr.bf16.mxu1 %v17163_v61  ;;  %v8541_v42 = vunpack.c.l.bf16 %v14568_v51  ;;  %v8542_v54 = vunpack.c.h.bf16 %v14568_v51 }
 0x6fd   : > { %v6843_v14 = vadd.f32 1e-13, %v6697_v11  ;;  %v6704_v9 = vsel %vm6702_vm14, %v6703_v39, %v6701_v45  ;;  %v4187_v1 = vmul.f32 %v8509_v16, %v8509_v16  ;;  %v8513_v24 = vunpack.c.l.bf16 %v14569_v34 }
 0x6fe   : > { %v6844_v25 = vadd.f32 1e-13, %v6704_v9  ;;  %v4203_v50 = vmul.f32 %v8541_v42, %v8541_v42  ;;  %v4204_v48 = vmul.f32 %v8542_v54, %v8542_v54  ;;  %v8514_v10 = vunpack.c.h.bf16 %v14569_v34  ;;  %v16358_v9 = vpop.xlane.xlu1 %3623 }
 0x6ff   : > { %v7035_v40 = vmul.f32 %v6946_v7, %v6843_v14  ;;  %v14570_v7 = vld [vmem:[%s14973_s5 + $0x578] sm:$0xff]   ;;  %v13717_v49 = vpack.c.bf16 %v4188_v12, %v4187_v1  ;;  %v4189_v57 = vmul.f32 %v8513_v24, %v8513_v24  ;;  %17170 = vst [vmem:[#allocation25_spill] sm:$0xff] %v16358_v9  ;;  %v8549_v51 = vunpack.c.l.bf16 %v14571_v26  ;;  %v14574_v24 = vld [vmem:[%s14973_s5 + $0x5c8] sm:$0xff]  }
 0x700   : > { %v7036_v6 = vmul.f32 %v6950_v62, %v6844_v25  ;;  %v8545_v52 = vunpack.c.l.bf16 %v14570_v7  ;;  %v8546_v23 = vunpack.c.h.bf16 %v14570_v7  ;;  %v13741_v19 = vpack.c.bf16 %v4204_v48, %v4203_v50  ;;  %v14572_v25 = vld [vmem:[%s14973_s5 + $0x5c0] sm:$0xff]  }
 0x701   : > { %14127 = vrcp.f32 %v7035_v40  ;;  %v4190_v62 = vmul.f32 %v8514_v10, %v8514_v10  ;;  %v8550_v42 = vunpack.c.h.bf16 %v14571_v26  ;;  %v8581_v54 = vunpack.c.l.bf16 %v14572_v25  ;;  %v14576_v26 = vld [vmem:[%s14973_s5 + $0x5d0] sm:$0xff]  }
 0x702   : > { %14129 = vrcp.f32 %v7036_v6  ;;  %v4205_v11 = vmul.f32 %v8545_v52, %v8545_v52  ;;  %v4206_v45 = vmul.f32 %v8546_v23, %v8546_v23  ;;  %v8582_v40 = vunpack.c.h.bf16 %v14572_v25  ;;  %v16368_v1 = vpop.xlane.xlu1 %3578 }
 0x703   : > { %13715 = vmatpush3.bf16.xpose.msra.mxu0 %v13714_v53  ;;  %13739 = vmatpush3.bf16.xpose.msra.mxu1 %v13738_v22  ;;  %v13720_v53 = vpack.c.bf16 %v4190_v62, %v4189_v57  ;;  %v4207_v6 = vmul.f32 %v8549_v51, %v8549_v51  ;;  %v4208_v12 = vmul.f32 %v8550_v42, %v8550_v42  ;;  %v8585_v10 = vunpack.c.l.bf16 %v14574_v24 }
 0x704   : > { %13716 = vmatprep.subr.bf16.mxu0 %v17163_v61  ;;  %13740 = vmatprep.subr.bf16.mxu1 %v17163_v61  ;;  %v13744_v22 = vpack.c.bf16 %v4206_v45, %v4205_v11  ;;  %v4223_v50 = vmul.f32 %v8581_v54, %v8581_v54  ;;  %v8586_v7 = vunpack.c.h.bf16 %v14574_v24  ;;  %v14575_v11 = vld [vmem:[%s14973_s5 + $0x590] sm:$0xff]   ;;  %v8589_v51 = vunpack.c.l.bf16 %v14576_v26 }
 0x705   : > { %v13747_v52 = vpack.c.bf16 %v4208_v12, %v4207_v6  ;;  %v8557_v45 = vunpack.c.l.bf16 %v14575_v11  ;;  %v8590_v25 = vunpack.c.h.bf16 %v14576_v26  ;;  %14131 = vrsqrt.f32 %v16368_v1 }
 0x706   : > { %v4226_v62 = vmul.f32 %v8586_v7, %v8586_v7  ;;  %v4227_v6 = vmul.f32 %v8589_v51, %v8589_v51  ;;  %v14580_v51 = vld [vmem:[%s14973_s5 + $0x5e0] sm:$0xff]   ;;  %vm3731_vm1 = vcmp.eq.f32.partialorder %v16368_v1, inf  ;;  %vm3733_vm2 = vcmp.eq.f32.partialorder %v16368_v1, 0.0 }
 0x707   : > { %v4228_v12 = vmul.f32 %v8590_v25, %v8590_v25  ;;  %v8597_v25 = vunpack.c.l.bf16 %v14580_v51 }
 0x709   : > { %v13777_v7 = vpack.c.bf16 %v4228_v12, %v4227_v6 }
 0x70b   : > { %v14128_v39 = vpop.eup %14127  ;;  %13718 = vmatpush3.bf16.xpose.msra.mxu0 %v13717_v49  ;;  %13742 = vmatpush3.bf16.xpose.msra.mxu1 %v13741_v19  ;;  %v16374_v49 = vpop.xlane.xlu1 %3626 }
 0x70c   : > { %v14130_v14 = vpop.eup %14129  ;;  %13719 = vmatprep.subr.bf16.mxu0 %v17163_v61  ;;  %13743 = vmatprep.subr.bf16.mxu1 %v17163_v61  ;;  %v16361_v63 = vmul.f32 %v14128_v39, %v15404_v36  ;;  %v4224_v36 = vmul.f32 %v8582_v40, %v8582_v40  ;;  %17171 = vst [vmem:[#allocation26_spill] sm:$0xff] %v16374_v49 }
 0x70d   : > { %v16364_v16 = vmul.f32 %v14130_v14, %v15406_v37  ;;  %v14573_v37 = vld [vmem:[%s14973_s5 + $0x588] sm:$0xff]   ;;  %v4225_v39 = vmul.f32 %v8585_v10, %v8585_v10  ;;  %v8558_v14 = vunpack.c.h.bf16 %v14575_v11 }
 0x70e   : > { %v8553_v48 = vunpack.c.l.bf16 %v14573_v37  ;;  %v8554_v34 = vunpack.c.h.bf16 %v14573_v37  ;;  %v13771_v23 = vpack.c.bf16 %v4224_v36, %v4223_v50  ;;  %v14577_v50 = vld [vmem:[%s14973_s5 + $0x598] sm:$0xff]  }
 0x70f   : > { %v16386_v42 = vpop.xlane.xlu1 %3581  ;;  %v13774_v40 = vpack.c.bf16 %v4226_v62, %v4225_v39  ;;  %v8561_v36 = vunpack.c.l.bf16 %v14577_v50  ;;  %v8562_v37 = vunpack.c.h.bf16 %v14577_v50 }
 0x710   : > { %v4209_v19 = vmul.f32 %v8553_v48, %v8553_v48  ;;  %v4210_v57 = vmul.f32 %v8554_v34, %v8554_v34  ;;  %14133 = vrsqrt.f32 %v16386_v42  ;;  %v14578_v48 = vld [vmem:[%s14973_s5 + $0x5d8] sm:$0xff]   ;;  %vm3738_vm15 = vcmp.eq.f32.partialorder %v16386_v42, inf }
 0x711   : > { %v8593_v34 = vunpack.c.l.bf16 %v14578_v48  ;;  %v8594_v24 = vunpack.c.h.bf16 %v14578_v48  ;;  %vm3740_vm3 = vcmp.eq.f32.partialorder %v16386_v42, 0.0 }
 0x712   : > { %v13750_v54 = vpack.c.bf16 %v4210_v57, %v4209_v19  ;;  %v4214_v57 = vmul.f32 %v8562_v37, %v8562_v37 }
 0x713   : > { %13721 = vmatpush3.bf16.xpose.msra.mxu0 %v13720_v53  ;;  %13745 = vmatpush3.bf16.xpose.msra.mxu1 %v13744_v22  ;;  %v4211_v53 = vmul.f32 %v8557_v45, %v8557_v45  ;;  %v4212_v22 = vmul.f32 %v8558_v14, %v8558_v14  ;;  %v4229_v39 = vmul.f32 %v8593_v34, %v8593_v34  ;;  %v14579_v45 = vld [vmem:[%s14973_s5 + $0x5a0] sm:$0xff]   ;;  %v3741_v34 = vand.u32 2147483648, %v16386_v42 }
 0x714   : > { %13746 = vmatprep.subr.bf16.mxu0 %v17163_v61  ;;  %13770 = vmatprep.subr.bf16.mxu1 %v17163_v61  ;;  %v4230_v62 = vmul.f32 %v8594_v24, %v8594_v24  ;;  %v8565_v14 = vunpack.c.l.bf16 %v14579_v45  ;;  %v8566_v26 = vunpack.c.h.bf16 %v14579_v45 }
 0x715   : > { %v13753_v10 = vpack.c.bf16 %v4212_v22, %v4211_v53  ;;  %v8598_v53 = vunpack.c.h.bf16 %v14580_v51  ;;  %v3734_v22 = vand.u32 2147483648, %v16368_v1 }
 0x716   : > { %v13780_v37 = vpack.c.bf16 %v4230_v62, %v4229_v39  ;;  %v4215_v24 = vmul.f32 %v8565_v14, %v8565_v14  ;;  %v14582_v39 = vld [vmem:[%s14973_s5 + $0x5e8] sm:$0xff]  }
 0x717   : > { %v8601_v62 = vunpack.c.l.bf16 %v14582_v39 }
 0x71a   : > { %12063 = vmatmul.mubr.f32.vlgmr.msra.gmra.mrb[52].mxu0 %v17166_v5  ;;  %12098 = vmatmul.mubr.f32.vlgmr.msra.gmra.mrb[52].mxu1 %v17166_v5 }
 0x71b   : > { %13748 = vmatpush3.bf16.xpose.msra.mxu0 %v13747_v52  ;;  %13772 = vmatpush3.bf16.xpose.msra.mxu1 %v13771_v23  ;;  %v14132_v52 = vpop.eup %14131  ;;  %v4213_v23 = vmul.f32 %v8561_v36, %v8561_v36 }
 0x71c   : > { %13749 = vmatprep.subr.bf16.mxu0 %v17163_v61  ;;  %13773 = vmatprep.subr.bf16.mxu1 %v17163_v61  ;;  %v14134_v19 = vpop.eup %14133  ;;  %v3730_v11 = vmul.f32 %v14132_v52, %v16368_v1  ;;  %v4231_v52 = vmul.f32 %v8597_v25, %v8597_v25 }
 0x71d   : > { %12132 = vmatprep.mubr.msk.f32.mxu0 %vm14790_vm0, %v17167_v4  ;;  %12167 = vmatprep.mubr.msk.f32.mxu1 %vm14790_vm0, %v17167_v4  ;;  %v3737_v6 = vmul.f32 %v14134_v19, %v16386_v42  ;;  %v13756_v36 = vpack.c.bf16 %v4214_v57, %v4213_v23  ;;  %v4232_v19 = vmul.f32 %v8598_v53, %v8598_v53  ;;  %v14581_v23 = vld [vmem:[%s14973_s5 + $0x5a8] sm:$0xff]  }
 0x71e   : > { %v3732_v48 = vsel %vm3731_vm1, %v16368_v1, %v3730_v11  ;;  %v8569_v57 = vunpack.c.l.bf16 %v14581_v23  ;;  %v8570_v1 = vunpack.c.h.bf16 %v14581_v23  ;;  %v8602_v11 = vunpack.c.h.bf16 %v14582_v39 }
 0x71f   : > { %v3735_v45 = vsel %vm3733_vm2, %v3734_v22, %v3732_v48  ;;  %vm3745_vm1 = vcmp.eq.f32.partialorder %v15999_v43, inf  ;;  %vm3747_vm2 = vcmp.eq.f32.partialorder %v15999_v43, 0.0 }
 0x720   : > { %v4217_v25 = vmul.f32 %v8569_v57, %v8569_v57 }
 0x723   : > { %13751 = vmatpush3.bf16.xpose.msra.mxu0 %v13750_v54  ;;  %13775 = vmatpush3.bf16.xpose.msra.mxu1 %v13774_v40 }
 0x724   : > { %13752 = vmatprep.subr.bf16.mxu0 %v17163_v61  ;;  %13776 = vmatprep.subr.bf16.mxu1 %v17163_v61 }
 0x72b   : > { %13754 = vmatpush3.bf16.xpose.msra.mxu0 %v13753_v10  ;;  %13778 = vmatpush3.bf16.xpose.msra.mxu1 %v13777_v7  ;;  %v4216_v10 = vmul.f32 %v8566_v26, %v8566_v26  ;;  %v3739_v7 = vsel %vm3738_vm15, %v16386_v42, %v3737_v6  ;;  %v6877_v26 = vadd.f32 1e-13, %v3735_v45  ;;  %v13783_v6 = vpack.c.bf16 %v4232_v19, %v4231_v52  ;;  %v14583_v45 = vld [vmem:[%s14973_s5 + $0x5b0] sm:$0xff]  }
 0x72c   : > { %13755 = vmatprep.subr.bf16.mxu0 %v17163_v61  ;;  %13779 = vmatprep.subr.bf16.mxu1 %v17163_v61  ;;  %v3742_v14 = vsel %vm3740_vm3, %v3741_v34, %v3739_v7  ;;  %v8573_v57 = vunpack.c.l.bf16 %v14583_v45  ;;  %vm3752_vm15 = vcmp.eq.f32.partialorder %v15926_v0, inf  ;;  %vm3754_vm3 = vcmp.eq.f32.partialorder %v15926_v0, 0.0 }
 0x72d   : > { %v5413_v54 = vpop.f32.mrb[46].mxu0  ;;  %v5483_v40 = vpop.f32.mrb[46].mxu1  ;;  %v13759_v51 = vpack.c.bf16 %v4216_v10, %v4215_v24  ;;  %v6878_v53 = vadd.f32 1e-13, %v3742_v14  ;;  %v6954_v48 = vrot.slane %v6877_v26, %v15910_v46 }
 0x72e   : > { %14135 = vrsqrt.f32 %v5413_v54  ;;  %v11854_v12 = vpop.f32.mrb[47].mxu0  ;;  %v11889_v50 = vpop.f32.mrb[47].mxu1  ;;  %vm6707_vm4 = vcmp.eq.f32.partialorder %v5413_v54, inf  ;;  %v6710_v49 = vand.u32 2147483648, %v5413_v54  ;;  %vm6709_vm5 = vcmp.eq.f32.partialorder %v5413_v54, 0.0 }
 0x72f   : > { %14137 = vrsqrt.f32 %v5483_v40  ;;  %v4218_v12 = vmul.f32 %v8570_v1, %v8570_v1  ;;  %v4233_v50 = vmul.f32 %v8601_v62, %v8601_v62  ;;  %vm6714_vm13 = vcmp.eq.f32.partialorder %v5483_v40, inf }
 0x730   : > { %v6717_v34 = vand.u32 2147483648, %v5483_v40  ;;  %v6958_v24 = vrot.slane %v6878_v53, %v15910_v46  ;;  %vm6716_vm14 = vcmp.eq.f32.partialorder %v5483_v40, 0.0  ;;  %v8574_v1 = vunpack.c.h.bf16 %v14583_v45 }
 0x731   : > { %v13762_v26 = vpack.c.bf16 %v4218_v12, %v4217_v25  ;;  %v7172_v53 = vrot.slane %v16232_v58, 7  ;;  %v14585_v25 = vld [vmem:[%s14973_s5 + $0x5b8] sm:$0xff]  }
 0x732   : > { %v8577_v12 = vunpack.c.l.bf16 %v14585_v25 }
 0x733   : > { %13757 = vmatpush3.bf16.xpose.msra.mxu0 %v13756_v36  ;;  %13781 = vmatpush3.bf16.xpose.msra.mxu1 %v13780_v37  ;;  %v4234_v36 = vmul.f32 %v8602_v11, %v8602_v11 }
 0x734   : > { %13758 = vmatprep.subr.bf16.mxu0 %v17163_v61  ;;  %13782 = vmatprep.subr.bf16.mxu1 %v17163_v61 }
 0x738   : > { %v14136_v42 = vpop.eup %14135 }
 0x739   : > { %v14138_v22 = vpop.eup %14137  ;;  %v6706_v37 = vmul.f32 %v14136_v42, %v5413_v54 }
 0x73a   : > { %v6713_v23 = vmul.f32 %v14138_v22, %v5483_v40  ;;  %v7174_v22 = vrot.slane %v16294_v41, 6 }
 0x73b   : > { %v6708_v9 = vsel %vm6707_vm4, %v5413_v54, %v6706_v37  ;;  %13760 = vmatpush3.bf16.xpose.msra.mxu0 %v13759_v51  ;;  %13784 = vmatpush3.bf16.xpose.msra.mxu1 %v13783_v6  ;;  %v14584_v54 = vld [vmem:[%s14973_s5 + $0x5f0] sm:$0xff]   ;;  %v13786_v51 = vpack.c.bf16 %v4234_v36, %v4233_v50  ;;  %v8578_v50 = vunpack.c.h.bf16 %v14585_v25  ;;  %v14586_v36 = vld [vmem:[%s14973_s5 + $0x5f8] sm:$0xff]  }
 0x73c   : > { %v6711_v10 = vsel %vm6709_vm5, %v6710_v49, %v6708_v9  ;;  %v6715_v7 = vsel %vm6714_vm13, %v5483_v40, %v6713_v23  ;;  %13761 = vmatprep.subr.bf16.mxu0 %v17163_v61  ;;  %13785 = vmatprep.subr.bf16.mxu1 %v17163_v61  ;;  %v8605_v39 = vunpack.c.l.bf16 %v14584_v54  ;;  %v8606_v11 = vunpack.c.h.bf16 %v14584_v54 }
 0x73d   : > { %v6845_v52 = vadd.f32 1e-13, %v6711_v10  ;;  %v6718_v19 = vsel %vm6716_vm14, %v6717_v34, %v6715_v7  ;;  %v4219_v49 = vmul.f32 %v8573_v57, %v8573_v57  ;;  %v4220_v40 = vmul.f32 %v8574_v1, %v8574_v1 }
 0x73e   : > { %v6846_v62 = vadd.f32 1e-13, %v6718_v19  ;;  %v4235_v6 = vmul.f32 %v8605_v39, %v8605_v39  ;;  %v4236_v42 = vmul.f32 %v8606_v11, %v8606_v11  ;;  %v8609_v37 = vunpack.c.l.bf16 %v14586_v36 }
 0x73f   : > { %v7037_v14 = vmul.f32 %v6954_v48, %v6845_v52  ;;  %v8610_v48 = vunpack.c.h.bf16 %v14586_v36  ;;  %v13765_v23 = vpack.c.bf16 %v4220_v40, %v4219_v49  ;;  %v7176_v10 = vrot.slane %v16298_v47, 5 }
 0x740   : > { %v7038_v9 = vmul.f32 %v6958_v24, %v6846_v62  ;;  %v13789_v34 = vpack.c.bf16 %v4236_v42, %v4235_v6  ;;  %v7173_v24 = vsel %vm7152_vm6, %v7172_v53, %v16229_v38  ;;  %v7178_v52 = vrot.slane %v16361_v63, 4  ;;  %v14588_v6 = vld [vmem:[%s14973_s5 + $0x640] sm:$0xff]  }
 0x741   : > { %14139 = vrcp.f32 %v7037_v14  ;;  %v7175_v7 = vsel %vm7155_vm7, %v7174_v22, %v7173_v24  ;;  %v4221_v19 = vmul.f32 %v8577_v12, %v8577_v12  ;;  %v4222_v45 = vmul.f32 %v8578_v50, %v8578_v50  ;;  %v14589_v24 = vld [vmem:[%s14973_s5 + $0x608] sm:$0xff]  }
 0x742   : > { %14141 = vrcp.f32 %v7038_v9  ;;  %v4237_v1 = vmul.f32 %v8609_v37, %v8609_v37  ;;  %v4238_v54 = vmul.f32 %v8610_v48, %v8610_v48  ;;  %v7177_v39 = vsel %vm7158_vm8, %v7176_v10, %v7175_v7 }
 0x743   : > { %13763 = vmatpush3.bf16.xpose.msra.mxu0 %v13762_v26  ;;  %13787 = vmatpush3.bf16.xpose.msra.mxu1 %v13786_v51  ;;  %v7180_v62 = vrot.slane %v16364_v16, 3  ;;  %v7179_v26 = vsel %vm7161_vm9, %v7178_v52, %v7177_v39  ;;  %v14587_v51 = vld [vmem:[%s14973_s5 + $0x600] sm:$0xff]   ;;  %v8645_v42 = vunpack.c.l.bf16 %v14588_v6  ;;  %v8646_v53 = vunpack.c.h.bf16 %v14588_v6  ;;  %v14590_v52 = vld [vmem:[%s14973_s5 + $0x648] sm:$0xff]  }
 0x744   : > { %13764 = vmatprep.subr.bf16.mxu0 %v17163_v61  ;;  %13788 = vmatprep.subr.bf16.mxu1 %v17163_v61  ;;  %v8613_v9 = vunpack.c.l.bf16 %v14587_v51  ;;  %v8614_v40 = vunpack.c.h.bf16 %v14587_v51  ;;  %v13792_v50 = vpack.c.bf16 %v4238_v54, %v4237_v1  ;;  %v8617_v10 = vunpack.c.l.bf16 %v14589_v24 }
 0x745   : > { %v7181_v25 = vsel %vm7164_vm10, %v7180_v62, %v7179_v26  ;;  %v8618_v7 = vunpack.c.h.bf16 %v14589_v24  ;;  %v14591_v26 = vld [vmem:[%s14973_s5 + $0x610] sm:$0xff]   ;;  %14143 = vrsqrt.f32 %v15999_v43 }
 0x746   : > { %v4240_v48 = vmul.f32 %v8614_v40, %v8614_v40  ;;  %v4241_v54 = vmul.f32 %v8617_v10, %v8617_v10  ;;  %v8621_v51 = vunpack.c.l.bf16 %v14591_v26  ;;  %v14592_v40 = vld [vmem:[%s14973_s5 + $0x650] sm:$0xff]   ;;  %14145 = vrsqrt.f32 %v15926_v0 }
 0x747   : > { %v4242_v39 = vmul.f32 %v8618_v7, %v8618_v7  ;;  %v8653_v6 = vunpack.c.l.bf16 %v14592_v40 }
 0x74b   : > { %v14140_v57 = vpop.eup %14139  ;;  %13766 = vmatpush3.bf16.xpose.msra.mxu0 %v13765_v23  ;;  %13790 = vmatpush3.bf16.xpose.msra.mxu1 %v13789_v34  ;;  %v4255_v23 = vmul.f32 %v8645_v42, %v8645_v42  ;;  %v4256_v34 = vmul.f32 %v8646_v53, %v8646_v53  ;;  %v8654_v42 = vunpack.c.h.bf16 %v14592_v40  ;;  %v13798_v53 = vpack.c.bf16 %v4242_v39, %v4241_v54  ;;  %v14595_v39 = vld [vmem:[%s14973_s5 + $0x620] sm:$0xff]  }
 0x74c   : > { %v14142_v11 = vpop.eup %14141  ;;  %13767 = vmatprep.subr.bf16.mxu0 %v17163_v61  ;;  %13791 = vmatprep.subr.bf16.mxu1 %v17163_v61  ;;  %v16434_v14 = vmul.f32 %v14140_v57, %v15446_v2  ;;  %v13768_v2 = vpack.c.bf16 %v4222_v45, %v4221_v19  ;;  %v8649_v19 = vunpack.c.l.bf16 %v14590_v52  ;;  %v8650_v45 = vunpack.c.h.bf16 %v14590_v52 }
 0x74d   : > { %v16439_v49 = vmul.f32 %v14142_v11, %v15448_v3  ;;  %v4239_v3 = vmul.f32 %v8613_v9, %v8613_v9  ;;  %v13819_v1 = vpack.c.bf16 %v4256_v34, %v4255_v23  ;;  %v8622_v9 = vunpack.c.h.bf16 %v14591_v26  ;;  %v14596_v26 = vld [vmem:[%s14973_s5 + $0x660] sm:$0xff]  }
 0x74e   : > { %v7182_v22 = vrot.slane %v16434_v14, 2  ;;  %v4257_v62 = vmul.f32 %v8649_v19, %v8649_v19  ;;  %v4258_v11 = vmul.f32 %v8650_v45, %v8650_v45 }
 0x74f   : > { %v7184_v12 = vrot.slane %v16439_v49, 1  ;;  %v13795_v57 = vpack.c.bf16 %v4240_v48, %v4239_v3  ;;  %v14594_v48 = vld [vmem:[%s14973_s5 + $0x658] sm:$0xff]   ;;  %v14144_v7 = vpop.eup %14143 }
 0x750   : > { %v7183_v36 = vsel %vm7167_vm11, %v7182_v22, %v7181_v25  ;;  %v13822_v22 = vpack.c.bf16 %v4258_v11, %v4257_v62  ;;  %v4243_v25 = vmul.f32 %v8621_v51, %v8621_v51  ;;  %v8657_v23 = vunpack.c.l.bf16 %v14594_v48  ;;  %v14146_v19 = vpop.eup %14145 }
 0x751   : > { %v7185_v37 = vsel %vm7170_vm12, %v7184_v12, %v7183_v36  ;;  %v4244_v12 = vmul.f32 %v8622_v9, %v8622_v9  ;;  %v14593_v36 = vld [vmem:[%s14973_s5 + $0x618] sm:$0xff]   ;;  %v8658_v34 = vunpack.c.h.bf16 %v14594_v48  ;;  %v3744_v54 = vmul.f32 %v14144_v7, %v15999_v43 }
 0x752   : > { %7220 = vmax.xlane.f32.xlu1 %v7185_v37  ;;  %v8625_v37 = vunpack.c.l.bf16 %v14593_v36  ;;  %v8626_v3 = vunpack.c.h.bf16 %v14593_v36  ;;  %v8629_v62 = vunpack.c.l.bf16 %v14595_v39  ;;  %v8630_v11 = vunpack.c.h.bf16 %v14595_v39 }
 0x753   : > { %13769 = vmatpush3.bf16.xpose.msra.mxu0 %v13768_v2  ;;  %13793 = vmatpush3.bf16.xpose.msra.mxu1 %v13792_v50  ;;  %v4259_v2 = vmul.f32 %v8653_v6, %v8653_v6  ;;  %v4260_v50 = vmul.f32 %v8654_v42, %v8654_v42  ;;  %v13801_v24 = vpack.c.bf16 %v4244_v12, %v4243_v25  ;;  %v8661_v51 = vunpack.c.l.bf16 %v14596_v26 }
 0x754   : > { %13794 = vmatprep.subr.bf16.mxu0 %v17163_v61  ;;  %13818 = vmatprep.subr.bf16.mxu1 %v17163_v61  ;;  %v4245_v52 = vmul.f32 %v8625_v37, %v8625_v37  ;;  %v4246_v45 = vmul.f32 %v8626_v3, %v8626_v3  ;;  %v8662_v6 = vunpack.c.h.bf16 %v14596_v26  ;;  %v3751_v42 = vmul.f32 %v14146_v19, %v15926_v0 }
 0x755   : > { %v13825_v10 = vpack.c.bf16 %v4260_v50, %v4259_v2  ;;  %v3748_v25 = vand.u32 2147483648, %v15999_v43  ;;  %v3746_v50 = vsel %vm3745_vm1, %v15999_v43, %v3744_v54  ;;  %v3755_v36 = vand.u32 2147483648, %v15926_v0 }
 0x756   : > { %v13804_v12 = vpack.c.bf16 %v4246_v45, %v4245_v52  ;;  %v4247_v37 = vmul.f32 %v8629_v62, %v8629_v62  ;;  %v4248_v3 = vmul.f32 %v8630_v11, %v8630_v11  ;;  %v3753_v48 = vsel %vm3752_vm15, %v15926_v0, %v3751_v42  ;;  %v14598_v52 = vld [vmem:[%s14973_s5 + $0x668] sm:$0xff]  }
 0x757   : > { %v8665_v19 = vunpack.c.l.bf16 %v14598_v52  ;;  %v8666_v45 = vunpack.c.h.bf16 %v14598_v52  ;;  %vm3759_vm1 = vcmp.eq.f32.partialorder %v15868_v8, inf  ;;  %vm3766_vm15 = vcmp.eq.f32.partialorder %v16285_v17, inf }
 0x758   : > { %v13807_v54 = vpack.c.bf16 %v4248_v3, %v4247_v37 }
 0x759   : > { %v4266_v42 = vmul.f32 %v8666_v45, %v8666_v45 }
 0x75a   : > { %12133 = vmatmul.mubr.f32.vlgmr.msra.gmra.mrb[54].mxu0 %v17166_v5  ;;  %12168 = vmatmul.mubr.f32.vlgmr.msra.gmra.mrb[54].mxu1 %v17166_v5 }
 0x75b   : > { %13796 = vmatpush3.bf16.xpose.msra.mxu0 %v13795_v57  ;;  %13820 = vmatpush3.bf16.xpose.msra.mxu1 %v13819_v1  ;;  %v4261_v57 = vmul.f32 %v8657_v23, %v8657_v23  ;;  %v4262_v1 = vmul.f32 %v8658_v34, %v8658_v34  ;;  %v4263_v23 = vmul.f32 %v8661_v51, %v8661_v51 }
 0x75c   : > { %13797 = vmatprep.subr.bf16.mxu0 %v17163_v61  ;;  %13821 = vmatprep.subr.bf16.mxu1 %v17163_v61  ;;  %v4264_v34 = vmul.f32 %v8662_v6, %v8662_v6  ;;  %v4265_v6 = vmul.f32 %v8665_v19, %v8665_v19 }
 0x75d   : > { %12202 = vmatprep.mubr.msk.f32.mxu0 %vm14790_vm0, %v17167_v4  ;;  %12237 = vmatprep.mubr.msk.f32.mxu1 %vm14790_vm0, %v17167_v4  ;;  %v13828_v2 = vpack.c.bf16 %v4262_v1, %v4261_v57  ;;  %v3756_v57 = vsel %vm3754_vm3, %v3755_v36, %v3753_v48  ;;  %vm3768_vm3 = vcmp.eq.f32.partialorder %v16285_v17, 0.0 }
 0x75e   : > { %v13831_v39 = vpack.c.bf16 %v4264_v34, %v4263_v23  ;;  %v6880_v11 = vadd.f32 1e-13, %v3756_v57  ;;  %v14599_v34 = vld [vmem:[%s14973_s5 + $0x630] sm:$0xff]   ;;  %v13834_v57 = vpack.c.bf16 %v4266_v42, %v4265_v6 }
 0x760   : > { %v6966_v36 = vrot.slane %v6880_v11, %v15910_v46  ;;  %v14601_v11 = vld [vmem:[%s14973_s5 + $0x638] sm:$0xff]  }
 0x763   : > { %13799 = vmatpush3.bf16.xpose.msra.mxu0 %v13798_v53  ;;  %13823 = vmatpush3.bf16.xpose.msra.mxu1 %v13822_v22 }
 0x764   : > { %13800 = vmatprep.subr.bf16.mxu0 %v17163_v61  ;;  %13824 = vmatprep.subr.bf16.mxu1 %v17163_v61 }
 0x76b   : > { %13802 = vmatpush3.bf16.xpose.msra.mxu0 %v13801_v24  ;;  %13826 = vmatpush3.bf16.xpose.msra.mxu1 %v13825_v10  ;;  %v3749_v24 = vsel %vm3747_vm2, %v3748_v25, %v3746_v50  ;;  %v14597_v10 = vld [vmem:[%s14973_s5 + $0x628] sm:$0xff]   ;;  %vm3761_vm2 = vcmp.eq.f32.partialorder %v15868_v8, 0.0 }
 0x76c   : > { %13803 = vmatprep.subr.bf16.mxu0 %v17163_v61  ;;  %13827 = vmatprep.subr.bf16.mxu1 %v17163_v61  ;;  %v8633_v7 = vunpack.c.l.bf16 %v14597_v10  ;;  %v8634_v43 = vunpack.c.h.bf16 %v14597_v10  ;;  %v6879_v1 = vadd.f32 1e-13, %v3749_v24  ;;  %v8637_v24 = vunpack.c.l.bf16 %v14599_v34 }
 0x76d   : > { %v5553_v9 = vpop.f32.mrb[48].mxu0  ;;  %v5623_v40 = vpop.f32.mrb[48].mxu1  ;;  %v8638_v10 = vunpack.c.h.bf16 %v14599_v34 }
 0x76e   : > { %14147 = vrsqrt.f32 %v5553_v9  ;;  %v11924_v53 = vpop.f32.mrb[49].mxu0  ;;  %v11959_v22 = vpop.f32.mrb[49].mxu1  ;;  %v4249_v62 = vmul.f32 %v8633_v7, %v8633_v7  ;;  %v4250_v51 = vmul.f32 %v8634_v43, %v8634_v43  ;;  %vm6721_vm4 = vcmp.eq.f32.partialorder %v5553_v9, inf }
 0x76f   : > { %14149 = vrsqrt.f32 %v5623_v40  ;;  %v6962_v22 = vrot.slane %v6879_v1, %v15910_v46  ;;  %v6724_v25 = vand.u32 2147483648, %v5553_v9  ;;  %vm6723_vm5 = vcmp.eq.f32.partialorder %v5553_v9, 0.0 }
 0x770   : > { %vm6728_vm13 = vcmp.eq.f32.partialorder %v5623_v40, inf  ;;  %v6731_v50 = vand.u32 2147483648, %v5623_v40  ;;  %vm6730_vm14 = vcmp.eq.f32.partialorder %v5623_v40, 0.0  ;;  %v13810_v45 = vpack.c.bf16 %v4250_v51, %v4249_v62 }
 0x773   : > { %13805 = vmatpush3.bf16.xpose.msra.mxu0 %v13804_v12  ;;  %13829 = vmatpush3.bf16.xpose.msra.mxu1 %v13828_v2 }
 0x774   : > { %13806 = vmatprep.subr.bf16.mxu0 %v17163_v61  ;;  %13830 = vmatprep.subr.bf16.mxu1 %v17163_v61 }
 0x778   : > { %v14148_v0 = vpop.eup %14147 }
 0x779   : > { %v14150_v26 = vpop.eup %14149  ;;  %v6720_v53 = vmul.f32 %v14148_v0, %v5553_v9 }
 0x77a   : > { %v6727_v12 = vmul.f32 %v14150_v26, %v5623_v40  ;;  %v8641_v26 = vunpack.c.l.bf16 %v14601_v11 }
 0x77b   : > { %v6722_v2 = vsel %vm6721_vm4, %v5553_v9, %v6720_v53  ;;  %13808 = vmatpush3.bf16.xpose.msra.mxu0 %v13807_v54  ;;  %13832 = vmatpush3.bf16.xpose.msra.mxu1 %v13831_v39  ;;  %v14600_v9 = vld [vmem:[%s14973_s5 + $0x670] sm:$0xff]   ;;  %v4252_v54 = vmul.f32 %v8638_v10, %v8638_v10  ;;  %v8642_v53 = vunpack.c.h.bf16 %v14601_v11  ;;  %v14604_v10 = vld [vmem:[%s14973_s5 + $0x6c0] sm:$0xff]  }
 0x77c   : > { %v6725_v37 = vsel %vm6723_vm5, %v6724_v25, %v6722_v2  ;;  %v6729_v3 = vsel %vm6728_vm13, %v5623_v40, %v6727_v12  ;;  %13809 = vmatprep.subr.bf16.mxu0 %v17163_v61  ;;  %13833 = vmatprep.subr.bf16.mxu1 %v17163_v61  ;;  %v8669_v7 = vunpack.c.l.bf16 %v14600_v9  ;;  %v8670_v52 = vunpack.c.h.bf16 %v14600_v9 }
 0x77d   : > { %v6847_v48 = vadd.f32 1e-13, %v6725_v37  ;;  %v6732_v23 = vsel %vm6730_vm14, %v6731_v50, %v6729_v3  ;;  %v4251_v40 = vmul.f32 %v8637_v24, %v8637_v24  ;;  %v4253_v25 = vmul.f32 %v8641_v26, %v8641_v26 }
 0x77e   : > { %v6848_v43 = vadd.f32 1e-13, %v6732_v23  ;;  %v4267_v39 = vmul.f32 %v8669_v7, %v8669_v7  ;;  %v4268_v0 = vmul.f32 %v8670_v52, %v8670_v52  ;;  %v4254_v2 = vmul.f32 %v8642_v53, %v8642_v53  ;;  %v14603_v23 = vld [vmem:[%s14973_s5 + $0x680] sm:$0xff]  }
 0x77f   : > { %v7039_v19 = vmul.f32 %v6962_v22, %v6847_v48  ;;  %v14602_v22 = vld [vmem:[%s14973_s5 + $0x678] sm:$0xff]   ;;  %v13813_v6 = vpack.c.bf16 %v4252_v54, %v4251_v40  ;;  %v8677_v34 = vunpack.c.l.bf16 %v14603_v23  ;;  %v8678_v24 = vunpack.c.h.bf16 %v14603_v23  ;;  %v14606_v54 = vld [vmem:[%s14973_s5 + $0x6c8] sm:$0xff]  }
 0x780   : > { %v7040_v1 = vmul.f32 %v6966_v36, %v6848_v43  ;;  %v8673_v62 = vunpack.c.l.bf16 %v14602_v22  ;;  %v8674_v51 = vunpack.c.h.bf16 %v14602_v22  ;;  %v13837_v42 = vpack.c.bf16 %v4268_v0, %v4267_v39 }
 0x781   : > { %14151 = vrcp.f32 %v7039_v19  ;;  %v8709_v9 = vunpack.c.l.bf16 %v14604_v10  ;;  %v8710_v7 = vunpack.c.h.bf16 %v14604_v10  ;;  %v13816_v43 = vpack.c.bf16 %v4254_v2, %v4253_v25 }
 0x782   : > { %14153 = vrcp.f32 %v7040_v1  ;;  %v4269_v50 = vmul.f32 %v8673_v62, %v8673_v62  ;;  %v4270_v36 = vmul.f32 %v8674_v51, %v8674_v51  ;;  %v4271_v19 = vmul.f32 %v8677_v34, %v8677_v34 }
 0x783   : > { %13811 = vmatpush3.bf16.xpose.msra.mxu0 %v13810_v45  ;;  %13835 = vmatpush3.bf16.xpose.msra.mxu1 %v13834_v57  ;;  %v4272_v45 = vmul.f32 %v8678_v24, %v8678_v24  ;;  %v4287_v57 = vmul.f32 %v8709_v9, %v8709_v9  ;;  %v4288_v1 = vmul.f32 %v8710_v7, %v8710_v7  ;;  %v8713_v39 = vunpack.c.l.bf16 %v14606_v54  ;;  %v14609_v9 = vld [vmem:[%s14973_s5 + $0x698] sm:$0xff]  }
 0x784   : > { %13812 = vmatprep.subr.bf16.mxu0 %v17163_v61  ;;  %13836 = vmatprep.subr.bf16.mxu1 %v17163_v61  ;;  %v13840_v52 = vpack.c.bf16 %v4270_v36, %v4269_v50  ;;  %v8714_v0 = vunpack.c.h.bf16 %v14606_v54  ;;  %14155 = vrsqrt.f32 %v15868_v8  ;;  %v8689_v7 = vunpack.c.l.bf16 %v14609_v9 }
 0x785   : > { %v13843_v11 = vpack.c.bf16 %v4272_v45, %v4271_v19  ;;  %v13867_v26 = vpack.c.bf16 %v4288_v1, %v4287_v57  ;;  %v4289_v62 = vmul.f32 %v8713_v39, %v8713_v39  ;;  %14157 = vrsqrt.f32 %v16285_v17 }
 0x786   : > { %v4290_v51 = vmul.f32 %v8714_v0, %v8714_v0 }
 0x78b   : > { %v14152_v12 = vpop.eup %14151  ;;  %13814 = vmatpush3.bf16.xpose.msra.mxu0 %v13813_v6  ;;  %13838 = vmatpush3.bf16.xpose.msra.mxu1 %v13837_v42  ;;  %v14607_v6 = vld [vmem:[%s14973_s5 + $0x690] sm:$0xff]  }
 0x78c   : > { %v14154_v37 = vpop.eup %14153  ;;  %13815 = vmatprep.subr.bf16.mxu0 %v17163_v61  ;;  %13839 = vmatprep.subr.bf16.mxu1 %v17163_v61  ;;  %v16498_v3 = vmul.f32 %v14152_v12, %v15488_v31  ;;  %v14605_v31 = vld [vmem:[%s14973_s5 + $0x688] sm:$0xff]   ;;  %v8685_v42 = vunpack.c.l.bf16 %v14607_v6  ;;  %v8686_v25 = vunpack.c.h.bf16 %v14607_v6  ;;  %v14608_v12 = vld [vmem:[%s14973_s5 + $0x6d0] sm:$0xff]  }
 0x78d   : > { %v16501_v48 = vmul.f32 %v14154_v37, %v15490_v32  ;;  %v8681_v32 = vunpack.c.l.bf16 %v14605_v31  ;;  %v8682_v40 = vunpack.c.h.bf16 %v14605_v31  ;;  %v8717_v2 = vunpack.c.l.bf16 %v14608_v12 }
 0x78e   : > { %v8718_v50 = vunpack.c.h.bf16 %v14608_v12  ;;  %v13870_v37 = vpack.c.bf16 %v4290_v51, %v4289_v62  ;;  %v4275_v23 = vmul.f32 %v8685_v42, %v8685_v42  ;;  %v4276_v34 = vmul.f32 %v8686_v25, %v8686_v25  ;;  %v14156_v31 = vpop.eup %14155  ;;  %v14612_v62 = vld [vmem:[%s14973_s5 + $0x6e0] sm:$0xff]  }
 0x78f   : > { %v4273_v53 = vmul.f32 %v8681_v32, %v8681_v32  ;;  %v4274_v22 = vmul.f32 %v8682_v40, %v8682_v40  ;;  %v4291_v24 = vmul.f32 %v8717_v2, %v8717_v2  ;;  %v4277_v32 = vmul.f32 %v8689_v7, %v8689_v7  ;;  %v14158_v40 = vpop.eup %14157 }
 0x790   : > { %v4292_v10 = vmul.f32 %v8718_v50, %v8718_v50  ;;  %v13849_v57 = vpack.c.bf16 %v4276_v34, %v4275_v23  ;;  %v8725_v51 = vunpack.c.l.bf16 %v14612_v62  ;;  %v8726_v25 = vunpack.c.h.bf16 %v14612_v62 }
 0x791   : > { %v13846_v36 = vpack.c.bf16 %v4274_v22, %v4273_v53  ;;  %v3762_v12 = vand.u32 2147483648, %v15868_v8  ;;  %v3765_v2 = vmul.f32 %v14158_v40, %v16285_v17 }
 0x792   : > { %v13873_v1 = vpack.c.bf16 %v4292_v10, %v4291_v24  ;;  %v3769_v24 = vand.u32 2147483648, %v16285_v17 }
 0x793   : > { %13817 = vmatpush3.bf16.xpose.msra.mxu0 %v13816_v43  ;;  %13841 = vmatpush3.bf16.xpose.msra.mxu1 %v13840_v52  ;;  %v8690_v43 = vunpack.c.h.bf16 %v14609_v9  ;;  %v14610_v52 = vld [vmem:[%s14973_s5 + $0x6d8] sm:$0xff]   ;;  %v3767_v7 = vsel %vm3766_vm15, %v16285_v17, %v3765_v2  ;;  %vm3780_vm15 = vcmp.eq.f32.partialorder %v16082_v55, inf }
 0x794   : > { %13842 = vmatprep.subr.bf16.mxu0 %v17163_v61  ;;  %13866 = vmatprep.subr.bf16.mxu1 %v17163_v61  ;;  %v8721_v19 = vunpack.c.l.bf16 %v14610_v52  ;;  %v8722_v45 = vunpack.c.h.bf16 %v14610_v52  ;;  %v4296_v52 = vmul.f32 %v8726_v25, %v8726_v25  ;;  %v3770_v40 = vsel %vm3768_vm3, %v3769_v24, %v3767_v7  ;;  %v14615_v7 = vld [vmem:[%s14973_s5 + $0x6b0] sm:$0xff]  }
 0x795   : > { %v4278_v54 = vmul.f32 %v8690_v43, %v8690_v43  ;;  %v4295_v43 = vmul.f32 %v8725_v51, %v8725_v51  ;;  %vm3782_vm3 = vcmp.eq.f32.partialorder %v16082_v55, 0.0 }
 0x796   : > { %v4293_v39 = vmul.f32 %v8721_v19, %v8721_v19  ;;  %v4294_v0 = vmul.f32 %v8722_v45, %v8722_v45  ;;  %v14613_v45 = vld [vmem:[%s14973_s5 + $0x6a8] sm:$0xff]  }
 0x798   : > { %v13876_v23 = vpack.c.bf16 %v4294_v0, %v4293_v39  ;;  %v13879_v0 = vpack.c.bf16 %v4296_v52, %v4295_v43  ;;  %v8701_v43 = vunpack.c.l.bf16 %v14615_v7  ;;  %v8702_v52 = vunpack.c.h.bf16 %v14615_v7  ;;  %v14620_v7 = vld [vmem:[%s14973_s5 + $0x740] sm:$0xff]  }
 0x79a   : > { %12203 = vmatmul.mubr.f32.vlgmr.msra.gmra.mrb[56].mxu0 %v17166_v5  ;;  %12238 = vmatmul.mubr.f32.vlgmr.msra.gmra.mrb[56].mxu1 %v17166_v5 }
 0x79b   : > { %13844 = vmatpush3.bf16.xpose.msra.mxu0 %v13843_v11  ;;  %13868 = vmatpush3.bf16.xpose.msra.mxu1 %v13867_v26  ;;  %v3758_v11 = vmul.f32 %v14156_v31, %v15868_v8  ;;  %v14611_v26 = vld [vmem:[%s14973_s5 + $0x6a0] sm:$0xff]  }
 0x79c   : > { %13845 = vmatprep.subr.bf16.mxu0 %v17163_v61  ;;  %13869 = vmatprep.subr.bf16.mxu1 %v17163_v61  ;;  %v8693_v53 = vunpack.c.l.bf16 %v14611_v26  ;;  %v8694_v22 = vunpack.c.h.bf16 %v14611_v26  ;;  %v6882_v26 = vadd.f32 1e-13, %v3770_v40  ;;  %v4284_v40 = vmul.f32 %v8702_v52, %v8702_v52 }
 0x79d   : > { %12272 = vmatprep.mubr.msk.f32.mxu0 %vm14790_vm0, %v17167_v4  ;;  %12307 = vmatprep.mubr.msk.f32.mxu1 %vm14790_vm0, %v17167_v4  ;;  %v3760_v34 = vsel %vm3759_vm1, %v15868_v8, %v3758_v11  ;;  %v8698_v8 = vunpack.c.h.bf16 %v14613_v45  ;;  %v8774_v52 = vunpack.c.h.bf16 %v14620_v7  ;;  %vm3773_vm1 = vcmp.eq.f32.partialorder %v16028_v21, inf }
 0x79e   : > { %v4279_v10 = vmul.f32 %v8693_v53, %v8693_v53  ;;  %v4280_v9 = vmul.f32 %v8694_v22, %v8694_v22  ;;  %v3763_v19 = vsel %vm3761_vm2, %v3762_v12, %v3760_v34  ;;  %vm3775_vm2 = vcmp.eq.f32.partialorder %v16028_v21, 0.0 }
 0x79f   : > { %v4282_v22 = vmul.f32 %v8698_v8, %v8698_v8 }
 0x7a0   : > { %v13855_v39 = vpack.c.bf16 %v4280_v9, %v4279_v10 }
 0x7a3   : > { %13847 = vmatpush3.bf16.xpose.msra.mxu0 %v13846_v36  ;;  %13871 = vmatpush3.bf16.xpose.msra.mxu1 %v13870_v37  ;;  %v13852_v37 = vpack.c.bf16 %v4278_v54, %v4277_v32  ;;  %v6881_v54 = vadd.f32 1e-13, %v3763_v19 }
 0x7a4   : > { %13848 = vmatprep.subr.bf16.mxu0 %v17163_v61  ;;  %13872 = vmatprep.subr.bf16.mxu1 %v17163_v61 }
 0x7a5   : > { %v6970_v12 = vrot.slane %v6881_v54, %v15910_v46 }
 0x7ab   : > { %13850 = vmatpush3.bf16.xpose.msra.mxu0 %v13849_v57  ;;  %13874 = vmatpush3.bf16.xpose.msra.mxu1 %v13873_v1  ;;  %v8697_v57 = vunpack.c.l.bf16 %v14613_v45  ;;  %v14614_v1 = vld [vmem:[%s14973_s5 + $0x6e8] sm:$0xff]  }
 0x7ac   : > { %13851 = vmatprep.subr.bf16.mxu0 %v17163_v61  ;;  %13875 = vmatprep.subr.bf16.mxu1 %v17163_v61  ;;  %v8729_v31 = vunpack.c.l.bf16 %v14614_v1  ;;  %v8730_v32 = vunpack.c.h.bf16 %v14614_v1 }
 0x7ad   : > { %v5693_v6 = vpop.f32.mrb[50].mxu0  ;;  %v5763_v42 = vpop.f32.mrb[50].mxu1  ;;  %v4281_v11 = vmul.f32 %v8697_v57, %v8697_v57 }
 0x7ae   : > { %14159 = vrsqrt.f32 %v5693_v6  ;;  %v11994_v50 = vpop.f32.mrb[51].mxu0  ;;  %v12029_v36 = vpop.f32.mrb[51].mxu1  ;;  %v4297_v62 = vmul.f32 %v8729_v31, %v8729_v31  ;;  %v4298_v51 = vmul.f32 %v8730_v32, %v8730_v32  ;;  %vm6735_vm4 = vcmp.eq.f32.partialorder %v5693_v6, inf }
 0x7af   : > { %14161 = vrsqrt.f32 %v5763_v42  ;;  %v6738_v2 = vand.u32 2147483648, %v5693_v6  ;;  %vm6737_vm5 = vcmp.eq.f32.partialorder %v5693_v6, 0.0  ;;  %vm6742_vm13 = vcmp.eq.f32.partialorder %v5763_v42, inf }
 0x7b0   : > { %vm6744_vm14 = vcmp.eq.f32.partialorder %v5763_v42, 0.0  ;;  %v13858_v1 = vpack.c.bf16 %v4282_v22, %v4281_v11  ;;  %v13882_v31 = vpack.c.bf16 %v4298_v51, %v4297_v62 }
 0x7b3   : > { %13853 = vmatpush3.bf16.xpose.msra.mxu0 %v13852_v37  ;;  %13877 = vmatpush3.bf16.xpose.msra.mxu1 %v13876_v23  ;;  %v6745_v37 = vand.u32 2147483648, %v5763_v42  ;;  %v6974_v23 = vrot.slane %v6882_v26, %v15910_v46 }
 0x7b4   : > { %13854 = vmatprep.subr.bf16.mxu0 %v17163_v61  ;;  %13878 = vmatprep.subr.bf16.mxu1 %v17163_v61 }
 0x7b8   : > { %v14160_v17 = vpop.eup %14159 }
 0x7b9   : > { %v14162_v53 = vpop.eup %14161  ;;  %v6734_v25 = vmul.f32 %v14160_v17, %v5693_v6 }
 0x7ba   : > { %v6741_v50 = vmul.f32 %v14162_v53, %v5763_v42  ;;  %v14618_v53 = vld [vmem:[%s14973_s5 + $0x6f8] sm:$0xff]  }
 0x7bb   : > { %v6736_v36 = vsel %vm6735_vm4, %v5693_v6, %v6734_v25  ;;  %13856 = vmatpush3.bf16.xpose.msra.mxu0 %v13855_v39  ;;  %13880 = vmatpush3.bf16.xpose.msra.mxu1 %v13879_v0  ;;  %v14616_v6 = vld [vmem:[%s14973_s5 + $0x6f0] sm:$0xff]   ;;  %v14617_v0 = vld [vmem:[%s14973_s5 + $0x6b8] sm:$0xff]   ;;  %v8737_v11 = vunpack.c.l.bf16 %v14618_v53  ;;  %v8738_v22 = vunpack.c.h.bf16 %v14618_v53 }
 0x7bc   : > { %v6739_v34 = vsel %vm6737_vm5, %v6738_v2, %v6736_v36  ;;  %v6743_v24 = vsel %vm6742_vm13, %v5763_v42, %v6741_v50  ;;  %13857 = vmatprep.subr.bf16.mxu0 %v17163_v61  ;;  %13881 = vmatprep.subr.bf16.mxu1 %v17163_v61  ;;  %v8733_v19 = vunpack.c.l.bf16 %v14616_v6  ;;  %v8734_v57 = vunpack.c.h.bf16 %v14616_v6 }
 0x7bd   : > { %v6849_v10 = vadd.f32 1e-13, %v6739_v34  ;;  %v6746_v9 = vsel %vm6744_vm14, %v6745_v37, %v6743_v24  ;;  %v4283_v42 = vmul.f32 %v8701_v43, %v8701_v43  ;;  %v8705_v17 = vunpack.c.l.bf16 %v14617_v0  ;;  %v14619_v24 = vld [vmem:[%s14973_s5 + $0x700] sm:$0xff]  }
 0x7be   : > { %v6850_v45 = vadd.f32 1e-13, %v6746_v9  ;;  %v4299_v54 = vmul.f32 %v8733_v19, %v8733_v19  ;;  %v4300_v39 = vmul.f32 %v8734_v57, %v8734_v57  ;;  %v8706_v26 = vunpack.c.h.bf16 %v14617_v0 }
 0x7bf   : > { %v7041_v8 = vmul.f32 %v6970_v12, %v6849_v10  ;;  %v13861_v62 = vpack.c.bf16 %v4284_v40, %v4283_v42  ;;  %v4285_v25 = vmul.f32 %v8705_v17, %v8705_v17  ;;  %v4301_v50 = vmul.f32 %v8737_v11, %v8737_v11  ;;  %v14623_v11 = vld [vmem:[%s14973_s5 + $0x710] sm:$0xff]  }
 0x7c0   : > { %v7042_v32 = vmul.f32 %v6974_v23, %v6850_v45  ;;  %v13885_v51 = vpack.c.bf16 %v4300_v39, %v4299_v54  ;;  %v4286_v2 = vmul.f32 %v8706_v26, %v8706_v26  ;;  %v4302_v36 = vmul.f32 %v8738_v22, %v8738_v22 }
 0x7c1   : > { %14163 = vrcp.f32 %v7041_v8  ;;  %v8741_v10 = vunpack.c.l.bf16 %v14619_v24  ;;  %v8742_v9 = vunpack.c.h.bf16 %v14619_v24  ;;  %v8773_v43 = vunpack.c.l.bf16 %v14620_v7 }
 0x7c2   : > { %14165 = vrcp.f32 %v7042_v32  ;;  %v13864_v6 = vpack.c.bf16 %v4286_v2, %v4285_v25  ;;  %v13888_v19 = vpack.c.bf16 %v4302_v36, %v4301_v50  ;;  %v14622_v32 = vld [vmem:[%s14973_s5 + $0x748] sm:$0xff]   ;;  %v8749_v22 = vunpack.c.l.bf16 %v14623_v11 }
 0x7c3   : > { %13859 = vmatpush3.bf16.xpose.msra.mxu0 %v13858_v1  ;;  %13883 = vmatpush3.bf16.xpose.msra.mxu1 %v13882_v31  ;;  %v4303_v45 = vmul.f32 %v8741_v10, %v8741_v10  ;;  %v4304_v57 = vmul.f32 %v8742_v9, %v8742_v9  ;;  %v4319_v8 = vmul.f32 %v8773_v43, %v8773_v43  ;;  %v8777_v42 = vunpack.c.l.bf16 %v14622_v32  ;;  %v14625_v9 = vld [vmem:[%s14973_s5 + $0x718] sm:$0xff]  }
 0x7c4   : > { %13860 = vmatprep.subr.bf16.mxu0 %v17163_v61  ;;  %13884 = vmatprep.subr.bf16.mxu1 %v17163_v61  ;;  %v4320_v1 = vmul.f32 %v8774_v52, %v8774_v52  ;;  %v8778_v40 = vunpack.c.h.bf16 %v14622_v32  ;;  %14167 = vrsqrt.f32 %v16028_v21  ;;  %v4307_v36 = vmul.f32 %v8749_v22, %v8749_v22  ;;  %v14626_v52 = vld [vmem:[%s14973_s5 + $0x758] sm:$0xff]  }
 0x7c5   : > { %v13891_v54 = vpack.c.bf16 %v4304_v57, %v4303_v45  ;;  %v4321_v26 = vmul.f32 %v8777_v42, %v8777_v42  ;;  %14169 = vrsqrt.f32 %v16082_v55  ;;  %v8753_v7 = vunpack.c.l.bf16 %v14625_v9 }
 0x7c6   : > { %v13915_v39 = vpack.c.bf16 %v4320_v1, %v4319_v8  ;;  %v4322_v53 = vmul.f32 %v8778_v40, %v8778_v40  ;;  %v8754_v43 = vunpack.c.h.bf16 %v14625_v9  ;;  %v14627_v40 = vld [vmem:[%s14973_s5 + $0x720] sm:$0xff]   ;;  %v3776_v22 = vand.u32 2147483648, %v16028_v21 }
 0x7c7   : > { %v4309_v1 = vmul.f32 %v8753_v7, %v8753_v7 }
 0x7c8   : > { %v13918_v50 = vpack.c.bf16 %v4322_v53, %v4321_v26 }
 0x7cb   : > { %v14164_v12 = vpop.eup %14163  ;;  %13862 = vmatpush3.bf16.xpose.msra.mxu0 %v13861_v62  ;;  %13886 = vmatpush3.bf16.xpose.msra.mxu1 %v13885_v51  ;;  %v8750_v62 = vunpack.c.h.bf16 %v14623_v11  ;;  %v14624_v51 = vld [vmem:[%s14973_s5 + $0x750] sm:$0xff]  }
 0x7cc   : > { %v14166_v37 = vpop.eup %14165  ;;  %13863 = vmatprep.subr.bf16.mxu0 %v17163_v61  ;;  %13887 = vmatprep.subr.bf16.mxu1 %v17163_v61  ;;  %v16556_v23 = vmul.f32 %v14164_v12, %v15536_v59  ;;  %v14621_v59 = vld [vmem:[%s14973_s5 + $0x708] sm:$0xff]   ;;  %v8781_v25 = vunpack.c.l.bf16 %v14624_v51  ;;  %v8782_v12 = vunpack.c.h.bf16 %v14624_v51 }
 0x7cd   : > { %v16559_v34 = vmul.f32 %v14166_v37, %v15538_v60  ;;  %v8745_v60 = vunpack.c.l.bf16 %v14621_v59  ;;  %v8746_v31 = vunpack.c.h.bf16 %v14621_v59  ;;  %v4308_v37 = vmul.f32 %v8750_v62, %v8750_v62 }
 0x7ce   : > { %v4323_v24 = vmul.f32 %v8781_v25, %v8781_v25  ;;  %v4324_v10 = vmul.f32 %v8782_v12, %v8782_v12  ;;  %v14168_v8 = vpop.eup %14167 }
 0x7cf   : > { %v4305_v0 = vmul.f32 %v8745_v60, %v8745_v60  ;;  %v4306_v17 = vmul.f32 %v8746_v31, %v8746_v31  ;;  %v13897_v45 = vpack.c.bf16 %v4308_v37, %v4307_v36  ;;  %v14170_v59 = vpop.eup %14169  ;;  %v4310_v60 = vmul.f32 %v8754_v43, %v8754_v43 }
 0x7d0   : > { %v13921_v57 = vpack.c.bf16 %v4324_v10, %v4323_v24  ;;  %v3772_v42 = vmul.f32 %v14168_v8, %v16028_v21  ;;  %v3779_v62 = vmul.f32 %v14170_v59, %v16082_v55  ;;  %v3783_v36 = vand.u32 2147483648, %v16082_v55 }
 0x7d1   : > { %v13894_v2 = vpack.c.bf16 %v4306_v17, %v4305_v0  ;;  %v14628_v0 = vld [vmem:[%s14973_s5 + $0x760] sm:$0xff]   ;;  %v13900_v12 = vpack.c.bf16 %v4310_v60, %v4309_v1 }
 0x7d2   : > { %v8789_v17 = vunpack.c.l.bf16 %v14628_v0  ;;  %v8790_v11 = vunpack.c.h.bf16 %v14628_v0  ;;  %v3781_v10 = vsel %vm3780_vm15, %v16082_v55, %v3779_v62 }
 0x7d3   : > { %13865 = vmatpush3.bf16.xpose.msra.mxu0 %v13864_v6  ;;  %13889 = vmatpush3.bf16.xpose.msra.mxu1 %v13888_v19  ;;  %v8785_v6 = vunpack.c.l.bf16 %v14626_v52  ;;  %v8786_v19 = vunpack.c.h.bf16 %v14626_v52  ;;  %v14629_v52 = vld [vmem:[%s14973_s5 + $0x728] sm:$0xff]   ;;  %v3784_v8 = vsel %vm3782_vm3, %v3783_v36, %v3781_v10 }
 0x7d4   : > { %13890 = vmatprep.subr.bf16.mxu0 %v17163_v61  ;;  %13914 = vmatprep.subr.bf16.mxu1 %v17163_v61  ;;  %v4327_v9 = vmul.f32 %v8789_v17, %v8789_v17  ;;  %v4328_v7 = vmul.f32 %v8790_v11, %v8790_v11 }
 0x7d5   : > { %v4325_v31 = vmul.f32 %v8785_v6, %v8785_v6  ;;  %v4326_v32 = vmul.f32 %v8786_v19, %v8786_v19  ;;  %v8761_v6 = vunpack.c.l.bf16 %v14629_v52  ;;  %v14630_v19 = vld [vmem:[%s14973_s5 + $0x768] sm:$0xff]  }
 0x7d6   : > { %v13927_v60 = vpack.c.bf16 %v4328_v7, %v4327_v9 }
 0x7da   : > { %12273 = vmatmul.mubr.f32.vlgmr.msra.gmra.mrb[58].mxu0 %v17166_v5  ;;  %12308 = vmatmul.mubr.f32.vlgmr.msra.gmra.mrb[58].mxu1 %v17166_v5 }
 0x7db   : > { %13892 = vmatpush3.bf16.xpose.msra.mxu0 %v13891_v54  ;;  %13916 = vmatpush3.bf16.xpose.msra.mxu1 %v13915_v39  ;;  %v8757_v54 = vunpack.c.l.bf16 %v14627_v40  ;;  %v8758_v39 = vunpack.c.h.bf16 %v14627_v40 }
 0x7dc   : > { %13893 = vmatprep.subr.bf16.mxu0 %v17163_v61  ;;  %13917 = vmatprep.subr.bf16.mxu1 %v17163_v61 }
 0x7dd   : > { %12342 = vmatprep.mubr.msk.f32.mxu0 %vm14790_vm0, %v17167_v4  ;;  %12377 = vmatprep.mubr.msk.f32.mxu1 %vm14790_vm0, %v17167_v4  ;;  %v4311_v37 = vmul.f32 %v8757_v54, %v8757_v54  ;;  %v4312_v24 = vmul.f32 %v8758_v39, %v8758_v39 }
 0x7df   : > { %v13903_v59 = vpack.c.bf16 %v4312_v24, %v4311_v37  ;;  %v14631_v37 = vld [vmem:[%s14973_s5 + $0x730] sm:$0xff]  }
 0x7e0   : > { %v8765_v24 = vunpack.c.l.bf16 %v14631_v37  ;;  %v8766_v10 = vunpack.c.h.bf16 %v14631_v37 }
 0x7e3   : > { %13895 = vmatpush3.bf16.xpose.msra.mxu0 %v13894_v2  ;;  %13919 = vmatpush3.bf16.xpose.msra.mxu1 %v13918_v50  ;;  %v13924_v2 = vpack.c.bf16 %v4326_v32, %v4325_v31  ;;  %v3774_v50 = vsel %vm3773_vm1, %v16028_v21, %v3772_v42  ;;  %v8762_v21 = vunpack.c.h.bf16 %v14629_v52  ;;  %v4313_v31 = vmul.f32 %v8761_v6, %v8761_v6 }
 0x7e4   : > { %13896 = vmatprep.subr.bf16.mxu0 %v17163_v61  ;;  %13920 = vmatprep.subr.bf16.mxu1 %v17163_v61  ;;  %v3777_v43 = vsel %vm3775_vm2, %v3776_v22, %v3774_v50  ;;  %v6884_v32 = vadd.f32 1e-13, %v3784_v8 }
 0x7e5   : > { %v6883_v1 = vadd.f32 1e-13, %v3777_v43  ;;  %v4314_v40 = vmul.f32 %v8762_v21, %v8762_v21 }
 0x7e7   : > { %v6978_v17 = vrot.slane %v6883_v1, %v15910_v46  ;;  %v13906_v6 = vpack.c.bf16 %v4314_v40, %v4313_v31  ;;  %v14633_v1 = vld [vmem:[%s14973_s5 + $0x738] sm:$0xff]  }
 0x7eb   : > { %13898 = vmatpush3.bf16.xpose.msra.mxu0 %v13897_v45  ;;  %13922 = vmatpush3.bf16.xpose.msra.mxu1 %v13921_v57  ;;  %v8793_v45 = vunpack.c.l.bf16 %v14630_v19  ;;  %v8794_v57 = vunpack.c.h.bf16 %v14630_v19 }
 0x7ec   : > { %13899 = vmatprep.subr.bf16.mxu0 %v17163_v61  ;;  %13923 = vmatprep.subr.bf16.mxu1 %v17163_v61 }
 0x7ed   : > { %v5833_v26 = vpop.f32.mrb[52].mxu0  ;;  %v5903_v53 = vpop.f32.mrb[52].mxu1  ;;  %v4329_v54 = vmul.f32 %v8793_v45, %v8793_v45  ;;  %v4330_v39 = vmul.f32 %v8794_v57, %v8794_v57  ;;  %v4316_v45 = vmul.f32 %v8766_v10, %v8766_v10 }
 0x7ee   : > { %14171 = vrsqrt.f32 %v5833_v26  ;;  %v12064_v51 = vpop.f32.mrb[53].mxu0  ;;  %v12099_v25 = vpop.f32.mrb[53].mxu1  ;;  %vm6749_vm4 = vcmp.eq.f32.partialorder %v5833_v26, inf  ;;  %v6752_v11 = vand.u32 2147483648, %v5833_v26  ;;  %vm6751_vm5 = vcmp.eq.f32.partialorder %v5833_v26, 0.0 }
 0x7ef   : > { %14173 = vrsqrt.f32 %v5903_v53  ;;  %vm6756_vm13 = vcmp.eq.f32.partialorder %v5903_v53, inf  ;;  %v6759_v51 = vand.u32 2147483648, %v5903_v53  ;;  %v6982_v25 = vrot.slane %v6884_v32, %v15910_v46 }
 0x7f0   : > { %vm6758_vm14 = vcmp.eq.f32.partialorder %v5903_v53, 0.0  ;;  %v13930_v21 = vpack.c.bf16 %v4330_v39, %v4329_v54 }
 0x7f3   : > { %13901 = vmatpush3.bf16.xpose.msra.mxu0 %v13900_v12  ;;  %13925 = vmatpush3.bf16.xpose.msra.mxu1 %v13924_v2 }
 0x7f4   : > { %13902 = vmatprep.subr.bf16.mxu0 %v17163_v61  ;;  %13926 = vmatprep.subr.bf16.mxu1 %v17163_v61 }
 0x7f8   : > { %v14172_v55 = vpop.eup %14171 }
 0x7f9   : > { %v14174_v42 = vpop.eup %14173  ;;  %v6748_v0 = vmul.f32 %v14172_v55, %v5833_v26  ;;  %v14634_v55 = vld [vmem:[%s14973_s5 + $0x778] sm:$0xff]  }
 0x7fa   : > { %v6755_v22 = vmul.f32 %v14174_v42, %v5903_v53  ;;  %v8801_v31 = vunpack.c.l.bf16 %v14634_v55  ;;  %v8802_v32 = vunpack.c.h.bf16 %v14634_v55  ;;  %v16628_v55 = vpop.xlane.xlu0 %3605 }
 0x7fb   : > { %v6750_v62 = vsel %vm6749_vm4, %v5833_v26, %v6748_v0  ;;  %13904 = vmatpush3.bf16.xpose.msra.mxu0 %v13903_v59  ;;  %13928 = vmatpush3.bf16.xpose.msra.mxu1 %v13927_v60  ;;  %v14632_v26 = vld [vmem:[%s14973_s5 + $0x770] sm:$0xff]   ;;  %v8769_v59 = vunpack.c.l.bf16 %v14633_v1  ;;  %v8770_v60 = vunpack.c.h.bf16 %v14633_v1  ;;  %vm3794_vm1 = vcmp.eq.f32.partialorder %v16628_v55, inf }
 0x7fc   : > { %v6753_v12 = vsel %vm6751_vm5, %v6752_v11, %v6750_v62  ;;  %v6757_v2 = vsel %vm6756_vm13, %v5903_v53, %v6755_v22  ;;  %13905 = vmatprep.subr.bf16.mxu0 %v17163_v61  ;;  %13929 = vmatprep.subr.bf16.mxu1 %v17163_v61  ;;  %v8797_v9 = vunpack.c.l.bf16 %v14632_v26  ;;  %v8798_v43 = vunpack.c.h.bf16 %v14632_v26 }
 0x7fd   : > { %v6851_v50 = vadd.f32 1e-13, %v6753_v12  ;;  %v6760_v36 = vsel %vm6758_vm14, %v6759_v51, %v6757_v2  ;;  %v4315_v53 = vmul.f32 %v8765_v24, %v8765_v24  ;;  %v4317_v54 = vmul.f32 %v8769_v59, %v8769_v59 }
 0x7fe   : > { %v6852_v7 = vadd.f32 1e-13, %v6760_v36  ;;  %v4331_v57 = vmul.f32 %v8797_v9, %v8797_v9  ;;  %v4332_v8 = vmul.f32 %v8798_v43, %v8798_v43  ;;  %v4318_v0 = vmul.f32 %v8770_v60, %v8770_v60  ;;  %v17172_v60 = vld [vmem:[#allocation24_spill] sm:$0xff] }
 0x7ff   : > { %v7043_v52 = vmul.f32 %v6978_v17, %v6851_v50  ;;  %v13909_v42 = vpack.c.bf16 %v4316_v45, %v4315_v53  ;;  %v4333_v17 = vmul.f32 %v8801_v31, %v8801_v31  ;;  %v4334_v11 = vmul.f32 %v8802_v32, %v8802_v32  ;;  %v14636_v50 = vld [vmem:[%s14973_s5 + $0x7c0] sm:$0xff]   ;;  %v14639_v31 = vld [vmem:[%s14973_s5 + $0x790] sm:$0xff]  }
 0x800   : > { %v7044_v19 = vmul.f32 %v6982_v25, %v6852_v7  ;;  %v13933_v40 = vpack.c.bf16 %v4332_v8, %v4331_v57  ;;  %v14635_v25 = vld [vmem:[%s14973_s5 + $0x780] sm:$0xff]   ;;  %v8837_v36 = vunpack.c.l.bf16 %v14636_v50  ;;  %v8838_v37 = vunpack.c.h.bf16 %v14636_v50 }
 0x801   : > { %14175 = vrcp.f32 %v7043_v52  ;;  %v8805_v12 = vunpack.c.l.bf16 %v14635_v25  ;;  %v8806_v2 = vunpack.c.h.bf16 %v14635_v25  ;;  %v13912_v24 = vpack.c.bf16 %v4318_v0, %v4317_v54 }
 0x802   : > { %14177 = vrcp.f32 %v7044_v19  ;;  %v13936_v10 = vpack.c.bf16 %v4334_v11, %v4333_v17  ;;  %v4351_v7 = vmul.f32 %v8837_v36, %v8837_v36  ;;  %v4352_v43 = vmul.f32 %v8838_v37, %v8838_v37 }
 0x803   : > { %13907 = vmatpush3.bf16.xpose.msra.mxu0 %v13906_v6  ;;  %13931 = vmatpush3.bf16.xpose.msra.mxu1 %v13930_v21  ;;  %v4335_v26 = vmul.f32 %v8805_v12, %v8805_v12  ;;  %v4336_v9 = vmul.f32 %v8806_v2, %v8806_v2  ;;  %v14638_v6 = vld [vmem:[%s14973_s5 + $0x7c8] sm:$0xff]   ;;  %14179 = vrsqrt.f32 %v17172_v60  ;;  %v8813_v32 = vunpack.c.l.bf16 %v14639_v31 }
 0x804   : > { %13908 = vmatprep.subr.bf16.mxu0 %v17163_v61  ;;  %13932 = vmatprep.subr.bf16.mxu1 %v17163_v61  ;;  %v8841_v21 = vunpack.c.l.bf16 %v14638_v6  ;;  %v8842_v19 = vunpack.c.h.bf16 %v14638_v6  ;;  %v13963_v45 = vpack.c.bf16 %v4352_v43, %v4351_v7  ;;  %14181 = vrsqrt.f32 %v16628_v55 }
 0x805   : > { %v13939_v53 = vpack.c.bf16 %v4336_v9, %v4335_v26  ;;  %v4339_v11 = vmul.f32 %v8813_v32, %v8813_v32  ;;  %vm3789_vm15 = vcmp.eq.f32.partialorder %v17172_v60, 0.0  ;;  %vm3796_vm2 = vcmp.eq.f32.partialorder %v16628_v55, 0.0 }
 0x806   : > { %v4353_v1 = vmul.f32 %v8841_v21, %v8841_v21  ;;  %v4354_v59 = vmul.f32 %v8842_v19, %v8842_v19 }
 0x808   : > { %v13966_v17 = vpack.c.bf16 %v4354_v59, %v4353_v1 }
 0x80b   : > { %v14176_v39 = vpop.eup %14175  ;;  %13910 = vmatpush3.bf16.xpose.msra.mxu0 %v13909_v42  ;;  %13934 = vmatpush3.bf16.xpose.msra.mxu1 %v13933_v40  ;;  %v8814_v42 = vunpack.c.h.bf16 %v14639_v31  ;;  %v14640_v40 = vld [vmem:[%s14973_s5 + $0x7d0] sm:$0xff]   ;;  %v14644_v31 = vld [vmem:[%s14973_s5 + $0x7e0] sm:$0xff]  }
 0x80c   : > { %v14178_v22 = vpop.eup %14177  ;;  %13911 = vmatprep.subr.bf16.mxu0 %v17163_v61  ;;  %13935 = vmatprep.subr.bf16.mxu1 %v17163_v61  ;;  %v16614_v62 = vmul.f32 %v14176_v39, %v15581_v30  ;;  %v14637_v30 = vld [vmem:[%s14973_s5 + $0x788] sm:$0xff]   ;;  %v8845_v54 = vunpack.c.l.bf16 %v14640_v40  ;;  %v8846_v39 = vunpack.c.h.bf16 %v14640_v40  ;;  %v8853_v32 = vunpack.c.l.bf16 %v14644_v31 }
 0x80d   : > { %v16617_v51 = vmul.f32 %v14178_v22, %v15583_v33  ;;  %v8809_v33 = vunpack.c.l.bf16 %v14637_v30  ;;  %v8810_v52 = vunpack.c.h.bf16 %v14637_v30  ;;  %v16639_v22 = vpop.xlane.xlu0 %7218  ;;  %v4340_v25 = vmul.f32 %v8814_v42, %v8814_v42 }
 0x80e   : > { %v4355_v12 = vmul.f32 %v8845_v54, %v8845_v54  ;;  %v4356_v2 = vmul.f32 %v8846_v39, %v8846_v39  ;;  %v7230_v37 = vrot.slane %v16639_v22, 1  ;;  %v8854_v40 = vunpack.c.h.bf16 %v14644_v31 }
 0x80f   : > { %v4337_v57 = vmul.f32 %v8809_v33, %v8809_v33  ;;  %v4338_v8 = vmul.f32 %v8810_v52, %v8810_v52  ;;  %v13945_v43 = vpack.c.bf16 %v4340_v25, %v4339_v11  ;;  %v7231_v33 = vrot.slane %v16639_v22, 2 }
 0x810   : > { %v13969_v30 = vpack.c.bf16 %v4356_v2, %v4355_v12  ;;  %v7291_v21 = vsub.f32 %v15937_v35, %v7230_v37  ;;  %v3790_v35 = vand.u32 2147483648, %v17172_v60  ;;  %v3797_v54 = vand.u32 2147483648, %v16628_v55 }
 0x811   : > { %v13942_v0 = vpack.c.bf16 %v4338_v8, %v4337_v57  ;;  %v14643_v8 = vld [vmem:[%s14973_s5 + $0x7a0] sm:$0xff]   ;;  %v7292_v42 = vsub.f32 %v16009_v18, %v7231_v33  ;;  %v7232_v39 = vrot.slane %v16639_v22, 3  ;;  %v14646_v33 = vld [vmem:[%s14973_s5 + $0x7e8] sm:$0xff]  }
 0x812   : > { %v8821_v1 = vunpack.c.l.bf16 %v14643_v8  ;;  %v8822_v59 = vunpack.c.h.bf16 %v14643_v8 }
 0x813   : > { %13913 = vmatpush3.bf16.xpose.msra.mxu0 %v13912_v24  ;;  %13937 = vmatpush3.bf16.xpose.msra.mxu1 %v13936_v10  ;;  %v14180_v24 = vpop.eup %14179  ;;  %v14642_v10 = vld [vmem:[%s14973_s5 + $0x7d8] sm:$0xff]  }
 0x814   : > { %13938 = vmatprep.subr.bf16.mxu0 %v17163_v61  ;;  %13962 = vmatprep.subr.bf16.mxu1 %v17163_v61  ;;  %v8849_v26 = vunpack.c.l.bf16 %v14642_v10  ;;  %v8850_v9 = vunpack.c.h.bf16 %v14642_v10  ;;  %v14182_v7 = vpop.eup %14181  ;;  %v4343_v37 = vmul.f32 %v8821_v1, %v8821_v1  ;;  %v7235_v1 = vrot.slane %v16639_v22, 6 }
 0x815   : > { %v3793_v57 = vmul.f32 %v14182_v7, %v16628_v55 }
 0x816   : > { %v4357_v19 = vmul.f32 %v8849_v26, %v8849_v26  ;;  %v7233_v26 = vrot.slane %v16639_v22, 4 }
 0x817   : > { %v3795_v18 = vsel %vm3794_vm1, %v16628_v55, %v3793_v57 }
 0x818   : > { %v3798_v7 = vsel %vm3796_vm2, %v3797_v54, %v3795_v18  ;;  %v7294_v8 = vsub.f32 %v16085_v15, %v7233_v26 }
 0x81a   : > { %12343 = vmatmul.mubr.f32.vlgmr.msra.gmra.mrb[60].mxu0 %v17166_v5  ;;  %12378 = vmatmul.mubr.f32.vlgmr.msra.gmra.mrb[60].mxu1 %v17166_v5 }
 0x81b   : > { %13940 = vmatpush3.bf16.xpose.msra.mxu0 %v13939_v53  ;;  %13964 = vmatpush3.bf16.xpose.msra.mxu1 %v13963_v45  ;;  %v4358_v53 = vmul.f32 %v8850_v9, %v8850_v9  ;;  %v3786_v45 = vmul.f32 %v14180_v24, %v17172_v60  ;;  %v14645_v24 = vld [vmem:[%s14973_s5 + $0x7a8] sm:$0xff]   ;;  %v7326_v9 = vmul.f32 1.442695, %v7292_v42 }
 0x81c   : > { %13941 = vmatprep.subr.bf16.mxu0 %v17163_v61  ;;  %13965 = vmatprep.subr.bf16.mxu1 %v17163_v61  ;;  %v8825_v10 = vunpack.c.l.bf16 %v14645_v24 }
 0x81d   : > { %12412 = vmatprep.mubr.msk.f32.mxu0 %vm14790_vm0, %v17167_v4  ;;  %12447 = vmatprep.mubr.msk.f32.mxu1 %vm14790_vm0, %v17167_v4  ;;  %v14641_v4 = vld [vmem:[%s14973_s5 + $0x798] sm:$0xff]   ;;  %vm3787_vm0 = vcmp.eq.f32.partialorder %v17172_v60, inf }
 0x81e   : > { %v8817_v50 = vunpack.c.l.bf16 %v14641_v4  ;;  %v8818_v36 = vunpack.c.h.bf16 %v14641_v4  ;;  %v3788_v25 = vsel %vm3787_vm0, %v17172_v60, %v3786_v45  ;;  %v7290_v4 = vsub.f32 %v15934_v28, %v16639_v22 }
 0x81f   : > { %v3791_v55 = vsel %vm3789_vm15, %v3790_v35, %v3788_v25  ;;  %v8857_v28 = vunpack.c.l.bf16 %v14646_v33  ;;  %v6886_v60 = vadd.f32 1e-13, %v3798_v7  ;;  %v14648_v7 = vld [vmem:[%s14973_s5 + $0x7f0] sm:$0xff]  }
 0x820   : > { %v4341_v52 = vmul.f32 %v8817_v50, %v8817_v50  ;;  %v4342_v6 = vmul.f32 %v8818_v36, %v8818_v36  ;;  %v13972_v36 = vpack.c.bf16 %v4358_v53, %v4357_v19  ;;  %v4359_v19 = vmul.f32 %v8853_v32, %v8853_v32 }
 0x821   : > { %v4360_v53 = vmul.f32 %v8854_v40, %v8854_v40  ;;  %v7322_v45 = vmul.f32 1.442695, %v7290_v4  ;;  %v6885_v57 = vadd.f32 1e-13, %v3791_v55  ;;  %v4361_v32 = vmul.f32 %v8857_v28, %v8857_v28  ;;  %v14647_v40 = vld [vmem:[%s14973_s5 + $0x7b0] sm:$0xff]  }
 0x822   : > { %v13948_v50 = vpack.c.bf16 %v4342_v6, %v4341_v52  ;;  %v7234_v52 = vrot.slane %v16639_v22, 5  ;;  %v4344_v6 = vmul.f32 %v8822_v59, %v8822_v59  ;;  %v8829_v54 = vunpack.c.l.bf16 %v14647_v40 }
 0x823   : > { %13943 = vmatpush3.bf16.xpose.msra.mxu0 %v13942_v0  ;;  %13967 = vmatpush3.bf16.xpose.msra.mxu1 %v13966_v17  ;;  %v7324_v0 = vmul.f32 1.442695, %v7291_v21  ;;  %v8858_v21 = vunpack.c.h.bf16 %v14646_v33  ;;  %v13975_v15 = vpack.c.bf16 %v4360_v53, %v4359_v19  ;;  %v8830_v25 = vunpack.c.h.bf16 %v14647_v40 }
 0x824   : > { %13944 = vmatprep.subr.bf16.mxu0 %v17163_v61  ;;  %13968 = vmatprep.subr.bf16.mxu1 %v17163_v61  ;;  %v7295_v42 = vsub.f32 %v16088_v56, %v7234_v52  ;;  %v6986_v18 = vrot.slane %v6885_v57, %v15910_v46  ;;  %v7296_v56 = vsub.f32 %v16165_v13, %v7235_v1 }
 0x825   : > { %v4362_v35 = vmul.f32 %v8858_v21, %v8858_v21 }
 0x82b   : > { %13946 = vmatpush3.bf16.xpose.msra.mxu0 %v13945_v43  ;;  %13970 = vmatpush3.bf16.xpose.msra.mxu1 %v13969_v30  ;;  %v7293_v43 = vsub.f32 %v16014_v20, %v7232_v39  ;;  %v8826_v30 = vunpack.c.h.bf16 %v14645_v24  ;;  %v16686_v20 = vmul.f32 %v8825_v10, %v8825_v10  ;;  %v13951_v39 = vpack.c.bf16 %v4344_v6, %v4343_v37 }
 0x82c   : > { %13947 = vmatprep.subr.bf16.mxu0 %v17163_v61  ;;  %13971 = vmatprep.subr.bf16.mxu1 %v17163_v61  ;;  %v7332_v10 = vmul.f32 1.442695, %v7295_v42  ;;  %v7334_v6 = vmul.f32 1.442695, %v7296_v56 }
 0x82d   : > { %v16661_v17 = vpop.f32.mrb[54].mxu0  ;;  %v16663_v11 = vpop.f32.mrb[54].mxu1  ;;  %v7328_v59 = vmul.f32 1.442695, %v7293_v43  ;;  %v4346_v31 = vmul.f32 %v8826_v30, %v8826_v30  ;;  %v8861_v43 = vunpack.c.l.bf16 %v14648_v7  ;;  %v8862_v30 = vunpack.c.h.bf16 %v14648_v7 }
 0x82e   : > { %14183 = vrsqrt.f32 %v16661_v17  ;;  %v12134_v12 = vpop.f32.mrb[55].mxu0  ;;  %v12169_v2 = vpop.f32.mrb[55].mxu1  ;;  %vm6763_vm3 = vcmp.eq.f32.partialorder %v16661_v17, inf  ;;  %v6766_v37 = vand.u32 2147483648, %v16661_v17  ;;  %vm6765_vm4 = vcmp.eq.f32.partialorder %v16661_v17, 0.0 }
 0x82f   : > { %14185 = vrsqrt.f32 %v16663_v11  ;;  %v6990_v12 = vrot.slane %v6886_v60, %v15910_v46  ;;  %v7330_v2 = vmul.f32 1.442695, %v7294_v8  ;;  %vm6770_vm5 = vcmp.eq.f32.partialorder %v16663_v11, inf }
 0x830   : > { %14187 = vpow2.f32 %v7324_v0  ;;  %vm6772_vm13 = vcmp.eq.f32.partialorder %v16663_v11, 0.0  ;;  %v4347_v8 = vmul.f32 %v8829_v54, %v8829_v54  ;;  %v14649_v54 = vld [vmem:[%s14973_s5 + $0x7b8] sm:$0xff]  }
 0x831   : > { %14189 = vpow2.f32 %v7326_v9 }
 0x832   : > { %14191 = vpow2.f32 %v7322_v45  ;;  %v13978_v45 = vpack.c.bf16 %v4362_v35, %v4361_v32  ;;  %v7186_v32 = vrot.slane %v16501_v48, 7  ;;  %v7188_v35 = vrot.slane %v16556_v23, 6 }
 0x833   : > { %13949 = vmatpush3.bf16.xpose.msra.mxu0 %v13948_v50  ;;  %13973 = vmatpush3.bf16.xpose.msra.mxu1 %v13972_v36  ;;  %14193 = vpow2.f32 %v7328_v59  ;;  %v7236_v36 = vrot.slane %v16639_v22, 7  ;;  %v6773_v22 = vand.u32 2147483648, %v16663_v11  ;;  %v4348_v59 = vmul.f32 %v8830_v25, %v8830_v25 }
 0x834   : > { %13950 = vmatprep.subr.bf16.mxu0 %v17163_v61  ;;  %13974 = vmatprep.subr.bf16.mxu1 %v17163_v61  ;;  %14195 = vpow2.f32 %v7330_v2  ;;  %v7187_v56 = vsel %vm7152_vm6, %v7186_v32, %v16498_v3 }
 0x835   : > { %v7297_v52 = vsub.f32 %v16170_v44, %v7236_v36  ;;  %14197 = vpow2.f32 %v7332_v10  ;;  %v7192_v10 = vrot.slane %v16614_v62, 4 }
 0x837   : > { %v7336_v42 = vmul.f32 1.442695, %v7297_v52 }
 0x838   : > { %v14184_v0 = vpop.eup %14183 }
 0x839   : > { %v14186_v4 = vpop.eup %14185  ;;  %v6762_v50 = vmul.f32 %v14184_v0, %v16661_v17 }
 0x83a   : > { %v6769_v24 = vmul.f32 %v14186_v4, %v16663_v11  ;;  %v16699_v26 = vpop.eup %14187 }
 0x83b   : > { %v6764_v9 = vsel %vm6763_vm3, %v16661_v17, %v6762_v50  ;;  %13952 = vmatpush3.bf16.xpose.msra.mxu0 %v13951_v39  ;;  %13976 = vmatpush3.bf16.xpose.msra.mxu1 %v13975_v15  ;;  %v16710_v28 = vpop.eup %14189  ;;  %v7418_v19 = vrot.slane %v16699_v26, 7  ;;  %v8833_v39 = vunpack.c.l.bf16 %v14649_v54  ;;  %v8834_v15 = vunpack.c.h.bf16 %v14649_v54 }
 0x83c   : > { %v6767_v13 = vsel %vm6765_vm4, %v6766_v37, %v6764_v9  ;;  %v6771_v55 = vsel %vm6770_vm5, %v16663_v11, %v6769_v24  ;;  %13953 = vmatprep.subr.bf16.mxu0 %v17163_v61  ;;  %13977 = vmatprep.subr.bf16.mxu1 %v17163_v61  ;;  %v13954_v11 = vpack.c.bf16 %v4346_v31, %v16686_v20  ;;  %v16715_v60 = vpop.eup %14191  ;;  %v7420_v1 = vrot.slane %v16710_v28, 6 }
 0x83d   : > { %v6853_v17 = vadd.f32 1e-13, %v6767_v13  ;;  %v6774_v33 = vsel %vm6772_vm13, %v6773_v22, %v6771_v55  ;;  %v7419_v44 = vsel %vm7152_vm6, %v7418_v19, %v16715_v60  ;;  %v16720_v40 = vpop.eup %14193  ;;  %v4363_v20 = vmul.f32 %v8861_v43, %v8861_v43  ;;  %v17173_v19 = vld [vmem:[#allocation11_spill] sm:$0xff] }
 0x83e   : > { %v6854_v21 = vadd.f32 1e-13, %v6774_v33  ;;  %v4364_v31 = vmul.f32 %v8862_v30, %v8862_v30  ;;  %v7421_v0 = vsel %vm7155_vm7, %v7420_v1, %v7419_v44  ;;  %v16728_v25 = vpop.eup %14195  ;;  %v7422_v4 = vrot.slane %v16720_v40, 5 }
 0x83f   : > { %v7045_v53 = vmul.f32 %v6986_v18, %v6853_v17  ;;  %v14650_v18 = vld [vmem:[%s14973_s5 + $0x7f8] sm:$0xff]   ;;  %v13957_v50 = vpack.c.bf16 %v4348_v59, %v4347_v8  ;;  %v7190_v37 = vrot.slane %v16559_v34, 5  ;;  %v7189_v24 = vsel %vm7155_vm7, %v7188_v35, %v7187_v56  ;;  %v16738_v22 = vpop.eup %14197  ;;  %v17174_v8 = vld [vmem:[#allocation12_spill] sm:$0xff] }
 0x840   : > { %v7046_v57 = vmul.f32 %v6990_v12, %v6854_v21  ;;  %v8865_v12 = vunpack.c.l.bf16 %v14650_v18  ;;  %v8866_v2 = vunpack.c.h.bf16 %v14650_v18  ;;  %v13981_v36 = vpack.c.bf16 %v4364_v31, %v4363_v20 }
 0x841   : > { %14199 = vrcp.f32 %v7045_v53  ;;  %v7423_v9 = vsel %vm7158_vm8, %v7422_v4, %v7421_v0  ;;  %v7424_v13 = vrot.slane %v16728_v25, 4  ;;  %v4349_v55 = vmul.f32 %v8833_v39, %v8833_v39 }
 0x842   : > { %14201 = vrcp.f32 %v7046_v57  ;;  %v4350_v7 = vmul.f32 %v8834_v15, %v8834_v15  ;;  %v4365_v43 = vmul.f32 %v8865_v12, %v8865_v12  ;;  %v4366_v17 = vmul.f32 %v8866_v2, %v8866_v2  ;;  %v17175_v12 = vld [vmem:[#allocation23_spill] sm:$0xff]  ;;  %v17176_v2 = vld [vmem:[#allocation21_spill] sm:$0xff] }
 0x843   : > { %13955 = vmatpush3.bf16.xpose.msra.mxu0 %v13954_v11  ;;  %13979 = vmatpush3.bf16.xpose.msra.mxu1 %v13978_v45  ;;  %14203 = vpow2.f32 %v7334_v6  ;;  %v7191_v33 = vsel %vm7158_vm8, %v7190_v37, %v7189_v24  ;;  %v7194_v21 = vrot.slane %v16617_v51, 3  ;;  %v7425_v52 = vsel %vm7161_vm9, %v7424_v13, %v7423_v9 }
 0x844   : > { %13956 = vmatprep.subr.bf16.mxu0 %v17163_v61  ;;  %13980 = vmatprep.subr.bf16.mxu1 %v17163_v61  ;;  %14205 = vpow2.f32 %v7336_v42  ;;  %v7193_v11 = vsel %vm7161_vm9, %v7192_v10, %v7191_v33  ;;  %v7426_v45 = vrot.slane %v16738_v22, 3  ;;  %v13960_v20 = vpack.c.bf16 %v4350_v7, %v4349_v55 }
 0x845   : > { %v7195_v44 = vsel %vm7164_vm10, %v7194_v21, %v7193_v11  ;;  %v13984_v31 = vpack.c.bf16 %v4366_v17, %v4365_v43  ;;  %14207 = vrsqrt.f32 %v17175_v12  ;;  %vm3801_vm14 = vcmp.eq.f32.partialorder %v17175_v12, inf }
 0x846   : > { %v7427_v42 = vsel %vm7164_vm10, %v7426_v45, %v7425_v52  ;;  %14209 = vrsqrt.f32 %v17176_v2  ;;  %vm3808_vm0 = vcmp.eq.f32.partialorder %v17176_v2, inf  ;;  %vm3803_vm1 = vcmp.eq.f32.partialorder %v17175_v12, 0.0 }
 0x847   : > { %v3811_v55 = vand.u32 2147483648, %v17176_v2  ;;  %vm3810_vm15 = vcmp.eq.f32.partialorder %v17176_v2, 0.0 }
 0x84b   : > { %v14200_v30 = vpop.eup %14199  ;;  %13958 = vmatpush3.bf16.xpose.msra.mxu0 %v13957_v50  ;;  %13982 = vmatpush3.bf16.xpose.msra.mxu1 %v13981_v36 }
 0x84c   : > { %v14202_v6 = vpop.eup %14201  ;;  %13959 = vmatprep.subr.bf16.mxu0 %v17163_v61  ;;  %13983 = vmatprep.subr.bf16.mxu1 %v17163_v61  ;;  %v16747_v53 = vmul.f32 %v14200_v30, %v17173_v19 }
 0x84d   : > { %v16751_v57 = vpop.eup %14203  ;;  %v16754_v1 = vmul.f32 %v14202_v6, %v17174_v8 }
 0x84e   : > { %v7196_v59 = vrot.slane %v16747_v53, 2  ;;  %v16760_v32 = vpop.eup %14205  ;;  %v7428_v54 = vrot.slane %v16751_v57, 2 }
 0x84f   : > { %v7198_v61 = vrot.slane %v16754_v1, 1  ;;  %v7430_v0 = vrot.slane %v16760_v32, 1  ;;  %v14208_v4 = vpop.eup %14207 }
 0x850   : > { %v7197_v35 = vsel %vm7167_vm11, %v7196_v59, %v7195_v44  ;;  %v7429_v15 = vsel %vm7167_vm11, %v7428_v54, %v7427_v42  ;;  %v14210_v50 = vpop.eup %14209  ;;  %v3800_v36 = vmul.f32 %v14208_v4, %v17175_v12 }
 0x851   : > { %v7199_v39 = vsel %vm7170_vm12, %v7198_v61, %v7197_v35  ;;  %v7431_v18 = vsel %vm7170_vm12, %v7430_v0, %v7429_v15  ;;  %v3807_v24 = vmul.f32 %v14210_v50, %v17176_v2  ;;  %v17179_v50 = vld [vmem:[#allocation22_spill] sm:$0xff] }
 0x852   : > { %7222 = vmax.xlane.f32.xlu0 %v7199_v39  ;;  %v3802_v13 = vsel %vm3801_vm14, %v17175_v12, %v3800_v36  ;;  %vm3815_vm13 = vcmp.eq.f32.partialorder %v17179_v50, inf  ;;  %vm3822_vm14 = vcmp.eq.f32.partialorder %v16291_v29, inf }
 0x853   : > { %13961 = vmatpush3.bf16.xpose.msra.mxu0 %v13960_v20  ;;  %13985 = vmatpush3.bf16.xpose.msra.mxu1 %v13984_v31  ;;  %v3809_v7 = vsel %vm3808_vm0, %v17176_v2, %v3807_v24  ;;  %v17178_v2 = vld [vmem:[#allocation14_spill] sm:$0xff]  ;;  %vm3817_vm0 = vcmp.eq.f32.partialorder %v17179_v50, 0.0 }
 0x854   : > { %v3812_v30 = vsel %vm3810_vm15, %v3811_v55, %v3809_v7  ;;  %v3818_v55 = vand.u32 2147483648, %v17179_v50 }
 0x855   : > { %v6888_v21 = vadd.f32 1e-13, %v3812_v30 }
 0x856   : > { %7478 = vadd.xlane.f32.xlu0 %v7431_v18  ;;  %v17177_v18 = vld [vmem:[#allocation13_spill] sm:$0xff] }
 0x857   : > { %v6998_v42 = vrot.slane %v6888_v21, %v15910_v46 }
 0x85a   : > { %12413 = vmatmul.mubr.f32.vlgmr.msra.gmra.mrb[62].mxu0 %v17166_v5  ;;  %12448 = vmatmul.mubr.f32.vlgmr.msra.gmra.mrb[62].mxu1 %v17166_v5  ;;  %v3804_v5 = vand.u32 2147483648, %v17175_v12 }
 0x85c   : > { %v3805_v43 = vsel %vm3803_vm1, %v3804_v5, %v3802_v13  ;;  %vm3824_vm1 = vcmp.eq.f32.partialorder %v16291_v29, 0.0 }
 0x85d   : > { %v6887_v17 = vadd.f32 1e-13, %v3805_v43  ;;  %v3825_v43 = vand.u32 2147483648, %v16291_v29 }
 0x85f   : > { %v6994_v19 = vrot.slane %v6887_v17, %v15910_v46 }
 0x86d   : > { %v6113_v56 = vpop.f32.mrb[56].mxu0  ;;  %v6183_v37 = vpop.f32.mrb[56].mxu1 }
 0x86e   : > { %14211 = vrsqrt.f32 %v6113_v56  ;;  %v12204_v10 = vpop.f32.mrb[57].mxu0  ;;  %v12239_v9 = vpop.f32.mrb[57].mxu1  ;;  %vm6777_vm2 = vcmp.eq.f32.partialorder %v6113_v56, inf  ;;  %v6780_v11 = vand.u32 2147483648, %v6113_v56  ;;  %vm6779_vm3 = vcmp.eq.f32.partialorder %v6113_v56, 0.0 }
 0x86f   : > { %14213 = vrsqrt.f32 %v6183_v37  ;;  %vm6784_vm4 = vcmp.eq.f32.partialorder %v6183_v37, inf  ;;  %v6787_v59 = vand.u32 2147483648, %v6183_v37  ;;  %vm6786_vm5 = vcmp.eq.f32.partialorder %v6183_v37, 0.0 }
 0x878   : > { %v14212_v33 = vpop.eup %14211 }
 0x879   : > { %v14214_v52 = vpop.eup %14213  ;;  %v6776_v6 = vmul.f32 %v14212_v33, %v6113_v56 }
 0x87a   : > { %v6783_v45 = vmul.f32 %v14214_v52, %v6183_v37 }
 0x87b   : > { %v6778_v8 = vsel %vm6777_vm2, %v6113_v56, %v6776_v6 }
 0x87c   : > { %v6781_v44 = vsel %vm6779_vm3, %v6780_v11, %v6778_v8  ;;  %v6785_v61 = vsel %vm6784_vm4, %v6183_v37, %v6783_v45 }
 0x87d   : > { %v6855_v20 = vadd.f32 1e-13, %v6781_v44  ;;  %v6788_v31 = vsel %vm6786_vm5, %v6787_v59, %v6785_v61  ;;  %vm3829_vm5 = vcmp.eq.f32.partialorder %v16308_v27, inf }
 0x87e   : > { %v6856_v35 = vadd.f32 1e-13, %v6788_v31 }
 0x87f   : > { %v7047_v54 = vmul.f32 %v6994_v19, %v6855_v20 }
 0x880   : > { %v7048_v39 = vmul.f32 %v6998_v42, %v6856_v35 }
 0x881   : > { %14215 = vrcp.f32 %v7047_v54 }
 0x882   : > { %14217 = vrcp.f32 %v7048_v39 }
 0x883   : > { %14219 = vrsqrt.f32 %v17179_v50 }
 0x884   : > { %14221 = vrsqrt.f32 %v16291_v29 }
 0x88b   : > { %v14216_v15 = vpop.eup %14215 }
 0x88c   : > { %v14218_v0 = vpop.eup %14217  ;;  %v16785_v12 = vmul.f32 %v14216_v15, %v17177_v18 }
 0x88d   : > { %v16788_v4 = vmul.f32 %v14218_v0, %v17178_v2  ;;  %v14220_v36 = vpop.eup %14219  ;;  %v17180_v2 = vld [vmem:[#allocation15_spill] sm:$0xff] }
 0x88e   : > { %v14222_v56 = vpop.eup %14221  ;;  %v3814_v37 = vmul.f32 %v14220_v36, %v17179_v50  ;;  %v17181_v36 = vld [vmem:[#allocation16_spill] sm:$0xff] }
 0x88f   : > { %v3821_v9 = vmul.f32 %v14222_v56, %v16291_v29 }
 0x890   : > { %v3816_v7 = vsel %vm3815_vm13, %v17179_v50, %v3814_v37  ;;  %v17182_v37 = vld [vmem:[#allocation25_spill] sm:$0xff]  ;;  %vm3831_vm13 = vcmp.eq.f32.partialorder %v16308_v27, 0.0 }
 0x891   : > { %v3823_v30 = vsel %vm3822_vm14, %v16291_v29, %v3821_v9  ;;  %v3819_v17 = vsel %vm3817_vm0, %v3818_v55, %v3816_v7  ;;  %vm3836_vm14 = vcmp.eq.f32.partialorder %v17182_v37, inf  ;;  %vm3838_vm0 = vcmp.eq.f32.partialorder %v17182_v37, 0.0 }
 0x892   : > { %v3826_v33 = vsel %vm3824_vm1, %v3825_v43, %v3823_v30  ;;  %v6889_v21 = vadd.f32 1e-13, %v3819_v17 }
 0x893   : > { %v6890_v6 = vadd.f32 1e-13, %v3826_v33 }
 0x894   : > { %v7002_v45 = vrot.slane %v6889_v21, %v15910_v46 }
 0x895   : > { %v7006_v61 = vrot.slane %v6890_v6, %v15910_v46 }
 0x8ad   : > { %v6253_v24 = vpop.f32.mrb[58].mxu0  ;;  %v6323_v10 = vpop.f32.mrb[58].mxu1 }
 0x8ae   : > { %14223 = vrsqrt.f32 %v6253_v24  ;;  %v12274_v5 = vpop.f32.mrb[59].mxu0  ;;  %v12309_v13 = vpop.f32.mrb[59].mxu1  ;;  %vm6791_vm15 = vcmp.eq.f32.partialorder %v6253_v24, inf  ;;  %v6794_v8 = vand.u32 2147483648, %v6253_v24  ;;  %vm6793_vm2 = vcmp.eq.f32.partialorder %v6253_v24, 0.0 }
 0x8af   : > { %14225 = vrsqrt.f32 %v6323_v10  ;;  %vm6798_vm3 = vcmp.eq.f32.partialorder %v6323_v10, inf  ;;  %v6801_v44 = vand.u32 2147483648, %v6323_v10  ;;  %vm6800_vm4 = vcmp.eq.f32.partialorder %v6323_v10, 0.0 }
 0x8b8   : > { %v14224_v52 = vpop.eup %14223 }
 0x8b9   : > { %v14226_v19 = vpop.eup %14225  ;;  %v6790_v11 = vmul.f32 %v14224_v52, %v6253_v24 }
 0x8ba   : > { %v6797_v59 = vmul.f32 %v14226_v19, %v6323_v10 }
 0x8bb   : > { %v6792_v42 = vsel %vm6791_vm15, %v6253_v24, %v6790_v11 }
 0x8bc   : > { %v6795_v20 = vsel %vm6793_vm2, %v6794_v8, %v6792_v42  ;;  %v6799_v29 = vsel %vm6798_vm3, %v6323_v10, %v6797_v59 }
 0x8bd   : > { %v6857_v31 = vadd.f32 1e-13, %v6795_v20  ;;  %v6802_v35 = vsel %vm6800_vm4, %v6801_v44, %v6799_v29  ;;  %v3839_v20 = vand.u32 2147483648, %v17182_v37 }
 0x8be   : > { %v6858_v54 = vadd.f32 1e-13, %v6802_v35 }
 0x8bf   : > { %v7049_v39 = vmul.f32 %v7002_v45, %v6857_v31 }
 0x8c0   : > { %v7050_v15 = vmul.f32 %v7006_v61, %v6858_v54 }
 0x8c1   : > { %14227 = vrcp.f32 %v7049_v39 }
 0x8c2   : > { %14229 = vrcp.f32 %v7050_v15 }
 0x8c3   : > { %14231 = vrsqrt.f32 %v16308_v27 }
 0x8c4   : > { %14233 = vrsqrt.f32 %v17182_v37 }
 0x8cb   : > { %v14228_v0 = vpop.eup %14227 }
 0x8cc   : > { %v14230_v18 = vpop.eup %14229  ;;  %v16805_v50 = vmul.f32 %v14228_v0, %v17180_v2 }
 0x8cd   : > { %v16808_v56 = vmul.f32 %v14230_v18, %v17181_v36  ;;  %v14232_v24 = vpop.eup %14231 }
 0x8ce   : > { %v3828_v55 = vmul.f32 %v14232_v24, %v16308_v27  ;;  %v14234_v33 = vpop.eup %14233 }
 0x8d0   : > { %v3830_v45 = vsel %vm3829_vm5, %v16308_v27, %v3828_v55 }
 0x8df   : > { %v7223_v10 = vpop.xlane.xlu0 %7222 }
 0x8e0   : > { %v7244_v9 = vrot.slane %v7223_v10, 1  ;;  %v7245_v5 = vrot.slane %v7223_v10, 2  ;;  %v7246_v13 = vrot.slane %v7223_v10, 3  ;;  %v7306_v7 = vsub.f32 %v16498_v3, %v7223_v10 }
 0x8e1   : > { %v3832_v3 = vand.u32 2147483648, %v16308_v27  ;;  %v7248_v59 = vrot.slane %v7223_v10, 5  ;;  %v7249_v44 = vrot.slane %v7223_v10, 6  ;;  %v7250_v31 = vrot.slane %v7223_v10, 7 }
 0x8e2   : > { %v7307_v43 = vsub.f32 %v16501_v48, %v7244_v9  ;;  %v7308_v30 = vsub.f32 %v16556_v23, %v7245_v5  ;;  %v7309_v17 = vsub.f32 %v16559_v34, %v7246_v13  ;;  %v7354_v21 = vmul.f32 1.442695, %v7306_v7 }
 0x8e3   : > { %v7479_v52 = vpop.xlane.xlu0 %7478  ;;  %v3835_v48 = vmul.f32 %v14234_v33, %v17182_v37  ;;  %v7247_v23 = vrot.slane %v7223_v10, 4  ;;  %v7311_v0 = vsub.f32 %v16617_v51, %v7248_v59  ;;  %v7312_v18 = vsub.f32 %v16747_v53, %v7249_v44 }
 0x8e4   : > { %v7356_v6 = vmul.f32 1.442695, %v7307_v43  ;;  %v7358_v19 = vmul.f32 1.442695, %v7308_v30  ;;  %v7360_v11 = vmul.f32 1.442695, %v7309_v17  ;;  %14235 = vrcp.f32 %v7479_v52 }
 0x8e5   : > { %14237 = vpow2.f32 %v7354_v21  ;;  %v7490_v8 = vrot.slane %v7479_v52, 1  ;;  %v7491_v34 = vrot.slane %v7479_v52, 2  ;;  %v7492_v42 = vrot.slane %v7479_v52, 3 }
 0x8e6   : > { %14239 = vpow2.f32 %v7356_v6  ;;  %v7493_v61 = vrot.slane %v7479_v52, 4  ;;  %v7494_v29 = vrot.slane %v7479_v52, 5  ;;  %v3837_v35 = vsel %vm3836_vm14, %v17182_v37, %v3835_v48 }
 0x8e7   : > { %14241 = vpow2.f32 %v7358_v19  ;;  %v7310_v54 = vsub.f32 %v16614_v62, %v7247_v23  ;;  %v7495_v39 = vrot.slane %v7479_v52, 6  ;;  %v7496_v15 = vrot.slane %v7479_v52, 7 }
 0x8e8   : > { %14243 = vpow2.f32 %v7360_v11  ;;  %v3833_v2 = vsel %vm3831_vm13, %v3832_v3, %v3830_v45  ;;  %v3840_v36 = vsel %vm3838_vm0, %v3839_v20, %v3837_v35  ;;  %v7313_v62 = vsub.f32 %v16754_v1, %v7250_v31 }
 0x8e9   : > { %14245 = vrcp.f32 %v7490_v8  ;;  %v7362_v5 = vmul.f32 1.442695, %v7310_v54  ;;  %v7364_v27 = vmul.f32 1.442695, %v7311_v0  ;;  %v16842_v37 = vadd.f32 1e-13, %v3833_v2 }
 0x8ea   : > { %14247 = vrcp.f32 %v7491_v34  ;;  %v16844_v7 = vadd.f32 1e-13, %v3840_v36  ;;  %v7366_v43 = vmul.f32 1.442695, %v7312_v18  ;;  %v7368_v1 = vmul.f32 1.442695, %v7313_v62 }
 0x8eb   : > { %14249 = vrcp.f32 %v7492_v42  ;;  %v7010_v6 = vrot.slane %v16842_v37, %v15910_v46  ;;  %v3630_v37 = vpop.xlane.xlu1 %3629 }
 0x8ec   : > { %14251 = vrcp.f32 %v7493_v61  ;;  %v7014_v19 = vrot.slane %v16844_v7, %v15910_v46  ;;  %vm3850_vm5 = vcmp.eq.f32.partialorder %v3630_v37, inf  ;;  %vm3852_vm14 = vcmp.eq.f32.partialorder %v3630_v37, 0.0 }
 0x8ed   : > { %14253 = vrcp.f32 %v7494_v29  ;;  %v16833_v24 = vpop.f32.mrb[60].mxu0  ;;  %v16835_v10 = vpop.f32.mrb[60].mxu1 }
 0x8ee   : > { %v14236_v9 = vpop.eup %14235  ;;  %14255 = vrcp.f32 %v7495_v39  ;;  %v12344_v51 = vpop.f32.mrb[61].mxu0  ;;  %vm6805_vm1 = vcmp.eq.f32.partialorder %v16833_v24, inf  ;;  %vm6807_vm15 = vcmp.eq.f32.partialorder %v16833_v24, 0.0  ;;  %vm6812_vm2 = vcmp.eq.f32.partialorder %v16835_v10, inf }
 0x8ef   : > { %v12379_v13 = vpop.f32.mrb[61].mxu1  ;;  %v16838_v55 = vpop.eup %14237  ;;  %14257 = vrcp.f32 %v7496_v15  ;;  %v7551_v23 = vmul.f32 %v14236_v9, %v16715_v60  ;;  %vm6814_vm3 = vcmp.eq.f32.partialorder %v16835_v10, 0.0 }
 0x8f0   : > { %v16840_v53 = vpop.eup %14239  ;;  %14259 = vrsqrt.f32 %v16833_v24 }
 0x8f1   : > { %v16847_v30 = vpop.eup %14241  ;;  %14261 = vrsqrt.f32 %v16835_v10  ;;  %v7446_v33 = vrot.slane %v16840_v53, 7 }
 0x8f2   : > { %v16850_v17 = vpop.eup %14243  ;;  %14263 = vpow2.f32 %v7362_v5  ;;  %v7448_v8 = vrot.slane %v16847_v30, 6 }
 0x8f3   : > { %v14246_v21 = vpop.eup %14245  ;;  %14265 = vpow2.f32 %v7364_v27  ;;  %v7447_v42 = vsel %vm7152_vm6, %v7446_v33, %v16838_v55  ;;  %v7450_v2 = vrot.slane %v16850_v17, 5  ;;  %v6815_v33 = vand.u32 2147483648, %v16835_v10 }
 0x8f4   : > { %v14248_v52 = vpop.eup %14247  ;;  %v7553_v11 = vmul.f32 %v14246_v21, %v16699_v26  ;;  %14267 = vpow2.f32 %v7366_v43 }
 0x8f5   : > { %v14250_v45 = vpop.eup %14249  ;;  %v7555_v3 = vmul.f32 %v14248_v52, %v16710_v28  ;;  %14269 = vpow2.f32 %v7368_v1  ;;  %v6808_v28 = vand.u32 2147483648, %v16833_v24 }
 0x8f6   : > { %v14252_v48 = vpop.eup %14251  ;;  %v7557_v34 = vmul.f32 %v14250_v45, %v16720_v40  ;;  %v7646_v59 = vrot.slane %v7553_v11, 7 }
 0x8f7   : > { %v14254_v44 = vpop.eup %14253  ;;  %v7559_v26 = vmul.f32 %v14252_v48, %v16728_v25  ;;  %v7648_v61 = vrot.slane %v7555_v3, 6  ;;  %v7449_v25 = vsel %vm7155_vm7, %v7448_v8, %v7447_v42 }
 0x8f8   : > { %v14256_v20 = vpop.eup %14255  ;;  %v7561_v29 = vmul.f32 %v14254_v44, %v16738_v22  ;;  %v7647_v31 = vsel %vm7152_vm6, %v7646_v59, %v7551_v23  ;;  %v7650_v60 = vrot.slane %v7557_v34, 5  ;;  %v7451_v13 = vsel %vm7158_vm8, %v7450_v2, %v7449_v25  ;;  %v16930_v25 = vpop.xlane.xlu1 %7220 }
 0x8f9   : > { %v14258_v40 = vpop.eup %14257  ;;  %v7563_v35 = vmul.f32 %v14256_v20, %v16751_v57  ;;  %v7649_v54 = vsel %vm7155_vm7, %v7648_v61, %v7647_v31  ;;  %v7652_v39 = vrot.slane %v7559_v26, 4  ;;  %v7237_v7 = vrot.slane %v16930_v25, 1 }
 0x8fa   : > { %v14260_v15 = vpop.eup %14259  ;;  %v7565_v0 = vmul.f32 %v14258_v40, %v16760_v32  ;;  %v7654_v18 = vrot.slane %v7561_v29, 3  ;;  %v7651_v22 = vsel %vm7158_vm8, %v7650_v60, %v7649_v54  ;;  %v17183_v40 = vld [vmem:[#allocation17_spill] sm:$0xff]  ;;  %v17184_v54 = vld [vmem:[#allocation18_spill] sm:$0xff] }
 0x8fb   : > { %v14262_v36 = vpop.eup %14261  ;;  %v7656_v62 = vrot.slane %v7563_v35, 2  ;;  %v6804_v9 = vmul.f32 %v14260_v15, %v16833_v24  ;;  %v7653_v57 = vsel %vm7161_vm9, %v7652_v39, %v7651_v22 }
 0x8fc   : > { %v16880_v5 = vpop.eup %14263  ;;  %v6811_v51 = vmul.f32 %v14262_v36, %v16835_v10  ;;  %v7655_v32 = vsel %vm7164_vm10, %v7654_v18, %v7653_v57  ;;  %v7658_v27 = vrot.slane %v7565_v0, 1  ;;  %v7299_v0 = vsub.f32 %v16232_v58, %v7237_v7 }
 0x8fd   : > { %v16885_v43 = vpop.eup %14265  ;;  %v6806_v1 = vsel %vm6805_vm1, %v16833_v24, %v6804_v9  ;;  %v7452_v21 = vrot.slane %v16880_v5, 4  ;;  %v7657_v52 = vsel %vm7167_vm11, %v7656_v62, %v7655_v32  ;;  %v7239_v57 = vrot.slane %v16930_v25, 3 }
 0x8fe   : > { %v16893_v11 = vpop.eup %14267  ;;  %v6809_v45 = vsel %vm6807_vm15, %v6808_v28, %v6806_v1  ;;  %v6813_v3 = vsel %vm6812_vm2, %v16835_v10, %v6811_v51  ;;  %v7454_v8 = vrot.slane %v16885_v43, 3  ;;  %v7659_v48 = vsel %vm7170_vm12, %v7658_v27, %v7657_v52 }
 0x8ff   : > { %v16902_v23 = vpop.eup %14269  ;;  %v6859_v34 = vadd.f32 1e-13, %v6809_v45  ;;  %v6816_v59 = vsel %vm6814_vm3, %v6815_v33, %v6813_v3  ;;  %v7453_v42 = vsel %vm7161_vm9, %v7452_v21, %v7451_v13  ;;  %v7456_v44 = vrot.slane %v16893_v11, 2  ;;  %7706 = vst [vmem:[%s16910_s20] sm:$0xff] %v7659_v48 }
 0x900   : > { %v6860_v24 = vadd.f32 1e-13, %v6816_v59  ;;  %v7455_v26 = vsel %vm7164_vm10, %v7454_v8, %v7453_v42  ;;  %v7458_v61 = vrot.slane %v16902_v23, 1  ;;  %v7340_v51 = vmul.f32 1.442695, %v7299_v0 }
 0x901   : > { %v7051_v28 = vmul.f32 %v7010_v6, %v6859_v34  ;;  %v7457_v10 = vsel %vm7167_vm11, %v7456_v44, %v7455_v26  ;;  %v17185_v6 = vld [vmem:[#allocation26_spill] sm:$0xff]  ;;  %v7298_v27 = vsub.f32 %v16229_v38, %v16930_v25  ;;  %v3853_v1 = vand.u32 2147483648, %v3630_v37 }
 0x902   : > { %v7052_v20 = vmul.f32 %v7014_v19, %v6860_v24  ;;  %v7459_v29 = vsel %vm7170_vm12, %v7458_v61, %v7457_v10  ;;  %v7238_v19 = vrot.slane %v16930_v25, 2  ;;  %vm3843_vm4 = vcmp.eq.f32.partialorder %v17185_v6, inf }
 0x903   : > { %14271 = vrcp.f32 %v7051_v28  ;;  %7482 = vadd.xlane.f32.xlu0 %v7459_v29  ;;  %vm3845_vm13 = vcmp.eq.f32.partialorder %v17185_v6, 0.0  ;;  %v3846_v58 = vand.u32 2147483648, %v17185_v6  ;;  %v7240_v33 = vrot.slane %v16930_v25, 4 }
 0x904   : > { %14273 = vrcp.f32 %v7052_v20  ;;  %v7300_v22 = vsub.f32 %v16294_v41, %v7238_v19  ;;  %v7301_v45 = vsub.f32 %v16298_v47, %v7239_v57  ;;  %v7241_v8 = vrot.slane %v16930_v25, 5 }
 0x905   : > { %14275 = vrsqrt.f32 %v17185_v6  ;;  %v7338_v48 = vmul.f32 1.442695, %v7298_v27  ;;  %v7242_v59 = vrot.slane %v16930_v25, 6  ;;  %v7302_v38 = vsub.f32 %v16361_v63, %v7240_v33 }
 0x906   : > { %14277 = vrsqrt.f32 %v3630_v37  ;;  %v7342_v21 = vmul.f32 1.442695, %v7300_v22  ;;  %v7344_v42 = vmul.f32 1.442695, %v7301_v45  ;;  %v7303_v61 = vsub.f32 %v16364_v16, %v7241_v8 }
 0x907   : > { %v7346_v47 = vmul.f32 1.442695, %v7302_v38  ;;  %v7243_v20 = vrot.slane %v16930_v25, 7  ;;  %v7304_v29 = vsub.f32 %v16434_v14, %v7242_v59 }
 0x908   : > { %v7348_v16 = vmul.f32 1.442695, %v7303_v61 }
 0x909   : > { %v7305_v0 = vsub.f32 %v16439_v49, %v7243_v20  ;;  %v7350_v22 = vmul.f32 1.442695, %v7304_v29 }
 0x90b   : > { %v7352_v57 = vmul.f32 1.442695, %v7305_v0 }
 0x90d   : > { %v14272_v31 = vpop.eup %14271 }
 0x90e   : > { %v14274_v60 = vpop.eup %14273  ;;  %v16924_v35 = vmul.f32 %v14272_v31, %v17183_v40 }
 0x90f   : > { %v16927_v39 = vmul.f32 %v14274_v60, %v17184_v54  ;;  %v14276_v15 = vpop.eup %14275 }
 0x910   : > { %v14278_v18 = vpop.eup %14277  ;;  %v3842_v2 = vmul.f32 %v14276_v15, %v17185_v6 }
 0x911   : > { %v3849_v9 = vmul.f32 %v14278_v18, %v3630_v37  ;;  %v7208_v59 = vrot.slane %v16927_v39, 3 }
 0x912   : > { %v3844_v41 = vsel %vm3843_vm4, %v17185_v6, %v3842_v2 }
 0x913   : > { %v3851_v52 = vsel %vm3850_vm5, %v3630_v37, %v3849_v9  ;;  %v3847_v3 = vsel %vm3845_vm13, %v3846_v58, %v3844_v41 }
 0x914   : > { %v3854_v34 = vsel %vm3852_vm14, %v3853_v1, %v3851_v52  ;;  %v6893_v24 = vadd.f32 1e-13, %v3847_v3  ;;  %v7204_v1 = vrot.slane %v16808_v56, 5  ;;  %v7206_v52 = vrot.slane %v16924_v35, 4 }
 0x915   : > { %v6894_v26 = vadd.f32 1e-13, %v3854_v34 }
 0x916   : > { %v7018_v7 = vrot.slane %v6893_v24, %v15910_v46 }
 0x917   : > { %v7022_v14 = vrot.slane %v6894_v26, %v15910_v46  ;;  %v7200_v46 = vrot.slane %v16788_v4, 7 }
 0x919   : > { %v7201_v41 = vsel %vm7152_vm6, %v7200_v46, %v16785_v12 }
 0x92d   : > { %v6533_v36 = vpop.f32.mrb[62].mxu0  ;;  %v6603_v62 = vpop.f32.mrb[62].mxu1 }
 0x92e   : > { %14279 = vrsqrt.f32 %v6533_v36  ;;  %v12414_v13 = vpop.f32.mrb[63].mxu0  ;;  %v12449_v32 = vpop.f32.mrb[63].mxu1  ;;  %vm6819_vm0 = vcmp.eq.f32.partialorder %v6533_v36, inf  ;;  %v6822_v31 = vand.u32 2147483648, %v6533_v36  ;;  %vm6821_vm1 = vcmp.eq.f32.partialorder %v6533_v36, 0.0 }
 0x92f   : > { %14281 = vrsqrt.f32 %v6603_v62  ;;  %vm6826_vm15 = vcmp.eq.f32.partialorder %v6603_v62, inf  ;;  %v6829_v40 = vand.u32 2147483648, %v6603_v62  ;;  %vm6828_vm2 = vcmp.eq.f32.partialorder %v6603_v62, 0.0 }
 0x930   : > { %14283 = vpow2.f32 %v7340_v51  ;;  %v7202_v32 = vrot.slane %v16805_v50, 6 }
 0x931   : > { %14285 = vpow2.f32 %v7342_v21 }
 0x932   : > { %14287 = vpow2.f32 %v7338_v48  ;;  %v7203_v21 = vsel %vm7155_vm7, %v7202_v32, %v7201_v41 }
 0x933   : > { %14289 = vpow2.f32 %v7344_v42  ;;  %v7205_v34 = vsel %vm7158_vm8, %v7204_v1, %v7203_v21  ;;  %v17186_v42 = vld [vmem:[#allocation19_spill] sm:$0xff] }
 0x934   : > { %14291 = vpow2.f32 %v7346_v47  ;;  %v7207_v24 = vsel %vm7161_vm9, %v7206_v52, %v7205_v34 }
 0x935   : > { %14293 = vpow2.f32 %v7348_v16  ;;  %v7209_v29 = vsel %vm7164_vm10, %v7208_v59, %v7207_v24 }
 0x938   : > { %v14280_v44 = vpop.eup %14279 }
 0x939   : > { %v14282_v28 = vpop.eup %14281  ;;  %v6818_v10 = vmul.f32 %v14280_v44, %v6533_v36 }
 0x93a   : > { %v6825_v60 = vmul.f32 %v14282_v28, %v6603_v62  ;;  %v16952_v54 = vpop.eup %14283  ;;  %v17187_v28 = vld [vmem:[#allocation20_spill] sm:$0xff] }
 0x93b   : > { %v6820_v63 = vsel %vm6819_vm0, %v6533_v36, %v6818_v10  ;;  %v16957_v18 = vpop.eup %14285  ;;  %v7432_v36 = vrot.slane %v16952_v54, 7 }
 0x93c   : > { %v6823_v37 = vsel %vm6821_vm1, %v6822_v31, %v6820_v63  ;;  %v6827_v6 = vsel %vm6826_vm15, %v6603_v62, %v6825_v60  ;;  %v16960_v62 = vpop.eup %14287  ;;  %v7434_v51 = vrot.slane %v16957_v18, 6 }
 0x93d   : > { %v6861_v19 = vadd.f32 1e-13, %v6823_v37  ;;  %v6830_v25 = vsel %vm6828_vm2, %v6829_v40, %v6827_v6  ;;  %v7433_v49 = vsel %vm7152_vm6, %v7432_v36, %v16960_v62  ;;  %v16966_v13 = vpop.eup %14289 }
 0x93e   : > { %v6862_v15 = vadd.f32 1e-13, %v6830_v25  ;;  %v7435_v58 = vsel %vm7155_vm7, %v7434_v51, %v7433_v49  ;;  %v16970_v27 = vpop.eup %14291  ;;  %v7436_v33 = vrot.slane %v16966_v13, 5 }
 0x93f   : > { %v7053_v2 = vmul.f32 %v7018_v7, %v6861_v19  ;;  %v16979_v3 = vpop.eup %14293  ;;  %v7438_v8 = vrot.slane %v16970_v27, 4 }
 0x940   : > { %v7054_v9 = vmul.f32 %v7022_v14, %v6862_v15  ;;  %v7437_v45 = vsel %vm7158_vm8, %v7436_v33, %v7435_v58  ;;  %v7440_v10 = vrot.slane %v16979_v3, 3 }
 0x941   : > { %14295 = vrcp.f32 %v7053_v2  ;;  %v7439_v26 = vsel %vm7161_vm9, %v7438_v8, %v7437_v45 }
 0x942   : > { %14297 = vrcp.f32 %v7054_v9  ;;  %v7441_v60 = vsel %vm7164_vm10, %v7440_v10, %v7439_v26 }
 0x943   : > { %14299 = vpow2.f32 %v7350_v22 }
 0x944   : > { %14301 = vpow2.f32 %v7352_v57 }
 0x94b   : > { %v14296_v48 = vpop.eup %14295 }
 0x94c   : > { %v14298_v38 = vpop.eup %14297  ;;  %v16985_v44 = vmul.f32 %v14296_v48, %v17186_v42 }
 0x94d   : > { %v16989_v61 = vpop.eup %14299  ;;  %v16992_v47 = vmul.f32 %v14298_v38, %v17187_v28 }
 0x94e   : > { %v7210_v20 = vrot.slane %v16985_v44, 2  ;;  %v16999_v63 = vpop.eup %14301  ;;  %v7442_v37 = vrot.slane %v16989_v61, 2 }
 0x94f   : > { %v7212_v31 = vrot.slane %v16992_v47, 1  ;;  %v7444_v7 = vrot.slane %v16999_v63, 1 }
 0x950   : > { %v7211_v40 = vsel %vm7167_vm11, %v7210_v20, %v7209_v29  ;;  %v7443_v16 = vsel %vm7167_vm11, %v7442_v37, %v7441_v60 }
 0x951   : > { %v7213_v6 = vsel %vm7170_vm12, %v7212_v31, %v7211_v40  ;;  %v7445_v19 = vsel %vm7170_vm12, %v7444_v7, %v7443_v16 }
 0x952   : > { %7224 = vmax.xlane.f32.xlu1 %v7213_v6 }
 0x956   : > { %7480 = vadd.xlane.f32.xlu1 %v7445_v19 }
 0x990   : > { %v7483_v25 = vpop.xlane.xlu0 %7482 }
 0x991   : > { %v7504_v14 = vrot.slane %v7483_v25, 1  ;;  %v7505_v15 = vrot.slane %v7483_v25, 2  ;;  %v7506_v0 = vrot.slane %v7483_v25, 3  ;;  %v7507_v2 = vrot.slane %v7483_v25, 4 }
 0x992   : > { %14303 = vrcp.f32 %v7483_v25  ;;  %v7508_v22 = vrot.slane %v7483_v25, 5  ;;  %v7509_v36 = vrot.slane %v7483_v25, 6  ;;  %v7510_v9 = vrot.slane %v7483_v25, 7 }
 0x993   : > { %14305 = vrcp.f32 %v7504_v14 }
 0x994   : > { %14307 = vrcp.f32 %v7505_v15 }
 0x995   : > { %14309 = vrcp.f32 %v7506_v0 }
 0x996   : > { %14311 = vrcp.f32 %v7507_v2 }
 0x997   : > { %14313 = vrcp.f32 %v7508_v22 }
 0x998   : > { %14315 = vrcp.f32 %v7509_v36 }
 0x999   : > { %14317 = vrcp.f32 %v7510_v9 }
 0x99c   : > { %v14304_v57 = vpop.eup %14303 }
 0x99d   : > { %v14306_v51 = vpop.eup %14305  ;;  %v7583_v1 = vmul.f32 %v14304_v57, %v16838_v55 }
 0x99e   : > { %v14308_v46 = vpop.eup %14307  ;;  %v7585_v49 = vmul.f32 %v14306_v51, %v16840_v53 }
 0x99f   : > { %v14310_v32 = vpop.eup %14309  ;;  %v7587_v58 = vmul.f32 %v14308_v46, %v16847_v30 }
 0x9a0   : > { %v14312_v41 = vpop.eup %14311  ;;  %v7589_v33 = vmul.f32 %v14310_v32, %v16850_v17  ;;  %v7674_v21 = vrot.slane %v7585_v49, 7 }
 0x9a1   : > { %v14314_v52 = vpop.eup %14313  ;;  %v7591_v45 = vmul.f32 %v14312_v41, %v16880_v5  ;;  %v7676_v8 = vrot.slane %v7587_v58, 6 }
 0x9a2   : > { %v14316_v48 = vpop.eup %14315  ;;  %v7593_v34 = vmul.f32 %v14314_v52, %v16885_v43  ;;  %v7675_v59 = vsel %vm7152_vm6, %v7674_v21, %v7583_v1  ;;  %v7678_v53 = vrot.slane %v7589_v33, 5 }
 0x9a3   : > { %v14318_v38 = vpop.eup %14317  ;;  %v7595_v30 = vmul.f32 %v14316_v48, %v16893_v11  ;;  %v7677_v42 = vsel %vm7155_vm7, %v7676_v8, %v7675_v59  ;;  %v7680_v55 = vrot.slane %v7591_v45, 4 }
 0x9a4   : > { %v7597_v17 = vmul.f32 %v14318_v38, %v16902_v23  ;;  %v7679_v24 = vsel %vm7158_vm8, %v7678_v53, %v7677_v42  ;;  %v7682_v26 = vrot.slane %v7593_v34, 3 }
 0x9a5   : > { %v7681_v5 = vsel %vm7161_vm9, %v7680_v55, %v7679_v24  ;;  %v7684_v28 = vrot.slane %v7595_v30, 2 }
 0x9a6   : > { %v7686_v10 = vrot.slane %v7597_v17, 1  ;;  %v7683_v43 = vsel %vm7164_vm10, %v7682_v26, %v7681_v5 }
 0x9a7   : > { %v7685_v20 = vsel %vm7167_vm11, %v7684_v28, %v7683_v43 }
 0x9a8   : > { %v7687_v29 = vsel %vm7170_vm12, %v7686_v10, %v7685_v20 }
 0x9a9   : > { %7708 = vst [vmem:[%s16910_s20 + $0x10] sm:$0xff] %v7687_v29 }
 0x9df   : > { %v7225_v11 = vpop.xlane.xlu1 %7224 }
 0x9e0   : > { %v7251_v31 = vrot.slane %v7225_v11, 1  ;;  %v7252_v60 = vrot.slane %v7225_v11, 2  ;;  %v7253_v40 = vrot.slane %v7225_v11, 3  ;;  %v7314_v23 = vsub.f32 %v16785_v12, %v7225_v11 }
 0x9e1   : > { %v7254_v7 = vrot.slane %v7225_v11, 4  ;;  %v7255_v2 = vrot.slane %v7225_v11, 5  ;;  %v7256_v36 = vrot.slane %v7225_v11, 6 }
 0x9e2   : > { %v7315_v37 = vsub.f32 %v16788_v4, %v7251_v31  ;;  %v7316_v6 = vsub.f32 %v16805_v50, %v7252_v60  ;;  %v7317_v16 = vsub.f32 %v16808_v56, %v7253_v40  ;;  %v7370_v19 = vmul.f32 1.442695, %v7314_v23 }
 0x9e3   : > { %v7481_v25 = vpop.xlane.xlu1 %7480  ;;  %v7257_v4 = vrot.slane %v7225_v11, 7  ;;  %v7318_v50 = vsub.f32 %v16924_v35, %v7254_v7  ;;  %v7319_v51 = vsub.f32 %v16927_v39, %v7255_v2  ;;  %v7320_v49 = vsub.f32 %v16985_v44, %v7256_v36 }
 0x9e4   : > { %v7372_v14 = vmul.f32 1.442695, %v7315_v37  ;;  %v7374_v15 = vmul.f32 1.442695, %v7316_v6  ;;  %v7376_v0 = vmul.f32 1.442695, %v7317_v16  ;;  %14319 = vrcp.f32 %v7481_v25 }
 0x9e5   : > { %14321 = vpow2.f32 %v7370_v19  ;;  %v7497_v22 = vrot.slane %v7481_v25, 1  ;;  %v7498_v9 = vrot.slane %v7481_v25, 2  ;;  %v7499_v12 = vrot.slane %v7481_v25, 3 }
 0x9e6   : > { %14323 = vpow2.f32 %v7372_v14  ;;  %v7500_v56 = vrot.slane %v7481_v25, 4  ;;  %v7501_v57 = vrot.slane %v7481_v25, 5  ;;  %v7502_v46 = vrot.slane %v7481_v25, 6 }
 0x9e7   : > { %14325 = vpow2.f32 %v7374_v15  ;;  %v7503_v32 = vrot.slane %v7481_v25, 7  ;;  %v7321_v58 = vsub.f32 %v16992_v47, %v7257_v4  ;;  %v7378_v41 = vmul.f32 1.442695, %v7318_v50 }
 0x9e8   : > { %14327 = vpow2.f32 %v7376_v0  ;;  %v7380_v1 = vmul.f32 1.442695, %v7319_v51  ;;  %v7382_v35 = vmul.f32 1.442695, %v7320_v49 }
 0x9e9   : > { %14329 = vrcp.f32 %v7497_v22  ;;  %v7384_v52 = vmul.f32 1.442695, %v7321_v58 }
 0x9ea   : > { %14331 = vrcp.f32 %v7498_v9 }
 0x9eb   : > { %14333 = vrcp.f32 %v7499_v12 }
 0x9ec   : > { %14335 = vrcp.f32 %v7500_v56 }
 0x9ed   : > { %14337 = vrcp.f32 %v7501_v57 }
 0x9ee   : > { %v14320_v33 = vpop.eup %14319  ;;  %14339 = vrcp.f32 %v7502_v46 }
 0x9ef   : > { %v17031_v21 = vpop.eup %14321  ;;  %14341 = vrcp.f32 %v7503_v32  ;;  %v7567_v55 = vmul.f32 %v14320_v33, %v16960_v62 }
 0x9f0   : > { %v17033_v39 = vpop.eup %14323  ;;  %14343 = vpow2.f32 %v7378_v41 }
 0x9f1   : > { %v17035_v45 = vpop.eup %14325  ;;  %14345 = vpow2.f32 %v7380_v1  ;;  %v7460_v44 = vrot.slane %v17033_v39, 7 }
 0x9f2   : > { %v17038_v47 = vpop.eup %14327  ;;  %14347 = vpow2.f32 %v7382_v35  ;;  %v7462_v48 = vrot.slane %v17035_v45, 6 }
 0x9f3   : > { %v14330_v8 = vpop.eup %14329  ;;  %14349 = vpow2.f32 %v7384_v52  ;;  %v7461_v53 = vsel %vm7152_vm6, %v7460_v44, %v17031_v21 }
 0x9f4   : > { %v14332_v34 = vpop.eup %14331  ;;  %v7569_v59 = vmul.f32 %v14330_v8, %v16952_v54  ;;  %v7463_v10 = vsel %vm7155_vm7, %v7462_v48, %v7461_v53 }
 0x9f5   : > { %v14334_v38 = vpop.eup %14333  ;;  %v7571_v30 = vmul.f32 %v14332_v34, %v16957_v18  ;;  %v7464_v18 = vrot.slane %v17038_v47, 5 }
 0x9f6   : > { %v14336_v42 = vpop.eup %14335  ;;  %v7573_v17 = vmul.f32 %v14334_v38, %v16966_v13  ;;  %v7660_v24 = vrot.slane %v7569_v59, 7 }
 0x9f7   : > { %v14338_v26 = vpop.eup %14337  ;;  %v7575_v5 = vmul.f32 %v14336_v42, %v16970_v27  ;;  %v7662_v28 = vrot.slane %v7571_v30, 6  ;;  %v7465_v23 = vsel %vm7158_vm8, %v7464_v18, %v7463_v10 }
 0x9f8   : > { %v14340_v43 = vpop.eup %14339  ;;  %v7577_v54 = vmul.f32 %v14338_v26, %v16979_v3  ;;  %v7661_v20 = vsel %vm7152_vm6, %v7660_v24, %v7567_v55  ;;  %v7664_v29 = vrot.slane %v7573_v17, 5 }
 0x9f9   : > { %v14342_v11 = vpop.eup %14341  ;;  %v7579_v62 = vmul.f32 %v14340_v43, %v16989_v61  ;;  %v7663_v13 = vsel %vm7155_vm7, %v7662_v28, %v7661_v20  ;;  %v7666_v31 = vrot.slane %v7575_v5, 4 }
 0x9fa   : > { %v14344_v60 = vpop.eup %14343  ;;  %v7581_v27 = vmul.f32 %v14342_v11, %v16999_v63  ;;  %v7668_v40 = vrot.slane %v7577_v54, 3  ;;  %v7665_v37 = vsel %vm7158_vm8, %v7664_v29, %v7663_v13 }
 0x9fb   : > { %v14346_v3 = vpop.eup %14345  ;;  %v7670_v6 = vrot.slane %v7579_v62, 2  ;;  %v7466_v16 = vrot.slane %v14344_v60, 4  ;;  %v7667_v7 = vsel %vm7161_vm9, %v7666_v31, %v7665_v37 }
 0x9fc   : > { %v14348_v19 = vpop.eup %14347  ;;  %v7468_v25 = vrot.slane %v14346_v3, 3  ;;  %v7669_v61 = vsel %vm7164_vm10, %v7668_v40, %v7667_v7  ;;  %v7672_v14 = vrot.slane %v7581_v27, 1 }
 0x9fd   : > { %v14350_v15 = vpop.eup %14349  ;;  %v7467_v0 = vsel %vm7161_vm9, %v7466_v16, %v7465_v23  ;;  %v7470_v63 = vrot.slane %v14348_v19, 2  ;;  %v7671_v2 = vsel %vm7167_vm11, %v7670_v6, %v7669_v61 }
 0x9fe   : > { %v7469_v22 = vsel %vm7164_vm10, %v7468_v25, %v7467_v0  ;;  %v7472_v36 = vrot.slane %v14350_v15, 1  ;;  %v7673_v9 = vsel %vm7170_vm12, %v7672_v14, %v7671_v2 }
 0x9ff   : > { %v7471_v12 = vsel %vm7167_vm11, %v7470_v63, %v7469_v22  ;;  %7707 = vst [vmem:[%s16910_s20 + $0x8] sm:$0xff] %v7673_v9 }
 0xa00   : > { %v7473_v4 = vsel %vm7170_vm12, %v7472_v36, %v7471_v12 }
 0xa01   : > { %7484 = vadd.xlane.f32.xlu1 %v7473_v4 }
 0xa8e   : > { %v7485_v50 = vpop.xlane.xlu1 %7484 }
 0xa8f   : > { %v7511_v56 = vrot.slane %v7485_v50, 1  ;;  %v7512_v57 = vrot.slane %v7485_v50, 2  ;;  %v7513_v51 = vrot.slane %v7485_v50, 3  ;;  %v7514_v46 = vrot.slane %v7485_v50, 4 }
 0xa90   : > { %14351 = vrcp.f32 %v7485_v50  ;;  %v7515_v49 = vrot.slane %v7485_v50, 5  ;;  %v7516_v32 = vrot.slane %v7485_v50, 6  ;;  %v7517_v58 = vrot.slane %v7485_v50, 7 }
 0xa91   : > { %14353 = vrcp.f32 %v7511_v56 }
 0xa92   : > { %14355 = vrcp.f32 %v7512_v57 }
 0xa93   : > { %14357 = vrcp.f32 %v7513_v51 }
 0xa94   : > { %14359 = vrcp.f32 %v7514_v46 }
 0xa95   : > { %14361 = vrcp.f32 %v7515_v49 }
 0xa96   : > { %14363 = vrcp.f32 %v7516_v32 }
 0xa97   : > { %14365 = vrcp.f32 %v7517_v58 }
 0xa9a   : > { %v14352_v41 = vpop.eup %14351 }
 0xa9b   : > { %v14354_v1 = vpop.eup %14353  ;;  %v7599_v48 = vmul.f32 %v14352_v41, %v17031_v21 }
 0xa9c   : > { %v14356_v33 = vpop.eup %14355  ;;  %v7601_v35 = vmul.f32 %v14354_v1, %v17033_v39 }
 0xa9d   : > { %v14358_v52 = vpop.eup %14357  ;;  %v7603_v44 = vmul.f32 %v14356_v33, %v17035_v45 }
 0xa9e   : > { %v14360_v8 = vpop.eup %14359  ;;  %v7605_v34 = vmul.f32 %v14358_v52, %v17038_v47  ;;  %v7688_v59 = vrot.slane %v7601_v35, 7 }
 0xa9f   : > { %v14362_v53 = vpop.eup %14361  ;;  %v7607_v38 = vmul.f32 %v14360_v8, %v14344_v60  ;;  %v7690_v30 = vrot.slane %v7603_v44, 6 }
 0xaa0   : > { %v14364_v42 = vpop.eup %14363  ;;  %v7609_v55 = vmul.f32 %v14362_v53, %v14346_v3  ;;  %v7689_v17 = vsel %vm7152_vm6, %v7688_v59, %v7599_v48  ;;  %v7692_v24 = vrot.slane %v7605_v34, 5 }
 0xaa1   : > { %v14366_v39 = vpop.eup %14365  ;;  %v7611_v26 = vmul.f32 %v14364_v42, %v14348_v19  ;;  %v7691_v45 = vsel %vm7155_vm7, %v7690_v30, %v7689_v17  ;;  %v7694_v5 = vrot.slane %v7607_v38, 4 }
 0xaa2   : > { %v7613_v21 = vmul.f32 %v14366_v39, %v14350_v15  ;;  %v7693_v47 = vsel %vm7158_vm8, %v7692_v24, %v7691_v45  ;;  %v7696_v28 = vrot.slane %v7609_v55, 3 }
 0xaa3   : > { %v7695_v10 = vsel %vm7161_vm9, %v7694_v5, %v7693_v47  ;;  %v7698_v43 = vrot.slane %v7611_v26, 2 }
 0xaa4   : > { %v7700_v54 = vrot.slane %v7613_v21, 1  ;;  %v7697_v20 = vsel %vm7164_vm10, %v7696_v28, %v7695_v10 }
 0xaa5   : > { %v7699_v29 = vsel %vm7167_vm11, %v7698_v43, %v7697_v20 }
 0xaa6   : > { %v7701_v18 = vsel %vm7170_vm12, %v7700_v54, %v7699_v29 }
 0xaa7   : > { %7709 = vst [vmem:[%s16910_s20 + $0x18] sm:$0xff] %v7701_v18 }
 0xaa8   : > { %14724 = shalt.err (!%p14721_p3)
}
 0xaa9   : > { %s14725_s14 = scalar_lea.hbm %s17080_s26, 512  ;;  %s14729_s19 = scalar_lea.hbm %s17131_s2, 1024 }
 0xaaa   : > { %p14726_p12 = scmp.ne.s32.totalorder %s17080_s26, %s14725_s14  ;;  %p14730_p2 = scmp.lt.u32.totalorder %s17080_s26, %s17131_s2 }
 0xaab   : > { %p14731_p4 = scmp.lt.u32.totalorder %s14729_s19, %s14725_s14  ;;  %p14733_p13 = scmp.lt.u32.totalorder %s14725_s14, %s17080_s26 }
 0xaac   : > { %p14727_p8 = pnand %p14726_p12, %p17188_p1 }
 0xaad   : > { %p14732_p6 = por %p14731_p4, %p14730_p2 }
 0xaae   : > { %p14728_p0 = pneg %p14727_p8 }
 0xaaf   : > { %p14734_p11 = por %p14733_p13, %p14732_p6 }
 0xab1   : > { %p14735_p10 = pnand %p14734_p11, %p14728_p0 }
 0xab3   : > { %14738 = shalt.err (!%p14735_p10)
}
 0xab4   : > { %s14794_s3 = smov 128   ;;  %s14795_s5 = smov 8  }
 0xab5   : > { %13990 = dma.vmem_to_hbm [thread:$0]  (%p17188_p1), %s17082_s17, 512, %s17080_s26, %s7711_s13, %s14794_s3, %s14794_s3, %s14795_s5  }
 0xab6 PF: > { %s7739_s20 = sand.u32 1, %s14769_s9   ;;  %p17189_p5 = scmp.ne.s32.totalorder %s17149_s22, 0 }
 0xab7   : > { %p17190_p7 = scmp.ge.s32.totalorder %s14781_s12, 2  ;;  %s7740_s8 = scalar_lea.sflag [#allocation4], %s7739_s20 }
 0xab9   : > { %p14000_p9 = pnand %p17190_p7, %p17189_p5 }
 0xabb   : > { %14764 = dma.done.wait (!%p14000_p9), %s7740_s8, 512  }
 0xabc   : > { %14766 = vsyncadd (!%p14000_p9), %s7740_s8, 4294966784  ;;  %p18_p3 = scmp.ge.s32.totalorder %s14836_s15, 4   ;;  %s17191_s9 = smov %s14773_s10 }
 0xabd   : > { %s17192_s10 = smov %s14777_s11  ;;  %s17193_s11 = smov %s14848_s18 }
 0xabe   : > { %s17194_s12 = smov %s14836_s15  ;;  %20 = sbr.rel (!%p18_p3) target bundleno = 7 (0x7), region = 86 }
 0xac5   :  { %7745 = vsyncpa [#allocation3], 1 }
 0xac6   :  { %7747 = vsyncpa [#allocation3 + $0x1], 1 }
 0xac7   :  { %7748 = vsyncpa [#allocation6], 1 }
 0xac8   :  { %7750 = vsyncpa [#allocation6 + $0x1], 1 }
 0xac9   :  { %7751 = vsyncpa [#allocation4], 1 }
 0xaca   :  { %7753 = vsyncpa [#allocation4 + $0x1], 1 }

</bundles_post_ra>
